<compile_context>
chip_gen: v6e
topology: v6e:2x2x1
jax: 0.10.0
libtpu: 0.0.40
codegen_flags: <defaults>
</compile_context>

<pallas_src>
import numpy as np

import jax
import jax.numpy as jnp
from jax.experimental import pallas as pl
from jax.experimental.pallas import tpu as pltpu


# ----------------------------- layer geometry ------------------------------
H1, P1 = 28, 30                 # conv1: 28x28 image, padded width 30
FLAT1 = P1 * P1                 # 900  flattened padded input
L1 = (H1 - 1) * P1 + H1         # 838  flat conv1 output anchors
POOL1 = L1 - 1 - P1             # 807  flat 2x2-window anchors after conv1

H2, P2 = 14, 16                 # conv2: 14x14 image, padded width 16
FLAT2 = P2 * P2                 # 256
L2 = (H2 - 1) * P2 + H2         # 222
POOL2 = L2 - 1 - P2             # 205

C1, C2 = 16, 32                 # channel counts
FEAT = C2 * 7 * 7               # 1568 classifier input (PyTorch CHW order)

BT = 8                          # samples per feature-kernel grid step
                                # (stacked M = 8*16 = 128 / 8*32 = 256)


# ------------------------------ Pallas kernels -----------------------------
def _features_kernel(x_ref, w1_ref, b1_ref, s1_ref, w2_ref, b2_ref, s2_ref,
                     o_ref):
    """conv1+ReLU+pool1+conv2+ReLU+pool2 for a tile of BT samples.

    x_ref : (BT, 900)        f32   zero-padded 30x30 inputs, row-major flat
    w1_ref: (128, 72)        bf16  conv1 block-diag weight  [b*16+c, t*BT+b']
    b1_ref: (128, 1)         f32   conv1 bias, rows (b, c)
    s1_ref: (807, 256)       bf16  pool1 anchor-select + conv2 zero-pad scatter
    w2_ref: (256, 1152)      bf16  conv2 block-diag weight  [b*32+o, t*128+b'*16+i]
    b2_ref: (256, 1)         f32   conv2 bias, rows (b, cout)
    s2_ref: (205, 49)        bf16  pool2 anchor-select
    o_ref : (BT, 32, 49)     bf16  pooled features per sample (CHW order)
    """
    x = x_ref[...]                                       # (BT, 900) f32

    # 9 shifted lane-slices shared by all BT samples, stacked along sublanes
    # in (tap, sample) order -> rows t*BT + b.
    xs = jnp.concatenate(
        [x[:, kh * P1 + kw: kh * P1 + kw + L1]
         for kh in range(3) for kw in range(3)], axis=0).astype(jnp.bfloat16)

    # conv1: ONE block-diagonal MXU matmul, output rows (b, c) = b*16 + c.
    acc1 = jnp.dot(w1_ref[...], xs,
                   preferred_element_type=jnp.float32)   # (128, 838)

    # maxpool1 (pairwise max at +1, +P1), then bias + ReLU.
    m = jnp.maximum(acc1[:, 0:L1 - 1], acc1[:, 1:L1])
    m = jnp.maximum(m[:, 0:POOL1], m[:, P1:P1 + POOL1])
    act1 = jnp.maximum(m + b1_ref[...], 0.0).astype(jnp.bfloat16)  # (128, 807)

    # selection matmul: gathers pooled anchors AND inserts the zero border of
    # the next layer's padded 16x16 flat image.  M = 128.
    xp2 = jnp.dot(act1, s1_ref[...],
                  preferred_element_type=jnp.float32)    # (128, 256)
    xp2 = xp2.astype(jnp.bfloat16)

    # conv2: stack the 9 shifted slices along sublanes -> (1152, 222), then
    # ONE block-diagonal MXU matmul with K = 1152, M = 256.
    xc = jnp.concatenate(
        [xp2[:, kh * P2 + kw: kh * P2 + kw + L2]
         for kh in range(3) for kw in range(3)], axis=0)  # (1152, 222) bf16
    acc2 = jnp.dot(w2_ref[...], xc,
                   preferred_element_type=jnp.float32)   # (256, 222)

    # maxpool2 + bias + ReLU + anchor selection (M = 256).
    m = jnp.maximum(acc2[:, 0:L2 - 1], acc2[:, 1:L2])
    m = jnp.maximum(m[:, 0:POOL2], m[:, P2:P2 + POOL2])
    act2 = jnp.maximum(m + b2_ref[...], 0.0).astype(jnp.bfloat16)  # (256, 205)
    pooled = jnp.dot(act2, s2_ref[...],
                     preferred_element_type=jnp.float32)  # (256, 49)

    # rows are (b, cout) sample-major -> leading-dim split is layout-free.
    o_ref[...] = pooled.reshape(BT, C2, 49).astype(o_ref.dtype)


def _mlp_kernel(x_ref, w1_ref, b1_ref, w2_ref, b2_ref, o_ref):
    """Fused fc1 + ReLU + fc2 (bf16 MXU inputs, f32 accumulation)."""
    h = jnp.dot(x_ref[...], w1_ref[...], preferred_element_type=jnp.float32)
    h = jnp.maximum(h + b1_ref[...], 0.0).astype(jnp.bfloat16)
    o_ref[...] = jnp.dot(h, w2_ref[...],
                         preferred_element_type=jnp.float32) + b2_ref[...]


# --------------------------- one-time param packing ------------------------
def _pool_select(pooled_hw, src_width, src_len, dst_h, dst_w, dst_pad):
    """0/1 matrix: picks each 2x2-window anchor of the flat conv output and
    scatters it into the (optionally zero-padded) flat destination image."""
    m = np.zeros((src_len, dst_h * dst_w), np.float32)
    for h in range(pooled_hw):
        for w in range(pooled_hw):
            q = 2 * h * src_width + 2 * w
            p = (h + dst_pad) * dst_w + (w + dst_pad)
            m[q, p] = 1.0
    return m


def prepare_params(params):
    """Pre-pack weights ONCE (block-diagonal batching over BT samples,
    transposes, bf16 casts) so the jitted forward contains no weight glue."""
    w1 = np.asarray(params["w1"], np.float32).reshape(C1, 9)
    w2 = np.asarray(params["w2"], np.float32)                  # (32, 16, 3, 3)
    b1 = np.asarray(params["b1"], np.float32)
    b2 = np.asarray(params["b2"], np.float32)

    # conv1 block-diagonal weight: rows (b, c) = b*16+c, cols (t, b') = t*BT+b'
    w1bd = np.zeros((BT * C1, 9 * BT), np.float32)
    for b in range(BT):
        w1bd[b * C1:(b + 1) * C1, b::BT] = w1

    # conv2 block-diagonal weight: rows (b, cout), cols (t, b', cin)
    w2bd = np.zeros((BT * C2, 9 * BT * C1), np.float32)
    for t in range(9):
        kh, kw = divmod(t, 3)
        wt = w2[:, :, kh, kw]                                  # (32, 16)
        for b in range(BT):
            col = t * BT * C1 + b * C1
            w2bd[b * C2:(b + 1) * C2, col:col + C1] = wt

    return {
        "w1": jnp.asarray(w1bd, jnp.bfloat16),
        "b1": jnp.asarray(np.tile(b1, BT).reshape(BT * C1, 1), jnp.float32),
        "s1": jnp.asarray(_pool_select(14, P1, POOL1, P2, P2, 1), jnp.bfloat16),
        "w2": jnp.asarray(w2bd, jnp.bfloat16),
        "b2": jnp.asarray(np.tile(b2, BT).reshape(BT * C2, 1), jnp.float32),
        "s2": jnp.asarray(_pool_select(7, P2, POOL2, 7, 7, 0), jnp.bfloat16),
        # feature flatten order is c*49 + h*7 + w == PyTorch CHW flatten.
        "wf1": jnp.asarray(np.asarray(params["wf1"], np.float32).T,
                           jnp.bfloat16),                      # (1568, 128)
        "bf1": jnp.asarray(np.asarray(params["bf1"],
                                      np.float32).reshape(1, 128), jnp.float32),
        "wf2": jnp.asarray(np.asarray(params["wf2"], np.float32).T,
                           jnp.bfloat16),                      # (128, 10)
        "bf2": jnp.asarray(np.asarray(params["bf2"],
                                      np.float32).reshape(1, 10), jnp.float32),
    }


# ------------------------------- forward pass ------------------------------
def cnn_forward(x_nchw, packed):
    """Forward pass matching CNN.forward.  x_nchw: (N, 1, 28, 28) float32."""
    N = x_nchw.shape[0]
    assert x_nchw.shape[1:] == (1, 28, 28), x_nchw.shape
    npad = ((N + BT - 1) // BT) * BT                 # pad batch to tile of BT

    # Only remaining XLA glue: tiny zero-pad + free reshapes.
    img = x_nchw.reshape(N, 28, 28).astype(jnp.float32)
    xpf = jnp.pad(img, ((0, npad - N), (1, 1), (1, 1))).reshape(npad, FLAT1)

    feats = pl.pallas_call(
        _features_kernel,
        out_shape=jax.ShapeDtypeStruct((npad, C2, 49), jnp.bfloat16),
        grid=(npad // BT,),
        in_specs=[
            pl.BlockSpec((BT, FLAT1), lambda i: (i, 0)),
            pl.BlockSpec((BT * C1, 9 * BT), lambda i: (0, 0)),
            pl.BlockSpec((BT * C1, 1), lambda i: (0, 0)),
            pl.BlockSpec((POOL1, FLAT2), lambda i: (0, 0)),
            pl.BlockSpec((BT * C2, 9 * BT * C1), lambda i: (0, 0)),
            pl.BlockSpec((BT * C2, 1), lambda i: (0, 0)),
            pl.BlockSpec((POOL2, 49), lambda i: (0, 0)),
        ],
        out_specs=pl.BlockSpec((BT, C2, 49), lambda i: (i, 0, 0)),
        compiler_params=pltpu.CompilerParams(
            dimension_semantics=("parallel",)),
    )(xpf, packed["w1"], packed["b1"], packed["s1"], packed["w2"],
      packed["b2"], packed["s2"])

    flat = feats.reshape(npad, FEAT)                 # free: merges trailing dims

    # MLP batch tile: largest "nice" divisor of npad (falls back to npad).
    tb = npad
    for cand in (256, 128, 64, 32, 16):
        if npad % cand == 0:
            tb = cand
            break

    out = pl.pallas_call(
        _mlp_kernel,
        out_shape=jax.ShapeDtypeStruct((npad, 10), jnp.float32),
        grid=(npad // tb,),
        in_specs=[
            pl.BlockSpec((tb, FEAT), lambda i: (i, 0)),
            pl.BlockSpec((FEAT, 128), lambda i: (0, 0)),
            pl.BlockSpec((1, 128), lambda i: (0, 0)),
            pl.BlockSpec((128, 10), lambda i: (0, 0)),
            pl.BlockSpec((1, 10), lambda i: (0, 0)),
        ],
        out_specs=pl.BlockSpec((tb, 10), lambda i: (i, 0)),
        compiler_params=pltpu.CompilerParams(
            dimension_semantics=("parallel",)),
    )(flat, packed["wf1"], packed["bf1"], packed["wf2"], packed["bf2"])

    return out[:N]


# ------------------- pure-JAX reference (numerical check) ------------------
def reference_forward(x_nchw, params):
    dn = ("NCHW", "OIHW", "NCHW")
    y = jax.lax.conv_general_dilated(x_nchw, params["w1"], (1, 1), "SAME",
                                     dimension_numbers=dn)
    y = jax.nn.relu(y + params["b1"][None, :, None, None])
    y = jax.lax.reduce_window(y, -jnp.inf, jax.lax.max, (1, 1, 2, 2),
                              (1, 1, 2, 2), "VALID")
    y = jax.lax.conv_general_dilated(y, params["w2"], (1, 1), "SAME",
                                     dimension_numbers=dn)
    y = jax.nn.relu(y + params["b2"][None, :, None, None])
    y = jax.lax.reduce_window(y, -jnp.inf, jax.lax.max, (1, 1, 2, 2),
                              (1, 1, 2, 2), "VALID")
    y = y.reshape(y.shape[0], -1)
    y = jax.nn.relu(y @ params["wf1"].T + params["bf1"])
    return y @ params["wf2"].T + params["bf2"]


# ---------------------------------------------------------------------------
if __name__ == "__main__":
    key = jax.random.PRNGKey(0)
    ks = jax.random.split(key, 9)
    # Deterministic synthetic parameters (shapes from CNN.__init__).
    params = {
        "w1": jax.random.normal(ks[0], (16, 1, 3, 3), jnp.float32) * 0.1,
        "b1": jax.random.normal(ks[1], (16,), jnp.float32) * 0.1,
        "w2": jax.random.normal(ks[2], (32, 16, 3, 3), jnp.float32) * 0.05,
        "b2": jax.random.normal(ks[3], (32,), jnp.float32) * 0.05,
        "wf1": jax.random.normal(ks[4], (128, 32 * 7 * 7), jnp.float32) * 0.02,
        "bf1": jax.random.normal(ks[5], (128,), jnp.float32) * 0.02,
        "wf2": jax.random.normal(ks[6], (10, 128), jnp.float32) * 0.05,
        "bf2": jax.random.normal(ks[7], (10,), jnp.float32) * 0.05,
    }
    # Spatial size 28 is dictated by fc1 = Linear(32*7*7, 128).  Batch of 10
    # exercises batch padding (10 -> 16) and a 2-step feature grid.
    x = jax.random.normal(ks[8], (10, 1, 28, 28), jnp.float32)

    packed = prepare_params(params)                      # pack once

    out = jax.jit(cnn_forward)(x, packed)
    out = jax.block_until_ready(out)

    assert out.shape == (10, 10), out.shape
    assert bool(jnp.all(jnp.isfinite(out)))

    ref = reference_forward(x, params)
    err = float(jnp.max(jnp.abs(out - ref)))
    assert err < 2e-2, f"mismatch vs JAX reference: {err}"

    print("KERNEL_OK")
</pallas_src>

<mosaic_0001>
module attributes {stable_mosaic.version = 11 : i64} {
  func.func @_features_kernel(%arg0: i32, %arg1: memref<8x900xf32, #tpu.memory_space<vmem>>, %arg2: memref<128x72xbf16, #tpu.memory_space<vmem>>, %arg3: memref<128x1xf32, #tpu.memory_space<vmem>>, %arg4: memref<807x256xbf16, #tpu.memory_space<vmem>>, %arg5: memref<256x1152xbf16, #tpu.memory_space<vmem>>, %arg6: memref<256x1xf32, #tpu.memory_space<vmem>>, %arg7: memref<205x49xbf16, #tpu.memory_space<vmem>>, %arg8: memref<8x32x49xbf16, #tpu.memory_space<vmem>>) attributes {dimension_semantics = [#tpu.dimension_semantics<parallel>], iteration_bounds = array<i64: 2>, scalar_prefetch = 0 : i64, scratch_operands = 0 : i64, tpu.core_type = #tpu.core_type<tc>, window_params = [{transform_indices = @transform_0, window_bounds = array<i64: 8, 900>}, {pipeline_mode = #tpu.pipeline_mode<synchronous>, transform_indices = @transform_1, window_bounds = array<i64: 128, 72>}, {pipeline_mode = #tpu.pipeline_mode<synchronous>, transform_indices = @transform_2, window_bounds = array<i64: 128, 1>}, {pipeline_mode = #tpu.pipeline_mode<synchronous>, transform_indices = @transform_3, window_bounds = array<i64: 807, 256>}, {pipeline_mode = #tpu.pipeline_mode<synchronous>, transform_indices = @transform_4, window_bounds = array<i64: 256, 1152>}, {pipeline_mode = #tpu.pipeline_mode<synchronous>, transform_indices = @transform_5, window_bounds = array<i64: 256, 1>}, {pipeline_mode = #tpu.pipeline_mode<synchronous>, transform_indices = @transform_6, window_bounds = array<i64: 205, 49>}, {transform_indices = @transform_7, window_bounds = array<i64: 8, 32, 49>}]} {
    %c0 = arith.constant 0 : index
    %c0_0 = arith.constant 0 : index
    %0 = vector.load %arg1[%c0, %c0_0] : memref<8x900xf32, #tpu.memory_space<vmem>>, vector<8x900xf32>
    %1 = vector.extract_strided_slice %0 {offsets = [0, 0], sizes = [8, 838], strides = [1, 1]} : vector<8x900xf32> to vector<8x838xf32>
    %2 = vector.extract_strided_slice %0 {offsets = [0, 1], sizes = [8, 838], strides = [1, 1]} : vector<8x900xf32> to vector<8x838xf32>
    %3 = vector.extract_strided_slice %0 {offsets = [0, 2], sizes = [8, 838], strides = [1, 1]} : vector<8x900xf32> to vector<8x838xf32>
    %4 = vector.extract_strided_slice %0 {offsets = [0, 30], sizes = [8, 838], strides = [1, 1]} : vector<8x900xf32> to vector<8x838xf32>
    %5 = vector.extract_strided_slice %0 {offsets = [0, 31], sizes = [8, 838], strides = [1, 1]} : vector<8x900xf32> to vector<8x838xf32>
    %6 = vector.extract_strided_slice %0 {offsets = [0, 32], sizes = [8, 838], strides = [1, 1]} : vector<8x900xf32> to vector<8x838xf32>
    %7 = vector.extract_strided_slice %0 {offsets = [0, 60], sizes = [8, 838], strides = [1, 1]} : vector<8x900xf32> to vector<8x838xf32>
    %8 = vector.extract_strided_slice %0 {offsets = [0, 61], sizes = [8, 838], strides = [1, 1]} : vector<8x900xf32> to vector<8x838xf32>
    %9 = vector.extract_strided_slice %0 {offsets = [0, 62], sizes = [8, 838], strides = [1, 1]} : vector<8x900xf32> to vector<8x838xf32>
    %10 = tpu.concatenate %1, %2, %3, %4, %5, %6, %7, %8, %9 in 0 : vector<8x838xf32>, vector<8x838xf32>, vector<8x838xf32>, vector<8x838xf32>, vector<8x838xf32>, vector<8x838xf32>, vector<8x838xf32>, vector<8x838xf32>, vector<8x838xf32> -> vector<72x838xf32>
    %11 = arith.truncf %10 : vector<72x838xf32> to vector<72x838xbf16>
    %c0_1 = arith.constant 0 : index
    %c0_2 = arith.constant 0 : index
    %12 = vector.load %arg2[%c0_1, %c0_2] : memref<128x72xbf16, #tpu.memory_space<vmem>>, vector<128x72xbf16>
    %cst = arith.constant dense<0.000000e+00> : vector<128x838xf32>
    %13 = tpu.matmul %12, %11, %cst {dimension_numbers = #tpu.dot_dimension_numbers<[1], [0], [0], [1], [0, 0, 1, 1], [], []>} : vector<128x72xbf16>, vector<72x838xbf16>, vector<128x838xf32> -> vector<128x838xf32>
    %14 = vector.extract_strided_slice %13 {offsets = [0, 0], sizes = [128, 837], strides = [1, 1]} : vector<128x838xf32> to vector<128x837xf32>
    %15 = vector.extract_strided_slice %13 {offsets = [0, 1], sizes = [128, 837], strides = [1, 1]} : vector<128x838xf32> to vector<128x837xf32>
    %16 = arith.maximumf %14, %15 : vector<128x837xf32>
    %17 = vector.extract_strided_slice %16 {offsets = [0, 0], sizes = [128, 807], strides = [1, 1]} : vector<128x837xf32> to vector<128x807xf32>
    %18 = vector.extract_strided_slice %16 {offsets = [0, 30], sizes = [128, 807], strides = [1, 1]} : vector<128x837xf32> to vector<128x807xf32>
    %19 = arith.maximumf %17, %18 : vector<128x807xf32>
    %c0_3 = arith.constant 0 : index
    %c0_4 = arith.constant 0 : index
    %20 = vector.load %arg3[%c0_3, %c0_4] : memref<128x1xf32, #tpu.memory_space<vmem>>, vector<128x1xf32>
    %21 = vector.broadcast %20 : vector<128x1xf32> to vector<128x807xf32>
    %22 = arith.addf %19, %21 : vector<128x807xf32>
    %cst_5 = arith.constant 0.000000e+00 : f32
    %23 = vector.broadcast %cst_5 : f32 to vector<128x807xf32>
    %24 = arith.maximumf %22, %23 : vector<128x807xf32>
    %25 = arith.truncf %24 : vector<128x807xf32> to vector<128x807xbf16>
    %c0_6 = arith.constant 0 : index
    %c0_7 = arith.constant 0 : index
    %26 = vector.load %arg4[%c0_6, %c0_7] : memref<807x256xbf16, #tpu.memory_space<vmem>>, vector<807x256xbf16>
    %cst_8 = arith.constant dense<0.000000e+00> : vector<128x256xf32>
    %27 = tpu.matmul %25, %26, %cst_8 {dimension_numbers = #tpu.dot_dimension_numbers<[1], [0], [0], [1], [0, 0, 1, 1], [], []>} : vector<128x807xbf16>, vector<807x256xbf16>, vector<128x256xf32> -> vector<128x256xf32>
    %28 = arith.truncf %27 : vector<128x256xf32> to vector<128x256xbf16>
    %29 = vector.extract_strided_slice %28 {offsets = [0, 0], sizes = [128, 222], strides = [1, 1]} : vector<128x256xbf16> to vector<128x222xbf16>
    %30 = vector.extract_strided_slice %28 {offsets = [0, 1], sizes = [128, 222], strides = [1, 1]} : vector<128x256xbf16> to vector<128x222xbf16>
    %31 = vector.extract_strided_slice %28 {offsets = [0, 2], sizes = [128, 222], strides = [1, 1]} : vector<128x256xbf16> to vector<128x222xbf16>
    %32 = vector.extract_strided_slice %28 {offsets = [0, 16], sizes = [128, 222], strides = [1, 1]} : vector<128x256xbf16> to vector<128x222xbf16>
    %33 = vector.extract_strided_slice %28 {offsets = [0, 17], sizes = [128, 222], strides = [1, 1]} : vector<128x256xbf16> to vector<128x222xbf16>
    %34 = vector.extract_strided_slice %28 {offsets = [0, 18], sizes = [128, 222], strides = [1, 1]} : vector<128x256xbf16> to vector<128x222xbf16>
    %35 = vector.extract_strided_slice %28 {offsets = [0, 32], sizes = [128, 222], strides = [1, 1]} : vector<128x256xbf16> to vector<128x222xbf16>
    %36 = vector.extract_strided_slice %28 {offsets = [0, 33], sizes = [128, 222], strides = [1, 1]} : vector<128x256xbf16> to vector<128x222xbf16>
    %37 = vector.extract_strided_slice %28 {offsets = [0, 34], sizes = [128, 222], strides = [1, 1]} : vector<128x256xbf16> to vector<128x222xbf16>
    %38 = tpu.concatenate %29, %30, %31, %32, %33, %34, %35, %36, %37 in 0 : vector<128x222xbf16>, vector<128x222xbf16>, vector<128x222xbf16>, vector<128x222xbf16>, vector<128x222xbf16>, vector<128x222xbf16>, vector<128x222xbf16>, vector<128x222xbf16>, vector<128x222xbf16> -> vector<1152x222xbf16>
    %c0_9 = arith.constant 0 : index
    %c0_10 = arith.constant 0 : index
    %39 = vector.load %arg5[%c0_9, %c0_10] : memref<256x1152xbf16, #tpu.memory_space<vmem>>, vector<256x1152xbf16>
    %cst_11 = arith.constant dense<0.000000e+00> : vector<256x222xf32>
    %40 = tpu.matmul %39, %38, %cst_11 {dimension_numbers = #tpu.dot_dimension_numbers<[1], [0], [0], [1], [0, 0, 1, 1], [], []>} : vector<256x1152xbf16>, vector<1152x222xbf16>, vector<256x222xf32> -> vector<256x222xf32>
    %41 = vector.extract_strided_slice %40 {offsets = [0, 0], sizes = [256, 221], strides = [1, 1]} : vector<256x222xf32> to vector<256x221xf32>
    %42 = vector.extract_strided_slice %40 {offsets = [0, 1], sizes = [256, 221], strides = [1, 1]} : vector<256x222xf32> to vector<256x221xf32>
    %43 = arith.maximumf %41, %42 : vector<256x221xf32>
    %44 = vector.extract_strided_slice %43 {offsets = [0, 0], sizes = [256, 205], strides = [1, 1]} : vector<256x221xf32> to vector<256x205xf32>
    %45 = vector.extract_strided_slice %43 {offsets = [0, 16], sizes = [256, 205], strides = [1, 1]} : vector<256x221xf32> to vector<256x205xf32>
    %46 = arith.maximumf %44, %45 : vector<256x205xf32>
    %c0_12 = arith.constant 0 : index
    %c0_13 = arith.constant 0 : index
    %47 = vector.load %arg6[%c0_12, %c0_13] : memref<256x1xf32, #tpu.memory_space<vmem>>, vector<256x1xf32>
    %48 = vector.broadcast %47 : vector<256x1xf32> to vector<256x205xf32>
    %49 = arith.addf %46, %48 : vector<256x205xf32>
    %cst_14 = arith.constant 0.000000e+00 : f32
    %50 = vector.broadcast %cst_14 : f32 to vector<256x205xf32>
    %51 = arith.maximumf %49, %50 : vector<256x205xf32>
    %52 = arith.truncf %51 : vector<256x205xf32> to vector<256x205xbf16>
    %c0_15 = arith.constant 0 : index
    %c0_16 = arith.constant 0 : index
    %53 = vector.load %arg7[%c0_15, %c0_16] : memref<205x49xbf16, #tpu.memory_space<vmem>>, vector<205x49xbf16>
    %cst_17 = arith.constant dense<0.000000e+00> : vector<256x49xf32>
    %54 = tpu.matmul %52, %53, %cst_17 {dimension_numbers = #tpu.dot_dimension_numbers<[1], [0], [0], [1], [0, 0, 1, 1], [], []>} : vector<256x205xbf16>, vector<205x49xbf16>, vector<256x49xf32> -> vector<256x49xf32>
    %55 = vector.shape_cast %54 : vector<256x49xf32> to vector<8x32x49xf32>
    %56 = arith.truncf %55 : vector<8x32x49xf32> to vector<8x32x49xbf16>
    %c0_18 = arith.constant 0 : index
    %c0_19 = arith.constant 0 : index
    %c0_20 = arith.constant 0 : index
    %57 = vector.load %arg8[%c0_18, %c0_19, %c0_20] : memref<8x32x49xbf16, #tpu.memory_space<vmem>>, vector<8x32x49xbf16>
    tpu.vector_store %arg8[%c0_18, %c0_19, %c0_20], %56 {strides = array<i32>} : memref<8x32x49xbf16, #tpu.memory_space<vmem>>, vector<8x32x49xbf16>,
    return
  }
  func.func @transform_0(%arg0: i32) -> (i32, i32) {
    %c0_i32 = arith.constant 0 : i32
    %c0_i32_0 = arith.constant 0 : i32
    return %arg0, %c0_i32 : i32, i32
  }
  func.func @transform_1(%arg0: i32) -> (i32, i32) {
    %c0_i32 = arith.constant 0 : i32
    %c0_i32_0 = arith.constant 0 : i32
    %c0_i32_1 = arith.constant 0 : i32
    return %c0_i32, %c0_i32_0 : i32, i32
  }
  func.func @transform_2(%arg0: i32) -> (i32, i32) {
    %c0_i32 = arith.constant 0 : i32
    %c0_i32_0 = arith.constant 0 : i32
    %c0_i32_1 = arith.constant 0 : i32
    return %c0_i32, %c0_i32_0 : i32, i32
  }
  func.func @transform_3(%arg0: i32) -> (i32, i32) {
    %c0_i32 = arith.constant 0 : i32
    %c0_i32_0 = arith.constant 0 : i32
    %c0_i32_1 = arith.constant 0 : i32
    return %c0_i32, %c0_i32_0 : i32, i32
  }
  func.func @transform_4(%arg0: i32) -> (i32, i32) {
    %c0_i32 = arith.constant 0 : i32
    %c0_i32_0 = arith.constant 0 : i32
    %c0_i32_1 = arith.constant 0 : i32
    return %c0_i32, %c0_i32_0 : i32, i32
  }
  func.func @transform_5(%arg0: i32) -> (i32, i32) {
    %c0_i32 = arith.constant 0 : i32
    %c0_i32_0 = arith.constant 0 : i32
    %c0_i32_1 = arith.constant 0 : i32
    return %c0_i32, %c0_i32_0 : i32, i32
  }
  func.func @transform_6(%arg0: i32) -> (i32, i32) {
    %c0_i32 = arith.constant 0 : i32
    %c0_i32_0 = arith.constant 0 : i32
    %c0_i32_1 = arith.constant 0 : i32
    return %c0_i32, %c0_i32_0 : i32, i32
  }
  func.func @transform_7(%arg0: i32) -> (i32, i32, i32) {
    %c0_i32 = arith.constant 0 : i32
    %c0_i32_0 = arith.constant 0 : i32
    %c0_i32_1 = arith.constant 0 : i32
    return %arg0, %c0_i32, %c0_i32_0 : i32, i32, i32
  }
}

module attributes {stable_mosaic.version = 11 : i64} {
  func.func @_mlp_kernel(%arg0: i32, %arg1: memref<16x1568xbf16, #tpu.memory_space<vmem>>, %arg2: memref<1568x128xbf16, #tpu.memory_space<vmem>>, %arg3: memref<1x128xf32, #tpu.memory_space<vmem>>, %arg4: memref<128x10xbf16, #tpu.memory_space<vmem>>, %arg5: memref<1x10xf32, #tpu.memory_space<vmem>>, %arg6: memref<16x10xf32, #tpu.memory_space<vmem>>) attributes {dimension_semantics = [#tpu.dimension_semantics<parallel>], iteration_bounds = array<i64: 1>, scalar_prefetch = 0 : i64, scratch_operands = 0 : i64, tpu.core_type = #tpu.core_type<tc>, window_params = [{transform_indices = @transform_0, window_bounds = array<i64: 16, 1568>}, {pipeline_mode = #tpu.pipeline_mode<synchronous>, transform_indices = @transform_1, window_bounds = array<i64: 1568, 128>}, {pipeline_mode = #tpu.pipeline_mode<synchronous>, transform_indices = @transform_2, window_bounds = array<i64: 1, 128>}, {pipeline_mode = #tpu.pipeline_mode<synchronous>, transform_indices = @transform_3, window_bounds = array<i64: 128, 10>}, {pipeline_mode = #tpu.pipeline_mode<synchronous>, transform_indices = @transform_4, window_bounds = array<i64: 1, 10>}, {transform_indices = @transform_5, window_bounds = array<i64: 16, 10>}]} {
    %c0 = arith.constant 0 : index
    %c0_0 = arith.constant 0 : index
    %0 = vector.load %arg1[%c0, %c0_0] : memref<16x1568xbf16, #tpu.memory_space<vmem>>, vector<16x1568xbf16>
    %c0_1 = arith.constant 0 : index
    %c0_2 = arith.constant 0 : index
    %1 = vector.load %arg2[%c0_1, %c0_2] : memref<1568x128xbf16, #tpu.memory_space<vmem>>, vector<1568x128xbf16>
    %cst = arith.constant dense<0.000000e+00> : vector<16x128xf32>
    %2 = tpu.matmul %0, %1, %cst {dimension_numbers = #tpu.dot_dimension_numbers<[1], [0], [0], [1], [0, 0, 1, 1], [], []>} : vector<16x1568xbf16>, vector<1568x128xbf16>, vector<16x128xf32> -> vector<16x128xf32>
    %c0_3 = arith.constant 0 : index
    %c0_4 = arith.constant 0 : index
    %3 = vector.load %arg3[%c0_3, %c0_4] : memref<1x128xf32, #tpu.memory_space<vmem>>, vector<1x128xf32>
    %4 = vector.broadcast %3 : vector<1x128xf32> to vector<16x128xf32>
    %5 = arith.addf %2, %4 : vector<16x128xf32>
    %cst_5 = arith.constant 0.000000e+00 : f32
    %6 = vector.broadcast %cst_5 : f32 to vector<16x128xf32>
    %7 = arith.maximumf %5, %6 : vector<16x128xf32>
    %8 = arith.truncf %7 : vector<16x128xf32> to vector<16x128xbf16>
    %c0_6 = arith.constant 0 : index
    %c0_7 = arith.constant 0 : index
    %9 = vector.load %arg4[%c0_6, %c0_7] : memref<128x10xbf16, #tpu.memory_space<vmem>>, vector<128x10xbf16>
    %cst_8 = arith.constant dense<0.000000e+00> : vector<16x10xf32>
    %10 = tpu.matmul %8, %9, %cst_8 {dimension_numbers = #tpu.dot_dimension_numbers<[1], [0], [0], [1], [0, 0, 1, 1], [], []>} : vector<16x128xbf16>, vector<128x10xbf16>, vector<16x10xf32> -> vector<16x10xf32>
    %c0_9 = arith.constant 0 : index
    %c0_10 = arith.constant 0 : index
    %11 = vector.load %arg5[%c0_9, %c0_10] : memref<1x10xf32, #tpu.memory_space<vmem>>, vector<1x10xf32>
    %12 = vector.broadcast %11 : vector<1x10xf32> to vector<16x10xf32>
    %13 = arith.addf %10, %12 : vector<16x10xf32>
    %c0_11 = arith.constant 0 : index
    %c0_12 = arith.constant 0 : index
    %14 = vector.load %arg6[%c0_11, %c0_12] : memref<16x10xf32, #tpu.memory_space<vmem>>, vector<16x10xf32>
    tpu.vector_store %arg6[%c0_11, %c0_12], %13 {strides = array<i32>} : memref<16x10xf32, #tpu.memory_space<vmem>>, vector<16x10xf32>,
    return
  }
  func.func @transform_0(%arg0: i32) -> (i32, i32) {
    %c0_i32 = arith.constant 0 : i32
    %c0_i32_0 = arith.constant 0 : i32
    return %arg0, %c0_i32 : i32, i32
  }
  func.func @transform_1(%arg0: i32) -> (i32, i32) {
    %c0_i32 = arith.constant 0 : i32
    %c0_i32_0 = arith.constant 0 : i32
    %c0_i32_1 = arith.constant 0 : i32
    return %c0_i32, %c0_i32_0 : i32, i32
  }
  func.func @transform_2(%arg0: i32) -> (i32, i32) {
    %c0_i32 = arith.constant 0 : i32
    %c0_i32_0 = arith.constant 0 : i32
    %c0_i32_1 = arith.constant 0 : i32
    return %c0_i32, %c0_i32_0 : i32, i32
  }
  func.func @transform_3(%arg0: i32) -> (i32, i32) {
    %c0_i32 = arith.constant 0 : i32
    %c0_i32_0 = arith.constant 0 : i32
    %c0_i32_1 = arith.constant 0 : i32
    return %c0_i32, %c0_i32_0 : i32, i32
  }
  func.func @transform_4(%arg0: i32) -> (i32, i32) {
    %c0_i32 = arith.constant 0 : i32
    %c0_i32_0 = arith.constant 0 : i32
    %c0_i32_1 = arith.constant 0 : i32
    return %c0_i32, %c0_i32_0 : i32, i32
  }
  func.func @transform_5(%arg0: i32) -> (i32, i32) {
    %c0_i32 = arith.constant 0 : i32
    %c0_i32_0 = arith.constant 0 : i32
    return %arg0, %c0_i32 : i32, i32
  }
}

</mosaic_0001>

<bundles_post_ra>
// kernel: cnn_forward.3
= control target key start
LH: loop header
LB: loop body
LE: loop exit
PB: predicated region body
PF: predicated region fallthrough
CT: control target
= control target key end

     0   :  { %vm892_vm0 = vcmask 261120   ;;  %vm1764_vm1 = vmmov 0   ;;  %s2164_s0 = inlined_call_operand.vmem [shape: bf16[16,1568], index: 0, kind: input, shape index: {}]   ;;  %s2165_s1 = inlined_call_operand.vmem [shape: bf16[1568,128], index: 1, kind: input, shape index: {}]   ;;  %s2166_s2 = inlined_call_operand.vmem [shape: f32[1,128], index: 2, kind: input, shape index: {}]   ;;  %s2167_s3 = inlined_call_operand.vmem [shape: bf16[128,10], index: 3, kind: input, shape index: {}]   ;;  %s2168_s4 = inlined_call_operand.vmem [shape: f32[1,10], index: 4, kind: input, shape index: {}]   ;;  %s2169_s5 = inlined_call_operand.hbm [shape: f32[16,10], index: 5, kind: output, shape index: {}]  }
   0x1   :  { %v1616_v0 = vld [vmem:[%s2165_s1 + $0x78] sm:$0xff]   ;;  %v1620_v4 = vld [vmem:[%s2165_s1 + $0x70] sm:$0xff]   ;;  %v1624_v8 = vld [vmem:[%s2165_s1 + $0x68] sm:$0xff]  }
   0x2   :  { %v1617_v1 = vld [vmem:[%s2165_s1 + $0xf8] sm:$0xff]   ;;  %1439 = vmatprep.subr.bf16.mxu0 %v1616_v0  ;;  %v1621_v5 = vld [vmem:[%s2165_s1 + $0xf0] sm:$0xff]   ;;  %v1625_v9 = vld [vmem:[%s2165_s1 + $0xe8] sm:$0xff]  }
   0x3   :  { %v1618_v2 = vld [vmem:[%s2165_s1 + $0x38] sm:$0xff]   ;;  %1461 = vmatprep.subr.bf16.mxu1 %v1617_v1  ;;  %v1622_v6 = vld [vmem:[%s2165_s1 + $0x30] sm:$0xff]   ;;  %v1626_v10 = vld [vmem:[%s2165_s1 + $0x28] sm:$0xff]  }
   0x4   :  { %v1619_v3 = vld [vmem:[%s2165_s1 + $0xb8] sm:$0xff]   ;;  %1440 = vmatpush3.bf16.msra.mxu0 %v1618_v2  ;;  %v1623_v7 = vld [vmem:[%s2165_s1 + $0xb0] sm:$0xff]   ;;  %v1627_v11 = vld [vmem:[%s2165_s1 + $0xa8] sm:$0xff]  }
   0x5   :  { %1462 = vmatpush3.bf16.msra.mxu1 %v1619_v3  ;;  %1441 = vmatprep.subr.bf16.mxu0 %v1620_v4  ;;  %v1628_v12 = vld [vmem:[%s2165_s1 + $0x60] sm:$0xff]   ;;  %v1632_v16 = vld [vmem:[%s2165_s1 + $0x58] sm:$0xff]   ;;  %v1636_v20 = vld [vmem:[%s2165_s1 + $0x50] sm:$0xff]  }
   0x6   :  { %1463 = vmatprep.subr.bf16.mxu1 %v1621_v5  ;;  %v1629_v13 = vld [vmem:[%s2165_s1 + $0xe0] sm:$0xff]   ;;  %v1633_v17 = vld [vmem:[%s2165_s1 + $0xd8] sm:$0xff]   ;;  %v1637_v21 = vld [vmem:[%s2165_s1 + $0xd0] sm:$0xff]  }
   0x7   :  { %v1630_v14 = vld [vmem:[%s2165_s1 + $0x20] sm:$0xff]   ;;  %v1634_v18 = vld [vmem:[%s2165_s1 + $0x18] sm:$0xff]   ;;  %v1638_v22 = vld [vmem:[%s2165_s1 + $0x10] sm:$0xff]  }
   0x8   :  { %1442 = vmatpush3.bf16.msra.mxu0 %v1622_v6  ;;  %v1631_v15 = vld [vmem:[%s2165_s1 + $0xa0] sm:$0xff]   ;;  %v1635_v19 = vld [vmem:[%s2165_s1 + $0x98] sm:$0xff]   ;;  %v1639_v23 = vld [vmem:[%s2165_s1 + $0x90] sm:$0xff]  }
   0x9   :  { %1464 = vmatpush3.bf16.msra.mxu1 %v1623_v7  ;;  %1443 = vmatprep.subr.bf16.mxu0 %v1624_v8  ;;  %v1640_v24 = vld [vmem:[%s2165_s1 + $0x48] sm:$0xff]   ;;  %v1644_v28 = vld [vmem:[%s2165_s1 + $0x40] sm:$0xff]   ;;  %v1654_v36 = vld [vmem:[%s2165_s1 + $0x178] sm:$0xff]  }
   0xa   :  { %1465 = vmatprep.subr.bf16.mxu1 %v1625_v9  ;;  %v1641_v25 = vld [vmem:[%s2165_s1 + $0xc8] sm:$0xff]   ;;  %v1645_v29 = vld [vmem:[%s2165_s1 + $0xc0] sm:$0xff]   ;;  %v1655_v37 = vld [vmem:[%s2165_s1 + $0x1f8] sm:$0xff]  }
   0xb   :  { %v1642_v26 = vld [vmem:[%s2165_s1 + $0x8] sm:$0xff]   ;;  %v1646_v30 = vld [vmem:[%s2165_s1] sm:$0xff]   ;;  %v1656_v38 = vld [vmem:[%s2165_s1 + $0x138] sm:$0xff]  }
   0xc   :  { %1444 = vmatpush3.bf16.msra.mxu0 %v1626_v10  ;;  %v1643_v27 = vld [vmem:[%s2165_s1 + $0x88] sm:$0xff]   ;;  %v1647_v31 = vld [vmem:[%s2165_s1 + $0x80] sm:$0xff]   ;;  %v1657_v39 = vld [vmem:[%s2165_s1 + $0x1b8] sm:$0xff]  }
   0xd   :  { %1466 = vmatpush3.bf16.msra.mxu1 %v1627_v11  ;;  %1445 = vmatprep.subr.bf16.mxu0 %v1628_v12  ;;  %v1648_v32 = vld [vmem:[%s2164_s0] ss:$52 sps:$4 sm:$0xff]   ;;  %v1650_v33 = vld [vmem:[%s2164_s0 + $0x4] ss:$52 sps:$4 sm:$0xff]   ;;  %v1651_v34 = vld [vmem:[%s2164_s0 + $0x8] ss:$52 sps:$4 sm:$0xff]  }
   0xe   :  { %1467 = vmatprep.subr.bf16.mxu1 %v1629_v13  ;;  %v1653_v35 = vld [vmem:[%s2164_s0 + $0xc] ss:$52 sps:$4 sm:$0xff]   ;;  %928 = vmatprep.mubr.bf16.mxu0 %v1650_v33  ;;  %v1658_v40 = vld [vmem:[%s2165_s1 + $0x170] sm:$0xff]   ;;  %v1670_v52 = vld [vmem:[%s2165_s1 + $0x158] sm:$0xff]  }
   0xf   :  { %969 = vmatprep.mubr.bf16.mxu1 %v1653_v35  ;;  %v1659_v41 = vld [vmem:[%s2165_s1 + $0x1f0] sm:$0xff]   ;;  %v1662_v44 = vld [vmem:[%s2165_s1 + $0x168] sm:$0xff]   ;;  %v1666_v48 = vld [vmem:[%s2165_s1 + $0x160] sm:$0xff]  }
  0x10   :  { %1446 = vmatpush3.bf16.msra.mxu0 %v1630_v14  ;;  %v1660_v42 = vld [vmem:[%s2165_s1 + $0x130] sm:$0xff]   ;;  %v1663_v45 = vld [vmem:[%s2165_s1 + $0x1e8] sm:$0xff]   ;;  %v1667_v49 = vld [vmem:[%s2165_s1 + $0x1e0] sm:$0xff]  }
  0x11   :  { %1468 = vmatpush3.bf16.msra.mxu1 %v1631_v15  ;;  %1447 = vmatprep.subr.bf16.mxu0 %v1632_v16  ;;  %v1661_v43 = vld [vmem:[%s2165_s1 + $0x1b0] sm:$0xff]   ;;  %v1664_v46 = vld [vmem:[%s2165_s1 + $0x128] sm:$0xff]   ;;  %v1668_v50 = vld [vmem:[%s2165_s1 + $0x120] sm:$0xff]  }
  0x12   :  { %1469 = vmatprep.subr.bf16.mxu1 %v1633_v17  ;;  %v1665_v47 = vld [vmem:[%s2165_s1 + $0x1a8] sm:$0xff]   ;;  %v1669_v51 = vld [vmem:[%s2165_s1 + $0x1a0] sm:$0xff]   ;;  %v1671_v53 = vld [vmem:[%s2165_s1 + $0x1d8] sm:$0xff]  }
  0x13   :  { %v1672_v54 = vld [vmem:[%s2165_s1 + $0x118] sm:$0xff]   ;;  %v1674_v56 = vld [vmem:[%s2165_s1 + $0x150] sm:$0xff]   ;;  %v1678_v60 = vld [vmem:[%s2165_s1 + $0x148] sm:$0xff]  }
  0x14   :  { %1448 = vmatpush3.bf16.msra.mxu0 %v1634_v18  ;;  %v1673_v55 = vld [vmem:[%s2165_s1 + $0x198] sm:$0xff]   ;;  %v1675_v57 = vld [vmem:[%s2165_s1 + $0x1d0] sm:$0xff]   ;;  %v1679_v61 = vld [vmem:[%s2165_s1 + $0x1c8] sm:$0xff]  }
  0x15   :  { %1470 = vmatpush3.bf16.msra.mxu1 %v1635_v19  ;;  %1449 = vmatprep.subr.bf16.mxu0 %v1636_v20  ;;  %v1676_v58 = vld [vmem:[%s2165_s1 + $0x110] sm:$0xff]   ;;  %v1680_v62 = vld [vmem:[%s2165_s1 + $0x108] sm:$0xff]   ;;  %v1682_v0 = vld [vmem:[%s2165_s1 + $0x140] sm:$0xff]  }
  0x16   :  { %1471 = vmatprep.subr.bf16.mxu1 %v1637_v21  ;;  %v1677_v59 = vld [vmem:[%s2165_s1 + $0x190] sm:$0xff]   ;;  %v1681_v63 = vld [vmem:[%s2165_s1 + $0x188] sm:$0xff]   ;;  %v1683_v1 = vld [vmem:[%s2165_s1 + $0x1c0] sm:$0xff]  }
  0x17   :  { %v1684_v2 = vld [vmem:[%s2165_s1 + $0x100] sm:$0xff]   ;;  %v1688_v5 = vld [vmem:[%s2164_s0 + $0x14] ss:$52 sps:$4 sm:$0xff]   ;;  %v1689_v6 = vld [vmem:[%s2164_s0 + $0x18] ss:$52 sps:$4 sm:$0xff]  }
  0x18   :  { %1450 = vmatpush3.bf16.msra.mxu0 %v1638_v22  ;;  %v1685_v3 = vld [vmem:[%s2165_s1 + $0x180] sm:$0xff]   ;;  %v1691_v7 = vld [vmem:[%s2164_s0 + $0x1c] ss:$52 sps:$4 sm:$0xff]   ;;  %v1700_v16 = vld [vmem:[%s2165_s1 + $0x268] sm:$0xff]  }
  0x19   :  { %1472 = vmatpush3.bf16.msra.mxu1 %v1639_v23  ;;  %1451 = vmatprep.subr.bf16.mxu0 %v1640_v24  ;;  %v1686_v4 = vld [vmem:[%s2164_s0 + $0x10] ss:$52 sps:$4 sm:$0xff]   ;;  %v1692_v8 = vld [vmem:[%s2165_s1 + $0x278] sm:$0xff]   ;;  %v1701_v17 = vld [vmem:[%s2165_s1 + $0x2e8] sm:$0xff]  }
  0x1a   :  { %1473 = vmatprep.subr.bf16.mxu1 %v1641_v25  ;;  %v1693_v9 = vld [vmem:[%s2165_s1 + $0x2f8] sm:$0xff]   ;;  %v1696_v12 = vld [vmem:[%s2165_s1 + $0x270] sm:$0xff]   ;;  %v1702_v18 = vld [vmem:[%s2165_s1 + $0x228] sm:$0xff]  }
  0x1b   :  { %v1694_v10 = vld [vmem:[%s2165_s1 + $0x238] sm:$0xff]   ;;  %v1697_v13 = vld [vmem:[%s2165_s1 + $0x2f0] sm:$0xff]   ;;  %v1703_v19 = vld [vmem:[%s2165_s1 + $0x2a8] sm:$0xff]  }
  0x1c   :  { %1452 = vmatpush3.bf16.msra.mxu0 %v1642_v26  ;;  %v1695_v11 = vld [vmem:[%s2165_s1 + $0x2b8] sm:$0xff]   ;;  %v1698_v14 = vld [vmem:[%s2165_s1 + $0x230] sm:$0xff]   ;;  %v1704_v20 = vld [vmem:[%s2165_s1 + $0x260] sm:$0xff]  }
  0x1d   :  { %1474 = vmatpush3.bf16.msra.mxu1 %v1643_v27  ;;  %1453 = vmatprep.subr.bf16.mxu0 %v1644_v28  ;;  %v1699_v15 = vld [vmem:[%s2165_s1 + $0x2b0] sm:$0xff]   ;;  %v1705_v21 = vld [vmem:[%s2165_s1 + $0x2e0] sm:$0xff]   ;;  %v1708_v24 = vld [vmem:[%s2165_s1 + $0x258] sm:$0xff]  }
  0x1e   :  { %1475 = vmatprep.subr.bf16.mxu1 %v1645_v29  ;;  %v1706_v22 = vld [vmem:[%s2165_s1 + $0x220] sm:$0xff]   ;;  %v1709_v25 = vld [vmem:[%s2165_s1 + $0x2d8] sm:$0xff]   ;;  %v1712_v28 = vld [vmem:[%s2165_s1 + $0x250] sm:$0xff]  }
  0x1f   :  { %v1707_v23 = vld [vmem:[%s2165_s1 + $0x2a0] sm:$0xff]   ;;  %v1710_v26 = vld [vmem:[%s2165_s1 + $0x218] sm:$0xff]   ;;  %v1713_v29 = vld [vmem:[%s2165_s1 + $0x2d0] sm:$0xff]  }
  0x20   :  { %1454 = vmatpush3.bf16.msra.mxu0 %v1646_v30  ;;  %v1711_v27 = vld [vmem:[%s2165_s1 + $0x298] sm:$0xff]   ;;  %v1714_v30 = vld [vmem:[%s2165_s1 + $0x210] sm:$0xff]   ;;  %v1717_v33 = vld [vmem:[%s2165_s1 + $0x2c8] sm:$0xff]  }
  0x21   :  { %1476 = vmatpush3.bf16.msra.mxu1 %v1647_v31  ;;  %1483 = vmatprep.subr.bf16.mxu0 %v1654_v36  ;;  %v1715_v31 = vld [vmem:[%s2165_s1 + $0x290] sm:$0xff]   ;;  %v1719_v35 = vld [vmem:[%s2165_s1 + $0x288] sm:$0xff]   ;;  %v1720_v36 = vld [vmem:[%s2165_s1 + $0x240] sm:$0xff]  }
  0x22   :  { %1505 = vmatprep.subr.bf16.mxu1 %v1655_v37  ;;  %v1721_v37 = vld [vmem:[%s2165_s1 + $0x2c0] sm:$0xff]  }
  0x23   :  { %929 = vmatmul.mubr.bf16.vlgmr.msra.gmra.mxu0 %v1648_v32  ;;  %v1716_v32 = vld [vmem:[%s2165_s1 + $0x248] sm:$0xff]  }
  0x24   :  { %970 = vmatmul.mubr.bf16.vlgmr.msra.gmra.mxu1 %v1651_v34  ;;  %1484 = vmatpush3.bf16.msra.mxu0 %v1656_v38  ;;  %v1718_v34 = vld [vmem:[%s2165_s1 + $0x208] sm:$0xff]   ;;  %v1722_v38 = vld [vmem:[%s2165_s1 + $0x200] sm:$0xff]  }
  0x25   :  { %1506 = vmatpush3.bf16.msra.mxu1 %v1657_v39  ;;  %1485 = vmatprep.subr.bf16.mxu0 %v1658_v40  ;;  %v1723_v39 = vld [vmem:[%s2165_s1 + $0x280] sm:$0xff]  }
  0x26   :  { %1507 = vmatprep.subr.bf16.mxu1 %v1659_v41  ;;  %1010 = vmatprep.mubr.bf16.mxu0 %v1688_v5  ;;  %v1724_v40 = vld [vmem:[%s2164_s0 + $0x20] ss:$52 sps:$4 sm:$0xff]   ;;  %v1726_v41 = vld [vmem:[%s2164_s0 + $0x24] ss:$52 sps:$4 sm:$0xff]  }
  0x27   :  { %1051 = vmatprep.mubr.bf16.mxu1 %v1691_v7 }
  0x28   :  { %1486 = vmatpush3.bf16.msra.mxu0 %v1660_v42  ;;  %v1727_v42 = vld [vmem:[%s2164_s0 + $0x28] ss:$52 sps:$4 sm:$0xff]  }
  0x29   :  { %1508 = vmatpush3.bf16.msra.mxu1 %v1661_v43  ;;  %1487 = vmatprep.subr.bf16.mxu0 %v1662_v44  ;;  %v1729_v43 = vld [vmem:[%s2164_s0 + $0x2c] ss:$52 sps:$4 sm:$0xff]   ;;  %v1763_v44 = vmov 0.0  }
  0x2a   :  { %1509 = vmatprep.subr.bf16.mxu1 %v1663_v45  ;;  %v1730_v45 = vld [vmem:[%s2165_s1 + $0x308] sm:$0xff]  }
  0x2c   :  { %1488 = vmatpush3.bf16.msra.mxu0 %v1664_v46  ;;  %v1731_v46 = vld [vmem:[%s2165_s1 + $0x300] sm:$0xff]  }
  0x2d   :  { %1510 = vmatpush3.bf16.msra.mxu1 %v1665_v47  ;;  %1489 = vmatprep.subr.bf16.mxu0 %v1666_v48  ;;  %v1732_v47 = vld [vmem:[%s2164_s0 + $0x30] ss:$52 sps:$4 sm:$0xff]  }
  0x2e   :  { %1511 = vmatprep.subr.bf16.mxu1 %v1667_v49 }
  0x30   :  { %1490 = vmatpush3.bf16.msra.mxu0 %v1668_v50 }
  0x31   :  { %1512 = vmatpush3.bf16.msra.mxu1 %v1669_v51  ;;  %1491 = vmatprep.subr.bf16.mxu0 %v1670_v52 }
  0x32   :  { %1513 = vmatprep.subr.bf16.mxu1 %v1671_v53 }
  0x34   :  { %1492 = vmatpush3.bf16.msra.mxu0 %v1672_v54 }
  0x35   :  { %1514 = vmatpush3.bf16.msra.mxu1 %v1673_v55  ;;  %1493 = vmatprep.subr.bf16.mxu0 %v1674_v56 }
  0x36   :  { %1515 = vmatprep.subr.bf16.mxu1 %v1675_v57 }
  0x38   :  { %1494 = vmatpush3.bf16.msra.mxu0 %v1676_v58 }
  0x39   :  { %1516 = vmatpush3.bf16.msra.mxu1 %v1677_v59  ;;  %1495 = vmatprep.subr.bf16.mxu0 %v1678_v60 }
  0x3a   :  { %1517 = vmatprep.subr.bf16.mxu1 %v1679_v61 }
  0x3c   :  { %1496 = vmatpush3.bf16.msra.mxu0 %v1680_v62 }
  0x3d   :  { %1518 = vmatpush3.bf16.msra.mxu1 %v1681_v63  ;;  %1497 = vmatprep.subr.bf16.mxu0 %v1682_v0 }
  0x3e   :  { %1519 = vmatprep.subr.bf16.mxu1 %v1683_v1 }
  0x40   :  { %1498 = vmatpush3.bf16.msra.mxu0 %v1684_v2 }
  0x41   :  { %1520 = vmatpush3.bf16.msra.mxu1 %v1685_v3  ;;  %1527 = vmatprep.subr.bf16.mxu0 %v1692_v8 }
  0x42   :  { %1549 = vmatprep.subr.bf16.mxu1 %v1693_v9 }
  0x43   :  { %1011 = vmatmul.mubr.bf16.vlgmr.msra.gmra.mxu0 %v1686_v4 }
  0x44   :  { %1052 = vmatmul.mubr.bf16.vlgmr.msra.gmra.mxu1 %v1689_v6  ;;  %1528 = vmatpush3.bf16.msra.mxu0 %v1694_v10 }
  0x45   :  { %1550 = vmatpush3.bf16.msra.mxu1 %v1695_v11  ;;  %1529 = vmatprep.subr.bf16.mxu0 %v1696_v12 }
  0x46   :  { %1551 = vmatprep.subr.bf16.mxu1 %v1697_v13  ;;  %1092 = vmatprep.mubr.bf16.mxu0 %v1726_v41 }
  0x47   :  { %1133 = vmatprep.mubr.bf16.mxu1 %v1729_v43 }
  0x48   :  { %1530 = vmatpush3.bf16.msra.mxu0 %v1698_v14 }
  0x49   :  { %1552 = vmatpush3.bf16.msra.mxu1 %v1699_v15  ;;  %1531 = vmatprep.subr.bf16.mxu0 %v1700_v16 }
  0x4a   :  { %1553 = vmatprep.subr.bf16.mxu1 %v1701_v17 }
  0x4c   :  { %1532 = vmatpush3.bf16.msra.mxu0 %v1702_v18 }
  0x4d   :  { %1554 = vmatpush3.bf16.msra.mxu1 %v1703_v19  ;;  %1533 = vmatprep.subr.bf16.mxu0 %v1704_v20 }
  0x4e   :  { %1555 = vmatprep.subr.bf16.mxu1 %v1705_v21 }
  0x50   :  { %1534 = vmatpush3.bf16.msra.mxu0 %v1706_v22 }
  0x51   :  { %1556 = vmatpush3.bf16.msra.mxu1 %v1707_v23  ;;  %1535 = vmatprep.subr.bf16.mxu0 %v1708_v24 }
  0x52   :  { %1557 = vmatprep.subr.bf16.mxu1 %v1709_v25 }
  0x54   :  { %1536 = vmatpush3.bf16.msra.mxu0 %v1710_v26 }
  0x55   :  { %1558 = vmatpush3.bf16.msra.mxu1 %v1711_v27  ;;  %1537 = vmatprep.subr.bf16.mxu0 %v1712_v28 }
  0x56   :  { %1559 = vmatprep.subr.bf16.mxu1 %v1713_v29 }
  0x58   :  { %1538 = vmatpush3.bf16.msra.mxu0 %v1714_v30 }
  0x59   :  { %1560 = vmatpush3.bf16.msra.mxu1 %v1715_v31  ;;  %1539 = vmatprep.subr.bf16.mxu0 %v1716_v32 }
  0x5a   :  { %1561 = vmatprep.subr.bf16.mxu1 %v1717_v33 }
  0x5c   :  { %1540 = vmatpush3.bf16.msra.mxu0 %v1718_v34 }
  0x5d   :  { %1562 = vmatpush3.bf16.msra.mxu1 %v1719_v35  ;;  %1541 = vmatprep.subr.bf16.mxu0 %v1720_v36 }
  0x5e   :  { %1563 = vmatprep.subr.bf16.mxu1 %v1721_v37 }
  0x60   :  { %1542 = vmatpush3.bf16.msra.mxu0 %v1722_v38 }
  0x61   :  { %1564 = vmatpush3.bf16.msra.mxu1 %v1723_v39  ;;  %1583 = vmatprep.subr.bf16.mxu0 %v1763_v44 }
  0x62   :  { %1591 = vmatprep.subr.bf16.mxu1 %v1763_v44 }
  0x63   :  { %1093 = vmatmul.mubr.bf16.vlgmr.msra.gmra.mxu0 %v1724_v40 }
  0x64   :  { %1134 = vmatmul.mubr.bf16.vlgmr.msra.gmra.mxu1 %v1727_v42  ;;  %1584 = vmatpush3.bf16.msra.mxu0 %v1730_v45 }
  0x65   :  { %1585 = vmatprep.subr.bf16.mxu0 %v1763_v44  ;;  %1587 = vmatprep.mubr.msk.bf16.mxu0 %vm1764_vm1, %v1763_v44 }
  0x66   :  { %1607 = vmatprep.mubr.msk.bf16.mxu1 %vm1764_vm1, %v1763_v44 }
  0x68   :  { %1586 = vmatpush3.bf16.msra.mxu0 %v1731_v46 }
  0x69   :  { %10 = vsyncpa [#allocation3], 0  ;;  %v1733_v48 = vld [vmem:[%s2167_s3 + $0x38] sm:$0xff]   ;;  %v1734_v49 = vld [vmem:[%s2167_s3 + $0x30] sm:$0xff]   ;;  %vm1298_vm2 = vcmask 80896   ;;  %s1765_s6 = smov [#allocation2]  }
  0x6a   :  { %1592 = vmatpush3.bf16.msra.mxu1 %v1733_v48  ;;  %v1735_v50 = vld [vmem:[%s2167_s3 + $0x28] sm:$0xff]   ;;  %v1736_v51 = vld [vmem:[%s2167_s3 + $0x20] sm:$0xff]   ;;  %v1737_v52 = vld [vmem:[%s2167_s3 + $0x18] sm:$0xff]   ;;  %s1306_s7 = sshll.u32 %s1765_s6, 4  ;;  %s1307_s7 = int_to_ptr.vmem [resolvable:$true] %s1306_s7 }
  0x6b   :  { %1588 = vmatmul.mubr.msk.bf16.vlgmr.msra.gmra.mxu0 %vm892_vm0, %v1732_v47  ;;  %1593 = vmatprep.subr.bf16.mxu1 %v1763_v44  ;;  %v1738_v53 = vld [vmem:[%s2167_s3 + $0x10] sm:$0xff]   ;;  %v1739_v54 = vld [vmem:[%s2167_s3 + $0x8] sm:$0xff]   ;;  %v1740_v55 = vld [vmem:[%s2167_s3] sm:$0xff]   ;;  %s1741_s8 = scalar_lea.vmem %s1307_s7, 256  ;;  %p1746_p1 = scmp.lt.s32.totalorder %s1307_s7, %s1307_s7 }
  0x6c   :  { %v1317_v4 = vld [vmem:[%s2166_s2] ss:$0 sm:$0xff]  ;;  %p1742_p0 = scmp.ne.s32.totalorder %s1307_s7, %s1741_s8  ;;  %p1747_p2 = scmp.lt.s32.totalorder %s1741_s8, %s1741_s8 }
  0x6e   :  { %1594 = vmatpush3.bf16.msra.mxu1 %v1734_v49  ;;  %p1748_p3 = por %p1747_p2, %p1746_p1 }
  0x6f   :  { %1595 = vmatprep.subr.bf16.mxu1 %v1763_v44 }
  0x70   :  { %p1749_p4 = pnand %p1748_p3, %p1742_p0 }
  0x72   :  { %1596 = vmatpush3.bf16.msra.mxu1 %v1735_v50  ;;  %v1430_v50 = vld [vmem:[%s2168_s4] ss:$0 sm:$0xff] }
  0x73   :  { %1597 = vmatprep.subr.bf16.mxu1 %v1763_v44 }
  0x76   :  { %1598 = vmatpush3.bf16.msra.mxu1 %v1736_v51 }
  0x77   :  { %1599 = vmatprep.subr.bf16.mxu1 %v1763_v44 }
  0x7a   :  { %1600 = vmatpush3.bf16.msra.mxu1 %v1737_v52 }
  0x7b   :  { %1601 = vmatprep.subr.bf16.mxu1 %v1763_v44 }
  0x7e   :  { %1602 = vmatpush3.bf16.msra.mxu1 %v1738_v53 }
  0x7f   :  { %1603 = vmatprep.subr.bf16.mxu1 %v1763_v44 }
  0x82   :  { %1604 = vmatpush3.bf16.msra.mxu1 %v1739_v54 }
  0x83   :  { %1605 = vmatprep.subr.bf16.mxu1 %v1763_v44 }
  0x86   :  { %1606 = vmatpush3.bf16.msra.mxu1 %v1740_v55 }
  0xe3   :  { %v1455_v56 = vpop.f32.mrf.mxu0 }
  0xe4   :  { %v1477_v57 = vpop.f32.mrf.mxu1 }
  0xe5   :  { %v1456_v58 = vpop.f32.mrf.mxu0 }
  0xe6   :  { %v1478_v59 = vpop.f32.mrf.mxu1  ;;  %v1457_v3 = vadd.f32 %v1456_v58, %v1455_v56 }
  0xe7   :  { %v1458_v60 = vpop.f32.mrf.mxu0  ;;  %v1479_v8 = vadd.f32 %v1478_v59, %v1477_v57 }
  0xe8   :  { %v1480_v61 = vpop.f32.mrf.mxu1  ;;  %v931_v7 = vadd.f32 %v1457_v3, %v1317_v4 }
  0xe9   :  { %v1459_v62 = vpop.f32.mrf.mxu0 }
  0xea   :  { %v1481_v0 = vpop.f32.mrf.mxu1  ;;  %v1460_v9 = vadd.f32 %v1459_v62, %v1458_v60  ;;  %v972_v13 = vadd.f32 %v1479_v8, %v931_v7 }
  0xeb   :  { %v1482_v15 = vadd.f32 %v1481_v0, %v1480_v61 }
  0xec   :  { %v934_v14 = vadd.f32 %v1460_v9, %v1317_v4 }
  0xee   :  { %v975_v21 = vadd.f32 %v1482_v15, %v934_v14 }
 0x103   :  { %v1499_v63 = vpop.f32.mrf.mxu0 }
 0x104   :  { %v1521_v1 = vpop.f32.mrf.mxu1 }
 0x105   :  { %v1500_v2 = vpop.f32.mrf.mxu0 }
 0x106   :  { %v1522_v5 = vpop.f32.mrf.mxu1  ;;  %v1501_v10 = vadd.f32 %v1500_v2, %v1499_v63 }
 0x107   :  { %v1502_v6 = vpop.f32.mrf.mxu0  ;;  %v1523_v17 = vadd.f32 %v1522_v5, %v1521_v1 }
 0x108   :  { %v1524_v11 = vpop.f32.mrf.mxu1  ;;  %v1013_v16 = vadd.f32 %v1501_v10, %v972_v13 }
 0x109   :  { %v1503_v12 = vpop.f32.mrf.mxu0 }
 0x10a   :  { %v1504_v18 = vadd.f32 %v1503_v12, %v1502_v6  ;;  %v1525_v19 = vpop.f32.mrf.mxu1  ;;  %v1054_v24 = vadd.f32 %v1523_v17, %v1013_v16 }
 0x10b   :  { %v1526_v29 = vadd.f32 %v1525_v19, %v1524_v11 }
 0x10c   :  { %v1016_v25 = vadd.f32 %v1504_v18, %v975_v21 }
 0x10e   :  { %v1057_v34 = vadd.f32 %v1526_v29, %v1016_v25 }
 0x123   :  { %v1543_v20 = vpop.f32.mrf.mxu0 }
 0x124   :  { %v1565_v22 = vpop.f32.mrf.mxu1 }
 0x125   :  { %v1544_v23 = vpop.f32.mrf.mxu0 }
 0x126   :  { %v1545_v26 = vadd.f32 %v1544_v23, %v1543_v20  ;;  %v1566_v27 = vpop.f32.mrf.mxu1 }
 0x127   :  { %v1546_v28 = vpop.f32.mrf.mxu0  ;;  %v1567_v31 = vadd.f32 %v1566_v27, %v1565_v22 }
 0x128   :  { %v1095_v30 = vadd.f32 %v1545_v26, %v1054_v24  ;;  %v1568_v32 = vpop.f32.mrf.mxu1 }
 0x129   :  { %v1547_v33 = vpop.f32.mrf.mxu0 }
 0x12a   :  { %v1548_v35 = vadd.f32 %v1547_v33, %v1546_v28  ;;  %v1569_v36 = vpop.f32.mrf.mxu1  ;;  %v1136_v37 = vadd.f32 %v1567_v31, %v1095_v30 }
 0x12b   :  { %v1176_v38 = vpop.f32.mrf.mxu0  ;;  %v1570_v40 = vadd.f32 %v1569_v36, %v1568_v32 }
 0x12c   :  { %v1098_v39 = vadd.f32 %v1548_v35, %v1057_v34  ;;  %v1177_v42 = vadd.f32 %v1176_v38, %v1136_v37 }
 0x12d   :  { %v1589_v41 = vpop.f32.mrf.mxu0 }
 0x12e   :  { %v1139_v43 = vadd.f32 %v1570_v40, %v1098_v39  ;;  %v1183_v47 = vmax.f32 %v1177_v42, 0.0 }
 0x12f   :  { %v1179_v44 = vpop.f32.mrf.mxu0 }
 0x130   :  { %v1180_v45 = vadd.f32 %v1179_v44, %v1139_v43 }
 0x131   :  { %v1590_v46 = vpop.f32.mrf.mxu0 }
 0x132   :  { %v1184_v48 = vmax.f32 %v1180_v45, 0.0 }
 0x134   :  { %v1185_v49 = vpack.c.bf16 %v1184_v48, %v1183_v47 }
 0x136   :  { %1608 = vmatmul.mubr.bf16.vlgmr.msra.gmra.mxu1 %v1185_v49 }
 0x1f6   :  { %v1291_v51 = vpop.f32.mrf.mxu1 }
 0x1f7   :  { %v1292_v52 = vadd.f32 %v1430_v50, %v1291_v51 }
 0x1f8   :  { %v1609_v53 = vpop.f32.mrf.mxu1 }
 0x1f9   :  { %1299 = vst.msk [vmem:[#allocation2] sm:$0xff] %vm1298_vm2, %v1292_v52 }
 0x1fa   :  { %v1294_v54 = vpop.f32.mrf.mxu1 }
 0x1fb   :  { %v1295_v55 = vadd.f32 %v1430_v50, %v1294_v54 }
 0x1fc   :  { %v1610_v56 = vpop.f32.mrf.mxu1 }
 0x1fd   :  { %1300 = vst.msk [vmem:[#allocation2 + $0x8] sm:$0xff] %vm1298_vm2, %v1295_v55 }
 0x1fe   :  { %1752 = shalt.err (!%p1749_p4)
}
 0x1ff   :  { %s1766_s4 = smov 128   ;;  %s1767_s9 = smov 8  }
 0x200   :  { %1312 = dma.vmem_to_hbm [thread:$0]  %s1307_s7, 256, %s2169_s5, [#allocation3], %s1766_s4, %s1766_s4, %s1767_s9  }
 0x201   :  { %1761 = dma.done.wait [#allocation3], 256  }
 0x202   :  { %1762 = vsyncadd [#allocation3], 4294967040 }
 0x203   :  { %1316 = vsyncpa [#allocation3], 1 }

// kernel: cnn_forward.2
= control target key start
LH: loop header
LB: loop body
LE: loop exit
PB: predicated region body
PF: predicated region fallthrough
CT: control target
= control target key end

     0   :  { %s8883_s24 = smov 0   ;;  %s14421_s0 = inlined_call_operand.vmem [shape: f32[16,900], index: 0, kind: input, shape index: {}]   ;;  %s14422_s1 = inlined_call_operand.vmem [shape: bf16[128,72], index: 1, kind: input, shape index: {}]   ;;  %s14423_s2 = inlined_call_operand.vmem [shape: f32[128,1], index: 2, kind: input, shape index: {}]   ;;  %s14424_s3 = inlined_call_operand.vmem [shape: bf16[807,256], index: 3, kind: input, shape index: {}]   ;;  %s14425_s4 = inlined_call_operand.vmem [shape: bf16[256,1152], index: 4, kind: input, shape index: {}]   ;;  %s14426_s5 = inlined_call_operand.vmem [shape: f32[256,1], index: 5, kind: input, shape index: {}]   ;;  %s14427_s6 = inlined_call_operand.vmem [shape: bf16[205,49], index: 6, kind: input, shape index: {}]   ;;  %s14428_s7 = inlined_call_operand.vmem [shape: bf16[16,32,49], index: 7, kind: output, shape index: {}]  }
   0x1 LB: > { %s8889_s25 = sadd.s32 4294967295, %s8826_s24   ;;  %p7835_p0 = scmp.ge.s32.totalorder %s8826_s24, 1  ;;  %s8826_s24 = sphi %s8883_s24, %s17_s24  }
   0x2   : > { %p237_p1 = scmp.lt.s32.totalorder %s8826_s24, 3 }
   0x4   : > { %p238_p2 = pnand %p7835_p0, %p237_p1 }
   0x6   : > { %241 = sbr.rel (%p238_p2) target bundleno = 2348 (0x92c), region = 48 }
   0xb   : > { %p270_p3 = scmp.lt.s32.totalorder %s8889_s25, 1  ;;  %s8828_s8 = smov 68   ;;  %v14429_v12 = vmov 0   ;;  %v2418_v17 = vld [vmem:[%s14423_s2] sm:$0xff]  ;;  %vm517_vm0 = vcmask 539648   ;;  %vm455_vm1 = vcmask 556032  }
   0xc   : > { %s8829_s9 = smov 66   ;;  %s8830_s10 = smov 67   ;;  %702 = vmatprep.mubr.bf16.mxu0 %v14429_v12  ;;  %815 = vmatprep.mubr.bf16.mxu1 %v14429_v12  ;;  %vm486_vm2 = vcmask 547840   ;;  %v2419_v31 = vld [vmem:[%s14423_s2 + $0x8] sm:$0xff]  ;;  %v2421_v32 = vld [vmem:[%s14423_s2 + $0x18] sm:$0xff]  ;;  %vm648_vm3 = vcmask 1043456  }
   0xd   : > { %s271_s26 = scalar_select %p270_p3, %s8889_s25, 1  ;;  %8433 = vset.pattern.permute.xlu0 %v14429_v12  ;;  %8434 = vset.pattern.permute.xlu1 %v14429_v12  ;;  %v2420_v41 = vld [vmem:[%s14423_s2 + $0x10] sm:$0xff]  ;;  %v2423_v44 = vld [vmem:[%s14423_s2 + $0x28] sm:$0xff]  ;;  %vm396_vm4 = vcmask 793600   ;;  %vm424_vm5 = vcmask 785408   ;;  %v2422_v54 = vld [vmem:[%s14423_s2 + $0x20] sm:$0xff] }
   0xe   : > { %s8831_s11 = smov 96   ;;  %s8832_s12 = smov 97   ;;  %v2425_v55 = vld [vmem:[%s14423_s2 + $0x38] sm:$0xff]  ;;  %v2424_v63 = vld [vmem:[%s14423_s2 + $0x30] sm:$0xff]  ;;  %vm368_vm6 = vcmask 801792   ;;  %vm340_vm7 = vcmask 1031168  }
   0xf   : > { %s8201_s27 = sshll.u32 %s271_s26, 6  ;;  %s8833_s13 = smov 98   ;;  %vm312_vm8 = vcmask 1039360   ;;  %vm623_vm9 = vcmask 588800   ;;  %vm3425_vm10 = vcmask 1042432   ;;  %vm3400_vm11 = vcmask 318464  }
  0x10   : > { %s8898_s30 = scalar_lea.vmem %s14421_s0, %s8201_s27  ;;  %s8834_s14 = smov 126   ;;  %vm4121_vm12 = vcmask 908288   ;;  %vm4064_vm13 = vcmask 916480   ;;  %vm4178_vm14 = vcmask 900096   ;;  %vm4292_vm15 = vcmask 777216  }
  0x11   : > { %v8901_v0 = vld [vmem:[%s8898_s30 + $0x8] sm:$0xff]  ;;  %v285_v1 = vld [vmem:[%s8898_s30 + $0x10] sm:$0xff]  ;;  %v8905_v2 = vld [vmem:[%s8898_s30] sm:$0xff]  ;;  %s8836_s15 = smov 127   ;;  %s8840_s16 = smov 110  }
  0x12   : > { %v8308_v3 = vpack.i.bf16 %v285_v1, %v8901_v0  ;;  %v8298_v4 = vpack.i.bf16 %v8901_v0, %v8905_v2  ;;  %v286_v5 = vld [vmem:[%s8898_s30 + $0x18] sm:$0xff]  ;;  %v289_v8 = vld [vmem:[%s8898_s30 + $0x30] sm:$0xff]  ;;  %v287_v10 = vld [vmem:[%s8898_s30 + $0x20] sm:$0xff] }
  0x13   : > { %v8303_v6 = vpack.i.bf16 %v286_v5, %v285_v1  ;;  %v8323_v7 = vpack.i.bf16 %v286_v5, %v8905_v2  ;;  %v290_v9 = vld [vmem:[%s8898_s30 + $0x38] sm:$0xff]  ;;  %v8928_v11 = vld [vmem:[%s8898_s30 + $0x28] sm:$0xff]  ;;  %v8413_v15 = vpack.i.bf16 %v287_v10, %v286_v5 }
  0x14   : > { %8309 = vrot.lane.b32.xlu1 %v8308_v3, %s8828_s8  ;;  %8299 = vrot.lane.b32.xlu0 %v8298_v4, %s8829_s9  ;;  %v8373_v13 = vpack.i.bf16 %v290_v9, %v289_v8  ;;  %v8368_v14 = vpack.i.bf16 %v8928_v11, %v287_v10  ;;  %v8418_v16 = vpack.i.bf16 %v289_v8, %v8928_v11  ;;  %v2427_v1 = vld [vmem:[%s14423_s2 + $0x48] sm:$0xff] }
  0x18   : > { %8314 = vrot.lane.b32.xlu1 %v8308_v3, %s8830_s10  ;;  %8304 = vrot.lane.b32.xlu0 %v8303_v6, %s8829_s9 }
  0x1c   : > { %8324 = vrot.lane.b32.xlu1 %v8323_v7, %s8830_s10  ;;  %8319 = vrot.lane.b32.xlu0 %v8323_v7, %s8828_s8 }
  0x20   : > { %8334 = vrot.lane.b32.xlu1 %v8308_v3, %s8831_s11  ;;  %8329 = vrot.lane.b32.xlu0 %v8308_v3, %s8832_s12 }
  0x24   : > { %8344 = vrot.lane.b32.xlu1 %v8323_v7, %s8831_s11  ;;  %8339 = vrot.lane.b32.xlu0 %v8323_v7, %s8832_s12 }
  0x28   : > { %8354 = vrot.lane.b32.xlu1 %v8308_v3, %s8833_s13  ;;  %8349 = vrot.lane.b32.xlu0 %v8308_v3, %s8834_s14 }
  0x2c   : > { %354 = vrot.lane.b32.xlu1 %v8905_v2, %s8833_s13  ;;  %8359 = vrot.lane.b32.xlu0 %v8323_v7, %s8834_s14 }
  0x30   : > { %298 = vrot.lane.b32.xlu1 %v8905_v2, %s8836_s15  ;;  %8364 = vrot.lane.b32.xlu0 %v8308_v3, %s8836_s15 }
  0x34   : > { %8374 = vrot.lane.b32.xlu1 %v8373_v13, %s8829_s9  ;;  %8369 = vrot.lane.b32.xlu0 %v8368_v14, %s8829_s9 }
  0x38   : > { %8384 = vrot.lane.b32.xlu1 %v8368_v14, %s8830_s10  ;;  %8379 = vrot.lane.b32.xlu0 %v8368_v14, %s8828_s8 }
  0x3c   : > { %8394 = vrot.lane.b32.xlu1 %v8373_v13, %s8830_s10  ;;  %8389 = vrot.lane.b32.xlu0 %v8373_v13, %s8828_s8 }
  0x40   : > { %8404 = vrot.lane.b32.xlu1 %v8368_v14, %s8831_s11  ;;  %8399 = vrot.lane.b32.xlu0 %v8368_v14, %s8832_s12 }
  0x44   : > { %422 = vrot.lane.b32.xlu1 %v289_v8, %s8831_s11  ;;  %394 = vrot.lane.b32.xlu0 %v289_v8, %s8832_s12  ;;  %s8838_s12 = smov 111  }
  0x48   : > { %8414 = vrot.lane.b32.xlu1 %v8413_v15, %s8833_s13  ;;  %8409 = vrot.lane.b32.xlu0 %v8368_v14, %s8834_s14  ;;  %v2426_v14 = vld [vmem:[%s14423_s2 + $0x40] sm:$0xff] }
  0x4c   : > { %8419 = vrot.lane.b32.xlu1 %v8418_v16, %s8833_s13  ;;  %338 = vrot.lane.b32.xlu0 %v289_v8, %s8834_s14 }
  0x50   : > { %8429 = vrot.lane.b32.xlu1 %v8418_v16, %s8836_s15  ;;  %8424 = vrot.lane.b32.xlu0 %v8413_v15, %s8836_s15  ;;  %v2429_v15 = vld [vmem:[%s14423_s2 + $0x58] sm:$0xff] }
  0x54   : > { %2436 = vperm.xlu0 %8433, %v2418_v17   ;;  %2441 = vperm.xlu1 %8434, %v2419_v31  }
  0x58   : > { %2451 = vperm.xlu0 %8433, %v2421_v32   ;;  %2446 = vperm.xlu1 %8434, %v2420_v41   ;;  %v2433_v41 = vld [vmem:[%s14423_s2 + $0x78] sm:$0xff] }
  0x5c   : > { %2461 = vperm.xlu0 %8433, %v2423_v44   ;;  %2456 = vperm.xlu1 %8434, %v2422_v54  }
  0x60   : > { %2471 = vperm.xlu0 %8433, %v2425_v55   ;;  %2466 = vperm.xlu1 %8434, %v2424_v63  }
  0x64   : > { %2481 = vperm.xlu0 %8433, %v2427_v1   ;;  %2476 = vperm.xlu1 %8434, %v2426_v14  }
  0x68   : > { %2491 = vperm.xlu0 %8433, %v2429_v15  }
  0x86   : > { %v8961_v18 = vpop.permute.xlu1 %8309  ;;  %v8300_v19 = vpop.permute.xlu0 %8299 }
  0x87   : > { %v8302_v20 = vunpack.i.h.bf16 %v8300_v19  ;;  %v8301_v21 = vunpack.i.l.bf16 %v8300_v19  ;;  %v8312_v22 = vunpack.i.h.bf16 %v8961_v18  ;;  %v8311_v23 = vunpack.i.l.bf16 %v8961_v18 }
  0x89   : > { %v518_v24 = vsel %vm517_vm0, %v8301_v21, %v8302_v20  ;;  %v457_v34 = vsel %vm455_vm1, %v8311_v23, %v8312_v22 }
  0x8a   : > { %v8966_v25 = vpop.permute.xlu1 %8314  ;;  %v8968_v26 = vpop.permute.xlu0 %8304  ;;  %v560_v30 = vpack.c.bf16 %v518_v24, %v518_v24 }
  0x8b   : > { %v8317_v27 = vunpack.i.h.bf16 %v8966_v25  ;;  %v8316_v28 = vunpack.i.l.bf16 %v8966_v25  ;;  %v8306_v29 = vunpack.i.l.bf16 %v8968_v26  ;;  %v8307_v31 = vunpack.i.h.bf16 %v8968_v26  ;;  %v9098_v26 = vld [vmem:[%s14422_s1] sm:$0xff]  }
  0x8c   : > { %v650_v42 = vsel %vm648_vm3, %v560_v30, 0  ;;  %v2431_v30 = vld [vmem:[%s14423_s2 + $0x68] sm:$0xff] }
  0x8d   : > { %v519_v33 = vsel %vm517_vm0, %v8302_v20, %v8306_v29  ;;  %v488_v35 = vsel %vm486_vm2, %v8316_v28, %v8317_v27  ;;  %2501 = vperm.xlu0 %8433, %v2431_v30   ;;  %v520_v44 = vsel %vm517_vm0, %v8306_v29, %v8307_v31 }
  0x8e   : > { %v8988_v36 = vpop.permute.xlu1 %8324  ;;  %v8990_v37 = vpop.permute.xlu0 %8319  ;;  %v561_v38 = vpack.c.bf16 %v519_v33, %v519_v33  ;;  %v554_v43 = vpack.c.bf16 %v488_v35, %v457_v34 }
  0x8f   : > { %v8326_v39 = vunpack.i.l.bf16 %v8988_v36  ;;  %v8321_v40 = vunpack.i.l.bf16 %v8990_v37 }
  0x90   : > { %7849 = vmatprep.subr.msk.bf16.mxu0 %vm648_vm3, %v561_v38 }
  0x91   : > { %677 = vmatpush1.bf16.msra.mxu0 %v650_v42  ;;  %v456_v45 = vsel %vm455_vm1, %v8321_v40, %v8311_v23  ;;  %v487_v46 = vsel %vm486_vm2, %v8326_v39, %v8316_v28  ;;  %v2428_v28 = vld [vmem:[%s14423_s2 + $0x50] sm:$0xff]  ;;  %v2430_v40 = vld [vmem:[%s14423_s2 + $0x60] sm:$0xff]  ;;  %2511 = vperm.xlu0 %8433, %v2433_v41  }
  0x92   : > { %v9004_v47 = vpop.permute.xlu1 %8334  ;;  %v9006_v48 = vpop.permute.xlu0 %8329  ;;  %678 = vmatprep.subr.bf16.mxu0 %v554_v43  ;;  %v553_v49 = vpack.c.bf16 %v487_v46, %v456_v45  ;;  %2486 = vperm.xlu1 %8434, %v2428_v28  }
  0x93   : > { %v8337_v50 = vunpack.i.h.bf16 %v9004_v47  ;;  %v8336_v51 = vunpack.i.l.bf16 %v9004_v47  ;;  %v8332_v52 = vunpack.i.h.bf16 %v9006_v48  ;;  %v8331_v53 = vunpack.i.l.bf16 %v9006_v48 }
  0x95   : > { %679 = vmatpush1.bf16.msra.mxu0 %v553_v49  ;;  %v398_v56 = vsel %vm396_vm4, %v8331_v53, %v8332_v52  ;;  %v426_v57 = vsel %vm424_vm5, %v8336_v51, %v8337_v50 }
  0x96   : > { %v9024_v58 = vpop.permute.xlu1 %8344  ;;  %v9026_v59 = vpop.permute.xlu0 %8339  ;;  %v547_v60 = vpack.c.bf16 %v426_v57, %v398_v56  ;;  %2496 = vperm.xlu1 %8434, %v2430_v40   ;;  %v2432_v56 = vld [vmem:[%s14423_s2 + $0x70] sm:$0xff] }
  0x97   : > { %v8346_v61 = vunpack.i.l.bf16 %v9024_v58  ;;  %v8341_v62 = vunpack.i.l.bf16 %v9026_v59  ;;  %v8342_v18 = vunpack.i.h.bf16 %v9026_v59 }
  0x98   : > { %680 = vmatprep.subr.bf16.mxu0 %v547_v60 }
  0x99   : > { %v397_v3 = vsel %vm396_vm4, %v8341_v62, %v8331_v53  ;;  %v425_v4 = vsel %vm424_vm5, %v8346_v61, %v8336_v51  ;;  %v8322_v61 = vunpack.i.h.bf16 %v8990_v37 }
  0x9a   : > { %v9038_v5 = vpop.permute.xlu1 %8354  ;;  %v9040_v6 = vpop.permute.xlu0 %8349  ;;  %v546_v7 = vpack.c.bf16 %v425_v4, %v397_v3  ;;  %2506 = vperm.xlu1 %8434, %v2432_v56  }
  0x9b   : > { %v8357_v8 = vunpack.i.h.bf16 %v9038_v5  ;;  %v8356_v9 = vunpack.i.l.bf16 %v9038_v5  ;;  %v8352_v10 = vunpack.i.h.bf16 %v9040_v6  ;;  %v8351_v13 = vunpack.i.l.bf16 %v9040_v6 }
  0x9c   : > { %681 = vmatpush1.bf16.msra.mxu0 %v546_v7 }
  0x9d   : > { %v342_v16 = vsel %vm340_vm7, %v8351_v13, %v8352_v10  ;;  %v370_v17 = vsel %vm368_vm6, %v8356_v9, %v8357_v8 }
  0x9e   : > { %v355_v19 = vpop.permute.xlu1 %354  ;;  %v9058_v20 = vpop.permute.xlu0 %8359  ;;  %v540_v21 = vpack.c.bf16 %v370_v17, %v342_v16 }
  0x9f   : > { %v369_v23 = vsel %vm368_vm6, %v355_v19, %v8356_v9  ;;  %v8361_v24 = vunpack.i.l.bf16 %v9058_v20 }
  0xa0   : > { %682 = vmatprep.subr.bf16.mxu0 %v540_v21  ;;  %v458_v21 = vsel %vm455_vm1, %v8312_v22, %v8322_v61  ;;  %v9135_v22 = vld [vmem:[%s14422_s1 + $0x8] sm:$0xff]  }
  0xa1   : > { %v341_v32 = vsel %vm340_vm7, %v8361_v24, %v8351_v13 }
  0xa2   : > { %v299_v33 = vpop.permute.xlu1 %298  ;;  %v9070_v34 = vpop.permute.xlu0 %8364  ;;  %v539_v35 = vpack.c.bf16 %v369_v23, %v341_v32  ;;  %v8347_v32 = vunpack.i.h.bf16 %v9024_v58 }
  0xa3   : > { %v8367_v38 = vunpack.i.h.bf16 %v9070_v34  ;;  %v8366_v39 = vunpack.i.l.bf16 %v9070_v34 }
  0xa4   : > { %683 = vmatpush1.bf16.msra.mxu0 %v539_v35 }
  0xa5   : > { %v314_v42 = vsel %vm312_vm8, %v8366_v39, %v8367_v38  ;;  %v313_v43 = vsel %vm312_vm8, %v299_v33, %v8366_v39 }
  0xa6   : > { %v9087_v45 = vpop.permute.xlu1 %8374  ;;  %v8370_v46 = vpop.permute.xlu0 %8369  ;;  %v533_v49 = vpack.c.bf16 %v314_v42, %v8901_v0  ;;  %v532_v51 = vpack.c.bf16 %v313_v43, %v8905_v2  ;;  %v562_v0 = vpack.c.bf16 %v520_v44, %v520_v44  ;;  %v8327_v2 = vunpack.i.h.bf16 %v8988_v36 }
  0xa7   : > { %v8376_v53 = vunpack.i.l.bf16 %v9087_v45  ;;  %v8372_v54 = vunpack.i.h.bf16 %v8370_v46  ;;  %v8371_v55 = vunpack.i.l.bf16 %v8370_v46  ;;  %v399_v46 = vsel %vm396_vm4, %v8332_v52, %v8342_v18 }
  0xa8   : > { %684 = vmatprep.subr.bf16.mxu0 %v533_v49  ;;  %v656_v14 = vsel %vm648_vm3, %v562_v0, 0  ;;  %v489_v23 = vsel %vm486_vm2, %v8317_v27, %v8327_v2  ;;  %v427_v49 = vsel %vm424_vm5, %v8337_v50, %v8347_v32 }
  0xa9   : > { %685 = vmatpush1.bf16.msra.mxu0 %v532_v51  ;;  %v521_v29 = vsel %vm517_vm0, %v8307_v31, %v8371_v55  ;;  %v523_v57 = vsel %vm517_vm0, %v8372_v54, %v8376_v53  ;;  %v522_v60 = vsel %vm517_vm0, %v8371_v55, %v8372_v54  ;;  %v555_v25 = vpack.c.bf16 %v489_v23, %v458_v21  ;;  %v9185_v23 = vld [vmem:[%s14422_s1 + $0x18] sm:$0xff]  }
  0xaa   : > { %v8385_v62 = vpop.permute.xlu1 %8384  ;;  %v8380_v63 = vpop.permute.xlu0 %8379  ;;  %v563_v1 = vpack.c.bf16 %v521_v29, %v521_v29  ;;  %v565_v3 = vpack.c.bf16 %v523_v57, %v523_v57  ;;  %v564_v4 = vpack.c.bf16 %v522_v60, %v522_v60  ;;  %v8362_v29 = vunpack.i.h.bf16 %v9058_v20  ;;  %v9168_v60 = vld [vmem:[%s14422_s1 + $0x10] sm:$0xff]  }
  0xab   : > { %v8387_v7 = vunpack.i.h.bf16 %v8385_v62  ;;  %v8386_v9 = vunpack.i.l.bf16 %v8385_v62  ;;  %v8382_v36 = vunpack.i.h.bf16 %v8380_v63  ;;  %v8381_v13 = vunpack.i.l.bf16 %v8380_v63 }
  0xac   : > { %7850 = vmatmul.mubr.msk.bf16.vlgmr.msra.gmra.mxu0 %vm623_vm9, %v9098_v26  ;;  %7858 = vmatprep.subr.msk.bf16.mxu1 %vm648_vm3, %v563_v1  ;;  %v662_v15 = vsel %vm648_vm3, %v564_v4, 0  ;;  %v343_v20 = vsel %vm340_vm7, %v8352_v10, %v8362_v29  ;;  %v8377_v21 = vunpack.i.h.bf16 %v9087_v45 }
  0xad   : > { %7867 = vmatprep.subr.msk.bf16.mxu0 %vm648_vm3, %v565_v3  ;;  %790 = vmatpush1.bf16.msra.mxu1 %v656_v14  ;;  %v459_v37 = vsel %vm455_vm1, %v8322_v61, %v8381_v13  ;;  %v490_v19 = vsel %vm486_vm2, %v8327_v2, %v8386_v9  ;;  %v491_v24 = vsel %vm486_vm2, %v8386_v9, %v8387_v7 }
  0xae   : > { %903 = vmatpush1.bf16.msra.mxu0 %v662_v15  ;;  %v9114_v16 = vpop.permute.xlu1 %8394  ;;  %v9116_v17 = vpop.permute.xlu0 %8389  ;;  %712 = vmatprep.mubr.bf16.mxu0 %v14429_v12  ;;  %v460_v28 = vsel %vm455_vm1, %v8381_v13, %v8382_v36  ;;  %v556_v33 = vpack.c.bf16 %v490_v19, %v459_v37  ;;  %v548_v2 = vpack.c.bf16 %v427_v49, %v399_v46  ;;  %v8816_v49 = vld [vmem:[%s8898_s30 + $0x18] sm:$0xff] }
  0xaf   : > { %v8396_v30 = vunpack.i.l.bf16 %v9114_v16  ;;  %v8391_v31 = vunpack.i.l.bf16 %v9116_v17  ;;  %v557_v59 = vpack.c.bf16 %v491_v24, %v460_v28 }
  0xb0   : > { %791 = vmatprep.subr.bf16.mxu1 %v556_v33 }
  0xb1   : > { %v461_v27 = vsel %vm455_vm1, %v8382_v36, %v8391_v31  ;;  %v492_v35 = vsel %vm486_vm2, %v8387_v7, %v8396_v30  ;;  %792 = vmatpush1.bf16.msra.mxu1 %v555_v25 }
  0xb2   : > { %v8405_v39 = vpop.permute.xlu1 %8404  ;;  %v8400_v58 = vpop.permute.xlu0 %8399  ;;  %v558_v40 = vpack.c.bf16 %v492_v35, %v461_v27 }
  0xb3   : > { %v8407_v41 = vunpack.i.h.bf16 %v8405_v39  ;;  %v8406_v42 = vunpack.i.l.bf16 %v8405_v39  ;;  %v8402_v43 = vunpack.i.h.bf16 %v8400_v58  ;;  %v8401_v44 = vunpack.i.l.bf16 %v8400_v58 }
  0xb4   : > { %904 = vmatprep.subr.bf16.mxu0 %v558_v40  ;;  %7851 = vmatmul.mubr.msk.bf16.gmra.mxu0 %vm623_vm9, %v9135_v22  ;;  %v8397_v40 = vunpack.i.h.bf16 %v9114_v16 }
  0xb5   : > { %905 = vmatpush1.bf16.msra.mxu0 %v557_v59  ;;  %v400_v51 = vsel %vm396_vm4, %v8342_v18, %v8401_v44  ;;  %v428_v54 = vsel %vm424_vm5, %v8347_v32, %v8406_v42  ;;  %v429_v55 = vsel %vm424_vm5, %v8406_v42, %v8407_v41  ;;  %v401_v56 = vsel %vm396_vm4, %v8401_v44, %v8402_v43 }
  0xb6   : > { %v9155_v0 = vpop.permute.xlu1 %422  ;;  %v9157_v48 = vpop.permute.xlu0 %394  ;;  %v549_v52 = vpack.c.bf16 %v428_v54, %v400_v51  ;;  %722 = vmatprep.mubr.bf16.mxu0 %v14429_v12  ;;  %v550_v61 = vpack.c.bf16 %v429_v55, %v401_v56  ;;  %v8392_v59 = vunpack.i.h.bf16 %v9116_v17  ;;  %v8817_v54 = vld [vmem:[%s8898_s30 + $0x10] sm:$0xff]  ;;  %v8818_v55 = vld [vmem:[%s8898_s30 + $0x20] sm:$0xff]  ;;  %v8440_v17 = vld [vmem:[%s14422_s1 + $0x28] sm:$0xff]  }
  0xb7   : > { %v430_v47 = vsel %vm424_vm5, %v8407_v41, %v9155_v0  ;;  %v402_v50 = vsel %vm396_vm4, %v8402_v43, %v9157_v48  ;;  %v524_v41 = vsel %vm517_vm0, %v8376_v53, %v8377_v21  ;;  %v552_v16 = vpack.c.bf16 %v9155_v0, %v9157_v48  ;;  %v8441_v48 = vld [vmem:[%s14422_s1 + $0x30] sm:$0xff]  }
  0xb8   : > { %793 = vmatprep.subr.bf16.mxu1 %v549_v52  ;;  %v551_v57 = vpack.c.bf16 %v430_v47, %v402_v50  ;;  %v566_v52 = vpack.c.bf16 %v524_v41, %v524_v41  ;;  %v8439_v47 = vld [vmem:[%s14422_s1 + $0x20] sm:$0xff]   ;;  %v462_v34 = vsel %vm455_vm1, %v8391_v31, %v8392_v59  ;;  %v8819_v31 = vld [vmem:[%s8898_s30 + $0x30] sm:$0xff]  ;;  %s8839_s30 = smov 112   ;;  %vm4349_vm0 = vcmask 769024  }
  0xb9   : > { %794 = vmatpush1.bf16.msra.mxu1 %v548_v2  ;;  %v8442_v2 = vld [vmem:[%s14422_s1 + $0x38] sm:$0xff]   ;;  %vm7444_vm1 = vcmask 1045504   ;;  %vm7740_vm4 = vcmask 396288  }
  0xba   : > { %v8415_v62 = vpop.permute.xlu1 %8414  ;;  %v8410_v63 = vpop.permute.xlu0 %8409  ;;  %906 = vmatprep.subr.bf16.mxu0 %v551_v57 }
  0xbb   : > { %v8417_v1 = vunpack.i.h.bf16 %v8415_v62  ;;  %v8416_v3 = vunpack.i.l.bf16 %v8415_v62  ;;  %v8411_v4 = vunpack.i.l.bf16 %v8410_v63  ;;  %907 = vmatpush1.bf16.msra.mxu0 %v550_v61  ;;  %v8412_v7 = vunpack.i.h.bf16 %v8410_v63 }
  0xbc   : > { %7852 = vmatmul.mubr.msk.bf16.gmra.mxu0 %vm623_vm9, %v9168_v60 }
  0xbd   : > { %v344_v9 = vsel %vm340_vm7, %v8362_v29, %v8411_v4  ;;  %v372_v36 = vsel %vm368_vm6, %v8416_v3, %v8417_v1  ;;  %v371_v13 = vsel %vm368_vm6, %v8357_v8, %v8416_v3  ;;  %732 = vmatprep.mubr.bf16.mxu0 %v14429_v12  ;;  %v345_v5 = vsel %vm340_vm7, %v8411_v4, %v8412_v7 }
  0xbe   : > { %v8420_v14 = vpop.permute.xlu1 %8419  ;;  %v339_v15 = vpop.permute.xlu0 %338  ;;  %v542_v37 = vpack.c.bf16 %v372_v36, %v344_v9  ;;  %v541_v6 = vpack.c.bf16 %v371_v13, %v343_v20 }
  0xbf   : > { %v8422_v19 = vunpack.i.h.bf16 %v8420_v14  ;;  %v8421_v10 = vunpack.i.l.bf16 %v8420_v14  ;;  %v346_v24 = vsel %vm340_vm7, %v8412_v7, %v339_v15 }
  0xc0   : > { %795 = vmatprep.subr.bf16.mxu1 %v542_v37 }
  0xc1   : > { %v373_v8 = vsel %vm368_vm6, %v8417_v1, %v8421_v10  ;;  %796 = vmatpush1.bf16.msra.mxu1 %v541_v6  ;;  %v374_v28 = vsel %vm368_vm6, %v8421_v10, %v8422_v19 }
  0xc2   : > { %v8430_v32 = vpop.permute.xlu1 %8429  ;;  %v8425_v18 = vpop.permute.xlu0 %8424  ;;  %v544_v33 = vpack.c.bf16 %v374_v28, %v346_v24  ;;  %v543_v25 = vpack.c.bf16 %v373_v8, %v345_v5 }
  0xc3   : > { %v8432_v27 = vunpack.i.h.bf16 %v8430_v32  ;;  %v8431_v35 = vunpack.i.l.bf16 %v8430_v32  ;;  %v8427_v39 = vunpack.i.h.bf16 %v8425_v18  ;;  %v8426_v58 = vunpack.i.l.bf16 %v8425_v18 }
  0xc4   : > { %908 = vmatprep.subr.bf16.mxu0 %v544_v33  ;;  %7853 = vmatmul.mubr.msk.bf16.gmra.mxu0 %vm623_vm9, %v9185_v23 }
  0xc5   : > { %v317_v42 = vsel %vm312_vm8, %v8427_v39, %v8431_v35  ;;  %909 = vmatpush1.bf16.msra.mxu0 %v543_v25  ;;  %v316_v43 = vsel %vm312_vm8, %v8426_v58, %v8427_v39  ;;  %v318_v44 = vsel %vm312_vm8, %v8431_v35, %v8432_v27  ;;  %v315_v46 = vsel %vm312_vm8, %v8367_v38, %v8426_v58 }
  0xc6   : > { %v535_v51 = vpack.c.bf16 %v316_v43, %v8816_v49  ;;  %v537_v45 = vpack.c.bf16 %v318_v44, %v8928_v11  ;;  %v534_v53 = vpack.c.bf16 %v315_v46, %v8817_v54  ;;  %v536_v56 = vpack.c.bf16 %v317_v42, %v8818_v55  ;;  %742 = vmatprep.mubr.bf16.mxu0 %v14429_v12 }
  0xc7   : > { %v493_v11 = vsel %vm486_vm2, %v8396_v30, %v8397_v40  ;;  %v668_v38 = vsel %vm648_vm3, %v566_v52, 0  ;;  %v545_v30 = vpack.c.bf16 %v8422_v19, %v339_v15  ;;  %v538_v0 = vpack.c.bf16 %v8432_v27, %v8819_v31 }
  0xc8   : > { %797 = vmatprep.subr.bf16.mxu1 %v535_v51  ;;  %910 = vmatprep.subr.bf16.mxu0 %v537_v45  ;;  %v559_v50 = vpack.c.bf16 %v493_v11, %v462_v34  ;;  %vm7445_vm2 = vcmask 1046528  }
  0xc9   : > { %798 = vmatpush1.bf16.msra.mxu1 %v534_v53  ;;  %911 = vmatpush1.bf16.msra.mxu0 %v536_v56 }
  0xca   : > { %8274 = vmatprep.subr.msk.bf16.mxu1 %vm648_vm3, %v566_v52 }
  0xcc   : > { %7859 = vmatmul.mubr.msk.bf16.vlgmr.msra.gmra.mxu1 %vm623_vm9, %v9098_v26  ;;  %7854 = vmatmul.mubr.msk.bf16.gmra.mxu0 %vm623_vm9, %v8439_v47 }
  0xcd   : > { %8249 = vmatpush3.bf16.msra.mxu1 %v668_v38  ;;  %825 = vmatprep.mubr.bf16.mxu1 %v14429_v12 }
  0xce   : > { %8250 = vmatprep.subr.bf16.mxu1 %v559_v50  ;;  %752 = vmatprep.mubr.bf16.mxu0 %v14429_v12 }
  0xcf   : > { %v9420_v39 = vpop.permute.xlu0 %2436  ;;  %v9446_v46 = vpop.permute.xlu1 %2441 }
  0xd0   : > { %14738 = vst [vmem:[#allocation17_spill] sm:$0xff] %v9420_v39  ;;  %14746 = vst [vmem:[#allocation25_spill] sm:$0xff] %v9446_v46 }
  0xd1   : > { %8251 = vmatpush3.bf16.msra.mxu1 %v559_v50 }
  0xd2   : > { %8252 = vmatprep.subr.bf16.mxu1 %v552_v16 }
  0xd3   : > { %v9436_v42 = vpop.permute.xlu0 %2451  ;;  %v9460_v54 = vpop.permute.xlu1 %2446 }
  0xd4   : > { %7860 = vmatmul.mubr.msk.bf16.gmra.mxu1 %vm623_vm9, %v9135_v22  ;;  %7855 = vmatmul.mubr.msk.bf16.gmra.mxu0 %vm623_vm9, %v8440_v17  ;;  %14743 = vst [vmem:[#allocation22_spill] sm:$0xff] %v9436_v42  ;;  %14750 = vst [vmem:[#allocation29_spill] sm:$0xff] %v9460_v54 }
  0xd5   : > { %8253 = vmatpush3.bf16.msra.mxu1 %v552_v16  ;;  %835 = vmatprep.mubr.bf16.mxu1 %v14429_v12 }
  0xd6   : > { %8254 = vmatprep.subr.bf16.mxu1 %v545_v30  ;;  %762 = vmatprep.mubr.bf16.mxu0 %v14429_v12 }
  0xd7   : > { %v9452_v51 = vpop.permute.xlu0 %2461  ;;  %v9478_v34 = vpop.permute.xlu1 %2456 }
  0xd8   : > { %14748 = vst [vmem:[#allocation27_spill] sm:$0xff] %v9452_v51  ;;  %14756 = vst [vmem:[#allocation35_spill] sm:$0xff] %v9478_v34 }
  0xd9   : > { %8255 = vmatpush3.bf16.msra.mxu1 %v545_v30 }
  0xda   : > { %8256 = vmatprep.subr.bf16.mxu1 %v538_v0 }
  0xdb   : > { %v9468_v56 = vpop.permute.xlu0 %2471  ;;  %v9496_v30 = vpop.permute.xlu1 %2466 }
  0xdc   : > { %7861 = vmatmul.mubr.msk.bf16.gmra.mxu1 %vm623_vm9, %v9168_v60  ;;  %7856 = vmatmul.mubr.msk.bf16.gmra.mxu0 %vm623_vm9, %v8441_v48  ;;  %14753 = vst [vmem:[#allocation32_spill] sm:$0xff] %v9468_v56  ;;  %14762 = vst [vmem:[#allocation41_spill] sm:$0xff] %v9496_v30 }
  0xdd   : > { %845 = vmatprep.mubr.bf16.mxu1 %v14429_v12  ;;  %772 = vmatprep.mubr.bf16.mxu0 %v14429_v12 }
  0xde   : > { %8257 = vmatpush3.bf16.msra.mxu1 %v538_v0 }
  0xdf   : > { %v9486_v50 = vpop.permute.xlu0 %2481 }
  0xe0   : > { %14759 = vst [vmem:[#allocation38_spill] sm:$0xff] %v9486_v50 }
  0xe3   : > { %v9500_v31 = vpop.permute.xlu0 %2491 }
  0xe4   : > { %7862 = vmatmul.mubr.msk.bf16.gmra.mxu1 %vm623_vm9, %v9185_v23  ;;  %7857 = vmatmul.mubr.msk.bf16.gmra.mxu0 %vm623_vm9, %v8442_v2  ;;  %14763 = vst [vmem:[#allocation42_spill] sm:$0xff] %v9500_v31 }
  0xe5   : > { %855 = vmatprep.mubr.bf16.mxu1 %v14429_v12  ;;  %928 = vmatprep.mubr.bf16.mxu0 %v14429_v12 }
  0xec   : > { %7863 = vmatmul.mubr.msk.bf16.gmra.mxu1 %vm623_vm9, %v8439_v47  ;;  %7868 = vmatmul.mubr.msk.bf16.vlgmr.msra.gmra.mxu0 %vm623_vm9, %v9098_v26 }
  0xed   : > { %865 = vmatprep.mubr.bf16.mxu1 %v14429_v12  ;;  %938 = vmatprep.mubr.bf16.mxu0 %v14429_v12 }
  0xf4   : > { %7864 = vmatmul.mubr.msk.bf16.gmra.mxu1 %vm623_vm9, %v8440_v17  ;;  %7869 = vmatmul.mubr.msk.bf16.gmra.mxu0 %vm623_vm9, %v9135_v22 }
  0xf5   : > { %875 = vmatprep.mubr.bf16.mxu1 %v14429_v12  ;;  %948 = vmatprep.mubr.bf16.mxu0 %v14429_v12 }
  0xfc   : > { %7865 = vmatmul.mubr.msk.bf16.gmra.mxu1 %vm623_vm9, %v8441_v48  ;;  %7870 = vmatmul.mubr.msk.bf16.gmra.mxu0 %vm623_vm9, %v9168_v60 }
  0xfd   : > { %885 = vmatprep.mubr.bf16.mxu1 %v14429_v12  ;;  %958 = vmatprep.mubr.bf16.mxu0 %v14429_v12 }
 0x104   : > { %7866 = vmatmul.mubr.msk.bf16.gmra.mxu1 %vm623_vm9, %v8442_v2  ;;  %7871 = vmatmul.mubr.msk.bf16.gmra.mxu0 %vm623_vm9, %v9185_v23 }
 0x105   : > { %8258 = vmatprep.mubr.msk.bf16.mxu1 %vm623_vm9, %v9098_v26  ;;  %968 = vmatprep.mubr.bf16.mxu0 %v14429_v12 }
 0x108   : > { %v9518_v31 = vpop.permute.xlu0 %2501 }
 0x109   : > { %14769 = vst [vmem:[#allocation48_spill] sm:$0xff] %v9518_v31 }
 0x10c   : > { %8259 = vmatmul.mubr.msk.bf16.vlgmr.msra.gmra.mxu1 %vm623_vm9, %v9135_v22  ;;  %7872 = vmatmul.mubr.msk.bf16.gmra.mxu0 %vm623_vm9, %v8439_v47  ;;  %v9534_v34 = vpop.permute.xlu0 %2511 }
 0x10d   : > { %8262 = vmatprep.mubr.msk.bf16.mxu1 %vm623_vm9, %v9168_v60  ;;  %978 = vmatprep.mubr.bf16.mxu0 %v14429_v12  ;;  %14774 = vst [vmem:[#allocation53_spill] sm:$0xff] %v9534_v34 }
 0x114   : > { %8263 = vmatmul.mubr.msk.bf16.gmra.mxu1 %vm623_vm9, %v9185_v23  ;;  %7873 = vmatmul.mubr.msk.bf16.gmra.mxu0 %vm623_vm9, %v8440_v17 }
 0x115   : > { %8266 = vmatprep.mubr.msk.bf16.mxu1 %vm623_vm9, %v8439_v47  ;;  %988 = vmatprep.mubr.bf16.mxu0 %v14429_v12 }
 0x11c   : > { %8267 = vmatmul.mubr.msk.bf16.gmra.mxu1 %vm623_vm9, %v8440_v17  ;;  %7874 = vmatmul.mubr.msk.bf16.gmra.mxu0 %vm623_vm9, %v8441_v48 }
 0x11d   : > { %8270 = vmatprep.mubr.msk.bf16.mxu1 %vm623_vm9, %v8441_v48  ;;  %998 = vmatprep.mubr.bf16.mxu0 %v14429_v12  ;;  %v9512_v12 = vpop.permute.xlu1 %2476 }
 0x11e   : > { %14767 = vst [vmem:[#allocation46_spill] sm:$0xff] %v9512_v12 }
 0x121   : > { %v9528_v51 = vpop.permute.xlu1 %2486 }
 0x122   : > { %14772 = vst [vmem:[#allocation51_spill] sm:$0xff] %v9528_v51 }
 0x124   : > { %8271 = vmatmul.mubr.msk.bf16.gmra.mxu1 %vm623_vm9, %v8442_v2  ;;  %7875 = vmatmul.mubr.msk.bf16.gmra.mxu0 %vm623_vm9, %v8442_v2 }
 0x16c   : > { %v9290_v26 = vpop.f32.mrf.mxu0 }
 0x16d   : > { %1218 = vrot.lane.b32.xlu0 %v9290_v26, %s8836_s15 }
 0x16e   : > { %v9294_v22 = vpop.f32.mrf.mxu0 }
 0x170   : > { %v9302_v57 = vpop.f32.mrf.mxu0 }
 0x171   : > { %1220 = vrot.lane.b32.xlu0 %v9294_v22, %s8836_s15 }
 0x172   : > { %v9310_v61 = vpop.f32.mrf.mxu0 }
 0x174   : > { %v9316_v63 = vpop.f32.mrf.mxu0 }
 0x176   : > { %v9324_v3 = vpop.f32.mrf.mxu0 }
 0x178   : > { %v9332_v20 = vpop.f32.mrf.mxu0 }
 0x17a   : > { %v9340_v9 = vpop.f32.mrf.mxu0 }
 0x17c   : > { %v9346_v13 = vpop.f32.mrf.mxu0 }
 0x17e   : > { %v9352_v14 = vpop.f32.mrf.mxu0 }
 0x180   : > { %v9362_v6 = vpop.f32.mrf.mxu0 }
 0x182   : > { %v9370_v10 = vpop.f32.mrf.mxu0 }
 0x184   : > { %v9374_v21 = vpop.f32.mrf.mxu0 }
 0x185   : > { %14728 = vst [vmem:[#allocation7_spill] sm:$0xff] %v9374_v21 }
 0x186   : > { %v9382_v5 = vpop.f32.mrf.mxu0 }
 0x187   : > { %14729 = vst [vmem:[#allocation8_spill] sm:$0xff] %v9382_v5 }
 0x188   : > { %v9390_v24 = vpop.f32.mrf.mxu0 }
 0x189   : > { %14731 = vst [vmem:[#allocation10_spill] sm:$0xff] %v9390_v24 }
 0x18a   : > { %v9398_v32 = vpop.f32.mrf.mxu0 }
 0x18b   : > { %14732 = vst [vmem:[#allocation11_spill] sm:$0xff] %v9398_v32 }
 0x18c   : > { %v9298_v29 = vpop.f32.mrf.mxu1  ;;  %v9404_v33 = vpop.f32.mrf.mxu0 }
 0x18d   : > { %1222 = vrot.lane.b32.xlu1 %v9298_v29, %s8836_s15  ;;  %14734 = vst [vmem:[#allocation13_spill] sm:$0xff] %v9404_v33 }
 0x18e   : > { %v9304_v60 = vpop.f32.mrf.mxu1  ;;  %v9412_v27 = vpop.f32.mrf.mxu0 }
 0x18f   : > { %14723 = vst [vmem:[#allocation2_spill] sm:$0xff] %v9304_v60  ;;  %1224 = vrot.lane.b32.xlu0 %v9304_v60, %s8836_s15  ;;  %14736 = vst [vmem:[#allocation15_spill] sm:$0xff] %v9412_v27 }
 0x190   : > { %v9312_v62 = vpop.f32.mrf.mxu1  ;;  %v9418_v35 = vpop.f32.mrf.mxu0 }
 0x191   : > { %1232 = vrot.lane.b32.xlu1 %v9302_v57, %s8836_s15  ;;  %14737 = vst [vmem:[#allocation16_spill] sm:$0xff] %v9418_v35 }
 0x192   : > { %v9322_v1 = vpop.f32.mrf.mxu1  ;;  %v9430_v59 = vpop.f32.mrf.mxu0 }
 0x193   : > { %1236 = vrot.lane.b32.xlu0 %v9312_v62, %s8836_s15  ;;  %14724 = vst [vmem:[#allocation3_spill] sm:$0xff] %v9322_v1  ;;  %14741 = vst [vmem:[#allocation20_spill] sm:$0xff] %v9430_v59 }
 0x194   : > { %v9328_v4 = vpop.f32.mrf.mxu1  ;;  %v9434_v41 = vpop.f32.mrf.mxu0 }
 0x195   : > { %1234 = vrot.lane.b32.xlu1 %v9310_v61, %s8836_s15  ;;  %14742 = vst [vmem:[#allocation21_spill] sm:$0xff] %v9434_v41 }
 0x196   : > { %v9336_v7 = vpop.f32.mrf.mxu1  ;;  %v9444_v44 = vpop.f32.mrf.mxu0 }
 0x197   : > { %1246 = vrot.lane.b32.xlu0 %v9316_v63, %s8836_s15  ;;  %14725 = vst [vmem:[#allocation4_spill] sm:$0xff] %v9336_v7  ;;  %14745 = vst [vmem:[#allocation24_spill] sm:$0xff] %v9444_v44 }
 0x198   : > { %v9344_v36 = vpop.f32.mrf.mxu1  ;;  %v9456_v45 = vpop.f32.mrf.mxu0 }
 0x199   : > { %1238 = vrot.lane.b32.xlu1 %v9322_v1, %s8836_s15  ;;  %14749 = vst [vmem:[#allocation28_spill] sm:$0xff] %v9456_v45 }
 0x19a   : > { %v9356_v15 = vpop.f32.mrf.mxu1  ;;  %v9466_v55 = vpop.f32.mrf.mxu0 }
 0x19b   : > { %1248 = vrot.lane.b32.xlu0 %v9324_v3, %s8836_s15  ;;  %14726 = vst [vmem:[#allocation5_spill] sm:$0xff] %v9356_v15  ;;  %14752 = vst [vmem:[#allocation31_spill] sm:$0xff] %v9466_v55 }
 0x19c   : > { %v9360_v37 = vpop.f32.mrf.mxu1  ;;  %v9474_v47 = vpop.f32.mrf.mxu0 }
 0x19d   : > { %1250 = vrot.lane.b32.xlu1 %v9328_v4, %s8836_s15  ;;  %14755 = vst [vmem:[#allocation34_spill] sm:$0xff] %v9474_v47 }
 0x19e   : > { %v9368_v19 = vpop.f32.mrf.mxu1  ;;  %v9484_v38 = vpop.f32.mrf.mxu0 }
 0x19f   : > { %1252 = vrot.lane.b32.xlu0 %v9336_v7, %s8836_s15  ;;  %14727 = vst [vmem:[#allocation6_spill] sm:$0xff] %v9368_v19  ;;  %14758 = vst [vmem:[#allocation37_spill] sm:$0xff] %v9484_v38 }
 0x1a0   : > { %v9378_v23 = vpop.f32.mrf.mxu1  ;;  %v9494_v17 = vpop.f32.mrf.mxu0 }
 0x1a1   : > { %1260 = vrot.lane.b32.xlu1 %v9332_v20, %s8836_s15  ;;  %14761 = vst [vmem:[#allocation40_spill] sm:$0xff] %v9494_v17 }
 0x1a2   : > { %v9388_v8 = vpop.f32.mrf.mxu1  ;;  %v9504_v0 = vpop.f32.mrf.mxu0 }
 0x1a3   : > { %1264 = vrot.lane.b32.xlu0 %v9344_v36, %s8836_s15  ;;  %14730 = vst [vmem:[#allocation9_spill] sm:$0xff] %v9388_v8  ;;  %14764 = vst [vmem:[#allocation43_spill] sm:$0xff] %v9504_v0 }
 0x1a4   : > { %v9394_v28 = vpop.f32.mrf.mxu1  ;;  %v9510_v2 = vpop.f32.mrf.mxu0 }
 0x1a5   : > { %1262 = vrot.lane.b32.xlu1 %v9340_v9, %s8836_s15  ;;  %14766 = vst [vmem:[#allocation45_spill] sm:$0xff] %v9510_v2 }
 0x1a6   : > { %v9402_v18 = vpop.f32.mrf.mxu1  ;;  %v9522_v56 = vpop.f32.mrf.mxu0 }
 0x1a7   : > { %1274 = vrot.lane.b32.xlu0 %v9346_v13, %s8836_s15  ;;  %14733 = vst [vmem:[#allocation12_spill] sm:$0xff] %v9402_v18  ;;  %14770 = vst [vmem:[#allocation49_spill] sm:$0xff] %v9522_v56 }
 0x1a8   : > { %v9410_v25 = vpop.f32.mrf.mxu1  ;;  %v9532_v12 = vpop.f32.mrf.mxu0 }
 0x1a9   : > { %1266 = vrot.lane.b32.xlu1 %v9356_v15, %s8836_s15  ;;  %14735 = vst [vmem:[#allocation14_spill] sm:$0xff] %v9410_v25  ;;  %14773 = vst [vmem:[#allocation52_spill] sm:$0xff] %v9532_v12 }
 0x1aa   : > { %v9424_v58 = vpop.f32.mrf.mxu1  ;;  %v9542_v42 = vpop.f32.mrf.mxu0 }
 0x1ab   : > { %1276 = vrot.lane.b32.xlu0 %v9352_v14, %s8836_s15  ;;  %14739 = vst [vmem:[#allocation18_spill] sm:$0xff] %v9424_v58  ;;  %14776 = vst [vmem:[#allocation55_spill] sm:$0xff] %v9542_v42 }
 0x1ac   : > { %v9428_v40 = vpop.f32.mrf.mxu1 }
 0x1ad   : > { %1278 = vrot.lane.b32.xlu1 %v9360_v37, %s8836_s15  ;;  %14740 = vst [vmem:[#allocation19_spill] sm:$0xff] %v9428_v40 }
 0x1ae   : > { %v9440_v43 = vpop.f32.mrf.mxu1 }
 0x1af   : > { %1280 = vrot.lane.b32.xlu0 %v9368_v19, %s8836_s15  ;;  %14744 = vst [vmem:[#allocation23_spill] sm:$0xff] %v9440_v43 }
 0x1b0   : > { %v9450_v49 = vpop.f32.mrf.mxu1 }
 0x1b1   : > { %1288 = vrot.lane.b32.xlu1 %v9362_v6, %s8836_s15  ;;  %14747 = vst [vmem:[#allocation26_spill] sm:$0xff] %v9450_v49 }
 0x1b2   : > { %v9464_v53 = vpop.f32.mrf.mxu1 }
 0x1b3   : > { %1292 = vrot.lane.b32.xlu0 %v9378_v23, %s8836_s15  ;;  %14751 = vst [vmem:[#allocation30_spill] sm:$0xff] %v9464_v53 }
 0x1b4   : > { %v9472_v52 = vpop.f32.mrf.mxu1 }
 0x1b5   : > { %1290 = vrot.lane.b32.xlu1 %v9370_v10, %s8836_s15  ;;  %14754 = vst [vmem:[#allocation33_spill] sm:$0xff] %v9472_v52 }
 0x1b6   : > { %v9482_v11 = vpop.f32.mrf.mxu1 }
 0x1b7   : > { %1302 = vrot.lane.b32.xlu0 %v9374_v21, %s8836_s15  ;;  %14757 = vst [vmem:[#allocation36_spill] sm:$0xff] %v9482_v11  ;;  %v8446_v21 = vld [vmem:[%s14424_s3 + $0x60] ss:$8 sps:$4 sm:$0xff]  }
 0x1b8   : > { %v9492_v16 = vpop.f32.mrf.mxu1 }
 0x1b9   : > { %1294 = vrot.lane.b32.xlu1 %v9388_v8, %s8836_s15  ;;  %14760 = vst [vmem:[#allocation39_spill] sm:$0xff] %v9492_v16 }
 0x1ba   : > { %v9508_v48 = vpop.f32.mrf.mxu1 }
 0x1bb   : > { %1304 = vrot.lane.b32.xlu0 %v9382_v5, %s8836_s15  ;;  %14765 = vst [vmem:[#allocation44_spill] sm:$0xff] %v9508_v48  ;;  %v8451_v5 = vld [vmem:[%s14424_s3 + $0x54] ss:$8 sps:$4 sm:$0xff]  }
 0x1bc   : > { %v9516_v50 = vpop.f32.mrf.mxu1 }
 0x1bd   : > { %1306 = vrot.lane.b32.xlu1 %v9394_v28, %s8836_s15  ;;  %14768 = vst [vmem:[#allocation47_spill] sm:$0xff] %v9516_v50 }
 0x1be   : > { %v9526_v30 = vpop.f32.mrf.mxu1 }
 0x1bf   : > { %1308 = vrot.lane.b32.xlu0 %v9402_v18, %s8836_s15  ;;  %14771 = vst [vmem:[#allocation50_spill] sm:$0xff] %v9526_v30 }
 0x1c0   : > { %v9538_v31 = vpop.f32.mrf.mxu1 }
 0x1c1   : > { %1316 = vrot.lane.b32.xlu1 %v9390_v24, %s8836_s15  ;;  %14775 = vst [vmem:[#allocation54_spill] sm:$0xff] %v9538_v31 }
 0x1c2   : > { %v9548_v51 = vpop.f32.mrf.mxu1 }
 0x1c3   : > { %1320 = vrot.lane.b32.xlu0 %v9410_v25, %s8836_s15  ;;  %14778 = vst [vmem:[#allocation57_spill] sm:$0xff] %v9548_v51 }
 0x1c4   : > { %v9556_v54 = vpop.f32.mrf.mxu1 }
 0x1c5   : > { %1318 = vrot.lane.b32.xlu1 %v9398_v32, %s8836_s15  ;;  %14780 = vst [vmem:[#allocation59_spill] sm:$0xff] %v9556_v54 }
 0x1c7   : > { %1330 = vrot.lane.b32.xlu0 %v9404_v33, %s8836_s15 }
 0x1c9   : > { %1322 = vrot.lane.b32.xlu1 %v9424_v58, %s8836_s15 }
 0x1cb   : > { %1332 = vrot.lane.b32.xlu0 %v9412_v27, %s8836_s15 }
 0x1cd   : > { %1334 = vrot.lane.b32.xlu1 %v9428_v40, %s8836_s15 }
 0x1cf   : > { %1336 = vrot.lane.b32.xlu0 %v9440_v43, %s8836_s15 }
 0x1d1   : > { %1344 = vrot.lane.b32.xlu1 %v9418_v35, %s8836_s15 }
 0x1d3   : > { %1348 = vrot.lane.b32.xlu0 %v9450_v49, %s8836_s15 }
 0x1d5   : > { %1346 = vrot.lane.b32.xlu1 %v9430_v59, %s8836_s15 }
 0x1d7   : > { %1358 = vrot.lane.b32.xlu0 %v9434_v41, %s8836_s15 }
 0x1d9   : > { %1350 = vrot.lane.b32.xlu1 %v9464_v53, %s8836_s15  ;;  %v9566_v53 = vpop.f32.mrf.mxu1 }
 0x1da   : > { %14783 = vst [vmem:[#allocation62_spill] sm:$0xff] %v9566_v53 }
 0x1db   : > { %1360 = vrot.lane.b32.xlu0 %v9444_v44, %s8836_s15 }
 0x1dd   : > { %1362 = vrot.lane.b32.xlu1 %v9472_v52, %s8836_s15 }
 0x1df   : > { %1364 = vrot.lane.b32.xlu0 %v9482_v11, %s8836_s15  ;;  %v9552_v34 = vpop.permute.xlu0 %1218 }
 0x1e1   : > { %1372 = vrot.lane.b32.xlu1 %v9456_v45, %s8836_s15 }
 0x1e3   : > { %1376 = vrot.lane.b32.xlu0 %v9492_v16, %s8836_s15  ;;  %v9568_v43 = vpop.permute.xlu0 %1220 }
 0x1e5   : > { %1374 = vrot.lane.b32.xlu1 %v9466_v55, %s8836_s15 }
 0x1e7   : > { %1386 = vrot.lane.b32.xlu0 %v9474_v47, %s8836_s15 }
 0x1e9   : > { %1378 = vrot.lane.b32.xlu1 %v9508_v48, %s8836_s15  ;;  %v9544_v48 = vpop.permute.xlu1 %2496 }
 0x1ea   : > { %14777 = vst [vmem:[#allocation56_spill] sm:$0xff] %v9544_v48 }
 0x1eb   : > { %1388 = vrot.lane.b32.xlu0 %v9484_v38, %s8836_s15 }
 0x1ed   : > { %1390 = vrot.lane.b32.xlu1 %v9516_v50, %s8836_s15  ;;  %v9562_v48 = vpop.permute.xlu1 %2506 }
 0x1ee   : > { %14782 = vst [vmem:[#allocation61_spill] sm:$0xff] %v9562_v48 }
 0x1ef   : > { %1392 = vrot.lane.b32.xlu0 %v9526_v30, %s8836_s15  ;;  %v9550_v30 = vpop.f32.mrf.mxu0 }
 0x1f0   : > { %14779 = vst [vmem:[#allocation58_spill] sm:$0xff] %v9550_v30 }
 0x1f1   : > { %1400 = vrot.lane.b32.xlu1 %v9494_v17, %s8836_s15  ;;  %v9560_v11 = vpop.f32.mrf.mxu0 }
 0x1f2   : > { %14781 = vst [vmem:[#allocation60_spill] sm:$0xff] %v9560_v11 }
 0x1f3   : > { %1404 = vrot.lane.b32.xlu0 %v9538_v31, %s8836_s15  ;;  %v9572_v46 = vpop.f32.mrf.mxu0 }
 0x1f4   : > { %14784 = vst [vmem:[#allocation63_spill] sm:$0xff] %v9572_v46 }
 0x1f5   : > { %1402 = vrot.lane.b32.xlu1 %v9504_v0, %s8836_s15  ;;  %v9584_v39 = vpop.f32.mrf.mxu0 }
 0x1f6   : > { %14787 = vst [vmem:[#allocation66_spill] sm:$0xff] %v9584_v39 }
 0x1f7   : > { %1414 = vrot.lane.b32.xlu0 %v9510_v2, %s8836_s15  ;;  %v9592_v19 = vpop.f32.mrf.mxu0 }
 0x1f8   : > { %14789 = vst [vmem:[#allocation68_spill] sm:$0xff] %v9592_v19 }
 0x1f9   : > { %1406 = vrot.lane.b32.xlu1 %v9548_v51, %s8836_s15  ;;  %v9578_v51 = vpop.f32.mrf.mxu1  ;;  %v9604_v1 = vpop.f32.mrf.mxu0 }
 0x1fa   : > { %14785 = vst [vmem:[#allocation64_spill] sm:$0xff] %v9578_v51  ;;  %14791 = vst [vmem:[#allocation70_spill] sm:$0xff] %v9604_v1 }
 0x1fb   : > { %1416 = vrot.lane.b32.xlu0 %v9522_v56, %s8836_s15  ;;  %v9590_v8 = vpop.f32.mrf.mxu1 }
 0x1fc   : > { %14788 = vst [vmem:[#allocation67_spill] sm:$0xff] %v9590_v8 }
 0x1fd   : > { %1418 = vrot.lane.b32.xlu1 %v9556_v54, %s8836_s15 }
 0x1ff   : > { %v9574_v58 = vpop.permute.xlu1 %1222  ;;  %1420 = vrot.lane.b32.xlu0 %v9566_v53, %s8836_s15  ;;  %v9598_v53 = vpop.f32.mrf.mxu1 }
 0x200   : > { %14790 = vst [vmem:[#allocation69_spill] sm:$0xff] %v9598_v53 }
 0x201   : > { %v9580_v48 = vpop.permute.xlu0 %1224  ;;  %1428 = vrot.lane.b32.xlu1 %v9532_v12, %s8836_s15  ;;  %v9610_v2 = vpop.f32.mrf.mxu1 }
 0x202   : > { %14786 = vst [vmem:[#allocation65_spill] sm:$0xff] %v9580_v48  ;;  %14792 = vst [vmem:[#allocation71_spill] sm:$0xff] %v9610_v2 }
 0x203   : > { %v9586_v18 = vpop.permute.xlu1 %1232  ;;  %1432 = vrot.lane.b32.xlu0 %v9578_v51, %s8836_s15 }
 0x205   : > { %v9594_v15 = vpop.permute.xlu0 %1236  ;;  %1430 = vrot.lane.b32.xlu1 %v9542_v42, %s8836_s15  ;;  %v9616_v42 = vpop.f32.mrf.mxu0 }
 0x206   : > { %14793 = vst [vmem:[#allocation72_spill] sm:$0xff] %v9616_v42 }
 0x207   : > { %v9600_v7 = vpop.permute.xlu1 %1234  ;;  %1226 = vrot.lane.b32.xlu0 %v9550_v30, %s8836_s15  ;;  %v9622_v30 = vpop.f32.mrf.mxu1 }
 0x208   : > { %14794 = vst [vmem:[#allocation73_spill] sm:$0xff] %v9622_v30 }
 0x209   : > { %v9606_v60 = vpop.permute.xlu0 %1246  ;;  %1434 = vrot.lane.b32.xlu1 %v9590_v8, %s8836_s15  ;;  %v9628_v8 = vpop.f32.mrf.mxu0 }
 0x20a   : > { %14795 = vst [vmem:[#allocation74_spill] sm:$0xff] %v9628_v8 }
 0x20b   : > { %v9612_v12 = vpop.permute.xlu1 %1238  ;;  %1240 = vrot.lane.b32.xlu0 %v9572_v46, %s8836_s15  ;;  %v9634_v46 = vpop.f32.mrf.mxu1 }
 0x20c   : > { %14796 = vst [vmem:[#allocation75_spill] sm:$0xff] %v9634_v46  ;;  %v9636_v54 = vpop.f32.mrf.mxu0 }
 0x20d   : > { %v9618_v56 = vpop.permute.xlu0 %1248  ;;  %1258 = vrot.lane.b32.xlu1 %v9598_v53, %s8836_s15  ;;  %14797 = vst [vmem:[#allocation76_spill] sm:$0xff] %v9636_v54 }
 0x20e   : > { %v9648_v17 = vpop.f32.mrf.mxu0 }
 0x20f   : > { %v9624_v51 = vpop.permute.xlu1 %1250  ;;  %1272 = vrot.lane.b32.xlu0 %v9622_v30, %s8836_s15  ;;  %v9646_v30 = vpop.f32.mrf.mxu1  ;;  %14799 = vst [vmem:[#allocation78_spill] sm:$0xff] %v9648_v17 }
 0x210   : > { %14798 = vst [vmem:[#allocation77_spill] sm:$0xff] %v9646_v30  ;;  %v9660_v31 = vpop.f32.mrf.mxu0 }
 0x211   : > { %v9630_v0 = vpop.permute.xlu0 %1252  ;;  %1228 = vrot.lane.b32.xlu1 %v9560_v11, %s8836_s15  ;;  %14801 = vst [vmem:[#allocation80_spill] sm:$0xff] %v9660_v31 }
 0x212   : > { %v9672_v50 = vpop.f32.mrf.mxu0 }
 0x213   : > { %v9638_v47 = vpop.permute.xlu1 %1260  ;;  %1244 = vrot.lane.b32.xlu0 %v9634_v46, %s8836_s15  ;;  %v9658_v46 = vpop.f32.mrf.mxu1  ;;  %14803 = vst [vmem:[#allocation82_spill] sm:$0xff] %v9672_v50 }
 0x214   : > { %14800 = vst [vmem:[#allocation79_spill] sm:$0xff] %v9658_v46 }
 0x215   : > { %v9642_v53 = vpop.permute.xlu0 %1264  ;;  %1230 = vrot.lane.b32.xlu1 %v9610_v2, %s8836_s15 }
 0x217   : > { %v9650_v38 = vpop.permute.xlu1 %1262  ;;  %1254 = vrot.lane.b32.xlu0 %v9592_v19, %s8836_s15  ;;  %v9670_v19 = vpop.f32.mrf.mxu1 }
 0x218   : > { %14802 = vst [vmem:[#allocation81_spill] sm:$0xff] %v9670_v19 }
 0x219   : > { %v9654_v11 = vpop.permute.xlu0 %1274  ;;  %1242 = vrot.lane.b32.xlu1 %v9584_v39, %s8836_s15  ;;  %v9678_v39 = vpop.f32.mrf.mxu0 }
 0x21a   : > { %14804 = vst [vmem:[#allocation83_spill] sm:$0xff] %v9678_v39 }
 0x21b   : > { %v9662_v55 = vpop.permute.xlu1 %1266  ;;  %1268 = vrot.lane.b32.xlu0 %v9616_v42, %s8836_s15  ;;  %v9684_v42 = vpop.f32.mrf.mxu1 }
 0x21c   : > { %14805 = vst [vmem:[#allocation84_spill] sm:$0xff] %v9684_v42 }
 0x21d   : > { %v9666_v2 = vpop.permute.xlu0 %1276  ;;  %1314 = vrot.lane.b32.xlu1 %v9646_v30, %s8836_s15  ;;  %v9690_v30 = vpop.f32.mrf.mxu0 }
 0x21e   : > { %14806 = vst [vmem:[#allocation85_spill] sm:$0xff] %v9690_v30 }
 0x21f   : > { %v9674_v41 = vpop.permute.xlu1 %1278  ;;  %1328 = vrot.lane.b32.xlu0 %v9670_v19, %s8836_s15  ;;  %v9696_v19 = vpop.f32.mrf.mxu1 }
 0x220   : > { %14807 = vst [vmem:[#allocation86_spill] sm:$0xff] %v9696_v19 }
 0x221   : > { %v9680_v45 = vpop.permute.xlu0 %1280  ;;  %1256 = vrot.lane.b32.xlu1 %v9604_v1, %s8836_s15  ;;  %v9702_v1 = vpop.f32.mrf.mxu0 }
 0x222   : > { %14808 = vst [vmem:[#allocation87_spill] sm:$0xff] %v9702_v1 }
 0x223   : > { %v9686_v44 = vpop.permute.xlu1 %1288  ;;  %1300 = vrot.lane.b32.xlu0 %v9684_v42, %s8836_s15  ;;  %v9708_v42 = vpop.f32.mrf.mxu1 }
 0x224   : > { %14810 = vst [vmem:[#allocation89_spill] sm:$0xff] %v9708_v42 }
 0x225   : > { %v9692_v16 = vpop.permute.xlu0 %1292  ;;  %1286 = vrot.lane.b32.xlu1 %v9658_v46, %s8836_s15  ;;  %v9714_v46 = vpop.f32.mrf.mxu0 }
 0x226   : > { %14811 = vst [vmem:[#allocation90_spill] sm:$0xff] %v9714_v46 }
 0x227   : > { %v9698_v59 = vpop.permute.xlu1 %1290  ;;  %1282 = vrot.lane.b32.xlu0 %v9636_v54, %s8836_s15  ;;  %v9720_v54 = vpop.f32.mrf.mxu1 }
 0x228   : > { %14812 = vst [vmem:[#allocation91_spill] sm:$0xff] %v9720_v54  ;;  %v9722_v27 = vpop.f32.mrf.mxu0 }
 0x229   : > { %v9704_v52 = vpop.permute.xlu0 %1302  ;;  %1270 = vrot.lane.b32.xlu1 %v9628_v8, %s8836_s15  ;;  %14813 = vst [vmem:[#allocation92_spill] sm:$0xff] %v9722_v27  ;;  %v8445_v8 = vld [vmem:[%s14424_s3 + $0x74] ss:$8 sps:$4 sm:$0xff]  }
 0x22a   : > { %14809 = vst [vmem:[#allocation88_spill] sm:$0xff] %v9704_v52  ;;  %3434 = vmatprep.subr.bf16.mxu0 %v8445_v8  ;;  %v9740_v40 = vpop.f32.mrf.mxu0  ;;  %v8449_v52 = vld [vmem:[%s14424_s3 + $0x50] ss:$8 sps:$4 sm:$0xff]  }
 0x22b   : > { %v9710_v33 = vpop.permute.xlu1 %1294  ;;  %1296 = vrot.lane.b32.xlu0 %v9660_v31, %s8836_s15  ;;  %v8443_v31 = vld [vmem:[%s14424_s3 + $0x70] ss:$8 sps:$4 sm:$0xff]   ;;  %14815 = vst [vmem:[#allocation94_spill] sm:$0xff] %v9740_v40 }
 0x22c   : > { %3435 = vmatpush1.bf16.msra.mxu0 %v8443_v31 }
 0x22d   : > { %v9716_v35 = vpop.permute.xlu0 %1304  ;;  %1370 = vrot.lane.b32.xlu1 %v9696_v19, %s8836_s15  ;;  %v9738_v19 = vpop.f32.mrf.mxu1 }
 0x22e   : > { %14814 = vst [vmem:[#allocation93_spill] sm:$0xff] %v9738_v19 }
 0x22f   : > { %v9727_v49 = vpop.permute.xlu1 %1306  ;;  %1384 = vrot.lane.b32.xlu0 %v9720_v54, %s8836_s15  ;;  %v8448_v54 = vld [vmem:[%s14424_s3 + $0x64] ss:$8 sps:$4 sm:$0xff]   ;;  %v9756_v31 = vpop.f32.mrf.mxu1 }
 0x230   : > { %3436 = vmatprep.subr.bf16.mxu0 %v8448_v54  ;;  %14817 = vst [vmem:[#allocation96_spill] sm:$0xff] %v9756_v31 }
 0x231   : > { %v9734_v32 = vpop.permute.xlu0 %1308  ;;  %1284 = vrot.lane.b32.xlu1 %v9648_v17, %s8836_s15  ;;  %3437 = vmatpush1.bf16.msra.mxu0 %v8446_v21  ;;  %v9758_v17 = vpop.f32.mrf.mxu0 }
 0x232   : > { %14818 = vst [vmem:[#allocation97_spill] sm:$0xff] %v9758_v17  ;;  %3438 = vmatprep.subr.bf16.mxu0 %v8451_v5  ;;  %v9774_v21 = vpop.f32.mrf.mxu1  ;;  %v8452_v5 = vld [vmem:[%s14424_s3 + $0x40] ss:$8 sps:$4 sm:$0xff]  }
 0x233   : > { %v9748_v24 = vpop.permute.xlu1 %1316  ;;  %1356 = vrot.lane.b32.xlu0 %v9738_v19, %s8836_s15  ;;  %14820 = vst [vmem:[#allocation99_spill] sm:$0xff] %v9774_v21 }
 0x234   : > { %14816 = vst [vmem:[#allocation95_spill] sm:$0xff] %v9748_v24  ;;  %v8454_v24 = vld [vmem:[%s14424_s3 + $0x44] ss:$8 sps:$4 sm:$0xff]  }
 0x235   : > { %v9752_v8 = vpop.permute.xlu0 %1320  ;;  %1342 = vrot.lane.b32.xlu1 %v9708_v42, %s8836_s15  ;;  %3439 = vmatpush1.bf16.msra.mxu0 %v8449_v52  ;;  %v9776_v42 = vpop.f32.mrf.mxu0 }
 0x236   : > { %14821 = vst [vmem:[#allocation100_spill] sm:$0xff] %v9776_v42  ;;  %3440 = vmatprep.subr.bf16.mxu0 %v8454_v24  ;;  %v9792_v52 = vpop.f32.mrf.mxu1  ;;  %v8455_v24 = vld [vmem:[%s14424_s3 + $0x30] ss:$8 sps:$4 sm:$0xff]  }
 0x237   : > { %v9766_v19 = vpop.permute.xlu1 %1318  ;;  %1310 = vrot.lane.b32.xlu0 %v9678_v39, %s8836_s15  ;;  %14823 = vst [vmem:[#allocation102_spill] sm:$0xff] %v9792_v52  ;;  %v9794_v39 = vpop.f32.mrf.mxu0 }
 0x238   : > { %14824 = vst [vmem:[#allocation103_spill] sm:$0xff] %v9794_v39 }
 0x239   : > { %v9770_v54 = vpop.permute.xlu0 %1330  ;;  %1298 = vrot.lane.b32.xlu1 %v9672_v50, %s8836_s15  ;;  %3441 = vmatpush1.bf16.msra.mxu0 %v8452_v5  ;;  %v9810_v5 = vpop.f32.mrf.mxu1 }
 0x23a   : > { %14819 = vst [vmem:[#allocation98_spill] sm:$0xff] %v9770_v54  ;;  %v8457_v54 = vld [vmem:[%s14424_s3 + $0x34] ss:$8 sps:$4 sm:$0xff]   ;;  %14827 = vst [vmem:[#allocation106_spill] sm:$0xff] %v9810_v5 }
 0x23b   : > { %v9781_v25 = vpop.permute.xlu1 %1322  ;;  %1324 = vrot.lane.b32.xlu0 %v9702_v1, %s8836_s15  ;;  %3442 = vmatprep.subr.bf16.mxu0 %v8457_v54  ;;  %v8458_v54 = vld [vmem:[%s14424_s3 + $0x20] ss:$8 sps:$4 sm:$0xff]  }
 0x23d   : > { %v9788_v50 = vpop.permute.xlu0 %1332  ;;  %1426 = vrot.lane.b32.xlu1 %v9756_v31, %s8836_s15  ;;  %3443 = vmatpush1.bf16.msra.mxu0 %v8455_v24 }
 0x23e   : > { %14822 = vst [vmem:[#allocation101_spill] sm:$0xff] %v9788_v50  ;;  %v9812_v50 = vpop.f32.mrf.mxu0 }
 0x23f   : > { %v9799_v1 = vpop.permute.xlu1 %1334  ;;  %1440 = vrot.lane.b32.xlu0 %v9792_v52, %s8836_s15  ;;  %14828 = vst [vmem:[#allocation107_spill] sm:$0xff] %v9812_v50 }
 0x240   : > { %14825 = vst [vmem:[#allocation104_spill] sm:$0xff] %v9799_v1  ;;  %v8460_v1 = vld [vmem:[%s14424_s3 + $0x24] ss:$8 sps:$4 sm:$0xff]   ;;  %v9828_v24 = vpop.f32.mrf.mxu0 }
 0x241   : > { %v9806_v31 = vpop.permute.xlu0 %1336  ;;  %1312 = vrot.lane.b32.xlu1 %v9690_v30, %s8836_s15  ;;  %3444 = vmatprep.subr.bf16.mxu0 %v8460_v1  ;;  %14830 = vst [vmem:[#allocation109_spill] sm:$0xff] %v9828_v24  ;;  %v8461_v1 = vld [vmem:[%s14424_s3 + $0x10] ss:$8 sps:$4 sm:$0xff]  }
 0x242   : > { %14826 = vst [vmem:[#allocation105_spill] sm:$0xff] %v9806_v31  ;;  %3445 = vmatpush1.bf16.msra.mxu0 %v8458_v54  ;;  %v9844_v54 = vpop.f32.mrf.mxu0 }
 0x243   : > { %v9817_v52 = vpop.permute.xlu1 %1344  ;;  %1412 = vrot.lane.b32.xlu0 %v9810_v5, %s8836_s15  ;;  %14833 = vst [vmem:[#allocation112_spill] sm:$0xff] %v9844_v54 }
 0x244   : > { %14829 = vst [vmem:[#allocation108_spill] sm:$0xff] %v9817_v52  ;;  %v8463_v52 = vld [vmem:[%s14424_s3 + $0x14] ss:$8 sps:$4 sm:$0xff]  }
 0x245   : > { %v9824_v30 = vpop.permute.xlu0 %1348  ;;  %1398 = vrot.lane.b32.xlu1 %v9774_v21, %s8836_s15  ;;  %3446 = vmatprep.subr.bf16.mxu0 %v8463_v52  ;;  %v8466_v21 = vld [vmem:[%s14424_s3 + $0x4] ss:$8 sps:$4 sm:$0xff]   ;;  %v8464_v52 = vld [vmem:[%s14424_s3] ss:$8 sps:$4 sm:$0xff]  }
 0x246   : > { %3447 = vmatpush1.bf16.msra.mxu0 %v8461_v1  ;;  %v9860_v1 = vpop.f32.mrf.mxu0 }
 0x247   : > { %v9833_v31 = vpop.permute.xlu1 %1346  ;;  %1338 = vrot.lane.b32.xlu0 %v9722_v27, %s8836_s15  ;;  %3448 = vmatprep.subr.bf16.mxu0 %v8466_v21  ;;  %14835 = vst [vmem:[#allocation114_spill] sm:$0xff] %v9860_v1  ;;  %v8467_v21 = vld [vmem:[%s14424_s3 + $0xf0] ss:$8 sps:$4 sm:$0xff]  }
 0x248   : > { %14831 = vst [vmem:[#allocation110_spill] sm:$0xff] %v9833_v31 }
 0x249   : > { %v9840_v5 = vpop.permute.xlu0 %1358  ;;  %1326 = vrot.lane.b32.xlu1 %v9714_v46, %s8836_s15  ;;  %v8469_v46 = vld [vmem:[%s14424_s3 + $0xf4] ss:$8 sps:$4 sm:$0xff]  }
 0x24a   : > { %14832 = vst [vmem:[#allocation111_spill] sm:$0xff] %v9840_v5  ;;  %3449 = vmatpush1.bf16.msra.mxu0 %v8464_v52  ;;  %v9876_v52 = vpop.f32.mrf.mxu0 }
 0x24b   : > { %v9849_v31 = vpop.permute.xlu1 %1350  ;;  %1352 = vrot.lane.b32.xlu0 %v9758_v17, %s8836_s15  ;;  %3450 = vmatprep.subr.bf16.mxu0 %v8469_v46  ;;  %14836 = vst [vmem:[#allocation115_spill] sm:$0xff] %v9876_v52  ;;  %v8470_v46 = vld [vmem:[%s14424_s3 + $0xe0] ss:$8 sps:$4 sm:$0xff]  }
 0x24d   : > { %v9856_v27 = vpop.permute.xlu0 %1360  ;;  %1340 = vrot.lane.b32.xlu1 %v9740_v40, %s8836_s15  ;;  %v8472_v40 = vld [vmem:[%s14424_s3 + $0xe4] ss:$8 sps:$4 sm:$0xff]  }
 0x24e   : > { %14834 = vst [vmem:[#allocation113_spill] sm:$0xff] %v9856_v27  ;;  %3451 = vmatpush2.bf16.msra.mxu0 %v8467_v21  ;;  %v8473_v21 = vld [vmem:[%s14424_s3 + $0xd0] ss:$8 sps:$4 sm:$0xff]  }
 0x24f   : > { %v9865_v5 = vpop.permute.xlu1 %1362  ;;  %1366 = vrot.lane.b32.xlu0 %v9794_v39, %s8836_s15  ;;  %3452 = vmatprep.subr.bf16.mxu0 %v8472_v40 }
 0x251   : > { %v9872_v17 = vpop.permute.xlu0 %1364  ;;  %1354 = vrot.lane.b32.xlu1 %v9776_v42, %s8836_s15  ;;  %v8475_v42 = vld [vmem:[%s14424_s3 + $0xd4] ss:$8 sps:$4 sm:$0xff]  }
 0x252   : > { %3453 = vmatpush2.bf16.msra.mxu0 %v8470_v46 }
 0x253   : > { %v9881_v27 = vpop.permute.xlu1 %1372  ;;  %1380 = vrot.lane.b32.xlu0 %v9828_v24, %s8836_s15  ;;  %v9898_v24 = vpop.f32.mrf.mxu0  ;;  %3454 = vmatprep.subr.bf16.mxu0 %v8475_v42  ;;  %v8476_v42 = vld [vmem:[%s14424_s3 + $0xc0] ss:$8 sps:$4 sm:$0xff]  }
 0x254   : > { %14837 = vst [vmem:[#allocation116_spill] sm:$0xff] %v9881_v27  ;;  %14839 = vst [vmem:[#allocation118_spill] sm:$0xff] %v9898_v24 }
 0x255   : > { %v9888_v39 = vpop.permute.xlu0 %1376  ;;  %1368 = vrot.lane.b32.xlu1 %v9812_v50, %s8836_s15  ;;  %v9908_v46 = vpop.f32.mrf.mxu0  ;;  %v8478_v50 = vld [vmem:[%s14424_s3 + $0xc4] ss:$8 sps:$4 sm:$0xff]  }
 0x256   : > { %14838 = vst [vmem:[#allocation117_spill] sm:$0xff] %v9888_v39  ;;  %3455 = vmatpush2.bf16.msra.mxu0 %v8473_v21  ;;  %14841 = vst [vmem:[#allocation120_spill] sm:$0xff] %v9908_v46  ;;  %v1444_v21 = vsel %vm312_vm8, %v9574_v58, %v9580_v48 }
 0x257   : > { %v9900_v27 = vpop.permute.xlu1 %1374  ;;  %1394 = vrot.lane.b32.xlu0 %v9860_v1, %s8836_s15  ;;  %v9920_v1 = vpop.f32.mrf.mxu0  ;;  %3456 = vmatprep.subr.bf16.mxu0 %v8478_v50  ;;  %v8479_v50 = vld [vmem:[%s14424_s3 + $0xb0] ss:$8 sps:$4 sm:$0xff]  }
 0x258   : > { %14842 = vst [vmem:[#allocation121_spill] sm:$0xff] %v9920_v1 }
 0x259   : > { %v9904_v40 = vpop.permute.xlu0 %1386  ;;  %1382 = vrot.lane.b32.xlu1 %v9844_v54, %s8836_s15 }
 0x25a   : > { %14840 = vst [vmem:[#allocation119_spill] sm:$0xff] %v9904_v40  ;;  %3457 = vmatpush2.bf16.msra.mxu0 %v8476_v42  ;;  %v1443_v42 = vsel %vm312_vm8, %v9568_v43, %v9574_v58 }
 0x25b   : > { %v9913_v39 = vpop.permute.xlu1 %1378  ;;  %1408 = vrot.lane.b32.xlu0 %v9898_v24, %s8836_s15  ;;  %v8481_v24 = vld [vmem:[%s14424_s3 + $0xb4] ss:$8 sps:$4 sm:$0xff]   ;;  %v9958_v58 = vmax.f32 %v9294_v22, %v1443_v42  ;;  %v1450_v22 = vsel %vm312_vm8, %v9594_v15, %v9612_v12 }
 0x25c   : > { %3458 = vmatprep.subr.bf16.mxu0 %v8481_v24  ;;  %v1442_v24 = vsel %vm312_vm8, %v9552_v34, %v9568_v43  ;;  %v8485_v34 = vld [vmem:[%s14424_s3 + $0x90] ss:$8 sps:$4 sm:$0xff]  }
 0x25d   : > { %v9922_v54 = vpop.permute.xlu0 %1388  ;;  %1396 = vrot.lane.b32.xlu1 %v9876_v52, %s8836_s15  ;;  %v9943_v52 = vmax.f32 %v9298_v29, %v1444_v21  ;;  %v9980_v42 = vmax.f32 %v9290_v26, %v1442_v24  ;;  %v1448_v26 = vsel %vm312_vm8, %v9586_v18, %v9600_v7  ;;  %v8490_v24 = vld [vmem:[%s14424_s3 + $0x84] ss:$8 sps:$4 sm:$0xff]  }
 0x25e   : > { %14843 = vst [vmem:[#allocation122_spill] sm:$0xff] %v9922_v54  ;;  %3459 = vmatpush2.bf16.msra.mxu0 %v8479_v50  ;;  %v8484_v54 = vld [vmem:[%s14424_s3 + $0xa4] ss:$8 sps:$4 sm:$0xff]   ;;  %v10013_v18 = vmax.f32 %v9302_v57, %v1448_v26 }
 0x25f   : > { %v9932_v40 = vpop.permute.xlu1 %1390  ;;  %1422 = vrot.lane.b32.xlu0 %v9920_v1, %s8836_s15  ;;  %14845 = vst [vmem:[#allocation124_spill] sm:$0xff] %v9943_v52  ;;  %v8482_v1 = vld [vmem:[%s14424_s3 + $0xa0] ss:$8 sps:$4 sm:$0xff]   ;;  %3460 = vmatprep.subr.bf16.mxu0 %v8484_v54  ;;  %v8487_v54 = vld [vmem:[%s14424_s3 + $0x94] ss:$8 sps:$4 sm:$0xff]  }
 0x260   : > { %14844 = vst [vmem:[#allocation123_spill] sm:$0xff] %v9932_v40  ;;  %v9955_v40 = vpop.f32.mrf.mxu0 }
 0x261   : > { %v9945_v48 = vpop.permute.xlu0 %1392  ;;  %1410 = vrot.lane.b32.xlu1 %v9908_v46, %s8836_s15  ;;  %14846 = vst [vmem:[#allocation125_spill] sm:$0xff] %v9955_v40 }
 0x262   : > { %3461 = vmatpush2.bf16.msra.mxu0 %v8482_v1  ;;  %v9974_v50 = vpop.f32.mrf.mxu0  ;;  %v9990_v1 = vmax.f32 %v9312_v62, %v1450_v22  ;;  %v8488_v62 = vld [vmem:[%s14424_s3 + $0x80] ss:$8 sps:$4 sm:$0xff]   ;;  %v1449_v22 = vsel %vm312_vm8, %v9600_v7, %v9594_v15  ;;  %v1462_v15 = vsel %vm312_vm8, %v9642_v53, %v9662_v55 }
 0x263   : > { %v9960_v29 = vpop.permute.xlu1 %1400  ;;  %1878 = vrot.lane.b32.xlu0 %v9943_v52, %s8833_s13  ;;  %14847 = vst [vmem:[#allocation126_spill] sm:$0xff] %v9974_v50  ;;  %3462 = vmatprep.subr.bf16.mxu0 %v8487_v54 }
 0x264   : > { %14848 = vst [vmem:[#allocation127_spill] sm:$0xff] %v9990_v1 }
 0x265   : > { %v9967_v21 = vpop.permute.xlu0 %1404  ;;  %1876 = vrot.lane.b32.xlu1 %v9958_v58, %s8833_s13 }
 0x266   : > { %3463 = vmatpush2.bf16.msra.mxu0 %v8485_v34  ;;  %v1456_v34 = vsel %vm312_vm8, %v9624_v51, %v9630_v0 }
 0x267   : > { %v9982_v43 = vpop.permute.xlu1 %1402  ;;  %1436 = vrot.lane.b32.xlu0 %v9974_v50, %s8836_s15  ;;  %3464 = vmatprep.subr.bf16.mxu0 %v8490_v24  ;;  %v10030_v57 = vmax.f32 %v9328_v4, %v1456_v34  ;;  %v10046_v4 = vpop.f32.mrf.mxu0  ;;  %v10049_v24 = vmax.f32 %v9344_v36, %v1462_v15  ;;  %v1454_v36 = vsel %vm312_vm8, %v9606_v60, %v9618_v56 }
 0x268   : > { %14850 = vst [vmem:[#allocation129_spill] sm:$0xff] %v10046_v4  ;;  %v1461_v60 = vsel %vm312_vm8, %v9650_v38, %v9642_v53 }
 0x269   : > { %v9992_v52 = vpop.permute.xlu0 %1414  ;;  %1874 = vrot.lane.b32.xlu1 %v9980_v42, %s8833_s13  ;;  %14849 = vst [vmem:[#allocation128_spill] sm:$0xff] %v10030_v57  ;;  %14851 = vst [vmem:[#allocation130_spill] sm:$0xff] %v10049_v24 }
 0x26a   : > { %3465 = vmatpush2.bf16.msra.mxu0 %v8488_v62 }
 0x26b   : > { %v10002_v46 = vpop.permute.xlu1 %1406  ;;  %1892 = vrot.lane.b32.xlu0 %v9990_v1, %s8833_s13  ;;  %v10023_v1 = vmax.f32 %v9310_v61, %v1449_v22  ;;  %v1455_v61 = vsel %vm312_vm8, %v9618_v56, %v9624_v51  ;;  %v1460_v22 = vsel %vm312_vm8, %v9638_v47, %v9650_v38  ;;  %v10079_v47 = vmax.f32 %v9316_v63, %v1454_v36 }
 0x26c   : > { %v10059_v34 = vmax.f32 %v9324_v3, %v1455_v61  ;;  %v10069_v51 = vmax.f32 %v9332_v20, %v1460_v22  ;;  %v1468_v3 = vsel %vm312_vm8, %v9674_v41, %v9680_v45  ;;  %v1474_v63 = vsel %vm312_vm8, %v9692_v16, %v9710_v33 }
 0x26d   : > { %v10015_v54 = vpop.permute.xlu0 %1416  ;;  %1424 = vrot.lane.b32.xlu1 %v9955_v40, %s8836_s15  ;;  %v10089_v20 = vmax.f32 %v9360_v37, %v1468_v3  ;;  %v10099_v22 = vmax.f32 %v9340_v9, %v1461_v60  ;;  %v1467_v37 = vsel %vm312_vm8, %v9666_v2, %v9674_v41  ;;  %v10109_v53 = vmax.f32 %v9378_v23, %v1474_v63 }
 0x26e   : > { %v1472_v9 = vsel %vm312_vm8, %v9686_v44, %v9698_v59  ;;  %v10119_v3 = vmax.f32 %v9352_v14, %v1467_v37  ;;  %v1466_v23 = vsel %vm312_vm8, %v9654_v11, %v9666_v2  ;;  %v1480_v14 = vsel %vm312_vm8, %v9727_v49, %v9734_v32 }
 0x26f   : > { %v10025_v50 = vpop.permute.xlu1 %1418  ;;  %1888 = vrot.lane.b32.xlu0 %v10013_v18, %s8833_s13  ;;  %14852 = vst [vmem:[#allocation131_spill] sm:$0xff] %v10089_v20  ;;  %14854 = vst [vmem:[#allocation133_spill] sm:$0xff] %v10109_v53  ;;  %v10129_v41 = vmax.f32 %v9362_v6, %v1472_v9  ;;  %v10139_v44 = vmax.f32 %v9346_v13, %v1466_v23  ;;  %v1473_v6 = vsel %vm312_vm8, %v9698_v59, %v9692_v16  ;;  %v14859_v59 = vld [vmem:[#allocation14_spill] sm:$0xff] }
 0x270   : > { %v10149_v11 = vmax.f32 %v9394_v28, %v1480_v14  ;;  %v1486_v13 = vsel %vm312_vm8, %v9752_v8, %v9781_v25  ;;  %v10159_v9 = vmax.f32 %v9370_v10, %v1473_v6  ;;  %v1479_v28 = vsel %vm312_vm8, %v9716_v35, %v9727_v49  ;;  %v8491_v10 = vld [vmem:[%s14424_s3 + $0x170] ss:$8 sps:$4 sm:$0xff]   ;;  %v8493_v6 = vld [vmem:[%s14424_s3 + $0x174] ss:$8 sps:$4 sm:$0xff]  }
 0x271   : > { %v10032_v7 = vpop.permute.xlu0 %1420  ;;  %1890 = vrot.lane.b32.xlu1 %v10023_v1, %s8833_s13  ;;  %v10169_v16 = vmax.f32 %v14859_v59, %v1486_v13  ;;  %3547 = vmatprep.subr.bf16.mxu1 %v8493_v6  ;;  %v14870_v6 = vld [vmem:[#allocation104_spill] sm:$0xff] }
 0x272   : > { %14858 = vst [vmem:[#allocation137_spill] sm:$0xff] %v10149_v11  ;;  %3548 = vmatpush1.bf16.msra.mxu1 %v8491_v10 }
 0x273   : > { %v10039_v26 = vpop.permute.xlu1 %1428  ;;  %1906 = vrot.lane.b32.xlu0 %v10030_v57, %s8833_s13  ;;  %14860 = vst [vmem:[#allocation14_spill] sm:$0xff] %v10169_v16 }
 0x275   : > { %v10051_v62 = vpop.permute.xlu0 %1432  ;;  %1438 = vrot.lane.b32.xlu1 %v10046_v4, %s8836_s15  ;;  %v14866_v4 = vld [vmem:[#allocation10_spill] sm:$0xff] }
 0x277   : > { %v10061_v57 = vpop.permute.xlu1 %1430  ;;  %1920 = vrot.lane.b32.xlu0 %v10049_v24, %s8833_s13 }
 0x279   : > { %v10071_v15 = vpop.permute.xlu0 %1226  ;;  %1904 = vrot.lane.b32.xlu1 %v10059_v34, %s8833_s13 }
 0x27b   : > { %v10081_v61 = vpop.permute.xlu1 %1434  ;;  %1916 = vrot.lane.b32.xlu0 %v10069_v51, %s8833_s13 }
 0x27d   : > { %v10091_v56 = vpop.permute.xlu0 %1240  ;;  %1902 = vrot.lane.b32.xlu1 %v10079_v47, %s8833_s13 }
 0x27f   : > { %v10101_v36 = vpop.permute.xlu1 %1258  ;;  %1934 = vrot.lane.b32.xlu0 %v10089_v20, %s8833_s13  ;;  %v14865_v20 = vld [vmem:[#allocation88_spill] sm:$0xff] }
 0x280   : > { %14853 = vst [vmem:[#allocation132_spill] sm:$0xff] %v10101_v36  ;;  %v1478_v24 = vsel %vm312_vm8, %v14865_v20, %v9716_v35  ;;  %v14871_v20 = vld [vmem:[#allocation7_spill] sm:$0xff] }
 0x281   : > { %v10111_v38 = vpop.permute.xlu0 %1272  ;;  %1918 = vrot.lane.b32.xlu1 %v10099_v22, %s8833_s13 }
 0x282   : > { %14855 = vst [vmem:[#allocation134_spill] sm:$0xff] %v10111_v38 }
 0x283   : > { %v10121_v60 = vpop.permute.xlu1 %1228  ;;  %1948 = vrot.lane.b32.xlu0 %v10109_v53, %s8833_s13  ;;  %v14862_v53 = vld [vmem:[#allocation8_spill] sm:$0xff] }
 0x284   : > { %v10185_v13 = vmax.f32 %v14862_v53, %v1479_v28  ;;  %v8494_v53 = vld [vmem:[%s14424_s3 + $0x160] ss:$8 sps:$4 sm:$0xff]   ;;  %v14869_v28 = vld [vmem:[#allocation105_spill] sm:$0xff] }
 0x285   : > { %v10131_v63 = vpop.permute.xlu0 %1244  ;;  %1932 = vrot.lane.b32.xlu1 %v10119_v3, %s8833_s13  ;;  %v1492_v35 = vsel %vm312_vm8, %v14870_v6, %v14869_v28 }
 0x286   : > { %14856 = vst [vmem:[#allocation135_spill] sm:$0xff] %v10131_v63 }
 0x287   : > { %v10141_v37 = vpop.permute.xlu1 %1230  ;;  %1944 = vrot.lane.b32.xlu0 %v10129_v41, %s8833_s13 }
 0x288   : > { %14857 = vst [vmem:[#allocation136_spill] sm:$0xff] %v10141_v37 }
 0x289   : > { %v10151_v2 = vpop.permute.xlu0 %1254  ;;  %1930 = vrot.lane.b32.xlu1 %v10139_v44, %s8833_s13 }
 0x28b   : > { %v10161_v23 = vpop.permute.xlu1 %1242  ;;  %1962 = vrot.lane.b32.xlu0 %v10149_v11, %s8833_s13  ;;  %v14861_v11 = vld [vmem:[#allocation95_spill] sm:$0xff] }
 0x28c   : > { %v1484_v49 = vsel %vm312_vm8, %v14861_v11, %v9766_v19  ;;  %14863 = vst [vmem:[#allocation95_spill] sm:$0xff] %v10185_v13  ;;  %v8496_v11 = vld [vmem:[%s14424_s3 + $0x164] ss:$8 sps:$4 sm:$0xff]  }
 0x28d   : > { %v10171_v14 = vpop.permute.xlu0 %1268  ;;  %1946 = vrot.lane.b32.xlu1 %v10159_v9, %s8833_s13  ;;  %v10195_v40 = vmax.f32 %v14866_v4, %v1484_v49  ;;  %v10211_v4 = vmax.f32 %v14871_v20, %v1478_v24  ;;  %3549 = vmatprep.subr.bf16.mxu1 %v8496_v11  ;;  %v1485_v49 = vsel %vm312_vm8, %v9766_v19, %v9752_v8  ;;  %v8499_v11 = vld [vmem:[%s14424_s3 + $0x154] ss:$8 sps:$4 sm:$0xff]   ;;  %v14876_v20 = vld [vmem:[#allocation11_spill] sm:$0xff]  ;;  %v8497_v8 = vld [vmem:[%s14424_s3 + $0x150] ss:$8 sps:$4 sm:$0xff]  }
 0x28e   : > { %3550 = vmatpush1.bf16.msra.mxu1 %v8494_v53  ;;  %v1498_v24 = vsel %vm312_vm8, %v9824_v30, %v9849_v31 }
 0x28f   : > { %v10187_v59 = vpop.permute.xlu1 %1314  ;;  %1976 = vrot.lane.b32.xlu0 %v10169_v16, %s8833_s13  ;;  %14867 = vst [vmem:[#allocation88_spill] sm:$0xff] %v10195_v40  ;;  %14872 = vst [vmem:[#allocation105_spill] sm:$0xff] %v10211_v4  ;;  %v14873_v16 = vld [vmem:[#allocation19_spill] sm:$0xff]  ;;  %3551 = vmatprep.subr.bf16.mxu1 %v8499_v11 }
 0x290   : > { %14864 = vst [vmem:[#allocation8_spill] sm:$0xff] %v10187_v59 }
 0x291   : > { %v10197_v38 = vpop.permute.xlu0 %1328  ;;  %1960 = vrot.lane.b32.xlu1 %v10185_v13, %s8833_s13 }
 0x292   : > { %14868 = vst [vmem:[#allocation10_spill] sm:$0xff] %v10197_v38  ;;  %v10221_v38 = vmax.f32 %v14873_v16, %v1492_v35  ;;  %v14879_v16 = vld [vmem:[#allocation101_spill] sm:$0xff]  ;;  %v14880_v35 = vld [vmem:[#allocation26_spill] sm:$0xff]  ;;  %3552 = vmatpush1.bf16.msra.mxu1 %v8497_v8 }
 0x293   : > { %v10213_v10 = vpop.permute.xlu1 %1256  ;;  %1972 = vrot.lane.b32.xlu0 %v10195_v40, %s8833_s13  ;;  %v10234_v40 = vmax.f32 %v14876_v20, %v1485_v49  ;;  %v1491_v53 = vsel %vm312_vm8, %v14879_v16, %v14870_v6  ;;  %v8500_v49 = vld [vmem:[%s14424_s3 + $0x140] ss:$8 sps:$4 sm:$0xff]   ;;  %v8502_v20 = vld [vmem:[%s14424_s3 + $0x144] ss:$8 sps:$4 sm:$0xff]   ;;  %v14883_v6 = vld [vmem:[#allocation108_spill] sm:$0xff] }
 0x294   : > { %14874 = vst [vmem:[#allocation104_spill] sm:$0xff] %v10221_v38  ;;  %3553 = vmatprep.subr.bf16.mxu1 %v8502_v20  ;;  %v14886_v8 = vld [vmem:[#allocation98_spill] sm:$0xff]  ;;  %v8505_v20 = vld [vmem:[%s14424_s3 + $0x134] ss:$8 sps:$4 sm:$0xff]  }
 0x295   : > { %v10223_v59 = vpop.permute.xlu0 %1300  ;;  %1958 = vrot.lane.b32.xlu1 %v10211_v4, %s8833_s13  ;;  %14877 = vst [vmem:[#allocation19_spill] sm:$0xff] %v10234_v40  ;;  %v14887_v4 = vld [vmem:[#allocation16_spill] sm:$0xff] }
 0x296   : > { %14875 = vst [vmem:[#allocation7_spill] sm:$0xff] %v10223_v59  ;;  %v10247_v59 = vmax.f32 %v14880_v35, %v1498_v24  ;;  %v14884_v24 = vld [vmem:[#allocation15_spill] sm:$0xff]  ;;  %3554 = vmatpush1.bf16.msra.mxu1 %v8500_v49 }
 0x297   : > { %v10236_v19 = vpop.permute.xlu1 %1286  ;;  %1990 = vrot.lane.b32.xlu0 %v10221_v38, %s8833_s13  ;;  %v14882_v38 = vld [vmem:[#allocation110_spill] sm:$0xff]  ;;  %v10263_v35 = vmax.f32 %v14884_v24, %v1491_v53  ;;  %v8503_v53 = vld [vmem:[%s14424_s3 + $0x130] ss:$8 sps:$4 sm:$0xff]   ;;  %3555 = vmatprep.subr.bf16.mxu1 %v8505_v20 }
 0x298   : > { %14878 = vst [vmem:[#allocation11_spill] sm:$0xff] %v10236_v19  ;;  %14881 = vst [vmem:[#allocation101_spill] sm:$0xff] %v10247_v59  ;;  %v1496_v11 = vsel %vm312_vm8, %v14883_v6, %v14882_v38  ;;  %v1497_v49 = vsel %vm312_vm8, %v14882_v38, %v9824_v30  ;;  %v14892_v24 = vld [vmem:[#allocation33_spill] sm:$0xff]  ;;  %v8508_v20 = vld [vmem:[%s14424_s3 + $0x124] ss:$8 sps:$4 sm:$0xff]  }
 0x299   : > { %v10249_v36 = vpop.permute.xlu0 %1282  ;;  %1974 = vrot.lane.b32.xlu1 %v10234_v40, %s8833_s13  ;;  %14885 = vst [vmem:[#allocation26_spill] sm:$0xff] %v10263_v35  ;;  %v1490_v40 = vsel %vm312_vm8, %v14886_v8, %v14879_v16  ;;  %v10273_v63 = vmax.f32 %v14887_v4, %v1496_v11  ;;  %v1504_v16 = vsel %vm312_vm8, %v9865_v5, %v9872_v17  ;;  %v14889_v4 = vld [vmem:[#allocation13_spill] sm:$0xff]  ;;  %v8506_v38 = vld [vmem:[%s14424_s3 + $0x120] ss:$8 sps:$4 sm:$0xff]  }
 0x29a   : > { %v10289_v6 = vmax.f32 %v14889_v4, %v1490_v40  ;;  %v10299_v8 = vmax.f32 %v14892_v24, %v1504_v16  ;;  %3556 = vmatpush1.bf16.msra.mxu1 %v8503_v53  ;;  %v14895_v40 = vld [vmem:[#allocation117_spill] sm:$0xff]  ;;  %v14899_v24 = vld [vmem:[#allocation39_spill] sm:$0xff] }
 0x29b   : > { %v10265_v19 = vpop.permute.xlu1 %1270  ;;  %2004 = vrot.lane.b32.xlu0 %v10247_v59, %s8833_s13  ;;  %14888 = vst [vmem:[#allocation110_spill] sm:$0xff] %v10273_v63  ;;  %v1510_v4 = vsel %vm312_vm8, %v14895_v40, %v9913_v39  ;;  %v14898_v53 = vld [vmem:[#allocation113_spill] sm:$0xff]  ;;  %3557 = vmatprep.subr.bf16.mxu1 %v8508_v20 }
 0x29c   : > { %14890 = vst [vmem:[#allocation108_spill] sm:$0xff] %v10289_v6  ;;  %14893 = vst [vmem:[#allocation98_spill] sm:$0xff] %v10299_v8  ;;  %v1503_v16 = vsel %vm312_vm8, %v14898_v53, %v9865_v5  ;;  %v14902_v5 = vld [vmem:[#allocation116_spill] sm:$0xff] }
 0x29d   : > { %v10275_v13 = vpop.permute.xlu0 %1296  ;;  %1988 = vrot.lane.b32.xlu1 %v10263_v35, %s8833_s13  ;;  %v1508_v20 = vsel %vm312_vm8, %v14902_v5, %v9900_v27  ;;  %v14909_v5 = vld [vmem:[#allocation123_spill] sm:$0xff] }
 0x29e   : > { %3558 = vmatpush1.bf16.msra.mxu1 %v8506_v38  ;;  %v14906_v38 = vld [vmem:[#allocation111_spill] sm:$0xff] }
 0x29f   : > { %v10291_v11 = vpop.permute.xlu1 %1370  ;;  %2000 = vrot.lane.b32.xlu0 %v10273_v63, %s8833_s13 }
 0x2a0   : > { %14891 = vst [vmem:[#allocation15_spill] sm:$0xff] %v10291_v11  ;;  %v14896_v11 = vld [vmem:[#allocation20_spill] sm:$0xff] }
 0x2a1   : > { %v10301_v59 = vpop.permute.xlu0 %1384  ;;  %1986 = vrot.lane.b32.xlu1 %v10289_v6, %s8833_s13  ;;  %v10312_v63 = vmax.f32 %v14896_v11, %v1497_v49  ;;  %v8509_v11 = vld [vmem:[%s14424_s3 + $0x110] ss:$8 sps:$4 sm:$0xff]   ;;  %v8511_v49 = vld [vmem:[%s14424_s3 + $0x114] ss:$8 sps:$4 sm:$0xff]  }
 0x2a2   : > { %14894 = vst [vmem:[#allocation16_spill] sm:$0xff] %v10301_v59  ;;  %v10325_v59 = vmax.f32 %v14899_v24, %v1510_v4  ;;  %v14903_v4 = vld [vmem:[#allocation24_spill] sm:$0xff]  ;;  %3559 = vmatprep.subr.bf16.mxu1 %v8511_v49  ;;  %v8514_v49 = vld [vmem:[%s14424_s3 + $0x104] ss:$8 sps:$4 sm:$0xff]  }
 0x2a3   : > { %14897 = vst [vmem:[#allocation13_spill] sm:$0xff] %v10312_v63  ;;  %v10314_v30 = vpop.permute.xlu1 %1284  ;;  %2018 = vrot.lane.b32.xlu0 %v10299_v8, %s8833_s13  ;;  %v10341_v24 = vmax.f32 %v14903_v4, %v1503_v16  ;;  %3560 = vmatpush1.bf16.msra.mxu1 %v8509_v11  ;;  %v8512_v16 = vld [vmem:[%s14424_s3 + $0x100] ss:$8 sps:$4 sm:$0xff]   ;;  %v1509_v11 = vsel %vm312_vm8, %v9900_v27, %v14895_v40  ;;  %v8515_v40 = vld [vmem:[%s14424_s3 + $0x1f0] ss:$8 sps:$4 sm:$0xff]  }
 0x2a4   : > { %14900 = vst [vmem:[#allocation33_spill] sm:$0xff] %v10325_v59  ;;  %3561 = vmatprep.subr.bf16.mxu1 %v8514_v49  ;;  %v8517_v49 = vld [vmem:[%s14424_s3 + $0x1f4] ss:$8 sps:$4 sm:$0xff]  }
 0x2a5   : > { %v10327_v6 = vpop.permute.xlu0 %1356  ;;  %2002 = vrot.lane.b32.xlu1 %v10312_v63, %s8833_s13  ;;  %14904 = vst [vmem:[#allocation20_spill] sm:$0xff] %v10341_v24  ;;  %v14907_v63 = vld [vmem:[#allocation28_spill] sm:$0xff] }
 0x2a6   : > { %14901 = vst [vmem:[#allocation117_spill] sm:$0xff] %v10327_v6  ;;  %v1502_v6 = vsel %vm312_vm8, %v14906_v38, %v14898_v53  ;;  %v10351_v35 = vmax.f32 %v14907_v63, %v1508_v20  ;;  %v1516_v53 = vsel %vm312_vm8, %v14909_v5, %v9945_v48  ;;  %v14910_v63 = vld [vmem:[#allocation21_spill] sm:$0xff]  ;;  %v14912_v38 = vld [vmem:[#allocation47_spill] sm:$0xff] }
 0x2a7   : > { %v10343_v8 = vpop.permute.xlu1 %1342  ;;  %2032 = vrot.lane.b32.xlu0 %v10325_v59, %s8833_s13  ;;  %v10367_v20 = vmax.f32 %v14910_v63, %v1502_v6  ;;  %v10377_v59 = vmax.f32 %v14912_v38, %v1516_v53  ;;  %3562 = vmatpush1.bf16.msra.mxu1 %v8512_v16  ;;  %v1522_v6 = vsel %vm312_vm8, %v9967_v21, %v10002_v46  ;;  %v14914_v63 = vld [vmem:[#allocation31_spill] sm:$0xff]  ;;  %v14917_v16 = vld [vmem:[#allocation122_spill] sm:$0xff] }
 0x2a8   : > { %14905 = vst [vmem:[#allocation113_spill] sm:$0xff] %v10343_v8  ;;  %14908 = vst [vmem:[#allocation39_spill] sm:$0xff] %v10351_v35  ;;  %v1515_v53 = vsel %vm312_vm8, %v14917_v16, %v14909_v5  ;;  %3563 = vmatprep.subr.bf16.mxu1 %v8517_v49  ;;  %v14918_v38 = vld [vmem:[#allocation54_spill] sm:$0xff]  ;;  %v1520_v5 = vsel %vm312_vm8, %v9960_v29, %v9982_v43  ;;  %v8521_v29 = vld [vmem:[%s14424_s3 + $0x1d0] ss:$8 sps:$4 sm:$0xff]  }
 0x2a9   : > { %v10353_v37 = vpop.permute.xlu0 %1310  ;;  %2016 = vrot.lane.b32.xlu1 %v10341_v24, %s8833_s13  ;;  %14911 = vst [vmem:[#allocation116_spill] sm:$0xff] %v10367_v20  ;;  %14913 = vst [vmem:[#allocation24_spill] sm:$0xff] %v10377_v59 }
 0x2ab   : > { %v10369_v4 = vpop.permute.xlu1 %1298  ;;  %2028 = vrot.lane.b32.xlu0 %v10351_v35, %s8833_s13  ;;  %v10390_v35 = vmax.f32 %v14914_v63, %v1509_v11  ;;  %3564 = vmatpush2.bf16.msra.mxu1 %v8515_v40  ;;  %v8518_v11 = vld [vmem:[%s14424_s3 + $0x1e0] ss:$8 sps:$4 sm:$0xff]   ;;  %v8520_v63 = vld [vmem:[%s14424_s3 + $0x1e4] ss:$8 sps:$4 sm:$0xff]  }
 0x2ac   : > { %3565 = vmatprep.subr.bf16.mxu1 %v8520_v63  ;;  %v14922_v40 = vld [vmem:[#allocation119_spill] sm:$0xff] }
 0x2ad   : > { %v10379_v8 = vpop.permute.xlu0 %1324  ;;  %2014 = vrot.lane.b32.xlu1 %v10367_v20, %s8833_s13  ;;  %14915 = vst [vmem:[#allocation111_spill] sm:$0xff] %v10390_v35  ;;  %v10403_v20 = vmax.f32 %v14918_v38, %v1522_v6  ;;  %v14921_v6 = vld [vmem:[#allocation37_spill] sm:$0xff] }
 0x2ae   : > { %v10419_v49 = vmax.f32 %v14921_v6, %v1515_v53  ;;  %v8523_v53 = vld [vmem:[%s14424_s3 + $0x1d4] ss:$8 sps:$4 sm:$0xff]   ;;  %v14928_v6 = vld [vmem:[#allocation59_spill] sm:$0xff] }
 0x2af   : > { %v10392_v27 = vpop.permute.xlu1 %1426  ;;  %2046 = vrot.lane.b32.xlu0 %v10377_v59, %s8833_s13  ;;  %14919 = vst [vmem:[#allocation123_spill] sm:$0xff] %v10403_v20  ;;  %v1514_v59 = vsel %vm312_vm8, %v14922_v40, %v14917_v16  ;;  %3566 = vmatpush2.bf16.msra.mxu1 %v8518_v11  ;;  %v1528_v16 = vsel %vm312_vm8, %v10025_v50, %v10032_v7 }
 0x2b0   : > { %14916 = vst [vmem:[#allocation28_spill] sm:$0xff] %v10392_v27  ;;  %3567 = vmatprep.subr.bf16.mxu1 %v8523_v53  ;;  %v1521_v11 = vsel %vm312_vm8, %v9982_v43, %v9967_v21  ;;  %v10455_v40 = vmax.f32 %v14928_v6, %v1528_v16  ;;  %v8526_v53 = vld [vmem:[%s14424_s3 + $0x1c4] ss:$8 sps:$4 sm:$0xff]   ;;  %v8524_v43 = vld [vmem:[%s14424_s3 + $0x1c0] ss:$8 sps:$4 sm:$0xff]   ;;  %v14932_v16 = vld [vmem:[#allocation64_spill] sm:$0xff] }
 0x2b1   : > { %v10405_v24 = vpop.permute.xlu0 %1440  ;;  %2030 = vrot.lane.b32.xlu1 %v10390_v35, %s8833_s13 }
 0x2b2   : > { %14920 = vst [vmem:[#allocation21_spill] sm:$0xff] %v10405_v24  ;;  %v14923_v24 = vld [vmem:[#allocation40_spill] sm:$0xff]  ;;  %14929 = vst [vmem:[#allocation54_spill] sm:$0xff] %v10455_v40 }
 0x2b3   : > { %v10421_v38 = vpop.permute.xlu1 %1312  ;;  %2060 = vrot.lane.b32.xlu0 %v10403_v20, %s8833_s13  ;;  %v10429_v27 = vmax.f32 %v14923_v24, %v1520_v5  ;;  %v14926_v24 = vld [vmem:[#allocation34_spill] sm:$0xff]  ;;  %3568 = vmatpush2.bf16.msra.mxu1 %v8521_v29  ;;  %v1527_v29 = vsel %vm312_vm8, %v10015_v54, %v10025_v50  ;;  %v1532_v50 = vsel %vm312_vm8, %v10039_v26, %v10061_v57 }
 0x2b4   : > { %v10445_v63 = vmax.f32 %v14926_v24, %v1514_v59  ;;  %v1534_v59 = vsel %vm312_vm8, %v10051_v62, %v10081_v61  ;;  %v14930_v24 = vld [vmem:[#allocation43_spill] sm:$0xff]  ;;  %3569 = vmatprep.subr.bf16.mxu1 %v8526_v53  ;;  %v1446_v26 = vsel %vm312_vm8, %v10071_v15, %v10121_v60 }
 0x2b5   : > { %14924 = vst [vmem:[#allocation47_spill] sm:$0xff] %v10429_v27  ;;  %v10431_v35 = vpop.permute.xlu0 %1412  ;;  %2044 = vrot.lane.b32.xlu1 %v10419_v49, %s8833_s13  ;;  %v10481_v6 = vmax.f32 %v14932_v16, %v1534_v59  ;;  %v14934_v59 = vld [vmem:[#allocation49_spill] sm:$0xff] }
 0x2b6   : > { %14925 = vst [vmem:[#allocation31_spill] sm:$0xff] %v10431_v35  ;;  %v10468_v35 = vmax.f32 %v14930_v24, %v1521_v11  ;;  %v8527_v11 = vld [vmem:[%s14424_s3 + $0x1b0] ss:$8 sps:$4 sm:$0xff]   ;;  %v8529_v24 = vld [vmem:[%s14424_s3 + $0x1b4] ss:$8 sps:$4 sm:$0xff]   ;;  %v10497_v53 = vmax.f32 %v14934_v59, %v1527_v29 }
 0x2b7   : > { %v10447_v5 = vpop.permute.xlu1 %1398  ;;  %2056 = vrot.lane.b32.xlu0 %v10429_v27, %s8833_s13  ;;  %14933 = vst [vmem:[#allocation119_spill] sm:$0xff] %v10481_v6  ;;  %3570 = vmatpush2.bf16.msra.mxu1 %v8524_v43  ;;  %v1526_v43 = vsel %vm312_vm8, %v9992_v52, %v10015_v54  ;;  %v8532_v29 = vld [vmem:[%s14424_s3 + $0x1a4] ss:$8 sps:$4 sm:$0xff]   ;;  %v8530_v54 = vld [vmem:[%s14424_s3 + $0x1a0] ss:$8 sps:$4 sm:$0xff]  }
 0x2b8   : > { %14927 = vst [vmem:[#allocation122_spill] sm:$0xff] %v10447_v5  ;;  %14931 = vst [vmem:[#allocation37_spill] sm:$0xff] %v10468_v35  ;;  %3571 = vmatprep.subr.bf16.mxu1 %v8529_v24  ;;  %v14938_v24 = vld [vmem:[#allocation45_spill] sm:$0xff] }
 0x2b9   : > { %v10457_v20 = vpop.permute.xlu0 %1338  ;;  %2042 = vrot.lane.b32.xlu1 %v10445_v63, %s8833_s13  ;;  %14935 = vst [vmem:[#allocation40_spill] sm:$0xff] %v10497_v53  ;;  %v10520_v59 = vmax.f32 %v14938_v24, %v1526_v43  ;;  %v1452_v43 = vsel %vm312_vm8, %v10091_v56, %v10161_v23  ;;  %v8535_v24 = vld [vmem:[%s14424_s3 + $0x194] ss:$8 sps:$4 sm:$0xff]  }
 0x2bb   : > { %v10470_v21 = vpop.permute.xlu1 %1326  ;;  %2074 = vrot.lane.b32.xlu0 %v10455_v40, %s8833_s13  ;;  %v14936_v40 = vld [vmem:[#allocation52_spill] sm:$0xff]  ;;  %3572 = vmatpush2.bf16.msra.mxu1 %v8527_v11  ;;  %14939 = vst [vmem:[#allocation59_spill] sm:$0xff] %v10520_v59  ;;  %v14940_v11 = vld [vmem:[#allocation58_spill] sm:$0xff] }
 0x2bc   : > { %3573 = vmatprep.subr.bf16.mxu1 %v8532_v29  ;;  %v14944_v29 = vld [vmem:[#allocation65_spill] sm:$0xff] }
 0x2bd   : > { %v10483_v5 = vpop.permute.xlu0 %1352  ;;  %2058 = vrot.lane.b32.xlu1 %v10468_v35, %s8833_s13  ;;  %v10507_v35 = vmax.f32 %v14936_v40, %v1532_v50  ;;  %v1533_v40 = vsel %vm312_vm8, %v10061_v57, %v10051_v62  ;;  %v10533_v50 = vmax.f32 %v14940_v11, %v1446_v26  ;;  %v8533_v26 = vld [vmem:[%s14424_s3 + $0x190] ss:$8 sps:$4 sm:$0xff]   ;;  %v14945_v11 = vld [vmem:[#allocation63_spill] sm:$0xff] }
 0x2bf   : > { %v10499_v16 = vpop.permute.xlu1 %1340  ;;  %2088 = vrot.lane.b32.xlu0 %v10481_v6, %s8833_s13  ;;  %14937 = vst [vmem:[#allocation34_spill] sm:$0xff] %v10507_v35  ;;  %14941 = vst [vmem:[#allocation43_spill] sm:$0xff] %v10533_v50  ;;  %3574 = vmatpush2.bf16.msra.mxu1 %v8530_v54  ;;  %v1445_v54 = vsel %vm312_vm8, %v14944_v29, %v10071_v15  ;;  %v14949_v29 = vld [vmem:[#allocation68_spill] sm:$0xff] }
 0x2c0   : > { %3575 = vmatprep.subr.bf16.mxu1 %v8535_v24 }
 0x2c1   : > { %v10509_v27 = vpop.permute.xlu0 %1366  ;;  %2072 = vrot.lane.b32.xlu1 %v10497_v53, %s8833_s13 }
 0x2c3   : > { %v10522_v52 = vpop.permute.xlu1 %1354  ;;  %2084 = vrot.lane.b32.xlu0 %v10507_v35, %s8833_s13  ;;  %v14942_v35 = vld [vmem:[#allocation55_spill] sm:$0xff]  ;;  %3576 = vmatpush2.bf16.msra.mxu1 %v8533_v26  ;;  %v1451_v26 = vsel %vm312_vm8, %v9612_v12, %v10091_v56 }
 0x2c4   : > { %v10546_v57 = vmax.f32 %v14942_v35, %v1533_v40  ;;  %v1458_v35 = vsel %vm312_vm8, %v10151_v2, %v10213_v10  ;;  %v8538_v40 = vld [vmem:[%s14424_s3 + $0x184] ss:$8 sps:$4 sm:$0xff]  }
 0x2c5   : > { %v10535_v6 = vpop.permute.xlu0 %1380  ;;  %2070 = vrot.lane.b32.xlu1 %v10520_v59, %s8833_s13  ;;  %v10559_v59 = vmax.f32 %v14945_v11, %v1452_v43  ;;  %v8536_v43 = vld [vmem:[%s14424_s3 + $0x180] ss:$8 sps:$4 sm:$0xff]   ;;  %3577 = vmatprep.subr.bf16.mxu1 %v8538_v40  ;;  %v10585_v11 = vmax.f32 %v14949_v29, %v1458_v35  ;;  %v1457_v35 = vsel %vm312_vm8, %v9630_v0, %v10151_v2  ;;  %v14953_v40 = vld [vmem:[#allocation72_spill] sm:$0xff] }
 0x2c6   : > { %14943 = vst [vmem:[#allocation64_spill] sm:$0xff] %v10546_v57  ;;  %v1463_v0 = vsel %vm312_vm8, %v9662_v55, %v10171_v14  ;;  %v14957_v2 = vld [vmem:[#allocation76_spill] sm:$0xff]  ;;  %v1469_v55 = vsel %vm312_vm8, %v9680_v45, %v10249_v36  ;;  %v1475_v45 = vsel %vm312_vm8, %v9710_v33, %v10275_v13 }
 0x2c7   : > { %v10548_v62 = vpop.permute.xlu1 %1368  ;;  %1882 = vrot.lane.b32.xlu0 %v10533_v50, %s8833_s13  ;;  %14946 = vst [vmem:[#allocation49_spill] sm:$0xff] %v10559_v59  ;;  %v14947_v50 = vld [vmem:[#allocation2_spill] sm:$0xff]  ;;  %14950 = vst [vmem:[#allocation45_spill] sm:$0xff] %v10585_v11  ;;  %3578 = vmatpush2.bf16.msra.mxu1 %v8536_v43 }
 0x2c8   : > { %v10572_v15 = vmax.f32 %v14947_v50, %v1445_v54  ;;  %v1464_v50 = vsel %vm312_vm8, %v10171_v14, %v10265_v19  ;;  %v8541_v54 = vld [vmem:[%s14424_s3 + $0x274] ss:$8 sps:$4 sm:$0xff]  }
 0x2c9   : > { %v10561_v53 = vpop.permute.xlu0 %1394  ;;  %2086 = vrot.lane.b32.xlu1 %v10546_v57, %s8833_s13  ;;  %3660 = vmatprep.subr.bf16.mxu0 %v8541_v54  ;;  %v10608_v43 = vmax.f32 %v14953_v40, %v1464_v50  ;;  %v14959_v40 = vld [vmem:[#allocation5_spill] sm:$0xff]  ;;  %v14961_v14 = vld [vmem:[#allocation80_spill] sm:$0xff] }
 0x2ca   : > { %14948 = vst [vmem:[#allocation52_spill] sm:$0xff] %v10572_v15 }
 0x2cb   : > { %v10574_v24 = vpop.permute.xlu1 %1382  ;;  %1896 = vrot.lane.b32.xlu0 %v10559_v59, %s8833_s13  ;;  %v14951_v59 = vld [vmem:[#allocation3_spill] sm:$0xff]  ;;  %14954 = vst [vmem:[#allocation55_spill] sm:$0xff] %v10608_v43 }
 0x2cc   : > { %v10598_v12 = vmax.f32 %v14951_v59, %v1451_v26  ;;  %v1470_v59 = vsel %vm312_vm8, %v10249_v36, %v10314_v30  ;;  %v14955_v26 = vld [vmem:[#allocation4_spill] sm:$0xff]  ;;  %v14965_v36 = vld [vmem:[#allocation83_spill] sm:$0xff] }
 0x2cd   : > { %v10587_v57 = vpop.permute.xlu0 %1408  ;;  %1880 = vrot.lane.b32.xlu1 %v10572_v15, %s8833_s13  ;;  %v10618_v15 = vmax.f32 %v14955_v26, %v1457_v35  ;;  %v10628_v50 = vmax.f32 %v14957_v2, %v1470_v59  ;;  %v1476_v35 = vsel %vm312_vm8, %v10275_v13, %v10369_v4  ;;  %v10638_v26 = vmax.f32 %v14959_v40, %v1463_v0  ;;  %v14963_v40 = vld [vmem:[#allocation6_spill] sm:$0xff] }
 0x2ce   : > { %14952 = vst [vmem:[#allocation58_spill] sm:$0xff] %v10598_v12  ;;  %v10646_v59 = vmax.f32 %v14961_v14, %v1476_v35  ;;  %v1482_v0 = vsel %vm312_vm8, %v10353_v37, %v10421_v38  ;;  %v1481_v13 = vsel %vm312_vm8, %v9734_v32, %v10353_v37  ;;  %v1487_v32 = vsel %vm312_vm8, %v9781_v25, %v10379_v8 }
 0x2cf   : > { %v10600_v56 = vpop.permute.xlu1 %1396  ;;  %1910 = vrot.lane.b32.xlu0 %v10585_v11, %s8833_s13  ;;  %14956 = vst [vmem:[#allocation65_spill] sm:$0xff] %v10618_v15  ;;  %14958 = vst [vmem:[#allocation63_spill] sm:$0xff] %v10628_v50  ;;  %v10664_v35 = vmax.f32 %v14965_v36, %v1482_v0  ;;  %v14969_v0 = vld [vmem:[#allocation87_spill] sm:$0xff] }
 0x2d0   : > { %14960 = vst [vmem:[#allocation2_spill] sm:$0xff] %v10638_v26  ;;  %14962 = vst [vmem:[#allocation68_spill] sm:$0xff] %v10646_v59 }
 0x2d1   : > { %v10610_v29 = vpop.permute.xlu0 %1422  ;;  %1894 = vrot.lane.b32.xlu1 %v10598_v12, %s8833_s13  ;;  %14966 = vst [vmem:[#allocation72_spill] sm:$0xff] %v10664_v35 }
 0x2d3   : > { %v10620_v11 = vpop.permute.xlu1 %1410  ;;  %1924 = vrot.lane.b32.xlu0 %v10608_v43, %s8833_s13 }
 0x2d5   : > { %v10630_v54 = vpop.permute.xlu0 %1878  ;;  %1908 = vrot.lane.b32.xlu1 %v10618_v15, %s8833_s13  ;;  %v10656_v15 = vmax.f32 %v14963_v40, %v1469_v55  ;;  %v1488_v55 = vsel %vm312_vm8, %v10379_v8, %v10470_v21 }
 0x2d6   : > { %v10687_v36 = vmax.f32 %v14969_v0, %v1488_v55  ;;  %v14973_v55 = vld [vmem:[#allocation92_spill] sm:$0xff] }
 0x2d7   : > { %v1877_v43 = vpop.permute.xlu1 %1876  ;;  %1938 = vrot.lane.b32.xlu0 %v10628_v50, %s8833_s13  ;;  %14964 = vst [vmem:[#allocation3_spill] sm:$0xff] %v10656_v15 }
 0x2d8   : > { %v2099_v40 = vsel %vm368_vm6, %v1877_v43, %v10630_v54  ;;  %14970 = vst [vmem:[#allocation76_spill] sm:$0xff] %v10687_v36 }
 0x2d9   : > { %v10648_v2 = vpop.permute.xlu0 %1436  ;;  %1922 = vrot.lane.b32.xlu1 %v10638_v26, %s8833_s13  ;;  %v14967_v26 = vld [vmem:[#allocation9_spill] sm:$0xff] }
 0x2da   : > { %v10677_v12 = vmax.f32 %v14967_v26, %v1475_v45  ;;  %v14971_v45 = vld [vmem:[#allocation12_spill] sm:$0xff] }
 0x2db   : > { %v1875_v50 = vpop.permute.xlu1 %1874  ;;  %1952 = vrot.lane.b32.xlu0 %v10646_v59, %s8833_s13 }
 0x2dc   : > { %v2098_v59 = vsel %vm368_vm6, %v1875_v50, %v1877_v43  ;;  %14968 = vst [vmem:[#allocation4_spill] sm:$0xff] %v10677_v12  ;;  %v2307_v43 = vmax.f32 %v9958_v58, %v2099_v40  ;;  %v1500_v58 = vsel %vm312_vm8, %v10483_v5, %v10522_v52  ;;  %v14975_v40 = vld [vmem:[#allocation17_spill] sm:$0xff] }
 0x2dd   : > { %v10666_v14 = vpop.permute.xlu0 %1892  ;;  %1936 = vrot.lane.b32.xlu1 %v10656_v15, %s8833_s13  ;;  %v1494_v15 = vsel %vm312_vm8, %v10457_v20, %v10499_v16  ;;  %v2306_v50 = vmax.f32 %v9980_v42, %v2098_v59 }
 0x2de   : > { %v10705_v0 = vmax.f32 %v14973_v55, %v1494_v15  ;;  %v2515_v15 = vadd.f32 %v14975_v40, %v2307_v43  ;;  %v14976_v55 = vld [vmem:[#allocation18_spill] sm:$0xff] }
 0x2df   : > { %v10679_v33 = vpop.permute.xlu1 %1424  ;;  %1966 = vrot.lane.b32.xlu0 %v10664_v35, %s8833_s13  ;;  %v10697_v35 = vmax.f32 %v14971_v45, %v1481_v13  ;;  %v2514_v13 = vadd.f32 %v14975_v40, %v2306_v50 }
 0x2e0   : > { %14974 = vst [vmem:[#allocation80_spill] sm:$0xff] %v10705_v0 }
 0x2e1   : > { %v1889_v26 = vpop.permute.xlu0 %1888  ;;  %1950 = vrot.lane.b32.xlu1 %v10677_v12, %s8833_s13  ;;  %14972 = vst [vmem:[#allocation5_spill] sm:$0xff] %v10697_v35  ;;  %v2626_v43 = vmax.f32 %v2514_v13, 0.0  ;;  %v1499_v13 = vsel %vm312_vm8, %v9849_v31, %v10483_v5  ;;  %v14983_v31 = vld [vmem:[#allocation30_spill] sm:$0xff] }
 0x2e2   : > { %v10768_v5 = vmax.f32 %v14983_v31, %v1499_v13 }
 0x2e3   : > { %v1891_v37 = vpop.permute.xlu1 %1890  ;;  %1980 = vrot.lane.b32.xlu0 %v10687_v36, %s8833_s13  ;;  %v10722_v36 = vmax.f32 %v14976_v55, %v1487_v32 }
 0x2e4   : > { %v2104_v42 = vsel %vm368_vm6, %v1889_v26, %v1891_v37  ;;  %v2105_v59 = vsel %vm368_vm6, %v1891_v37, %v10666_v14  ;;  %v14977_v26 = vld [vmem:[#allocation25_spill] sm:$0xff] }
 0x2e5   : > { %v2313_v25 = vmax.f32 %v10013_v18, %v2104_v42  ;;  %v2314_v8 = vmax.f32 %v10023_v1, %v2105_v59  ;;  %v10716_v45 = vpop.permute.xlu0 %1906  ;;  %1964 = vrot.lane.b32.xlu1 %v10697_v35, %s8833_s13  ;;  %v1493_v1 = vsel %vm312_vm8, %v14869_v28, %v10457_v20  ;;  %v14978_v37 = vld [vmem:[#allocation97_spill] sm:$0xff] }
 0x2e6   : > { %v10734_v42 = vmax.f32 %v14978_v37, %v1500_v58  ;;  %v8539_v58 = vld [vmem:[%s14424_s3 + $0x270] ss:$8 sps:$4 sm:$0xff]   ;;  %v1512_v37 = vsel %vm312_vm8, %v10535_v6, %v10574_v24 }
 0x2e7   : > { %v2521_v12 = vadd.f32 %v14977_v26, %v2313_v25  ;;  %1994 = vrot.lane.b32.xlu0 %v10705_v0, %s8833_s13  ;;  %v10727_v50 = vpop.permute.xlu1 %1438  ;;  %v2522_v18 = vadd.f32 %v14977_v26, %v2314_v8  ;;  %v2627_v25 = vmax.f32 %v2515_v15, 0.0  ;;  %v1506_v8 = vsel %vm312_vm8, %v10509_v27, %v10548_v62  ;;  %v14980_v0 = vld [vmem:[#allocation23_spill] sm:$0xff] }
 0x2e8   : > { %14979 = vst [vmem:[#allocation6_spill] sm:$0xff] %v10734_v42  ;;  %v10744_v35 = vmax.f32 %v14980_v0, %v1493_v1  ;;  %v8544_v15 = vld [vmem:[%s14424_s3 + $0x264] ss:$8 sps:$4 sm:$0xff]  }
 0x2e9   : > { %v2633_v59 = vmax.f32 %v2521_v12, 0.0  ;;  %v10736_v32 = vpop.permute.xlu0 %1920  ;;  %1978 = vrot.lane.b32.xlu1 %v10722_v36, %s8833_s13  ;;  %v2634_v55 = vmax.f32 %v2522_v18, 0.0  ;;  %v14981_v0 = vld [vmem:[#allocation103_spill] sm:$0xff] }
 0x2ea   : > { %v10758_v18 = vmax.f32 %v14981_v0, %v1506_v8 }
 0x2eb   : > { %v2738_v28 = vpack.c.bf16 %v2633_v59, %v2626_v43  ;;  %2008 = vrot.lane.b32.xlu0 %v10734_v42, %s8833_s13  ;;  %v1905_v20 = vpop.permute.xlu1 %1904  ;;  %v2739_v12 = vpack.c.bf16 %v2634_v55, %v2627_v25  ;;  %v8542_v25 = vld [vmem:[%s14424_s3 + $0x260] ss:$8 sps:$4 sm:$0xff]   ;;  %v1505_v55 = vsel %vm312_vm8, %v9872_v17, %v10509_v27  ;;  %v14986_v17 = vld [vmem:[#allocation36_spill] sm:$0xff] }
 0x2ec   : > { %14982 = vst [vmem:[#allocation83_spill] sm:$0xff] %v10758_v18  ;;  %v2111_v43 = vsel %vm368_vm6, %v1905_v20, %v10716_v45  ;;  %v10795_v27 = vmax.f32 %v14986_v17, %v1505_v55  ;;  %v14990_v17 = vld [vmem:[#allocation44_spill] sm:$0xff]  ;;  %v15008_v42 = vld [vmem:[#allocation67_spill] sm:$0xff] }
 0x2ed   : > { %3466 = vmatprep.mubr.bf16.mxu0 %v2739_v12  ;;  %v1917_v1 = vpop.permute.xlu0 %1916  ;;  %1992 = vrot.lane.b32.xlu1 %v10744_v35, %s8833_s13  ;;  %v14984_v12 = vld [vmem:[#allocation109_spill] sm:$0xff]  ;;  %v2321_v0 = vmax.f32 %v10059_v34, %v2111_v43  ;;  %v1524_v43 = vsel %vm312_vm8, %v10587_v57, %v10620_v11 }
 0x2ee   : > { %3467 = vmatmul.mubr.bf16.vlgmr.msra.gmra.mxu0 %v2738_v28  ;;  %v8547_v28 = vld [vmem:[%s14424_s3 + $0x254] ss:$8 sps:$4 sm:$0xff]   ;;  %v10783_v13 = vmax.f32 %v14984_v12, %v1512_v37  ;;  %v8545_v34 = vld [vmem:[%s14424_s3 + $0x250] ss:$8 sps:$4 sm:$0xff]  }
 0x2ef   : > { %2022 = vrot.lane.b32.xlu0 %v10758_v18, %s8833_s13  ;;  %v1903_v59 = vpop.permute.xlu1 %1902  ;;  %3661 = vmatpush1.bf16.msra.mxu0 %v8539_v58  ;;  %v1518_v58 = vsel %vm312_vm8, %v10561_v53, %v10600_v56 }
 0x2f0   : > { %v2110_v8 = vsel %vm368_vm6, %v1903_v59, %v1905_v20  ;;  %3662 = vmatprep.subr.bf16.mxu0 %v8544_v15  ;;  %14985 = vst [vmem:[#allocation9_spill] sm:$0xff] %v10783_v13  ;;  %v1511_v20 = vsel %vm312_vm8, %v9913_v39, %v10535_v6  ;;  %v8550_v6 = vld [vmem:[%s14424_s3 + $0x244] ss:$8 sps:$4 sm:$0xff]  }
 0x2f1   : > { %v2320_v31 = vmax.f32 %v10079_v47, %v2110_v8  ;;  %v10790_v18 = vpop.permute.xlu0 %1934  ;;  %2006 = vrot.lane.b32.xlu1 %v10768_v5, %s8833_s13  ;;  %v14987_v47 = vld [vmem:[#allocation114_spill] sm:$0xff] }
 0x2f2   : > { %v10806_v37 = vmax.f32 %v14987_v47, %v1518_v58 }
 0x2f3   : > { %2036 = vrot.lane.b32.xlu0 %v10783_v13, %s8833_s13  ;;  %v1919_v15 = vpop.permute.xlu1 %1918  ;;  %3663 = vmatpush1.bf16.msra.mxu0 %v8542_v25  ;;  %v14989_v25 = vld [vmem:[#allocation29_spill] sm:$0xff] }
 0x2f4   : > { %14988 = vst [vmem:[#allocation87_spill] sm:$0xff] %v10806_v37  ;;  %v2116_v59 = vsel %vm368_vm6, %v1917_v1, %v1919_v15  ;;  %v2117_v39 = vsel %vm368_vm6, %v1919_v15, %v10736_v32  ;;  %3664 = vmatprep.subr.bf16.mxu0 %v8547_v28  ;;  %v2528_v55 = vadd.f32 %v14989_v25, %v2320_v31  ;;  %v14991_v31 = vld [vmem:[#allocation22_spill] sm:$0xff] }
 0x2f5   : > { %v2327_v8 = vmax.f32 %v10069_v51, %v2116_v59  ;;  %v2328_v12 = vmax.f32 %v10099_v22, %v2117_v39  ;;  %v10820_v58 = vpop.permute.xlu0 %1948  ;;  %2020 = vrot.lane.b32.xlu1 %v10795_v27, %s8833_s13  ;;  %v2529_v1 = vadd.f32 %v14989_v25, %v2321_v0  ;;  %v10826_v15 = vmax.f32 %v14990_v17, %v1511_v20  ;;  %v8548_v0 = vld [vmem:[%s14424_s3 + $0x240] ss:$8 sps:$4 sm:$0xff]  }
 0x2f6   : > { %v1517_v28 = vsel %vm312_vm8, %v9945_v48, %v10561_v53  ;;  %v14992_v59 = vld [vmem:[#allocation118_spill] sm:$0xff]  ;;  %v8553_v48 = vld [vmem:[%s14424_s3 + $0x234] ss:$8 sps:$4 sm:$0xff]   ;;  %v2640_v53 = vmax.f32 %v2528_v55, 0.0 }
 0x2f7   : > { %2050 = vrot.lane.b32.xlu0 %v10806_v37, %s8833_s13  ;;  %v1933_v51 = vpop.permute.xlu1 %1932  ;;  %v2536_v22 = vadd.f32 %v14991_v31, %v2328_v12  ;;  %v2535_v47 = vadd.f32 %v14991_v31, %v2327_v8  ;;  %3665 = vmatpush1.bf16.msra.mxu0 %v8545_v34  ;;  %v10839_v20 = vmax.f32 %v14992_v59, %v1524_v43  ;;  %v2641_v34 = vmax.f32 %v2529_v1, 0.0  ;;  %v14994_v37 = vld [vmem:[#allocation50_spill] sm:$0xff] }
 0x2f8   : > { %v2123_v39 = vsel %vm368_vm6, %v1933_v51, %v10790_v18  ;;  %3666 = vmatprep.subr.bf16.mxu0 %v8550_v6  ;;  %v10849_v13 = vmax.f32 %v14994_v37, %v1517_v28  ;;  %v1523_v43 = vsel %vm312_vm8, %v10002_v46, %v10587_v57  ;;  %v1530_v6 = vsel %vm312_vm8, %v10610_v29, %v10679_v33  ;;  %v8551_v37 = vld [vmem:[%s14424_s3 + $0x230] ss:$8 sps:$4 sm:$0xff]  }
 0x2f9   : > { %14993 = vst [vmem:[#allocation12_spill] sm:$0xff] %v10839_v20  ;;  %v1945_v12 = vpop.permute.xlu0 %1944  ;;  %2034 = vrot.lane.b32.xlu1 %v10826_v15, %s8833_s13  ;;  %v2648_v8 = vmax.f32 %v2536_v22, 0.0  ;;  %v2647_v17 = vmax.f32 %v2535_v47, 0.0  ;;  %v2335_v55 = vmax.f32 %v10119_v3, %v2123_v39  ;;  %v1536_v46 = vsel %vm312_vm8, %v10648_v2, %v10727_v50  ;;  %v8556_v3 = vld [vmem:[%s14424_s3 + $0x224] ss:$8 sps:$4 sm:$0xff]   ;;  %v14995_v28 = vld [vmem:[#allocation121_spill] sm:$0xff] }
 0x2fa   : > { %v10871_v47 = vmax.f32 %v14995_v28, %v1530_v6 }
 0x2fb   : > { %2064 = vrot.lane.b32.xlu0 %v10839_v20, %s8833_s13  ;;  %v1931_v59 = vpop.permute.xlu1 %1930  ;;  %v2746_v1 = vpack.c.bf16 %v2648_v8, %v2641_v34  ;;  %v2745_v22 = vpack.c.bf16 %v2647_v17, %v2640_v53  ;;  %3667 = vmatpush1.bf16.msra.mxu0 %v8548_v0  ;;  %v14997_v53 = vld [vmem:[#allocation57_spill] sm:$0xff]  ;;  %v15001_v17 = vld [vmem:[#allocation35_spill] sm:$0xff] }
 0x2fc   : > { %v2122_v57 = vsel %vm368_vm6, %v1931_v59, %v1933_v51  ;;  %3668 = vmatprep.subr.bf16.mxu0 %v8553_v48  ;;  %14996 = vst [vmem:[#allocation92_spill] sm:$0xff] %v10871_v47  ;;  %v10879_v34 = vmax.f32 %v14997_v53, %v1523_v43  ;;  %v1529_v51 = vsel %vm312_vm8, %v10032_v7, %v10610_v29  ;;  %v14999_v48 = vld [vmem:[#allocation126_spill] sm:$0xff] }
 0x2fd   : > { %v2334_v0 = vmax.f32 %v10139_v44, %v2122_v57  ;;  %v10874_v39 = vpop.permute.xlu0 %1962  ;;  %2048 = vrot.lane.b32.xlu1 %v10849_v13, %s8833_s13  ;;  %3476 = vmatprep.mubr.bf16.mxu0 %v2746_v1  ;;  %v10885_v8 = vmax.f32 %v14999_v48, %v1536_v46  ;;  %v2543_v6 = vadd.f32 %v15001_v17, %v2335_v55  ;;  %v8554_v43 = vld [vmem:[%s14424_s3 + $0x220] ss:$8 sps:$4 sm:$0xff]   ;;  %v8559_v55 = vld [vmem:[%s14424_s3 + $0x214] ss:$8 sps:$4 sm:$0xff]  }
 0x2fe   : > { %14998 = vst [vmem:[#allocation17_spill] sm:$0xff] %v10879_v34  ;;  %3477 = vmatmul.mubr.bf16.gmra.mxu0 %v2745_v22  ;;  %v2894_v59 = vld [vmem:[%s14424_s3 + $0x320] sm:$0xff]  ;;  %v14618_v22 = vmov 65535  }
 0x2ff   : > { %15000 = vst [vmem:[#allocation18_spill] sm:$0xff] %v10885_v8  ;;  %2078 = vrot.lane.b32.xlu0 %v10871_v47, %s8833_s13  ;;  %v1947_v44 = vpop.permute.xlu1 %1946  ;;  %3669 = vmatpush1.bf16.msra.mxu0 %v8551_v37  ;;  %v7985_v1 = vcombine.high %v2894_v59, %v2894_v59  ;;  %v3426_v37 = vsel %vm3425_vm10, 4294967295, %v14618_v22  ;;  %v2542_v46 = vadd.f32 %v15001_v17, %v2334_v0  ;;  %v15004_v0 = vld [vmem:[#allocation27_spill] sm:$0xff] }
 0x300   : > { %v2128_v7 = vsel %vm368_vm6, %v1945_v12, %v1947_v44  ;;  %v2129_v29 = vsel %vm368_vm6, %v1947_v44, %v10820_v58  ;;  %3670 = vmatprep.subr.bf16.mxu0 %v8556_v3  ;;  %v7984_v12 = vcombine.low %v2894_v59, %v2894_v59  ;;  %v15002_v3 = vld [vmem:[#allocation62_spill] sm:$0xff]  ;;  %v3427_v44 = vsel %vm648_vm3, %v3426_v37, 0  ;;  %v15005_v59 = vld [vmem:[#allocation136_spill] sm:$0xff] }
 0x301   : > { %v2341_v57 = vmax.f32 %v10129_v41, %v2128_v7  ;;  %v2342_v28 = vmax.f32 %v10159_v9, %v2129_v29  ;;  %v10906_v53 = vpop.permute.xlu0 %1976  ;;  %2062 = vrot.lane.b32.xlu1 %v10879_v34, %s8833_s13  ;;  %v10911_v48 = vmax.f32 %v15002_v3, %v1529_v51  ;;  %v8557_v9 = vld [vmem:[%s14424_s3 + $0x210] ss:$8 sps:$4 sm:$0xff]   ;;  %v15006_v51 = vld [vmem:[#allocation71_spill] sm:$0xff]  ;;  %v1535_v37 = vsel %vm312_vm8, %v10081_v61, %v10648_v2 }
 0x302   : > { %v10921_v7 = vand.u32 %v7984_v12, %v3427_v44  ;;  %v10925_v29 = vmax.f32 %v15006_v51, %v15005_v59  ;;  %v2655_v3 = vmax.f32 %v2543_v6, 0.0  ;;  %v10938_v61 = vmax.f32 %v15008_v42, %v1535_v37  ;;  %v15011_v37 = vld [vmem:[#allocation135_spill] sm:$0xff] }
 0x303   : > { %15003 = vst [vmem:[#allocation25_spill] sm:$0xff] %v10911_v48  ;;  %2092 = vrot.lane.b32.xlu0 %v10885_v8, %s8833_s13  ;;  %v1961_v22 = vpop.permute.xlu1 %1960  ;;  %v2550_v47 = vadd.f32 %v15004_v0, %v2342_v28  ;;  %v2549_v41 = vadd.f32 %v15004_v0, %v2341_v57  ;;  %3671 = vmatpush1.bf16.msra.mxu0 %v8554_v43  ;;  %v8562_v43 = vld [vmem:[%s14424_s3 + $0x204] ss:$8 sps:$4 sm:$0xff]   ;;  %v2654_v28 = vmax.f32 %v2542_v46, 0.0  ;;  %vm7395_vm3 = vcmask 629760  }
 0x304   : > { %15007 = vst [vmem:[#allocation97_spill] sm:$0xff] %v10925_v29  ;;  %3672 = vmatprep.subr.bf16.mxu0 %v8559_v55  ;;  %v3432_v57 = vand.u32 %v7985_v1, %v3427_v44  ;;  %v2135_v12 = vsel %vm368_vm6, %v1961_v22, %v10874_v39  ;;  %15009 = vst [vmem:[#allocation23_spill] sm:$0xff] %v10938_v61  ;;  %v8560_v1 = vld [vmem:[%s14424_s3 + $0x200] ss:$8 sps:$4 sm:$0xff]  }
 0x305   : > { %v1973_v8 = vpop.permute.xlu0 %1972  ;;  %2076 = vrot.lane.b32.xlu1 %v10911_v48, %s8833_s13  ;;  %v2662_v51 = vmax.f32 %v2550_v47, 0.0  ;;  %v2661_v20 = vmax.f32 %v2549_v41, 0.0  ;;  %v1447_v47 = vsel %vm312_vm8, %v10121_v60, %v15005_v59  ;;  %v15010_v46 = vld [vmem:[#allocation95_spill] sm:$0xff]  ;;  %v8565_v41 = vld [vmem:[%s14424_s3 + $0x2f4] ss:$8 sps:$4 sm:$0xff]  }
 0x306   : > { %3783 = vmatprep.subr.bf16.mxu1 %v3432_v57  ;;  %v2349_v44 = vmax.f32 %v15010_v46, %v2135_v12  ;;  %v15015_v60 = vld [vmem:[#allocation60_spill] sm:$0xff]  ;;  %v1453_v12 = vsel %vm312_vm8, %v10161_v23, %v15011_v37  ;;  %v15019_v46 = vld [vmem:[#allocation69_spill] sm:$0xff] }
 0x307   : > { %1886 = vrot.lane.b32.xlu0 %v10925_v29, %s8833_s13  ;;  %v1959_v2 = vpop.permute.xlu1 %1958  ;;  %v2753_v6 = vpack.c.bf16 %v2662_v51, %v2655_v3  ;;  %v2752_v55 = vpack.c.bf16 %v2661_v20, %v2654_v28  ;;  %3673 = vmatpush1.bf16.msra.mxu0 %v8557_v9  ;;  %v15012_v20 = vld [vmem:[#allocation75_spill] sm:$0xff]  ;;  %v15014_v3 = vld [vmem:[#allocation105_spill] sm:$0xff]  ;;  %v15029_v29 = vld [vmem:[#allocation70_spill] sm:$0xff] }
 0x308   : > { %v2134_v42 = vsel %vm368_vm6, %v1959_v2, %v1961_v22  ;;  %3674 = vmatprep.subr.bf16.mxu0 %v8562_v43  ;;  %v10955_v9 = vmax.f32 %v15012_v20, %v15011_v37  ;;  %v10963_v22 = vmax.f32 %v15015_v60, %v1447_v47  ;;  %v8563_v43 = vld [vmem:[%s14424_s3 + $0x2f0] ss:$8 sps:$4 sm:$0xff]   ;;  %v15022_v37 = vld [vmem:[#allocation19_spill] sm:$0xff] }
 0x309   : > { %v2348_v57 = vmax.f32 %v15014_v3, %v2134_v42  ;;  %v10958_v28 = vpop.permute.xlu0 %1990  ;;  %2090 = vrot.lane.b32.xlu1 %v10938_v61, %s8833_s13  ;;  %3486 = vmatprep.mubr.bf16.mxu0 %v2753_v6  ;;  %v15017_v6 = vld [vmem:[#allocation41_spill] sm:$0xff]  ;;  %v15018_v47 = vld [vmem:[#allocation132_spill] sm:$0xff] }
 0x30a   : > { %15013 = vst [vmem:[#allocation103_spill] sm:$0xff] %v10955_v9  ;;  %3487 = vmatmul.mubr.bf16.gmra.mxu0 %v2752_v55  ;;  %15016 = vst [vmem:[#allocation30_spill] sm:$0xff] %v10963_v22  ;;  %v2557_v55 = vadd.f32 %v15017_v6, %v2349_v44  ;;  %v10982_v42 = vmax.f32 %v15019_v46, %v15018_v47  ;;  %v15021_v3 = vld [vmem:[#allocation88_spill] sm:$0xff]  ;;  %v15023_v44 = vld [vmem:[#allocation66_spill] sm:$0xff] }
 0x30b   : > { %1900 = vrot.lane.b32.xlu0 %v10955_v9, %s8833_s13  ;;  %v1975_v59 = vpop.permute.xlu1 %1974  ;;  %3675 = vmatpush1.bf16.msra.mxu0 %v8560_v1  ;;  %v8568_v1 = vld [vmem:[%s14424_s3 + $0x2e4] ss:$8 sps:$4 sm:$0xff]   ;;  %v2556_v20 = vadd.f32 %v15017_v6, %v2348_v57  ;;  %v15025_v46 = vld [vmem:[#allocation32_spill] sm:$0xff] }
 0x30c   : > { %v2140_v51 = vsel %vm368_vm6, %v1973_v8, %v1975_v59  ;;  %v2141_v2 = vsel %vm368_vm6, %v1975_v59, %v10906_v53  ;;  %3676 = vmatprep.subr.bf16.mxu0 %v8565_v41  ;;  %15020 = vst [vmem:[#allocation109_spill] sm:$0xff] %v10982_v42  ;;  %v10992_v41 = vmax.f32 %v15023_v44, %v1453_v12  ;;  %v2669_v44 = vmax.f32 %v2557_v55, 0.0 }
 0x30d   : > { %v2355_v23 = vmax.f32 %v15021_v3, %v2140_v51  ;;  %v2356_v8 = vmax.f32 %v15022_v37, %v2141_v2  ;;  %v10987_v60 = vpop.permute.xlu0 %2004  ;;  %1884 = vrot.lane.b32.xlu1 %v10963_v22, %s8833_s13  ;;  %v8566_v51 = vld [vmem:[%s14424_s3 + $0x2e0] ss:$8 sps:$4 sm:$0xff]   ;;  %v15027_v3 = vld [vmem:[#allocation73_spill] sm:$0xff]  ;;  %v1459_v12 = vsel %vm312_vm8, %v10213_v10, %v15018_v47 }
 0x30e   : > { %15024 = vst [vmem:[#allocation36_spill] sm:$0xff] %v10992_v41  ;;  %v15026_v2 = vld [vmem:[#allocation134_spill] sm:$0xff]  ;;  %v11016_v61 = vmax.f32 %v15029_v29, %v1459_v12  ;;  %v8569_v47 = vld [vmem:[%s14424_s3 + $0x2d0] ss:$8 sps:$4 sm:$0xff]  }
 0x30f   : > { %1914 = vrot.lane.b32.xlu0 %v10982_v42, %s8833_s13  ;;  %v1989_v59 = vpop.permute.xlu1 %1988  ;;  %v2564_v9 = vadd.f32 %v15025_v46, %v2356_v8  ;;  %v2563_v57 = vadd.f32 %v15025_v46, %v2355_v23  ;;  %3677 = vmatpush2.bf16.msra.mxu0 %v8563_v43  ;;  %v11003_v37 = vmax.f32 %v15027_v3, %v15026_v2  ;;  %v8571_v8 = vld [vmem:[%s14424_s3 + $0x2d4] ss:$8 sps:$4 sm:$0xff]   ;;  %v2668_v23 = vmax.f32 %v2556_v20, 0.0  ;;  %v8574_v12 = vld [vmem:[%s14424_s3 + $0x2c4] ss:$8 sps:$4 sm:$0xff]  }
 0x310   : > { %3678 = vmatprep.subr.bf16.mxu0 %v8568_v1  ;;  %v2147_v43 = vsel %vm368_vm6, %v1989_v59, %v10958_v28  ;;  %15030 = vst [vmem:[#allocation29_spill] sm:$0xff] %v11016_v61  ;;  %v1465_v20 = vsel %vm312_vm8, %v10265_v19, %v15026_v2  ;;  %v15036_v19 = vld [vmem:[#allocation74_spill] sm:$0xff] }
 0x311   : > { %15028 = vst [vmem:[#allocation114_spill] sm:$0xff] %v11003_v37  ;;  %v2001_v42 = vpop.permute.xlu0 %2000  ;;  %1898 = vrot.lane.b32.xlu1 %v10992_v41, %s8833_s13  ;;  %v2676_v3 = vmax.f32 %v2564_v9, 0.0  ;;  %v2675_v22 = vmax.f32 %v2563_v57, 0.0  ;;  %v15031_v9 = vld [vmem:[#allocation26_spill] sm:$0xff] }
 0x312   : > { %v2363_v57 = vmax.f32 %v15031_v9, %v2147_v43  ;;  %v15039_v9 = vld [vmem:[#allocation7_spill] sm:$0xff]  ;;  %v15050_v41 = vld [vmem:[#allocation82_spill] sm:$0xff] }
 0x313   : > { %1928 = vrot.lane.b32.xlu0 %v11003_v37, %s8833_s13  ;;  %v1987_v10 = vpop.permute.xlu1 %1986  ;;  %v2760_v55 = vpack.c.bf16 %v2676_v3, %v2669_v44  ;;  %v2759_v1 = vpack.c.bf16 %v2675_v22, %v2668_v23  ;;  %3679 = vmatpush2.bf16.msra.mxu0 %v8566_v51  ;;  %v15032_v44 = vld [vmem:[#allocation11_spill] sm:$0xff]  ;;  %v15035_v23 = vld [vmem:[#allocation108_spill] sm:$0xff] }
 0x314   : > { %v2146_v29 = vsel %vm368_vm6, %v1987_v10, %v1989_v59  ;;  %3680 = vmatprep.subr.bf16.mxu0 %v8571_v8  ;;  %v15033_v22 = vld [vmem:[#allocation79_spill] sm:$0xff]  ;;  %v11041_v59 = vmax.f32 %v15036_v19, %v1465_v20  ;;  %v1471_v43 = vsel %vm312_vm8, %v10314_v30, %v15032_v44  ;;  %v15042_v19 = vld [vmem:[#allocation110_spill] sm:$0xff] }
 0x315   : > { %v11033_v51 = vmax.f32 %v15033_v22, %v15032_v44  ;;  %v2362_v3 = vmax.f32 %v15035_v23, %v2146_v29  ;;  %v11036_v37 = vpop.permute.xlu0 %2018  ;;  %1912 = vrot.lane.b32.xlu1 %v11016_v61, %s8833_s13  ;;  %3496 = vmatprep.mubr.bf16.mxu0 %v2760_v55  ;;  %v8572_v8 = vld [vmem:[%s14424_s3 + $0x2c0] ss:$8 sps:$4 sm:$0xff]   ;;  %v15040_v29 = vld [vmem:[#allocation84_spill] sm:$0xff]  ;;  %v15043_v44 = vld [vmem:[#allocation13_spill] sm:$0xff] }
 0x316   : > { %3497 = vmatmul.mubr.bf16.gmra.mxu0 %v2759_v1  ;;  %15037 = vst [vmem:[#allocation22_spill] sm:$0xff] %v11041_v59  ;;  %v15038_v1 = vld [vmem:[#allocation46_spill] sm:$0xff]  ;;  %v11060_v22 = vmax.f32 %v15040_v29, %v15039_v9 }
 0x317   : > { %15034 = vst [vmem:[#allocation44_spill] sm:$0xff] %v11033_v51  ;;  %1942 = vrot.lane.b32.xlu0 %v11033_v51, %s8833_s13  ;;  %v2003_v2 = vpop.permute.xlu1 %2002  ;;  %3681 = vmatpush2.bf16.msra.mxu0 %v8569_v47  ;;  %v2571_v20 = vadd.f32 %v15038_v1, %v2363_v57  ;;  %v8577_v47 = vld [vmem:[%s14424_s3 + $0x2b4] ss:$8 sps:$4 sm:$0xff]   ;;  %v2570_v23 = vadd.f32 %v15038_v1, %v2362_v3  ;;  %v15044_v57 = vld [vmem:[#allocation78_spill] sm:$0xff] }
 0x318   : > { %v2152_v10 = vsel %vm368_vm6, %v2001_v42, %v2003_v2  ;;  %v2153_v55 = vsel %vm368_vm6, %v2003_v2, %v10987_v60  ;;  %3682 = vmatprep.subr.bf16.mxu0 %v8574_v12  ;;  %15041 = vst [vmem:[#allocation118_spill] sm:$0xff] %v11060_v22  ;;  %v11070_v12 = vmax.f32 %v15044_v57, %v1471_v43  ;;  %v15046_v29 = vld [vmem:[#allocation38_spill] sm:$0xff] }
 0x319   : > { %v2369_v30 = vmax.f32 %v15042_v19, %v2152_v10  ;;  %v2370_v42 = vmax.f32 %v15043_v44, %v2153_v55  ;;  %v11065_v51 = vpop.permute.xlu0 %2032  ;;  %1926 = vrot.lane.b32.xlu1 %v11041_v59, %s8833_s13  ;;  %v8575_v10 = vld [vmem:[%s14424_s3 + $0x2b0] ss:$8 sps:$4 sm:$0xff]   ;;  %v1477_v43 = vsel %vm312_vm8, %v10369_v4, %v15039_v9  ;;  %v2683_v57 = vmax.f32 %v2571_v20, 0.0  ;;  %v8578_v9 = vld [vmem:[%s14424_s3 + $0x2a0] ss:$8 sps:$4 sm:$0xff]  }
 0x31a   : > { %15045 = vst [vmem:[#allocation50_spill] sm:$0xff] %v11070_v12  ;;  %v15047_v55 = vld [vmem:[#allocation8_spill] sm:$0xff]  ;;  %v15048_v19 = vld [vmem:[#allocation77_spill] sm:$0xff]  ;;  %v11094_v48 = vmax.f32 %v15050_v41, %v1477_v43 }
 0x31b   : > { %1956 = vrot.lane.b32.xlu0 %v11060_v22, %s8833_s13  ;;  %v2017_v2 = vpop.permute.xlu1 %2016  ;;  %v2578_v61 = vadd.f32 %v15046_v29, %v2370_v42  ;;  %v2577_v3 = vadd.f32 %v15046_v29, %v2369_v30  ;;  %3683 = vmatpush2.bf16.msra.mxu0 %v8572_v8  ;;  %v11081_v44 = vmax.f32 %v15048_v19, %v15047_v55  ;;  %v8580_v42 = vld [vmem:[%s14424_s3 + $0x2a4] ss:$8 sps:$4 sm:$0xff]   ;;  %v2682_v30 = vmax.f32 %v2570_v23, 0.0  ;;  %v8585_v43 = vld [vmem:[%s14424_s3 + $0x294] ss:$8 sps:$4 sm:$0xff]  }
 0x31c   : > { %3684 = vmatprep.subr.bf16.mxu0 %v8577_v47  ;;  %v2159_v8 = vsel %vm368_vm6, %v2017_v2, %v11036_v37  ;;  %15051 = vst [vmem:[#allocation57_spill] sm:$0xff] %v11094_v48  ;;  %v1483_v23 = vsel %vm312_vm8, %v10421_v38, %v15047_v55  ;;  %v15057_v38 = vld [vmem:[#allocation85_spill] sm:$0xff] }
 0x31d   : > { %15049 = vst [vmem:[#allocation121_spill] sm:$0xff] %v11081_v44  ;;  %v2029_v22 = vpop.permute.xlu0 %2028  ;;  %1940 = vrot.lane.b32.xlu1 %v11070_v12, %s8833_s13  ;;  %v2690_v19 = vmax.f32 %v2578_v61, 0.0  ;;  %v2689_v59 = vmax.f32 %v2577_v3, 0.0  ;;  %v15052_v61 = vld [vmem:[#allocation20_spill] sm:$0xff]  ;;  %v15071_v12 = vld [vmem:[#allocation94_spill] sm:$0xff] }
 0x31e   : > { %v2377_v3 = vmax.f32 %v15052_v61, %v2159_v8  ;;  %v15060_v61 = vld [vmem:[#allocation113_spill] sm:$0xff] }
 0x31f   : > { %1970 = vrot.lane.b32.xlu0 %v11081_v44, %s8833_s13  ;;  %v2015_v4 = vpop.permute.xlu1 %2014  ;;  %v2767_v20 = vpack.c.bf16 %v2690_v19, %v2683_v57  ;;  %v2766_v47 = vpack.c.bf16 %v2689_v59, %v2682_v30  ;;  %3685 = vmatpush2.bf16.msra.mxu0 %v8575_v10  ;;  %v15053_v57 = vld [vmem:[#allocation10_spill] sm:$0xff]  ;;  %v15054_v59 = vld [vmem:[#allocation81_spill] sm:$0xff]  ;;  %v15056_v30 = vld [vmem:[#allocation116_spill] sm:$0xff] }
 0x320   : > { %v2158_v41 = vsel %vm368_vm6, %v2015_v4, %v2017_v2  ;;  %3686 = vmatprep.subr.bf16.mxu0 %v8580_v42  ;;  %v11111_v10 = vmax.f32 %v15054_v59, %v15053_v57  ;;  %v11119_v2 = vmax.f32 %v15057_v38, %v1483_v23  ;;  %v8583_v42 = vld [vmem:[%s14424_s3 + $0x290] ss:$8 sps:$4 sm:$0xff]   ;;  %v1489_v8 = vsel %vm312_vm8, %v10470_v21, %v15053_v57  ;;  %v15063_v38 = vld [vmem:[#allocation39_spill] sm:$0xff] }
 0x321   : > { %v2376_v19 = vmax.f32 %v15056_v30, %v2158_v41  ;;  %v11114_v44 = vpop.permute.xlu0 %2046  ;;  %1954 = vrot.lane.b32.xlu1 %v11094_v48, %s8833_s13  ;;  %3506 = vmatprep.mubr.bf16.mxu0 %v2767_v20  ;;  %v15061_v41 = vld [vmem:[#allocation89_spill] sm:$0xff]  ;;  %v15064_v57 = vld [vmem:[#allocation111_spill] sm:$0xff] }
 0x322   : > { %15055 = vst [vmem:[#allocation126_spill] sm:$0xff] %v11111_v10  ;;  %3507 = vmatmul.mubr.bf16.gmra.mxu0 %v2766_v47  ;;  %15058 = vst [vmem:[#allocation35_spill] sm:$0xff] %v11119_v2  ;;  %v15059_v47 = vld [vmem:[#allocation51_spill] sm:$0xff]  ;;  %v11138_v59 = vmax.f32 %v15061_v41, %v15060_v61  ;;  %v15067_v41 = vld [vmem:[#allocation42_spill] sm:$0xff] }
 0x323   : > { %1984 = vrot.lane.b32.xlu0 %v11111_v10, %s8833_s13  ;;  %v2031_v55 = vpop.permute.xlu1 %2030  ;;  %3687 = vmatpush2.bf16.msra.mxu0 %v8578_v9  ;;  %v2585_v23 = vadd.f32 %v15059_v47, %v2377_v3  ;;  %v8591_v9 = vld [vmem:[%s14424_s3 + $0x284] ss:$8 sps:$4 sm:$0xff]   ;;  %v2584_v30 = vadd.f32 %v15059_v47, %v2376_v19 }
 0x324   : > { %v2164_v4 = vsel %vm368_vm6, %v2029_v22, %v2031_v55  ;;  %v2165_v20 = vsel %vm368_vm6, %v2031_v55, %v11065_v51  ;;  %3688 = vmatprep.subr.bf16.mxu0 %v8585_v43  ;;  %15062 = vst [vmem:[#allocation62_spill] sm:$0xff] %v11138_v59  ;;  %v15065_v3 = vld [vmem:[#allocation90_spill] sm:$0xff] }
 0x325   : > { %v2383_v21 = vmax.f32 %v15063_v38, %v2164_v4  ;;  %v2384_v22 = vmax.f32 %v15064_v57, %v2165_v20  ;;  %v11143_v10 = vpop.permute.xlu0 %2060  ;;  %1968 = vrot.lane.b32.xlu1 %v11119_v2, %s8833_s13  ;;  %v11148_v43 = vmax.f32 %v15065_v3, %v1489_v8  ;;  %v8589_v4 = vld [vmem:[%s14424_s3 + $0x280] ss:$8 sps:$4 sm:$0xff]   ;;  %v15068_v20 = vld [vmem:[#allocation117_spill] sm:$0xff]  ;;  %v1495_v8 = vsel %vm312_vm8, %v10499_v16, %v15060_v61 }
 0x326   : > { %v15069_v38 = vld [vmem:[#allocation93_spill] sm:$0xff]  ;;  %v2697_v3 = vmax.f32 %v2585_v23, 0.0  ;;  %v11169_v34 = vmax.f32 %v15071_v12, %v1495_v8 }
 0x327   : > { %15066 = vst [vmem:[#allocation27_spill] sm:$0xff] %v11148_v43  ;;  %1998 = vrot.lane.b32.xlu0 %v11138_v59, %s8833_s13  ;;  %v2045_v55 = vpop.permute.xlu1 %2044  ;;  %v2592_v48 = vadd.f32 %v15067_v41, %v2384_v22  ;;  %v2591_v19 = vadd.f32 %v15067_v41, %v2383_v21  ;;  %3689 = vmatpush2.bf16.msra.mxu0 %v8583_v42  ;;  %v2696_v59 = vmax.f32 %v2584_v30, 0.0 }
 0x328   : > { %v11159_v57 = vmax.f32 %v15069_v38, %v15068_v20  ;;  %3690 = vmatprep.subr.bf16.mxu0 %v8591_v9  ;;  %v2171_v22 = vsel %vm368_vm6, %v2045_v55, %v11114_v44  ;;  %15072 = vst [vmem:[#allocation71_spill] sm:$0xff] %v11169_v34  ;;  %v1501_v9 = vsel %vm312_vm8, %v10522_v52, %v15068_v20 }
 0x329   : > { %v2057_v21 = vpop.permute.xlu0 %2056  ;;  %1982 = vrot.lane.b32.xlu1 %v11148_v43, %s8833_s13  ;;  %v2704_v42 = vmax.f32 %v2592_v48, 0.0  ;;  %v2703_v2 = vmax.f32 %v2591_v19, 0.0  ;;  %v2391_v61 = vmax.f32 %v10419_v49, %v2171_v22  ;;  %v15073_v48 = vld [vmem:[#allocation15_spill] sm:$0xff]  ;;  %v15074_v19 = vld [vmem:[#allocation86_spill] sm:$0xff] }
 0x32a   : > { %15070 = vst [vmem:[#allocation136_spill] sm:$0xff] %v11159_v57  ;;  %v11180_v43 = vmax.f32 %v15074_v19, %v15073_v48  ;;  %v1507_v52 = vsel %vm312_vm8, %v10548_v62, %v15073_v48  ;;  %v15080_v22 = vld [vmem:[#allocation91_spill] sm:$0xff]  ;;  %v15086_v48 = vld [vmem:[#allocation48_spill] sm:$0xff] }
 0x32b   : > { %2012 = vrot.lane.b32.xlu0 %v11159_v57, %s8833_s13  ;;  %v2043_v38 = vpop.permute.xlu1 %2042  ;;  %v2774_v16 = vpack.c.bf16 %v2704_v42, %v2697_v3  ;;  %v2773_v23 = vpack.c.bf16 %v2703_v2, %v2696_v59  ;;  %3691 = vmatpush2.bf16.msra.mxu0 %v8589_v4  ;;  %v15076_v2 = vld [vmem:[#allocation100_spill] sm:$0xff]  ;;  %v15084_v62 = vld [vmem:[#allocation107_spill] sm:$0xff] }
 0x32c   : > { %v2170_v30 = vsel %vm368_vm6, %v2043_v38, %v2045_v55  ;;  %15075 = vst [vmem:[#allocation67_spill] sm:$0xff] %v11180_v43  ;;  %v11188_v59 = vmax.f32 %v15076_v2, %v1501_v9  ;;  %v15078_v4 = vld [vmem:[#allocation56_spill] sm:$0xff]  ;;  %v15083_v9 = vld [vmem:[#allocation37_spill] sm:$0xff] }
 0x32d   : > { %v2390_v12 = vmax.f32 %v10445_v63, %v2170_v30  ;;  %v11183_v8 = vpop.permute.xlu0 %2074  ;;  %1996 = vrot.lane.b32.xlu1 %v11169_v34, %s8833_s13  ;;  %3516 = vmatprep.mubr.bf16.mxu0 %v2774_v16  ;;  %v2599_v20 = vadd.f32 %v15078_v4, %v2391_v61  ;;  %v15079_v3 = vld [vmem:[#allocation16_spill] sm:$0xff]  ;;  %v15082_v16 = vld [vmem:[#allocation47_spill] sm:$0xff] }
 0x32e   : > { %3517 = vmatmul.mubr.bf16.gmra.mxu0 %v2773_v23  ;;  %15077 = vst [vmem:[#allocation95_spill] sm:$0xff] %v11188_v59  ;;  %v11201_v42 = vmax.f32 %v15080_v22, %v15079_v3 }
 0x32f   : > { %2026 = vrot.lane.b32.xlu0 %v11180_v43, %s8833_s13  ;;  %v2059_v49 = vpop.permute.xlu1 %2058  ;;  %v2598_v38 = vadd.f32 %v15078_v4, %v2390_v12 }
 0x330   : > { %v2176_v63 = vsel %vm368_vm6, %v2057_v21, %v2059_v49  ;;  %v2177_v55 = vsel %vm368_vm6, %v2059_v49, %v11143_v10  ;;  %15081 = vst [vmem:[#allocation135_spill] sm:$0xff] %v11201_v42  ;;  %v11211_v21 = vmax.f32 %v15084_v62, %v1507_v52  ;;  %v15087_v49 = vld [vmem:[#allocation122_spill] sm:$0xff] }
 0x331   : > { %v2397_v23 = vmax.f32 %v15082_v16, %v2176_v63  ;;  %v2398_v30 = vmax.f32 %v15083_v9, %v2177_v55  ;;  %v11206_v19 = vpop.permute.xlu0 %2088  ;;  %2010 = vrot.lane.b32.xlu1 %v11188_v59, %s8833_s13  ;;  %v15088_v63 = vld [vmem:[#allocation99_spill] sm:$0xff]  ;;  %v1513_v55 = vsel %vm312_vm8, %v10574_v24, %v15079_v3  ;;  %v2711_v16 = vmax.f32 %v2599_v20, 0.0  ;;  %v15091_v3 = vld [vmem:[#allocation40_spill] sm:$0xff] }
 0x332   : > { %15085 = vst [vmem:[#allocation75_spill] sm:$0xff] %v11211_v21  ;;  %v11219_v22 = vmax.f32 %v15088_v63, %v15087_v49  ;;  %v2710_v9 = vmax.f32 %v2598_v38, 0.0  ;;  %v1519_v20 = vsel %vm312_vm8, %v10600_v56, %v15087_v49  ;;  %v15098_v49 = vld [vmem:[#allocation61_spill] sm:$0xff] }
 0x333   : > { %2040 = vrot.lane.b32.xlu0 %v11201_v42, %s8833_s13  ;;  %v2073_v61 = vpop.permute.xlu1 %2072  ;;  %v2606_v2 = vadd.f32 %v15086_v48, %v2398_v30  ;;  %v2605_v12 = vadd.f32 %v15086_v48, %v2397_v23  ;;  %v15090_v23 = vld [vmem:[#allocation112_spill] sm:$0xff] }
 0x334   : > { %15089 = vst [vmem:[#allocation105_spill] sm:$0xff] %v11219_v22  ;;  %v2183_v52 = vsel %vm368_vm6, %v2073_v61, %v11183_v8  ;;  %v11229_v42 = vmax.f32 %v15090_v23, %v1513_v55  ;;  %v15095_v55 = vld [vmem:[#allocation59_spill] sm:$0xff] }
 0x335   : > { %v2085_v62 = vpop.permute.xlu0 %2084  ;;  %2024 = vrot.lane.b32.xlu1 %v11211_v21, %s8833_s13  ;;  %v2718_v30 = vmax.f32 %v2606_v2, 0.0  ;;  %v2717_v43 = vmax.f32 %v2605_v12, 0.0  ;;  %v2405_v38 = vmax.f32 %v15091_v3, %v2183_v52  ;;  %v15092_v21 = vld [vmem:[#allocation31_spill] sm:$0xff]  ;;  %v15093_v2 = vld [vmem:[#allocation106_spill] sm:$0xff] }
 0x336   : > { %v11240_v12 = vmax.f32 %v15093_v2, %v15092_v21  ;;  %v1525_v56 = vsel %vm312_vm8, %v10620_v11, %v15092_v21  ;;  %v15103_v11 = vld [vmem:[#allocation64_spill] sm:$0xff] }
 0x337   : > { %2054 = vrot.lane.b32.xlu0 %v11219_v22, %s8833_s13  ;;  %v2071_v63 = vpop.permute.xlu1 %2070  ;;  %v2781_v59 = vpack.c.bf16 %v2718_v30, %v2711_v16  ;;  %v2780_v24 = vpack.c.bf16 %v2717_v43, %v2710_v9  ;;  %v15096_v43 = vld [vmem:[#allocation115_spill] sm:$0xff]  ;;  %v15099_v30 = vld [vmem:[#allocation28_spill] sm:$0xff] }
 0x338   : > { %v2182_v34 = vsel %vm368_vm6, %v2071_v63, %v2073_v61  ;;  %15094 = vst [vmem:[#allocation60_spill] sm:$0xff] %v11240_v12  ;;  %v11248_v16 = vmax.f32 %v15096_v43, %v1519_v20  ;;  %v15100_v63 = vld [vmem:[#allocation96_spill] sm:$0xff]  ;;  %v15102_v20 = vld [vmem:[#allocation34_spill] sm:$0xff] }
 0x339   : > { %v2404_v23 = vmax.f32 %v15095_v55, %v2182_v34  ;;  %v11243_v57 = vpop.permute.xlu0 %1882  ;;  %2038 = vrot.lane.b32.xlu1 %v11229_v42, %s8833_s13  ;;  %3526 = vmatprep.mubr.bf16.mxu0 %v2781_v59  ;;  %v2613_v59 = vadd.f32 %v15098_v49, %v2405_v38  ;;  %v15104_v55 = vld [vmem:[#allocation21_spill] sm:$0xff]  ;;  %v15106_v43 = vld [vmem:[#allocation120_spill] sm:$0xff]  ;;  %v1531_v38 = vsel %vm312_vm8, %v10679_v33, %v15099_v30 }
 0x33a   : > { %3527 = vmatmul.mubr.bf16.gmra.mxu0 %v2780_v24  ;;  %15097 = vst [vmem:[#allocation41_spill] sm:$0xff] %v11248_v16  ;;  %v11262_v24 = vmax.f32 %v15100_v63, %v15099_v30  ;;  %v15108_v22 = vld [vmem:[#allocation124_spill] sm:$0xff] }
 0x33b   : > { %2068 = vrot.lane.b32.xlu0 %v11240_v12, %s8833_s13  ;;  %v2087_v61 = vpop.permute.xlu1 %2086  ;;  %v2612_v34 = vadd.f32 %v15098_v49, %v2404_v23  ;;  %v15109_v12 = vld [vmem:[#allocation52_spill] sm:$0xff] }
 0x33c   : > { %v2188_v9 = vsel %vm368_vm6, %v2085_v62, %v2087_v61  ;;  %v2189_v52 = vsel %vm368_vm6, %v2087_v61, %v11206_v19  ;;  %15101 = vst [vmem:[#allocation132_spill] sm:$0xff] %v11262_v24  ;;  %v15105_v62 = vld [vmem:[#allocation102_spill] sm:$0xff]  ;;  %v11275_v61 = vmax.f32 %v15106_v43, %v1525_v56  ;;  %v2725_v43 = vmax.f32 %v2613_v59, 0.0 }
 0x33d   : > { %v2411_v3 = vmax.f32 %v15102_v20, %v2188_v9  ;;  %v2412_v21 = vmax.f32 %v15103_v11, %v2189_v52  ;;  %v11266_v2 = vpop.permute.xlu0 %1896  ;;  %2052 = vrot.lane.b32.xlu1 %v11248_v16, %s8833_s13  ;;  %v11272_v23 = vmax.f32 %v15105_v62, %v15104_v55  ;;  %v15107_v52 = vld [vmem:[#allocation53_spill] sm:$0xff]  ;;  %v2724_v11 = vmax.f32 %v2612_v34, 0.0 }
 0x33f   : > { %2082 = vrot.lane.b32.xlu0 %v11262_v24, %s8833_s13  ;;  %v1881_v9 = vpop.permute.xlu1 %1880  ;;  %v2620_v63 = vadd.f32 %v15107_v52, %v2412_v21  ;;  %v2619_v20 = vadd.f32 %v15107_v52, %v2411_v3  ;;  %v15110_v3 = vld [vmem:[#allocation125_spill] sm:$0xff] }
 0x340   : > { %v2100_v62 = vsel %vm368_vm6, %v10630_v54, %v1881_v9  ;;  %v2101_v56 = vsel %vm368_vm6, %v1881_v9, %v11243_v57  ;;  %v11295_v34 = vmax.f32 %v15110_v3, %v1531_v38  ;;  %v1537_v54 = vsel %vm312_vm8, %v10727_v50, %v15104_v55  ;;  %v15113_v3 = vld [vmem:[#allocation58_spill] sm:$0xff] }
 0x341   : > { %v2308_v16 = vmax.f32 %v15108_v22, %v2100_v62  ;;  %v2309_v33 = vmax.f32 %v15109_v12, %v2101_v56  ;;  %v11290_v30 = vpop.permute.xlu0 %1910  ;;  %2066 = vrot.lane.b32.xlu1 %v11275_v61, %s8833_s13  ;;  %v2732_v21 = vmax.f32 %v2620_v63, 0.0  ;;  %v2731_v24 = vmax.f32 %v2619_v20, 0.0  ;;  %v15112_v20 = vld [vmem:[#allocation127_spill] sm:$0xff] }
 0x342   : > { %15111 = vst [vmem:[#allocation69_spill] sm:$0xff] %v11295_v34 }
 0x343   : > { %2096 = vrot.lane.b32.xlu0 %v11272_v23, %s8833_s13  ;;  %v1895_v22 = vpop.permute.xlu1 %1894  ;;  %v2788_v59 = vpack.c.bf16 %v2732_v21, %v2725_v43  ;;  %v2787_v12 = vpack.c.bf16 %v2731_v24, %v2724_v11  ;;  %v2516_v9 = vadd.f32 %v14975_v40, %v2308_v16  ;;  %v2517_v38 = vadd.f32 %v14975_v40, %v2309_v33  ;;  %v15114_v16 = vld [vmem:[#allocation129_spill] sm:$0xff] }
 0x344   : > { %v2106_v62 = vsel %vm368_vm6, %v10666_v14, %v1895_v22  ;;  %v2107_v63 = vsel %vm368_vm6, %v1895_v22, %v11266_v2  ;;  %v11315_v24 = vmax.f32 %v15114_v16, %v1537_v54 }
 0x345   : > { %v2315_v56 = vmax.f32 %v15112_v20, %v2106_v62  ;;  %v2316_v50 = vmax.f32 %v15113_v3, %v2107_v63  ;;  %v11310_v55 = vpop.permute.xlu0 %1924  ;;  %2080 = vrot.lane.b32.xlu1 %v11295_v34, %s8833_s13  ;;  %3536 = vmatprep.mubr.bf16.mxu0 %v2788_v59  ;;  %v2628_v33 = vmax.f32 %v2516_v9, 0.0  ;;  %v2629_v62 = vmax.f32 %v2517_v38, 0.0  ;;  %v15116_v20 = vld [vmem:[#allocation128_spill] sm:$0xff] }
 0x346   : > { %3537 = vmatmul.mubr.bf16.gmra.mxu0 %v2787_v12  ;;  %15115 = vst [vmem:[#allocation88_spill] sm:$0xff] %v11315_v24  ;;  %v15117_v12 = vld [vmem:[#allocation65_spill] sm:$0xff] }
 0x347   : > { %v2523_v14 = vadd.f32 %v14977_v26, %v2315_v56  ;;  %v1909_v11 = vpop.permute.xlu1 %1908  ;;  %v2524_v43 = vadd.f32 %v14977_v26, %v2316_v50 }
 0x348   : > { %v2112_v21 = vsel %vm368_vm6, %v10716_v45, %v1909_v11  ;;  %v2113_v22 = vsel %vm368_vm6, %v1909_v11, %v11290_v30 }
 0x349   : > { %v2635_v63 = vmax.f32 %v2523_v14, 0.0  ;;  %v2322_v59 = vmax.f32 %v15116_v20, %v2112_v21  ;;  %v2323_v3 = vmax.f32 %v15117_v12, %v2113_v22  ;;  %v11325_v54 = vpop.permute.xlu0 %1938  ;;  %2094 = vrot.lane.b32.xlu1 %v11315_v24, %s8833_s13  ;;  %v2636_v56 = vmax.f32 %v2524_v43, 0.0  ;;  %v8588_v21 = vld [vmem:[%s14424_s3 + $0x314] ss:$8 sps:$4 sm:$0xff]   ;;  %v15118_v22 = vld [vmem:[#allocation130_spill] sm:$0xff]  ;;  %s8841_s13 = smov 95  }
 0x34a   : > { %v15119_v43 = vld [vmem:[#allocation2_spill] sm:$0xff] }
 0x34b   : > { %v2740_v50 = vpack.c.bf16 %v2635_v63, %v2628_v33  ;;  %v1923_v9 = vpop.permute.xlu1 %1922  ;;  %v2741_v16 = vpack.c.bf16 %v2636_v56, %v2629_v62  ;;  %v2531_v14 = vadd.f32 %v14989_v25, %v2323_v3  ;;  %v2530_v11 = vadd.f32 %v14989_v25, %v2322_v59  ;;  %v8586_v59 = vld [vmem:[%s14424_s3 + $0x310] ss:$8 sps:$4 sm:$0xff]  }
 0x34c   : > { %v2118_v45 = vsel %vm368_vm6, %v10736_v32, %v1923_v9  ;;  %v2119_v38 = vsel %vm368_vm6, %v1923_v9, %v11310_v55 }
 0x34d   : > { %v2329_v20 = vmax.f32 %v15118_v22, %v2118_v45  ;;  %v2330_v33 = vmax.f32 %v15119_v43, %v2119_v38  ;;  %v11340_v63 = vpop.permute.xlu0 %1952  ;;  %3579 = vmatprep.mubr.bf16.mxu1 %v2741_v16  ;;  %v2643_v9 = vmax.f32 %v2531_v14, 0.0  ;;  %v2642_v16 = vmax.f32 %v2530_v11, 0.0  ;;  %v15120_v45 = vld [vmem:[#allocation131_spill] sm:$0xff] }
 0x34e   : > { %3580 = vmatmul.mubr.bf16.vlgmr.msra.gmra.mxu1 %v2740_v50  ;;  %v8594_v50 = vld [vmem:[%s14424_s3 + $0x304] ss:$8 sps:$4 sm:$0xff]   ;;  %v8592_v14 = vld [vmem:[%s14424_s3 + $0x300] ss:$8 sps:$4 sm:$0xff]  }
 0x34f   : > { %v1937_v32 = vpop.permute.xlu1 %1936  ;;  %v2538_v62 = vadd.f32 %v14991_v31, %v2330_v33  ;;  %v2537_v12 = vadd.f32 %v14991_v31, %v2329_v20  ;;  %3784 = vmatpush1.bf16.msra.mxu1 %v10921_v7  ;;  %v15121_v7 = vld [vmem:[#allocation3_spill] sm:$0xff] }
 0x350   : > { %v2124_v3 = vsel %vm368_vm6, %v10790_v18, %v1937_v32  ;;  %v2125_v56 = vsel %vm368_vm6, %v1937_v32, %v11325_v54  ;;  %3785 = vmatprep.subr.bf16.mxu1 %v8588_v21 }
 0x351   : > { %v2336_v38 = vmax.f32 %v15120_v45, %v2124_v3  ;;  %v2337_v22 = vmax.f32 %v15121_v7, %v2125_v56  ;;  %v11357_v20 = vpop.permute.xlu0 %1966  ;;  %v2650_v43 = vmax.f32 %v2538_v62, 0.0  ;;  %v2649_v33 = vmax.f32 %v2537_v12, 0.0  ;;  %v15122_v62 = vld [vmem:[#allocation133_spill] sm:$0xff]  ;;  %v15123_v56 = vld [vmem:[#allocation4_spill] sm:$0xff] }
 0x353   : > { %v1951_v24 = vpop.permute.xlu1 %1950  ;;  %v2748_v18 = vpack.c.bf16 %v2650_v43, %v2643_v9  ;;  %v2747_v34 = vpack.c.bf16 %v2649_v33, %v2642_v16  ;;  %3786 = vmatpush1.bf16.msra.mxu1 %v8586_v59  ;;  %v2545_v32 = vadd.f32 %v15001_v17, %v2337_v22  ;;  %v2544_v3 = vadd.f32 %v15001_v17, %v2336_v38  ;;  %v15124_v22 = vld [vmem:[#allocation137_spill] sm:$0xff] }
 0x354   : > { %v2130_v11 = vsel %vm368_vm6, %v10820_v58, %v1951_v24  ;;  %v2131_v21 = vsel %vm368_vm6, %v1951_v24, %v11340_v63  ;;  %3787 = vmatprep.subr.bf16.mxu1 %v8594_v50  ;;  %v15125_v33 = vld [vmem:[#allocation5_spill] sm:$0xff] }
 0x355   : > { %v2343_v12 = vmax.f32 %v15122_v62, %v2130_v11  ;;  %v2344_v9 = vmax.f32 %v15123_v56, %v2131_v21  ;;  %v11370_v59 = vpop.permute.xlu0 %1980  ;;  %3589 = vmatprep.mubr.bf16.mxu1 %v2748_v18  ;;  %v2657_v38 = vmax.f32 %v2545_v32, 0.0  ;;  %v2656_v7 = vmax.f32 %v2544_v3, 0.0 }
 0x356   : > { %3590 = vmatmul.mubr.bf16.gmra.mxu1 %v2747_v34 }
 0x357   : > { %v1965_v16 = vpop.permute.xlu1 %1964  ;;  %v2552_v45 = vadd.f32 %v15004_v0, %v2344_v9  ;;  %v2551_v58 = vadd.f32 %v15004_v0, %v2343_v12  ;;  %3788 = vmatpush1.bf16.msra.mxu1 %v8592_v14  ;;  %v15126_v9 = vld [vmem:[#allocation14_spill] sm:$0xff] }
 0x358   : > { %v2136_v24 = vsel %vm368_vm6, %v10874_v39, %v1965_v16  ;;  %v2137_v50 = vsel %vm368_vm6, %v1965_v16, %v11357_v20 }
 0x359   : > { %v2350_v43 = vmax.f32 %v15124_v22, %v2136_v24  ;;  %v2351_v11 = vmax.f32 %v15125_v33, %v2137_v50  ;;  %v11380_v18 = vpop.permute.xlu0 %1994  ;;  %v2664_v34 = vmax.f32 %v2552_v45, 0.0  ;;  %v2663_v21 = vmax.f32 %v2551_v58, 0.0  ;;  %v15127_v33 = vld [vmem:[#allocation104_spill] sm:$0xff] }
 0x35b   : > { %v1979_v62 = vpop.permute.xlu1 %1978  ;;  %v2755_v56 = vpack.c.bf16 %v2664_v34, %v2657_v38  ;;  %v2754_v12 = vpack.c.bf16 %v2663_v21, %v2656_v7  ;;  %v2559_v32 = vadd.f32 %v15017_v6, %v2351_v11  ;;  %v2558_v3 = vadd.f32 %v15017_v6, %v2350_v43 }
 0x35c   : > { %v2142_v14 = vsel %vm368_vm6, %v10906_v53, %v1979_v62  ;;  %v2143_v39 = vsel %vm368_vm6, %v1979_v62, %v11370_v59 }
 0x35d   : > { %v2357_v16 = vmax.f32 %v15126_v9, %v2142_v14  ;;  %v2358_v24 = vmax.f32 %v10722_v36, %v2143_v39  ;;  %v11390_v50 = vpop.permute.xlu0 %2008  ;;  %3599 = vmatprep.mubr.bf16.mxu1 %v2755_v56  ;;  %v2671_v22 = vmax.f32 %v2559_v32, 0.0  ;;  %v2670_v43 = vmax.f32 %v2558_v3, 0.0  ;;  %v15128_v9 = vld [vmem:[#allocation101_spill] sm:$0xff] }
 0x35e   : > { %3600 = vmatmul.mubr.bf16.gmra.mxu1 %v2754_v12 }
 0x35f   : > { %v1993_v45 = vpop.permute.xlu1 %1992  ;;  %v2566_v58 = vadd.f32 %v15025_v46, %v2358_v24  ;;  %v2565_v53 = vadd.f32 %v15025_v46, %v2357_v16 }
 0x360   : > { %v2148_v38 = vsel %vm368_vm6, %v10958_v28, %v1993_v45  ;;  %v2149_v7 = vsel %vm368_vm6, %v1993_v45, %v11380_v18 }
 0x361   : > { %v2364_v11 = vmax.f32 %v15127_v33, %v2148_v38  ;;  %v2365_v36 = vmax.f32 %v10744_v35, %v2149_v7  ;;  %v11400_v34 = vpop.permute.xlu0 %2022  ;;  %v2678_v21 = vmax.f32 %v2566_v58, 0.0  ;;  %v2677_v62 = vmax.f32 %v2565_v53, 0.0 }
 0x363   : > { %v2007_v56 = vpop.permute.xlu1 %2006  ;;  %v2762_v12 = vpack.c.bf16 %v2678_v21, %v2671_v22  ;;  %v2761_v14 = vpack.c.bf16 %v2677_v62, %v2670_v43  ;;  %v2573_v32 = vadd.f32 %v15038_v1, %v2365_v36  ;;  %v2572_v3 = vadd.f32 %v15038_v1, %v2364_v11  ;;  %v15129_v43 = vld [vmem:[#allocation98_spill] sm:$0xff] }
 0x364   : > { %v2154_v39 = vsel %vm368_vm6, %v10987_v60, %v2007_v56  ;;  %v2155_v28 = vsel %vm368_vm6, %v2007_v56, %v11390_v50 }
 0x365   : > { %v2371_v16 = vmax.f32 %v15128_v9, %v2154_v39  ;;  %v2372_v35 = vmax.f32 %v10768_v5, %v2155_v28  ;;  %v11410_v24 = vpop.permute.xlu0 %2036  ;;  %3609 = vmatprep.mubr.bf16.mxu1 %v2762_v12  ;;  %v2685_v7 = vmax.f32 %v2573_v32, 0.0  ;;  %v2684_v22 = vmax.f32 %v2572_v3, 0.0  ;;  %v15130_v32 = vld [vmem:[#allocation33_spill] sm:$0xff] }
 0x366   : > { %3610 = vmatmul.mubr.bf16.gmra.mxu1 %v2761_v14 }
 0x367   : > { %v2021_v45 = vpop.permute.xlu1 %2020  ;;  %v2580_v58 = vadd.f32 %v15046_v29, %v2372_v35  ;;  %v2579_v60 = vadd.f32 %v15046_v29, %v2371_v16 }
 0x368   : > { %v2160_v53 = vsel %vm368_vm6, %v11036_v37, %v2021_v45  ;;  %v2161_v38 = vsel %vm368_vm6, %v2021_v45, %v11400_v34 }
 0x369   : > { %v2378_v33 = vmax.f32 %v15129_v43, %v2160_v53  ;;  %v2379_v5 = vmax.f32 %v10795_v27, %v2161_v38  ;;  %v11420_v11 = vpop.permute.xlu0 %2050  ;;  %v2692_v36 = vmax.f32 %v2580_v58, 0.0  ;;  %v2691_v21 = vmax.f32 %v2579_v60, 0.0  ;;  %v15131_v38 = vld [vmem:[#allocation24_spill] sm:$0xff] }
 0x36b   : > { %v2035_v62 = vpop.permute.xlu1 %2034  ;;  %v2769_v56 = vpack.c.bf16 %v2692_v36, %v2685_v7  ;;  %v2768_v12 = vpack.c.bf16 %v2691_v21, %v2684_v22  ;;  %v2587_v39 = vadd.f32 %v15059_v47, %v2379_v5  ;;  %v2586_v28 = vadd.f32 %v15059_v47, %v2378_v33 }
 0x36c   : > { %v2166_v14 = vsel %vm368_vm6, %v11065_v51, %v2035_v62  ;;  %v2167_v37 = vsel %vm368_vm6, %v2035_v62, %v11410_v24 }
 0x36d   : > { %v2385_v3 = vmax.f32 %v15130_v32, %v2166_v14  ;;  %v2386_v27 = vmax.f32 %v10826_v15, %v2167_v37  ;;  %v11430_v9 = vpop.permute.xlu0 %2064  ;;  %3619 = vmatprep.mubr.bf16.mxu1 %v2769_v56  ;;  %v2699_v60 = vmax.f32 %v2587_v39, 0.0  ;;  %v2698_v53 = vmax.f32 %v2586_v28, 0.0  ;;  %v15132_v14 = vld [vmem:[#allocation123_spill] sm:$0xff] }
 0x36e   : > { %3620 = vmatmul.mubr.bf16.gmra.mxu1 %v2768_v12 }
 0x36f   : > { %v2049_v16 = vpop.permute.xlu1 %2048  ;;  %v2594_v35 = vadd.f32 %v15067_v41, %v2386_v27  ;;  %v2593_v51 = vadd.f32 %v15067_v41, %v2385_v3 }
 0x370   : > { %v2172_v45 = vsel %vm368_vm6, %v11114_v44, %v2049_v16  ;;  %v2173_v58 = vsel %vm368_vm6, %v2049_v16, %v11420_v11 }
 0x371   : > { %v2392_v7 = vmax.f32 %v15131_v38, %v2172_v45  ;;  %v2393_v15 = vmax.f32 %v10849_v13, %v2173_v58  ;;  %v11440_v22 = vpop.permute.xlu0 %2078  ;;  %v2706_v43 = vmax.f32 %v2594_v35, 0.0  ;;  %v2705_v33 = vmax.f32 %v2593_v51, 0.0  ;;  %v15133_v13 = vld [vmem:[#allocation17_spill] sm:$0xff]  ;;  %v15134_v45 = vld [vmem:[#allocation54_spill] sm:$0xff] }
 0x373   : > { %v2063_v5 = vpop.permute.xlu1 %2062  ;;  %v2776_v36 = vpack.c.bf16 %v2706_v43, %v2699_v60  ;;  %v2775_v21 = vpack.c.bf16 %v2705_v33, %v2698_v53  ;;  %v2601_v56 = vadd.f32 %v15078_v4, %v2393_v15  ;;  %v2600_v12 = vadd.f32 %v15078_v4, %v2392_v7  ;;  %v15135_v60 = vld [vmem:[#allocation25_spill] sm:$0xff] }
 0x374   : > { %v2178_v62 = vsel %vm368_vm6, %v11143_v10, %v2063_v5  ;;  %v2179_v44 = vsel %vm368_vm6, %v2063_v5, %v11430_v9 }
 0x375   : > { %v2399_v37 = vmax.f32 %v15132_v14, %v2178_v62  ;;  %v2400_v39 = vmax.f32 %v15133_v13, %v2179_v44  ;;  %v11450_v28 = vpop.permute.xlu0 %2092  ;;  %3629 = vmatprep.mubr.bf16.mxu1 %v2776_v36  ;;  %v2713_v35 = vmax.f32 %v2601_v56, 0.0  ;;  %v2712_v51 = vmax.f32 %v2600_v12, 0.0  ;;  %v15136_v44 = vld [vmem:[#allocation119_spill] sm:$0xff]  ;;  %v15138_v13 = vld [vmem:[#allocation97_spill] sm:$0xff] }
 0x376   : > { %3630 = vmatmul.mubr.bf16.gmra.mxu1 %v2775_v21  ;;  %v15137_v12 = vld [vmem:[#allocation23_spill] sm:$0xff] }
 0x377   : > { %v2077_v32 = vpop.permute.xlu1 %2076  ;;  %v2608_v3 = vadd.f32 %v15086_v48, %v2400_v39  ;;  %v2607_v10 = vadd.f32 %v15086_v48, %v2399_v37 }
 0x378   : > { %v2184_v27 = vsel %vm368_vm6, %v11183_v8, %v2077_v32  ;;  %v2185_v16 = vsel %vm368_vm6, %v2077_v32, %v11440_v22  ;;  %v15139_v32 = vld [vmem:[#allocation103_spill] sm:$0xff] }
 0x379   : > { %v2406_v58 = vmax.f32 %v15134_v45, %v2184_v27  ;;  %v2407_v53 = vmax.f32 %v15135_v60, %v2185_v16  ;;  %v1887_v38 = vpop.permute.xlu0 %1886  ;;  %v2720_v7 = vmax.f32 %v2608_v3, 0.0  ;;  %v2719_v15 = vmax.f32 %v2607_v10, 0.0 }
 0x37a   : > { %v2312_v39 = vmax.f32 %v15138_v13, %v1887_v38  ;;  %v15143_v13 = vld [vmem:[#allocation36_spill] sm:$0xff] }
 0x37b   : > { %v2091_v43 = vpop.permute.xlu1 %2090  ;;  %v2783_v33 = vpack.c.bf16 %v2720_v7, %v2713_v35  ;;  %v2782_v5 = vpack.c.bf16 %v2719_v15, %v2712_v51  ;;  %v2615_v21 = vadd.f32 %v15098_v49, %v2407_v53  ;;  %v2614_v62 = vadd.f32 %v15098_v49, %v2406_v58  ;;  %v15140_v58 = vld [vmem:[#allocation43_spill] sm:$0xff]  ;;  %v15141_v53 = vld [vmem:[#allocation30_spill] sm:$0xff] }
 0x37c   : > { %v2190_v36 = vsel %vm368_vm6, %v11206_v19, %v2091_v43  ;;  %v2191_v8 = vsel %vm368_vm6, %v2091_v43, %v11450_v28 }
 0x37d   : > { %v2413_v56 = vmax.f32 %v15136_v44, %v2190_v36  ;;  %v2414_v14 = vmax.f32 %v15137_v12, %v2191_v8  ;;  %v1901_v37 = vpop.permute.xlu0 %1900  ;;  %3639 = vmatprep.mubr.bf16.mxu1 %v2783_v33  ;;  %v2727_v51 = vmax.f32 %v2615_v21, 0.0  ;;  %v2726_v45 = vmax.f32 %v2614_v62, 0.0  ;;  %v15142_v12 = vld [vmem:[#allocation49_spill] sm:$0xff] }
 0x37e   : > { %3640 = vmatmul.mubr.bf16.gmra.mxu1 %v2782_v5  ;;  %v2319_v3 = vmax.f32 %v15139_v32, %v1901_v37  ;;  %v2520_v5 = vadd.f32 %v14975_v40, %v2312_v39 }
 0x37f   : > { %v1885_v10 = vpop.permute.xlu1 %1884  ;;  %v2622_v19 = vadd.f32 %v15107_v52, %v2414_v14  ;;  %v2621_v27 = vadd.f32 %v15107_v52, %v2413_v56 }
 0x380   : > { %v2102_v16 = vsel %vm368_vm6, %v11243_v57, %v1885_v10  ;;  %v2103_v35 = vsel %vm368_vm6, %v1885_v10, %v1887_v38  ;;  %v2527_v36 = vadd.f32 %v14977_v26, %v2319_v3  ;;  %v2632_v39 = vmax.f32 %v2520_v5, 0.0  ;;  %v15144_v3 = vld [vmem:[#allocation109_spill] sm:$0xff] }
 0x381   : > { %v2310_v60 = vmax.f32 %v15140_v58, %v2102_v16  ;;  %v2311_v7 = vmax.f32 %v15141_v53, %v2103_v35  ;;  %v1915_v15 = vpop.permute.xlu0 %1914  ;;  %v2734_v43 = vmax.f32 %v2622_v19, 0.0  ;;  %v2733_v33 = vmax.f32 %v2621_v27, 0.0  ;;  %v15145_v35 = vld [vmem:[#allocation114_spill] sm:$0xff]  ;;  %v15148_v5 = vld [vmem:[#allocation29_spill] sm:$0xff] }
 0x382   : > { %v2326_v19 = vmax.f32 %v15144_v3, %v1915_v15  ;;  %v2639_v27 = vmax.f32 %v2527_v36, 0.0  ;;  %v15150_v3 = vld [vmem:[#allocation22_spill] sm:$0xff] }
 0x383   : > { %v1899_v8 = vpop.permute.xlu1 %1898  ;;  %v2790_v44 = vpack.c.bf16 %v2734_v43, %v2727_v51  ;;  %v2789_v56 = vpack.c.bf16 %v2733_v33, %v2726_v45  ;;  %v2518_v57 = vadd.f32 %v14975_v40, %v2310_v60  ;;  %v2519_v62 = vadd.f32 %v14975_v40, %v2311_v7  ;;  %v15147_v43 = vld [vmem:[#allocation45_spill] sm:$0xff] }
 0x384   : > { %v2108_v38 = vsel %vm368_vm6, %v11266_v2, %v1899_v8  ;;  %v2109_v21 = vsel %vm368_vm6, %v1899_v8, %v1901_v37  ;;  %v15146_v45 = vmov 0  }
 0x385   : > { %v2317_v14 = vmax.f32 %v15142_v12, %v2108_v38  ;;  %v2318_v32 = vmax.f32 %v15143_v13, %v2109_v21  ;;  %v1929_v10 = vpop.permute.xlu0 %1928  ;;  %3649 = vmatprep.mubr.bf16.mxu1 %v2790_v44  ;;  %v2630_v40 = vmax.f32 %v2518_v57, 0.0  ;;  %v2631_v53 = vmax.f32 %v2519_v62, 0.0  ;;  %v15149_v13 = vld [vmem:[#allocation55_spill] sm:$0xff] }
 0x386   : > { %3650 = vmatmul.mubr.bf16.gmra.mxu1 %v2789_v56  ;;  %v2333_v51 = vmax.f32 %v15145_v35, %v1929_v10  ;;  %v2534_v56 = vadd.f32 %v14989_v25, %v2326_v19 }
 0x387   : > { %v2525_v16 = vadd.f32 %v14977_v26, %v2317_v14  ;;  %v1913_v2 = vpop.permute.xlu1 %1912  ;;  %v2526_v37 = vadd.f32 %v14977_v26, %v2318_v32  ;;  %3805 = vmatprep.mubr.bf16.mxu1 %v15146_v45  ;;  %v2744_v26 = vpack.c.bf16 %v2639_v27, %v2632_v39  ;;  %v15151_v27 = vld [vmem:[#allocation44_spill] sm:$0xff] }
 0x388   : > { %v2114_v58 = vsel %vm368_vm6, %v11290_v30, %v1913_v2  ;;  %v2115_v60 = vsel %vm368_vm6, %v1913_v2, %v1915_v15  ;;  %v2541_v57 = vadd.f32 %v14991_v31, %v2333_v51  ;;  %v2646_v39 = vmax.f32 %v2534_v56, 0.0 }
 0x389   : > { %v2637_v7 = vmax.f32 %v2525_v16, 0.0  ;;  %v2324_v33 = vmax.f32 %v15147_v43, %v2114_v58  ;;  %v2325_v36 = vmax.f32 %v15148_v5, %v2115_v60  ;;  %v1943_v8 = vpop.permute.xlu0 %1942  ;;  %v2638_v44 = vmax.f32 %v2526_v37, 0.0 }
 0x38a   : > { %v2340_v35 = vmax.f32 %v15151_v27, %v1943_v8  ;;  %v2653_v51 = vmax.f32 %v2541_v57, 0.0  ;;  %v15157_v27 = vld [vmem:[#allocation121_spill] sm:$0xff] }
 0x38b   : > { %v2742_v38 = vpack.c.bf16 %v2637_v7, %v2630_v40  ;;  %v1927_v21 = vpop.permute.xlu1 %1926  ;;  %v2743_v12 = vpack.c.bf16 %v2638_v44, %v2631_v53  ;;  %v2533_v62 = vadd.f32 %v14989_v25, %v2325_v36  ;;  %v2532_v14 = vadd.f32 %v14989_v25, %v2324_v33  ;;  %v15153_v7 = vld [vmem:[#allocation63_spill] sm:$0xff]  ;;  %v15154_v33 = vld [vmem:[#allocation50_spill] sm:$0xff] }
 0x38c   : > { %v2120_v30 = vsel %vm368_vm6, %v11310_v55, %v1927_v21  ;;  %v2121_v15 = vsel %vm368_vm6, %v1927_v21, %v1929_v10  ;;  %v15152_v55 = vld [vmem:[#allocation118_spill] sm:$0xff] }
 0x38d   : > { %v2331_v32 = vmax.f32 %v15149_v13, %v2120_v30  ;;  %v2332_v19 = vmax.f32 %v15150_v3, %v2121_v15  ;;  %v1957_v16 = vpop.permute.xlu0 %1956  ;;  %3692 = vmatprep.mubr.bf16.mxu0 %v2743_v12  ;;  %v2645_v60 = vmax.f32 %v2533_v62, 0.0  ;;  %v2644_v53 = vmax.f32 %v2532_v14, 0.0  ;;  %v15155_v62 = vld [vmem:[#allocation68_spill] sm:$0xff]  ;;  %v15156_v13 = vld [vmem:[#allocation57_spill] sm:$0xff] }
 0x38e   : > { %3693 = vmatmul.mubr.bf16.vlgmr.msra.gmra.mxu0 %v2742_v38  ;;  %7986 = vmatmul.mubr.msk.bf16.vlgmr.msra.gmra.mxu1 %vm3400_vm11, %v2744_v26  ;;  %v2347_v2 = vmax.f32 %v15152_v55, %v1957_v16  ;;  %v2548_v26 = vadd.f32 %v15001_v17, %v2340_v35  ;;  %v2751_v12 = vpack.c.bf16 %v2653_v51, %v2646_v39 }
 0x38f   : > { %v1941_v10 = vpop.permute.xlu1 %1940  ;;  %v2540_v37 = vadd.f32 %v14991_v31, %v2332_v19  ;;  %3815 = vmatprep.mubr.bf16.mxu1 %v15146_v45  ;;  %v2539_v25 = vadd.f32 %v14991_v31, %v2331_v32 }
 0x390   : > { %v2126_v40 = vsel %vm368_vm6, %v11325_v54, %v1941_v10  ;;  %v2127_v58 = vsel %vm368_vm6, %v1941_v10, %v1943_v8  ;;  %v2555_v38 = vadd.f32 %v15004_v0, %v2347_v2  ;;  %v2660_v19 = vmax.f32 %v2548_v26, 0.0 }
 0x391   : > { %v2338_v43 = vmax.f32 %v15153_v7, %v2126_v40  ;;  %v2339_v5 = vmax.f32 %v15154_v33, %v2127_v58  ;;  %v1971_v36 = vpop.permute.xlu0 %1970  ;;  %v2652_v44 = vmax.f32 %v2540_v37, 0.0  ;;  %v2651_v56 = vmax.f32 %v2539_v25, 0.0  ;;  %v15159_v40 = vld [vmem:[#allocation72_spill] sm:$0xff] }
 0x392   : > { %v2354_v35 = vmax.f32 %v15157_v27, %v1971_v36  ;;  %v2667_v39 = vmax.f32 %v2555_v38, 0.0 }
 0x393   : > { %v1955_v57 = vpop.permute.xlu1 %1954  ;;  %v2750_v31 = vpack.c.bf16 %v2652_v44, %v2645_v60  ;;  %v2749_v21 = vpack.c.bf16 %v2651_v56, %v2644_v53  ;;  %v2547_v30 = vadd.f32 %v15001_v17, %v2339_v5  ;;  %v2546_v15 = vadd.f32 %v15001_v17, %v2338_v43  ;;  %v15160_v60 = vld [vmem:[#allocation35_spill] sm:$0xff] }
 0x394   : > { %v2132_v54 = vsel %vm368_vm6, %v11340_v63, %v1955_v57  ;;  %v2133_v8 = vsel %vm368_vm6, %v1955_v57, %v1957_v16  ;;  %v15158_v63 = vld [vmem:[#allocation126_spill] sm:$0xff]  ;;  %v2562_v5 = vadd.f32 %v15017_v6, %v2354_v35  ;;  %v2758_v38 = vpack.c.bf16 %v2667_v39, %v2660_v19 }
 0x395   : > { %v2345_v14 = vmax.f32 %v15155_v62, %v2132_v54  ;;  %v2346_v32 = vmax.f32 %v15156_v13, %v2133_v8  ;;  %v1985_v3 = vpop.permute.xlu0 %1984  ;;  %3702 = vmatprep.mubr.bf16.mxu0 %v2750_v31  ;;  %v2659_v37 = vmax.f32 %v2547_v30, 0.0  ;;  %v2658_v25 = vmax.f32 %v2546_v15, 0.0  ;;  %v15162_v54 = vld [vmem:[#allocation27_spill] sm:$0xff]  ;;  %v15163_v62 = vld [vmem:[#allocation62_spill] sm:$0xff] }
 0x396   : > { %3703 = vmatmul.mubr.bf16.gmra.mxu0 %v2749_v21  ;;  %7987 = vmatmul.mubr.msk.bf16.gmra.mxu1 %vm3400_vm11, %v2751_v12  ;;  %v2361_v51 = vmax.f32 %v15158_v63, %v1985_v3  ;;  %v15161_v21 = vld [vmem:[#allocation76_spill] sm:$0xff]  ;;  %v2674_v15 = vmax.f32 %v2562_v5, 0.0  ;;  %v15167_v5 = vld [vmem:[#allocation6_spill] sm:$0xff] }
 0x397   : > { %v1969_v16 = vpop.permute.xlu1 %1968  ;;  %v2554_v55 = vadd.f32 %v15004_v0, %v2346_v32  ;;  %3825 = vmatprep.mubr.bf16.mxu1 %v15146_v45  ;;  %v2553_v17 = vadd.f32 %v15004_v0, %v2345_v14 }
 0x398   : > { %v2138_v2 = vsel %vm368_vm6, %v11357_v20, %v1969_v16  ;;  %v2139_v10 = vsel %vm368_vm6, %v1969_v16, %v1971_v36  ;;  %v2569_v44 = vadd.f32 %v15025_v46, %v2361_v51  ;;  %v15165_v51 = vld [vmem:[#allocation80_spill] sm:$0xff] }
 0x399   : > { %v2352_v58 = vmax.f32 %v15159_v40, %v2138_v2  ;;  %v2353_v53 = vmax.f32 %v15160_v60, %v2139_v10  ;;  %v1999_v7 = vpop.permute.xlu0 %1998  ;;  %v2666_v43 = vmax.f32 %v2554_v55, 0.0  ;;  %v2665_v33 = vmax.f32 %v2553_v17, 0.0  ;;  %v15166_v55 = vld [vmem:[#allocation71_spill] sm:$0xff] }
 0x39a   : > { %v2368_v14 = vmax.f32 %v15163_v62, %v1999_v7  ;;  %v2681_v13 = vmax.f32 %v2569_v44, 0.0 }
 0x39b   : > { %v1983_v56 = vpop.permute.xlu1 %1982  ;;  %v2757_v0 = vpack.c.bf16 %v2666_v43, %v2659_v37  ;;  %v2756_v26 = vpack.c.bf16 %v2665_v33, %v2658_v25  ;;  %v2561_v57 = vadd.f32 %v15017_v6, %v2353_v53  ;;  %v2560_v31 = vadd.f32 %v15017_v6, %v2352_v58 }
 0x39c   : > { %v2144_v20 = vsel %vm368_vm6, %v11370_v59, %v1983_v56  ;;  %v2145_v36 = vsel %vm368_vm6, %v1983_v56, %v1985_v3  ;;  %v15164_v59 = vld [vmem:[#allocation136_spill] sm:$0xff]  ;;  %v2576_v25 = vadd.f32 %v15038_v1, %v2368_v14  ;;  %v2765_v53 = vpack.c.bf16 %v2681_v13, %v2674_v15  ;;  %v15168_v56 = vld [vmem:[#allocation95_spill] sm:$0xff] }
 0x39d   : > { %v2359_v12 = vmax.f32 %v15161_v21, %v2144_v20  ;;  %v2360_v8 = vmax.f32 %v15162_v54, %v2145_v36  ;;  %v2013_v30 = vpop.permute.xlu0 %2012  ;;  %3712 = vmatprep.mubr.bf16.mxu0 %v2757_v0  ;;  %v2673_v39 = vmax.f32 %v2561_v57, 0.0  ;;  %v2672_v63 = vmax.f32 %v2560_v31, 0.0  ;;  %v15169_v57 = vld [vmem:[#allocation135_spill] sm:$0xff] }
 0x39e   : > { %3713 = vmatmul.mubr.bf16.gmra.mxu0 %v2756_v26  ;;  %7988 = vmatmul.mubr.msk.bf16.gmra.mxu1 %vm3400_vm11, %v2758_v38  ;;  %v2375_v32 = vmax.f32 %v15164_v59, %v2013_v30  ;;  %v2688_v38 = vmax.f32 %v2576_v25, 0.0  ;;  %v15170_v15 = vld [vmem:[#allocation83_spill] sm:$0xff] }
 0x39f   : > { %v1997_v3 = vpop.permute.xlu1 %1996  ;;  %v2568_v19 = vadd.f32 %v15025_v46, %v2360_v8  ;;  %3835 = vmatprep.mubr.bf16.mxu1 %v15146_v45  ;;  %v2567_v6 = vadd.f32 %v15025_v46, %v2359_v12  ;;  %v15171_v14 = vld [vmem:[#allocation75_spill] sm:$0xff] }
 0x3a0   : > { %v2150_v27 = vsel %vm368_vm6, %v11380_v18, %v1997_v3  ;;  %v2151_v35 = vsel %vm368_vm6, %v1997_v3, %v1999_v7  ;;  %v2583_v40 = vadd.f32 %v15046_v29, %v2375_v32  ;;  %v15172_v3 = vld [vmem:[#allocation67_spill] sm:$0xff] }
 0x3a1   : > { %v2366_v16 = vmax.f32 %v15165_v51, %v2150_v27  ;;  %v2367_v17 = vmax.f32 %v15166_v55, %v2151_v35  ;;  %v2027_v2 = vpop.permute.xlu0 %2026  ;;  %v2680_v10 = vmax.f32 %v2568_v19, 0.0  ;;  %v2679_v37 = vmax.f32 %v2567_v6, 0.0  ;;  %v15173_v55 = vld [vmem:[#allocation9_spill] sm:$0xff] }
 0x3a2   : > { %v2695_v20 = vmax.f32 %v2583_v40, 0.0  ;;  %v2382_v19 = vmax.f32 %v15172_v3, %v2027_v2 }
 0x3a3   : > { %v2011_v58 = vpop.permute.xlu1 %2010  ;;  %v2764_v46 = vpack.c.bf16 %v2680_v10, %v2673_v39  ;;  %v2763_v60 = vpack.c.bf16 %v2679_v37, %v2672_v63  ;;  %v2574_v18 = vadd.f32 %v15038_v1, %v2366_v16  ;;  %v2575_v33 = vadd.f32 %v15038_v1, %v2367_v17 }
 0x3a4   : > { %v2156_v7 = vsel %vm368_vm6, %v11390_v50, %v2011_v58  ;;  %v2157_v43 = vsel %vm368_vm6, %v2011_v58, %v2013_v30  ;;  %v2772_v39 = vpack.c.bf16 %v2695_v20, %v2688_v38  ;;  %v2590_v37 = vadd.f32 %v15059_v47, %v2382_v19  ;;  %v15174_v58 = vld [vmem:[#allocation60_spill] sm:$0xff]  ;;  %v15177_v38 = vld [vmem:[#allocation105_spill] sm:$0xff] }
 0x3a5   : > { %v2373_v44 = vmax.f32 %v15167_v5, %v2156_v7  ;;  %v2374_v0 = vmax.f32 %v15168_v56, %v2157_v43  ;;  %v2041_v26 = vpop.permute.xlu0 %2040  ;;  %3722 = vmatprep.mubr.bf16.mxu0 %v2764_v46  ;;  %v2686_v1 = vmax.f32 %v2574_v18, 0.0  ;;  %v2687_v8 = vmax.f32 %v2575_v33, 0.0  ;;  %v15175_v43 = vld [vmem:[#allocation87_spill] sm:$0xff]  ;;  %v15176_v5 = vld [vmem:[#allocation41_spill] sm:$0xff] }
 0x3a6   : > { %3723 = vmatmul.mubr.bf16.gmra.mxu0 %v2763_v60  ;;  %7989 = vmatmul.mubr.msk.bf16.gmra.mxu1 %vm3400_vm11, %v2765_v53  ;;  %v2389_v31 = vmax.f32 %v15169_v57, %v2041_v26 }
 0x3a7   : > { %v2581_v36 = vadd.f32 %v15046_v29, %v2373_v44  ;;  %v2025_v50 = vpop.permute.xlu1 %2024  ;;  %v2582_v21 = vadd.f32 %v15046_v29, %v2374_v0  ;;  %3845 = vmatprep.mubr.bf16.mxu1 %v15146_v45 }
 0x3a8   : > { %v2162_v12 = vsel %vm368_vm6, %v11400_v34, %v2025_v50  ;;  %v2163_v54 = vsel %vm368_vm6, %v2025_v50, %v2027_v2  ;;  %v2597_v29 = vadd.f32 %v15067_v41, %v2389_v31 }
 0x3a9   : > { %v2693_v30 = vmax.f32 %v2581_v36, 0.0  ;;  %v2380_v62 = vmax.f32 %v15170_v15, %v2162_v12  ;;  %v2381_v13 = vmax.f32 %v15171_v14, %v2163_v54  ;;  %v2055_v59 = vpop.permute.xlu0 %2054  ;;  %v2694_v32 = vmax.f32 %v2582_v21, 0.0  ;;  %v15178_v54 = vld [vmem:[#allocation12_spill] sm:$0xff] }
 0x3aa   : > { %v2709_v25 = vmax.f32 %v2597_v29, 0.0  ;;  %v2396_v20 = vmax.f32 %v15177_v38, %v2055_v59 }
 0x3ab   : > { %v2039_v6 = vpop.permute.xlu1 %2038  ;;  %v2771_v27 = vpack.c.bf16 %v2694_v32, %v2687_v8  ;;  %v2770_v35 = vpack.c.bf16 %v2693_v30, %v2686_v1  ;;  %v2588_v34 = vadd.f32 %v15059_v47, %v2380_v62  ;;  %v2589_v16 = vadd.f32 %v15059_v47, %v2381_v13 }
 0x3ac   : > { %v2168_v63 = vsel %vm368_vm6, %v11410_v24, %v2039_v6  ;;  %v2169_v51 = vsel %vm368_vm6, %v2039_v6, %v2041_v26  ;;  %v2702_v26 = vmax.f32 %v2590_v37, 0.0  ;;  %v2604_v62 = vadd.f32 %v15078_v4, %v2396_v20  ;;  %v15179_v6 = vld [vmem:[#allocation92_spill] sm:$0xff] }
 0x3ad   : > { %v2387_v17 = vmax.f32 %v15173_v55, %v2168_v63  ;;  %v2388_v10 = vmax.f32 %v11229_v42, %v2169_v51  ;;  %v2069_v2 = vpop.permute.xlu0 %2068  ;;  %3732 = vmatprep.mubr.bf16.mxu0 %v2771_v27  ;;  %v2700_v53 = vmax.f32 %v2588_v34, 0.0  ;;  %v2701_v47 = vmax.f32 %v2589_v16, 0.0  ;;  %v15181_v51 = vld [vmem:[#allocation132_spill] sm:$0xff] }
 0x3ae   : > { %3733 = vmatmul.mubr.bf16.gmra.mxu0 %v2770_v35  ;;  %7990 = vmatmul.mubr.msk.bf16.gmra.mxu1 %vm3400_vm11, %v2772_v39  ;;  %v2403_v24 = vmax.f32 %v15174_v58, %v2069_v2  ;;  %v2779_v1 = vpack.c.bf16 %v2709_v25, %v2702_v26  ;;  %v15180_v35 = vld [vmem:[#allocation69_spill] sm:$0xff]  ;;  %v2716_v63 = vmax.f32 %v2604_v62, 0.0  ;;  %v15182_v25 = vld [vmem:[#allocation18_spill] sm:$0xff]  ;;  %v15183_v58 = vld [vmem:[#allocation88_spill] sm:$0xff] }
 0x3af   : > { %v2595_v40 = vadd.f32 %v15067_v41, %v2387_v17  ;;  %v2053_v46 = vpop.permute.xlu1 %2052  ;;  %v2596_v60 = vadd.f32 %v15067_v41, %v2388_v10  ;;  %3855 = vmatprep.mubr.bf16.mxu1 %v15146_v45 }
 0x3b0   : > { %v2174_v42 = vsel %vm368_vm6, %v11420_v11, %v2053_v46  ;;  %v2175_v18 = vsel %vm368_vm6, %v2053_v46, %v2055_v59  ;;  %v2611_v41 = vadd.f32 %v15086_v48, %v2403_v24 }
 0x3b1   : > { %v2707_v7 = vmax.f32 %v2595_v40, 0.0  ;;  %v2394_v33 = vmax.f32 %v15175_v43, %v2174_v42  ;;  %v2395_v44 = vmax.f32 %v15176_v5, %v2175_v18  ;;  %v2083_v56 = vpop.permute.xlu0 %2082  ;;  %v2708_v0 = vmax.f32 %v2596_v60, 0.0 }
 0x3b2   : > { %v2723_v14 = vmax.f32 %v2611_v41, 0.0  ;;  %v2410_v16 = vmax.f32 %v15181_v51, %v2083_v56 }
 0x3b3   : > { %v2602_v36 = vadd.f32 %v15078_v4, %v2394_v33  ;;  %v2067_v57 = vpop.permute.xlu1 %2066  ;;  %v2778_v31 = vpack.c.bf16 %v2708_v0, %v2701_v47  ;;  %v2777_v11 = vpack.c.bf16 %v2707_v7, %v2700_v53  ;;  %v2603_v12 = vadd.f32 %v15078_v4, %v2395_v44 }
 0x3b4   : > { %v2180_v50 = vsel %vm368_vm6, %v11430_v9, %v2067_v57  ;;  %v2181_v21 = vsel %vm368_vm6, %v2067_v57, %v2069_v2  ;;  %v2786_v2 = vpack.c.bf16 %v2723_v14, %v2716_v63  ;;  %v2618_v60 = vadd.f32 %v15098_v49, %v2410_v16 }
 0x3b5   : > { %v2401_v8 = vmax.f32 %v15178_v54, %v2180_v50  ;;  %v2402_v30 = vmax.f32 %v11275_v61, %v2181_v21  ;;  %v2097_v15 = vpop.permute.xlu0 %2096  ;;  %3742 = vmatprep.mubr.bf16.mxu0 %v2778_v31  ;;  %v2714_v13 = vmax.f32 %v2602_v36, 0.0  ;;  %v2715_v4 = vmax.f32 %v2603_v12, 0.0 }
 0x3b6   : > { %3743 = vmatmul.mubr.bf16.gmra.mxu0 %v2777_v11  ;;  %7991 = vmatmul.mubr.msk.bf16.gmra.mxu1 %vm3400_vm11, %v2779_v1  ;;  %v2417_v3 = vmax.f32 %v11272_v23, %v2097_v15  ;;  %v2730_v33 = vmax.f32 %v2618_v60, 0.0 }
 0x3b7   : > { %v2609_v9 = vadd.f32 %v15086_v48, %v2401_v8  ;;  %v2081_v59 = vpop.permute.xlu1 %2080  ;;  %v2610_v32 = vadd.f32 %v15086_v48, %v2402_v30  ;;  %3865 = vmatprep.mubr.bf16.mxu1 %v15146_v45 }
 0x3b8   : > { %v2186_v61 = vsel %vm368_vm6, %v11440_v22, %v2081_v59  ;;  %v2187_v19 = vsel %vm368_vm6, %v2081_v59, %v2083_v56  ;;  %v2625_v23 = vadd.f32 %v15107_v52, %v2417_v3 }
 0x3b9   : > { %v2721_v29 = vmax.f32 %v2609_v9, 0.0  ;;  %v2408_v27 = vmax.f32 %v15179_v6, %v2186_v61  ;;  %v2409_v39 = vmax.f32 %v15180_v35, %v2187_v19  ;;  %v2722_v34 = vmax.f32 %v2610_v32, 0.0 }
 0x3ba   : > { %v2737_v42 = vmax.f32 %v2625_v23, 0.0 }
 0x3bb   : > { %v2095_v48 = vpop.permute.xlu1 %2094  ;;  %v2785_v55 = vpack.c.bf16 %v2722_v34, %v2715_v4  ;;  %v2784_v17 = vpack.c.bf16 %v2721_v29, %v2714_v13  ;;  %v2616_v37 = vadd.f32 %v15098_v49, %v2408_v27  ;;  %v2617_v46 = vadd.f32 %v15098_v49, %v2409_v39  ;;  %v11630_v49 = vpop.f32.mrf.mxu0 }
 0x3bc   : > { %v2192_v22 = vsel %vm368_vm6, %v11450_v28, %v2095_v48  ;;  %v2193_v10 = vsel %vm368_vm6, %v2095_v48, %v2097_v15  ;;  %v2793_v56 = vpack.c.bf16 %v2737_v42, %v2730_v33 }
 0x3bd   : > { %v2415_v40 = vmax.f32 %v15182_v25, %v2192_v22  ;;  %v2416_v24 = vmax.f32 %v15183_v58, %v2193_v10  ;;  %3752 = vmatprep.mubr.bf16.mxu0 %v2785_v55  ;;  %v2728_v18 = vmax.f32 %v2616_v37, 0.0  ;;  %v2729_v7 = vmax.f32 %v2617_v46, 0.0  ;;  %v11632_v0 = vpop.f32.mrf.mxu0 }
 0x3be   : > { %3753 = vmatmul.mubr.bf16.gmra.mxu0 %v2784_v17  ;;  %7992 = vmatmul.mubr.msk.bf16.gmra.mxu1 %vm3400_vm11, %v2786_v2 }
 0x3bf   : > { %v2623_v53 = vadd.f32 %v15107_v52, %v2415_v40  ;;  %v2624_v28 = vadd.f32 %v15107_v52, %v2416_v24  ;;  %3875 = vmatprep.mubr.bf16.mxu1 %v15146_v45  ;;  %v11634_v52 = vpop.f32.mrf.mxu0 }
 0x3c1   : > { %v2735_v47 = vmax.f32 %v2623_v53, 0.0  ;;  %v2736_v43 = vmax.f32 %v2624_v28, 0.0  ;;  %v11636_v26 = vpop.f32.mrf.mxu0 }
 0x3c2   : > { %15184 = vst [vmem:[#allocation19_spill] sm:$0xff] %v11636_v26 }
 0x3c3   : > { %v2792_v5 = vpack.c.bf16 %v2736_v43, %v2729_v7  ;;  %v2791_v44 = vpack.c.bf16 %v2735_v47, %v2728_v18  ;;  %v11638_v38 = vpop.f32.mrf.mxu0 }
 0x3c5   : > { %3762 = vmatprep.mubr.bf16.mxu0 %v2792_v5  ;;  %v11640_v20 = vpop.f32.mrf.mxu0 }
 0x3c6   : > { %3763 = vmatmul.mubr.bf16.gmra.mxu0 %v2791_v44  ;;  %7993 = vmatmul.mubr.msk.bf16.gmra.mxu1 %vm3400_vm11, %v2793_v56 }
 0x3c7   : > { %v11642_v41 = vpop.f32.mrf.mxu0 }
 0x3c9   : > { %v11644_v36 = vpop.f32.mrf.mxu0 }
 0x3ca   : > { %15185 = vst [vmem:[#allocation66_spill] sm:$0xff] %v11644_v36 }
 0x3cb   : > { %v11646_v57 = vpop.f32.mrf.mxu0 }
 0x3cd   : > { %v11648_v31 = vpop.f32.mrf.mxu0 }
 0x3ce   : > { %15186 = vst [vmem:[#allocation32_spill] sm:$0xff] %v11648_v31 }
 0x3cf   : > { %v11650_v11 = vpop.f32.mrf.mxu0 }
 0x3d1   : > { %v11652_v50 = vpop.f32.mrf.mxu0 }
 0x3d2   : > { %15187 = vst [vmem:[#allocation134_spill] sm:$0xff] %v11652_v50 }
 0x3d6   : > { %v11654_v21 = vpop.f32.mrf.mxu0 }
 0x3d8   : > { %v11656_v1 = vpop.f32.mrf.mxu0 }
 0x3d9   : > { %15188 = vst [vmem:[#allocation73_spill] sm:$0xff] %v11656_v1 }
 0x3da   : > { %v11658_v54 = vpop.f32.mrf.mxu0 }
 0x3dc   : > { %v11660_v15 = vpop.f32.mrf.mxu0 }
 0x3dd   : > { %15189 = vst [vmem:[#allocation70_spill] sm:$0xff] %v11660_v15 }
 0x3e2   : > { %v11664_v14 = vpop.f32.mrf.mxu0 }
 0x3e4   : > { %v11668_v59 = vpop.f32.mrf.mxu0 }
 0x3e5   : > { %15191 = vst [vmem:[#allocation11_spill] sm:$0xff] %v11668_v59 }
 0x3e6   : > { %v11674_v61 = vpop.f32.mrf.mxu0 }
 0x3e8   : > { %v11680_v29 = vpop.f32.mrf.mxu0 }
 0x3ee   : > { %v11684_v27 = vpop.f32.mrf.mxu0 }
 0x3f0   : > { %v11690_v34 = vpop.f32.mrf.mxu0 }
 0x3f2   : > { %v11696_v16 = vpop.f32.mrf.mxu0 }
 0x3f4   : > { %v11702_v17 = vpop.f32.mrf.mxu0 }
 0x3fa   : > { %v11706_v22 = vpop.f32.mrf.mxu0 }
 0x3fc   : > { %v11712_v37 = vpop.f32.mrf.mxu0 }
 0x3fe   : > { %v11718_v58 = vpop.f32.mrf.mxu0 }
 0x400   : > { %v11724_v60 = vpop.f32.mrf.mxu0 }
 0x406   : > { %v3538_v28 = vpop.f32.mrf.mxu0 }
 0x408   : > { %v3540_v47 = vpop.f32.mrf.mxu0 }
 0x40a   : > { %v11736_v5 = vpop.f32.mrf.mxu0 }
 0x40e   : > { %v3581_v12 = vpop.f32.mrf.mxu1 }
 0x410   : > { %v3583_v8 = vpop.f32.mrf.mxu1 }
 0x411   : > { %v3584_v31 = vadd.f32 %v3583_v8, %v11632_v0 }
 0x412   : > { %v3585_v30 = vpop.f32.mrf.mxu1 }
 0x413   : > { %v3586_v50 = vadd.f32 %v3585_v30, %v11634_v52 }
 0x414   : > { %v11662_v62 = vpop.f32.mrf.mxu1 }
 0x415   : > { %15190 = vst [vmem:[#allocation26_spill] sm:$0xff] %v11662_v62  ;;  %v11742_v62 = vpop.f32.mrf.mxu0 }
 0x416   : > { %v3591_v13 = vpop.f32.mrf.mxu1 }
 0x418   : > { %v11666_v9 = vpop.f32.mrf.mxu1 }
 0x419   : > { %v3594_v8 = vadd.f32 %v11666_v9, %v11640_v20 }
 0x41a   : > { %v11670_v32 = vpop.f32.mrf.mxu1 }
 0x41c   : > { %v11672_v3 = vpop.f32.mrf.mxu1 }
 0x41d   : > { %15192 = vst [vmem:[#allocation79_spill] sm:$0xff] %v11672_v3  ;;  %v3582_v3 = vadd.f32 %v3581_v12, %v11630_v49  ;;  %v3592_v49 = vadd.f32 %v3591_v13, %v11638_v38 }
 0x41e   : > { %v11676_v19 = vpop.f32.mrf.mxu1 }
 0x41f   : > { %v3602_v20 = vadd.f32 %v11676_v19, %v11646_v57 }
 0x420   : > { %v11678_v4 = vpop.f32.mrf.mxu1 }
 0x421   : > { %15193 = vst [vmem:[#allocation108_spill] sm:$0xff] %v11678_v4 }
 0x422   : > { %v11682_v6 = vpop.f32.mrf.mxu1 }
 0x424   : > { %v11686_v35 = vpop.f32.mrf.mxu1 }
 0x425   : > { %15194 = vst [vmem:[#allocation74_spill] sm:$0xff] %v11686_v35 }
 0x426   : > { %v11688_v39 = vpop.f32.mrf.mxu1 }
 0x428   : > { %v11692_v63 = vpop.f32.mrf.mxu1 }
 0x429   : > { %15195 = vst [vmem:[#allocation46_spill] sm:$0xff] %v11692_v63 }
 0x42a   : > { %v11694_v51 = vpop.f32.mrf.mxu1 }
 0x42c   : > { %v11698_v48 = vpop.f32.mrf.mxu1 }
 0x42d   : > { %15196 = vst [vmem:[#allocation7_spill] sm:$0xff] %v11698_v48 }
 0x42e   : > { %v11700_v55 = vpop.f32.mrf.mxu1 }
 0x430   : > { %v11704_v23 = vpop.f32.mrf.mxu1 }
 0x431   : > { %15197 = vst [vmem:[#allocation84_spill] sm:$0xff] %v11704_v23 }
 0x432   : > { %v11708_v10 = vpop.f32.mrf.mxu1 }
 0x434   : > { %v11710_v2 = vpop.f32.mrf.mxu1 }
 0x436   : > { %v11714_v25 = vpop.f32.mrf.mxu1 }
 0x438   : > { %v11716_v40 = vpop.f32.mrf.mxu1 }
 0x43a   : > { %v11720_v24 = vpop.f32.mrf.mxu1 }
 0x43c   : > { %v11722_v46 = vpop.f32.mrf.mxu1 }
 0x43e   : > { %v11726_v53 = vpop.f32.mrf.mxu1 }
 0x440   : > { %v11728_v42 = vpop.f32.mrf.mxu1 }
 0x442   : > { %v11730_v18 = vpop.f32.mrf.mxu1 }
 0x444   : > { %v11732_v7 = vpop.f32.mrf.mxu1 }
 0x446   : > { %v3651_v43 = vpop.f32.mrf.mxu1 }
 0x447   : > { %v11734_v33 = vadd.f32 %v3651_v43, %v3538_v28 }
 0x448   : > { %v3653_v44 = vpop.f32.mrf.mxu1 }
 0x449   : > { %v11738_v56 = vadd.f32 %v3653_v44, %v3540_v47 }
 0x44a   : > { %v11740_v45 = vpop.f32.mrf.mxu1 }
 0x44c   : > { %v11744_v26 = vpop.f32.mrf.mxu1 }
 0x44e   : > { %v3694_v36 = vpop.f32.mrf.mxu0  ;;  %v3807_v4 = vpop.f32.mrf.mxu1 }
 0x44f   : > { %v3695_v35 = vadd.f32 %v3694_v36, %v3582_v3 }
 0x450   : > { %v3696_v28 = vpop.f32.mrf.mxu0  ;;  %v3809_v43 = vpop.f32.mrf.mxu1 }
 0x451   : > { %v3808_v63 = vadd.f32 %v3807_v4, %v3695_v35  ;;  %v3697_v47 = vadd.f32 %v3696_v28, %v3584_v31 }
 0x452   : > { %v3698_v44 = vpop.f32.mrf.mxu0  ;;  %v3811_v1 = vpop.f32.mrf.mxu1 }
 0x453   : > { %v11749_v48 = vadd.f32 %v3809_v43, %v3697_v47  ;;  %v3699_v15 = vadd.f32 %v3698_v44, %v3586_v50  ;;  %v3596_v50 = vadd.f32 %v11670_v32, %v11642_v41 }
 0x454   : > { %v11751_v23 = vpop.f32.mrf.mxu0  ;;  %v11753_v59 = vpop.f32.mrf.mxu1 }
 0x455   : > { %15198 = vst [vmem:[#allocation110_spill] sm:$0xff] %v11749_v48  ;;  %v3812_v12 = vadd.f32 %v3811_v1, %v3699_v15 }
 0x456   : > { %v3704_v0 = vpop.f32.mrf.mxu0  ;;  %v3817_v36 = vpop.f32.mrf.mxu1 }
 0x457   : > { %v11758_v52 = vpack.c.bf16 %v3812_v12, %v3808_v63  ;;  %v3705_v31 = vadd.f32 %v3704_v0, %v3592_v49  ;;  %v3606_v12 = vadd.f32 %v11682_v6, %v11650_v11  ;;  %v3616_v11 = vadd.f32 %v11694_v51, %v11658_v54 }
 0x458   : > { %v3706_v30 = vpop.f32.mrf.mxu0  ;;  %v3819_v3 = vpop.f32.mrf.mxu1  ;;  %v3626_v51 = vadd.f32 %v11708_v10, %v11674_v61  ;;  %v3636_v61 = vadd.f32 %v11720_v24, %v11696_v16  ;;  %v3646_v16 = vadd.f32 %v11730_v18, %v11718_v58  ;;  %v3656_v58 = vadd.f32 %v11740_v45, %v11736_v5 }
 0x459   : > { %15199 = vst [vmem:[#allocation13_spill] sm:$0xff] %v11758_v52  ;;  %v3818_v4 = vadd.f32 %v3817_v36, %v3705_v31  ;;  %v3707_v35 = vadd.f32 %v3706_v30, %v3594_v8 }
 0x45a   : > { %v3708_v28 = vpop.f32.mrf.mxu0  ;;  %v3821_v43 = vpop.f32.mrf.mxu1 }
 0x45b   : > { %v11762_v47 = vadd.f32 %v3819_v3, %v3707_v35  ;;  %v3709_v38 = vadd.f32 %v3708_v28, %v3596_v50 }
 0x45c   : > { %v11764_v1 = vpop.f32.mrf.mxu0  ;;  %v11766_v15 = vpop.f32.mrf.mxu1 }
 0x45d   : > { %v3822_v13 = vadd.f32 %v3821_v43, %v3709_v38 }
 0x45e   : > { %v3714_v9 = vpop.f32.mrf.mxu0  ;;  %v3827_v63 = vpop.f32.mrf.mxu1 }
 0x45f   : > { %v11770_v44 = vpack.c.bf16 %v3822_v13, %v3818_v4  ;;  %v3715_v41 = vadd.f32 %v3714_v9, %v3602_v20  ;;  %v3612_v4 = vadd.f32 %v11688_v39, %v11654_v21 }
 0x460   : > { %v11772_v32 = vpop.f32.mrf.mxu0  ;;  %v11774_v49 = vpop.f32.mrf.mxu1 }
 0x461   : > { %15200 = vst [vmem:[#allocation78_spill] sm:$0xff] %v11770_v44  ;;  %v3828_v0 = vadd.f32 %v3827_v63, %v3715_v41 }
 0x462   : > { %v3718_v36 = vpop.f32.mrf.mxu0  ;;  %v3831_v8 = vpop.f32.mrf.mxu1 }
 0x463   : > { %v3719_v31 = vadd.f32 %v3718_v36, %v3606_v12 }
 0x464   : > { %v11778_v30 = vpop.f32.mrf.mxu0  ;;  %v11780_v57 = vpop.f32.mrf.mxu1 }
 0x465   : > { %v3832_v19 = vadd.f32 %v3831_v8, %v3719_v31 }
 0x466   : > { %v3724_v3 = vpop.f32.mrf.mxu0  ;;  %v3837_v50 = vpop.f32.mrf.mxu1 }
 0x467   : > { %v11784_v35 = vpack.c.bf16 %v3832_v19, %v3828_v0  ;;  %v3725_v6 = vadd.f32 %v3724_v3, %v3612_v4  ;;  %v3622_v0 = vadd.f32 %v11700_v55, %v11664_v14 }
 0x468   : > { %v11786_v28 = vpop.f32.mrf.mxu0  ;;  %v11788_v43 = vpop.f32.mrf.mxu1 }
 0x469   : > { %v3838_v41 = vadd.f32 %v3837_v50, %v3725_v6 }
 0x46a   : > { %v3728_v38 = vpop.f32.mrf.mxu0  ;;  %v3841_v20 = vpop.f32.mrf.mxu1 }
 0x46b   : > { %v3729_v13 = vadd.f32 %v3728_v38, %v3616_v11 }
 0x46c   : > { %v11792_v9 = vpop.f32.mrf.mxu0  ;;  %v11794_v63 = vpop.f32.mrf.mxu1 }
 0x46d   : > { %v3842_v12 = vadd.f32 %v3841_v20, %v3729_v13  ;;  %v3632_v20 = vadd.f32 %v11714_v25, %v11684_v27  ;;  %v3642_v27 = vadd.f32 %v11726_v53, %v11706_v22 }
 0x46e   : > { %v3734_v21 = vpop.f32.mrf.mxu0  ;;  %v3847_v39 = vpop.f32.mrf.mxu1 }
 0x46f   : > { %v11798_v36 = vpack.c.bf16 %v3842_v12, %v3838_v41  ;;  %v3735_v31 = vadd.f32 %v3734_v21, %v3622_v0 }
 0x470   : > { %v11800_v8 = vpop.f32.mrf.mxu0  ;;  %v11802_v54 = vpop.f32.mrf.mxu1 }
 0x471   : > { %v3848_v6 = vadd.f32 %v3847_v39, %v3735_v31 }
 0x472   : > { %v3738_v19 = vpop.f32.mrf.mxu0  ;;  %v3851_v3 = vpop.f32.mrf.mxu1 }
 0x473   : > { %v3739_v4 = vadd.f32 %v3738_v19, %v3626_v51 }
 0x474   : > { %v11806_v50 = vpop.f32.mrf.mxu0  ;;  %v11808_v11 = vpop.f32.mrf.mxu1 }
 0x475   : > { %v3852_v38 = vadd.f32 %v3851_v3, %v3739_v4 }
 0x476   : > { %v3744_v14 = vpop.f32.mrf.mxu0  ;;  %v3857_v55 = vpop.f32.mrf.mxu1 }
 0x477   : > { %v11812_v13 = vpack.c.bf16 %v3852_v38, %v3848_v6  ;;  %v3745_v10 = vadd.f32 %v3744_v14, %v3632_v20 }
 0x478   : > { %v3746_v41 = vpop.f32.mrf.mxu0  ;;  %v11814_v12 = vpop.f32.mrf.mxu1 }
 0x479   : > { %v3858_v31 = vadd.f32 %v3857_v55, %v3745_v10 }
 0x47a   : > { %v3748_v21 = vpop.f32.mrf.mxu0  ;;  %v3861_v0 = vpop.f32.mrf.mxu1 }
 0x47b   : > { %v3749_v51 = vadd.f32 %v3748_v21, %v3636_v61 }
 0x47c   : > { %v3750_v19 = vpop.f32.mrf.mxu0  ;;  %v3863_v39 = vpop.f32.mrf.mxu1 }
 0x47d   : > { %v3862_v3 = vadd.f32 %v3861_v0, %v3749_v51 }
 0x47e   : > { %v3754_v4 = vpop.f32.mrf.mxu0  ;;  %v3867_v52 = vpop.f32.mrf.mxu1 }
 0x47f   : > { %v11820_v25 = vpack.c.bf16 %v3862_v3, %v3858_v31  ;;  %v3755_v24 = vadd.f32 %v3754_v4, %v3642_v27  ;;  %v3648_v31 = vadd.f32 %v11732_v7, %v11724_v60  ;;  %v3644_v3 = vadd.f32 %v11728_v42, %v11712_v37 }
 0x480   : > { %v3756_v6 = vpop.f32.mrf.mxu0  ;;  %v3869_v38 = vpop.f32.mrf.mxu1  ;;  %v3658_v27 = vadd.f32 %v11744_v26, %v11742_v62  ;;  %v3638_v60 = vadd.f32 %v11722_v46, %v11702_v17  ;;  %v3634_v37 = vadd.f32 %v11716_v40, %v11690_v34 }
 0x481   : > { %v3868_v55 = vadd.f32 %v3867_v52, %v3755_v24 }
 0x482   : > { %v3758_v14 = vpop.f32.mrf.mxu0  ;;  %v3871_v20 = vpop.f32.mrf.mxu1  ;;  %v3751_v42 = vadd.f32 %v3750_v19, %v3638_v60 }
 0x483   : > { %v3759_v61 = vadd.f32 %v3758_v14, %v3646_v16 }
 0x484   : > { %v3760_v21 = vpop.f32.mrf.mxu0  ;;  %v3873_v48 = vpop.f32.mrf.mxu1 }
 0x485   : > { %v3872_v10 = vadd.f32 %v3871_v20, %v3759_v61  ;;  %v3761_v16 = vadd.f32 %v3760_v21, %v3648_v31  ;;  %v3757_v20 = vadd.f32 %v3756_v6, %v3644_v3  ;;  %v3747_v21 = vadd.f32 %v3746_v41, %v3634_v37  ;;  %v15201_v6 = vld [vmem:[#allocation11_spill] sm:$0xff] }
 0x486   : > { %v3764_v0 = vpop.f32.mrf.mxu0  ;;  %v3877_v51 = vpop.f32.mrf.mxu1  ;;  %v8597_v37 = vld [vmem:[%s14425_s4 + $0x4] ss:$36 sps:$4 sm:$0xff]  }
 0x487   : > { %v11824_v44 = vpack.c.bf16 %v3872_v10, %v3868_v55  ;;  %v3765_v18 = vadd.f32 %v3764_v0, %v11734_v33  ;;  %v3874_v55 = vadd.f32 %v3873_v48, %v3761_v16  ;;  %v3870_v17 = vadd.f32 %v3869_v38, %v3757_v20  ;;  %v15202_v0 = vld [vmem:[#allocation84_spill] sm:$0xff]  ;;  %5302 = vmatprep.mubr.bf16.mxu0 %v8597_v37  ;;  %v8609_v37 = vld [vmem:[%s14425_s4 + $0x124] ss:$36 sps:$4 sm:$0xff]  }
 0x488   : > { %v3766_v22 = vpop.f32.mrf.mxu0  ;;  %v3879_v53 = vpop.f32.mrf.mxu1  ;;  %v3624_v34 = vadd.f32 %v15202_v0, %v15201_v6  ;;  %v3864_v48 = vadd.f32 %v3863_v39, %v3751_v42  ;;  %v15206_v39 = vld [vmem:[#allocation46_spill] sm:$0xff] }
 0x489   : > { %v3767_v24 = vadd.f32 %v3766_v22, %v11738_v56  ;;  %v3878_v45 = vadd.f32 %v3877_v51, %v3765_v18  ;;  %v3628_v56 = vadd.f32 %v11710_v2, %v11680_v29  ;;  %v11851_v19 = vpack.c.bf16 %v3874_v55, %v3870_v17  ;;  %v15203_v29 = vld [vmem:[#allocation70_spill] sm:$0xff]  ;;  %v15204_v2 = vld [vmem:[#allocation7_spill] sm:$0xff] }
 0x48a   : > { %v3768_v4 = vpop.f32.mrf.mxu0  ;;  %v3881_v52 = vpop.f32.mrf.mxu1  ;;  %v3618_v41 = vadd.f32 %v15204_v2, %v15203_v29  ;;  %v3737_v38 = vadd.f32 %v11800_v8, %v3624_v34  ;;  %v3860_v51 = vadd.f32 %v11814_v12, %v3747_v21  ;;  %v15207_v8 = vld [vmem:[#allocation134_spill] sm:$0xff] }
 0x48b   : > { %v3769_v14 = vadd.f32 %v3768_v4, %v3656_v58  ;;  %v3880_v10 = vadd.f32 %v3879_v53, %v3767_v24  ;;  %v3741_v40 = vadd.f32 %v11806_v50, %v3628_v56  ;;  %v15205_v50 = vld [vmem:[#allocation73_spill] sm:$0xff]  ;;  %v15208_v12 = vld [vmem:[#allocation74_spill] sm:$0xff] }
 0x48c   : > { %v3770_v7 = vpop.f32.mrf.mxu0  ;;  %v3883_v61 = vpop.f32.mrf.mxu1  ;;  %v3614_v22 = vadd.f32 %v15206_v39, %v15205_v50  ;;  %v3731_v53 = vadd.f32 %v11792_v9, %v3618_v41  ;;  %v11868_v58 = vpack.c.bf16 %v3864_v48, %v3860_v51  ;;  %v3608_v18 = vadd.f32 %v15208_v12, %v15207_v8  ;;  %v15209_v9 = vld [vmem:[#allocation32_spill] sm:$0xff]  ;;  %v15216_v42 = vld [vmem:[#allocation110_spill] sm:$0xff] }
 0x48d   : > { %v3882_v5 = vadd.f32 %v3881_v52, %v3769_v14  ;;  %v3771_v33 = vadd.f32 %v3770_v7, %v3658_v27  ;;  %v3854_v31 = vadd.f32 %v11808_v11, %v3741_v40  ;;  %v3850_v4 = vadd.f32 %v11802_v54, %v3737_v38  ;;  %v15210_v11 = vld [vmem:[#allocation108_spill] sm:$0xff]  ;;  %v15212_v54 = vld [vmem:[#allocation79_spill] sm:$0xff] }
 0x48e   : > { %v3727_v3 = vadd.f32 %v11786_v28, %v3614_v22  ;;  %v3604_v52 = vadd.f32 %v15210_v11, %v15209_v9  ;;  %v3721_v27 = vadd.f32 %v11778_v30, %v3608_v18  ;;  %v3844_v16 = vadd.f32 %v11794_v63, %v3731_v53  ;;  %v15211_v28 = vld [vmem:[#allocation66_spill] sm:$0xff]  ;;  %v8645_v8 = vld [vmem:[%s14425_s4 + $0xc] ss:$36 sps:$4 sm:$0xff]  }
 0x48f   : > { %v11840_v26 = vpack.c.bf16 %v3882_v5, %v3878_v45  ;;  %v3884_v62 = vadd.f32 %v3883_v61, %v3771_v33  ;;  %v11884_v24 = vpack.c.bf16 %v3854_v31, %v3850_v4  ;;  %v3598_v14 = vadd.f32 %v15212_v54, %v15211_v28  ;;  %v15213_v45 = vld [vmem:[#allocation19_spill] sm:$0xff]  ;;  %5495 = vmatprep.mubr.bf16.mxu1 %v8645_v8  ;;  %v8603_v54 = vld [vmem:[%s14425_s4 + $0x94] ss:$36 sps:$4 sm:$0xff]  }
 0x490   : > { %v3717_v60 = vadd.f32 %v11772_v32, %v3604_v52  ;;  %v3840_v7 = vadd.f32 %v11788_v43, %v3727_v3  ;;  %v3834_v63 = vadd.f32 %v11780_v57, %v3721_v27  ;;  %v15214_v32 = vld [vmem:[#allocation26_spill] sm:$0xff]  ;;  %v8600_v9 = vld [vmem:[%s14425_s4 + $0x4c] ss:$36 sps:$4 sm:$0xff]  }
 0x491   : > { %v11844_v46 = vpack.c.bf16 %v3884_v62, %v3880_v10  ;;  %3946 = vrot.lane.b32.xlu1 %v11840_v26, %s8836_s15  ;;  %v3711_v30 = vadd.f32 %v11764_v1, %v3598_v14  ;;  %v3588_v5 = vadd.f32 %v15214_v32, %v15213_v45  ;;  %v8595_v3 = vld [vmem:[%s14425_s4] ss:$36 sps:$4 sm:$0xff]  }
 0x492   : > { %v11898_v20 = vpack.c.bf16 %v3844_v16, %v3840_v7  ;;  %v3830_v43 = vadd.f32 %v11774_v49, %v3717_v60  ;;  %v15215_v49 = vld [vmem:[#allocation78_spill] sm:$0xff]  ;;  %v8598_v16 = vld [vmem:[%s14425_s4 + $0x48] ss:$36 sps:$4 sm:$0xff]  }
 0x493   : > { %3948 = vrot.lane.b32.xlu0 %v11844_v46, %s8836_s15  ;;  %5270 = vmatprep.subr.bf16.mxu0 %v11844_v46  ;;  %v3701_v1 = vadd.f32 %v11751_v23, %v3588_v5  ;;  %v3824_v57 = vadd.f32 %v11766_v15, %v3711_v30  ;;  %v8601_v30 = vld [vmem:[%s14425_s4 + $0x90] ss:$36 sps:$4 sm:$0xff]   ;;  %v8606_v45 = vld [vmem:[%s14425_s4 + $0xdc] ss:$36 sps:$4 sm:$0xff]  }
 0x494   : > { %5271 = vmatpush1.bf16.msra.mxu0 %v11840_v26  ;;  %v11911_v33 = vpack.c.bf16 %v3834_v63, %v3830_v43 }
 0x495   : > { %3942 = vrot.lane.b32.xlu1 %v11824_v44, %s8836_s15  ;;  %5272 = vmatprep.subr.bf16.mxu0 %v11851_v19  ;;  %v3814_v23 = vadd.f32 %v11753_v59, %v3701_v1  ;;  %v11924_v15 = vpack.c.bf16 %v3824_v57, %v11762_v47  ;;  %v15217_v59 = vld [vmem:[#allocation13_spill] sm:$0xff] }
 0x496   : > { %v8604_v1 = vld [vmem:[%s14425_s4 + $0xd8] ss:$36 sps:$4 sm:$0xff]  }
 0x497   : > { %3944 = vrot.lane.b32.xlu0 %v11851_v19, %s8836_s15  ;;  %v11933_v61 = vpack.c.bf16 %v3814_v23, %v15216_v42 }
 0x498   : > { %5273 = vmatpush1.bf16.msra.mxu0 %v11824_v44 }
 0x499   : > { %3938 = vrot.lane.b32.xlu1 %v11820_v25, %s8836_s15  ;;  %5274 = vmatprep.subr.bf16.mxu0 %v11868_v58 }
 0x49b   : > { %3940 = vrot.lane.b32.xlu0 %v11868_v58, %s8836_s15 }
 0x49c   : > { %5275 = vmatpush1.bf16.msra.mxu0 %v11820_v25 }
 0x49d   : > { %3934 = vrot.lane.b32.xlu1 %v11812_v13, %s8836_s15  ;;  %5276 = vmatprep.subr.bf16.mxu0 %v11884_v24 }
 0x49f   : > { %3936 = vrot.lane.b32.xlu0 %v11884_v24, %s8836_s15 }
 0x4a0   : > { %5277 = vmatpush1.bf16.msra.mxu0 %v11812_v13 }
 0x4a1   : > { %3930 = vrot.lane.b32.xlu1 %v11798_v36, %s8836_s15  ;;  %5278 = vmatprep.subr.bf16.mxu0 %v11898_v20 }
 0x4a3   : > { %3932 = vrot.lane.b32.xlu0 %v11898_v20, %s8836_s15 }
 0x4a4   : > { %5279 = vmatpush1.bf16.msra.mxu0 %v11798_v36 }
 0x4a5   : > { %3926 = vrot.lane.b32.xlu1 %v11784_v35, %s8836_s15  ;;  %5280 = vmatprep.subr.bf16.mxu0 %v11911_v33 }
 0x4a7   : > { %3928 = vrot.lane.b32.xlu0 %v11911_v33, %s8836_s15 }
 0x4a8   : > { %5281 = vmatpush1.bf16.msra.mxu0 %v11784_v35 }
 0x4a9   : > { %3922 = vrot.lane.b32.xlu1 %v15215_v49, %s8836_s15  ;;  %5282 = vmatprep.subr.bf16.mxu0 %v11924_v15 }
 0x4ab   : > { %3924 = vrot.lane.b32.xlu0 %v11924_v15, %s8836_s15 }
 0x4ac   : > { %5283 = vmatpush1.bf16.msra.mxu0 %v15215_v49 }
 0x4ad   : > { %3918 = vrot.lane.b32.xlu1 %v15217_v59, %s8836_s15  ;;  %5284 = vmatprep.subr.bf16.mxu0 %v11933_v61 }
 0x4af   : > { %3920 = vrot.lane.b32.xlu0 %v11933_v61, %s8836_s15 }
 0x4b0   : > { %5285 = vmatpush1.bf16.msra.mxu0 %v15217_v59 }
 0x4b1   : > { %4003 = vrot.lane.b32.xlu1 %v11840_v26, %s8834_s14 }
 0x4b3   : > { %4001 = vrot.lane.b32.xlu0 %v11851_v19, %s8834_s14 }
 0x4b5   : > { %4117 = vrot.lane.b32.xlu1 %v11840_v26, %s8838_s12 }
 0x4b7   : > { %4115 = vrot.lane.b32.xlu0 %v11851_v19, %s8838_s12 }
 0x4b9   : > { %3999 = vrot.lane.b32.xlu1 %v11824_v44, %s8834_s14 }
 0x4bb   : > { %3997 = vrot.lane.b32.xlu0 %v11868_v58, %s8834_s14 }
 0x4bd   : > { %4113 = vrot.lane.b32.xlu1 %v11824_v44, %s8838_s12 }
 0x4bf   : > { %4111 = vrot.lane.b32.xlu0 %v11868_v58, %s8838_s12 }
 0x4c1   : > { %3995 = vrot.lane.b32.xlu1 %v11820_v25, %s8834_s14 }
 0x4c3   : > { %3993 = vrot.lane.b32.xlu0 %v11884_v24, %s8834_s14 }
 0x4c5   : > { %4109 = vrot.lane.b32.xlu1 %v11820_v25, %s8838_s12 }
 0x4c7   : > { %4107 = vrot.lane.b32.xlu0 %v11884_v24, %s8838_s12 }
 0x4c9   : > { %3991 = vrot.lane.b32.xlu1 %v11812_v13, %s8834_s14 }
 0x4cb   : > { %3989 = vrot.lane.b32.xlu0 %v11898_v20, %s8834_s14 }
 0x4cd   : > { %4105 = vrot.lane.b32.xlu1 %v11812_v13, %s8838_s12 }
 0x4cf   : > { %4103 = vrot.lane.b32.xlu0 %v11898_v20, %s8838_s12 }
 0x4d1   : > { %3987 = vrot.lane.b32.xlu1 %v11798_v36, %s8834_s14 }
 0x4d3   : > { %3985 = vrot.lane.b32.xlu0 %v11911_v33, %s8834_s14 }
 0x4d5   : > { %4101 = vrot.lane.b32.xlu1 %v11798_v36, %s8838_s12 }
 0x4d7   : > { %4099 = vrot.lane.b32.xlu0 %v11911_v33, %s8838_s12 }
 0x4d9   : > { %3983 = vrot.lane.b32.xlu1 %v11784_v35, %s8834_s14 }
 0x4db   : > { %3981 = vrot.lane.b32.xlu0 %v11924_v15, %s8834_s14 }
 0x4dd   : > { %4097 = vrot.lane.b32.xlu1 %v11784_v35, %s8838_s12 }
 0x4df   : > { %4095 = vrot.lane.b32.xlu0 %v11924_v15, %s8838_s12 }
 0x4e1   : > { %3979 = vrot.lane.b32.xlu1 %v15215_v49, %s8834_s14 }
 0x4e3   : > { %3977 = vrot.lane.b32.xlu0 %v11933_v61, %s8834_s14 }
 0x4e5   : > { %4093 = vrot.lane.b32.xlu1 %v15215_v49, %s8838_s12 }
 0x4e7   : > { %4091 = vrot.lane.b32.xlu0 %v11933_v61, %s8838_s12 }
 0x4e9   : > { %3975 = vrot.lane.b32.xlu1 %v15217_v59, %s8834_s14 }
 0x4eb   : > { %4058 = vrot.lane.b32.xlu0 %v11851_v19, %s8839_s30 }
 0x4ed   : > { %4089 = vrot.lane.b32.xlu1 %v15217_v59, %s8838_s12 }
 0x4ef   : > { %4005 = vrot.lane.b32.xlu0 %v11844_v46, %s8834_s14 }
 0x4f1   : > { %4060 = vrot.lane.b32.xlu1 %v11840_v26, %s8839_s30 }
 0x4f3   : > { %4119 = vrot.lane.b32.xlu0 %v11844_v46, %s8838_s12 }
 0x4f5   : > { %4174 = vrot.lane.b32.xlu1 %v11840_v26, %s8840_s16 }
 0x4f7   : > { %4172 = vrot.lane.b32.xlu0 %v11851_v19, %s8840_s16 }
 0x4f9   : > { %4056 = vrot.lane.b32.xlu1 %v11824_v44, %s8839_s30 }
 0x4fb   : > { %4054 = vrot.lane.b32.xlu0 %v11868_v58, %s8839_s30 }
 0x4fd   : > { %4170 = vrot.lane.b32.xlu1 %v11824_v44, %s8840_s16 }
 0x4ff   : > { %4168 = vrot.lane.b32.xlu0 %v11868_v58, %s8840_s16 }
 0x501   : > { %4052 = vrot.lane.b32.xlu1 %v11820_v25, %s8839_s30 }
 0x503   : > { %v3947_v47 = vpop.permute.xlu1 %3946  ;;  %4050 = vrot.lane.b32.xlu0 %v11884_v24, %s8839_s30 }
 0x505   : > { %4166 = vrot.lane.b32.xlu1 %v11820_v25, %s8840_s16  ;;  %v3949_v55 = vpop.permute.xlu0 %3948 }
 0x506   : > { %5286 = vmatprep.subr.bf16.mxu0 %v3949_v55  ;;  %v3958_v10 = vsel %vm312_vm8, %v3947_v47, %v3949_v55  ;;  %v8607_v55 = vld [vmem:[%s14425_s4 + $0x120] ss:$36 sps:$4 sm:$0xff]  }
 0x507   : > { %v3943_v62 = vpop.permute.xlu1 %3942  ;;  %4164 = vrot.lane.b32.xlu0 %v11884_v24, %s8840_s16  ;;  %5287 = vmatpush2.bf16.msra.mxu0 %v3958_v10 }
 0x509   : > { %4048 = vrot.lane.b32.xlu1 %v11812_v13, %s8839_s30  ;;  %v3945_v56 = vpop.permute.xlu0 %3944 }
 0x50a   : > { %5288 = vmatprep.subr.bf16.mxu0 %v3945_v56  ;;  %v3957_v21 = vsel %vm312_vm8, %v3943_v62, %v3945_v56  ;;  %v8612_v62 = vld [vmem:[%s14425_s4 + $0x16c] ss:$36 sps:$4 sm:$0xff]  }
 0x50b   : > { %v3939_v17 = vpop.permute.xlu1 %3938  ;;  %4046 = vrot.lane.b32.xlu0 %v11898_v20, %s8839_s30  ;;  %5289 = vmatpush2.bf16.msra.mxu0 %v3957_v21 }
 0x50d   : > { %4162 = vrot.lane.b32.xlu1 %v11812_v13, %s8840_s16  ;;  %v3941_v6 = vpop.permute.xlu0 %3940 }
 0x50e   : > { %5290 = vmatprep.subr.bf16.mxu0 %v3941_v6  ;;  %v3956_v0 = vsel %vm312_vm8, %v3939_v17, %v3941_v6  ;;  %v8610_v6 = vld [vmem:[%s14425_s4 + $0x168] ss:$36 sps:$4 sm:$0xff]  }
 0x50f   : > { %v3935_v34 = vpop.permute.xlu1 %3934  ;;  %4062 = vrot.lane.b32.xlu0 %v11844_v46, %s8839_s30  ;;  %5291 = vmatpush2.bf16.msra.mxu0 %v3956_v0 }
 0x511   : > { %4044 = vrot.lane.b32.xlu1 %v11798_v36, %s8839_s30  ;;  %v3937_v40 = vpop.permute.xlu0 %3936 }
 0x512   : > { %5292 = vmatprep.subr.bf16.mxu0 %v3937_v40  ;;  %v3955_v48 = vsel %vm312_vm8, %v3935_v34, %v3937_v40  ;;  %v8615_v34 = vld [vmem:[%s14425_s4 + $0x1b4] ss:$36 sps:$4 sm:$0xff]  }
 0x513   : > { %v3931_v29 = vpop.permute.xlu1 %3930  ;;  %4176 = vrot.lane.b32.xlu0 %v11844_v46, %s8840_s16  ;;  %5293 = vmatpush2.bf16.msra.mxu0 %v3955_v48 }
 0x515   : > { %4158 = vrot.lane.b32.xlu1 %v11798_v36, %s8840_s16  ;;  %v3933_v2 = vpop.permute.xlu0 %3932 }
 0x516   : > { %5294 = vmatprep.subr.bf16.mxu0 %v3933_v2  ;;  %v3954_v41 = vsel %vm312_vm8, %v3931_v29, %v3933_v2  ;;  %v8613_v2 = vld [vmem:[%s14425_s4 + $0x1b0] ss:$36 sps:$4 sm:$0xff]  }
 0x517   : > { %v3927_v38 = vpop.permute.xlu1 %3926  ;;  %4160 = vrot.lane.b32.xlu0 %v11898_v20, %s8840_s16  ;;  %5295 = vmatpush2.bf16.msra.mxu0 %v3954_v41 }
 0x519   : > { %4040 = vrot.lane.b32.xlu1 %v11784_v35, %s8839_s30  ;;  %v3929_v51 = vpop.permute.xlu0 %3928 }
 0x51a   : > { %5296 = vmatprep.subr.bf16.mxu0 %v3929_v51  ;;  %v3953_v50 = vsel %vm312_vm8, %v3927_v38, %v3929_v51  ;;  %v8618_v38 = vld [vmem:[%s14425_s4 + $0x1fc] ss:$36 sps:$4 sm:$0xff]  }
 0x51b   : > { %v3923_v39 = vpop.permute.xlu1 %3922  ;;  %4042 = vrot.lane.b32.xlu0 %v11911_v33, %s8839_s30  ;;  %5297 = vmatpush2.bf16.msra.mxu0 %v3953_v50 }
 0x51d   : > { %4154 = vrot.lane.b32.xlu1 %v11784_v35, %s8840_s16  ;;  %v3925_v22 = vpop.permute.xlu0 %3924 }
 0x51e   : > { %5298 = vmatprep.subr.bf16.mxu0 %v3925_v22  ;;  %v3952_v53 = vsel %vm312_vm8, %v3923_v39, %v3925_v22  ;;  %v8616_v22 = vld [vmem:[%s14425_s4 + $0x1f8] ss:$36 sps:$4 sm:$0xff]  }
 0x51f   : > { %v3919_v31 = vpop.permute.xlu1 %3918  ;;  %4156 = vrot.lane.b32.xlu0 %v11911_v33, %s8840_s16  ;;  %5299 = vmatpush2.bf16.msra.mxu0 %v3952_v53 }
 0x521   : > { %4036 = vrot.lane.b32.xlu1 %v15215_v49, %s8839_s30  ;;  %v3921_v12 = vpop.permute.xlu0 %3920 }
 0x522   : > { %5300 = vmatprep.subr.bf16.mxu0 %v3921_v12  ;;  %v3951_v18 = vsel %vm312_vm8, %v3919_v31, %v3921_v12 }
 0x523   : > { %v12072_v4 = vpop.permute.xlu1 %4003  ;;  %4038 = vrot.lane.b32.xlu0 %v11924_v15, %s8839_s30  ;;  %5301 = vmatpush2.bf16.msra.mxu0 %v3951_v18 }
 0x525   : > { %4150 = vrot.lane.b32.xlu1 %v15215_v49, %s8840_s16  ;;  %v12081_v11 = vpop.permute.xlu0 %4001 }
 0x526   : > { %5303 = vmatmul.mubr.bf16.vlgmr.msra.gmra.mxu0 %v8595_v3 }
 0x527   : > { %v12083_v52 = vpop.permute.xlu1 %4117  ;;  %4152 = vrot.lane.b32.xlu0 %v11924_v15, %s8840_s16  ;;  %5312 = vmatprep.mubr.bf16.mxu0 %v8600_v9  ;;  %v8624_v9 = vld [vmem:[%s14425_s4 + $0x28c] ss:$36 sps:$4 sm:$0xff]  }
 0x529   : > { %4032 = vrot.lane.b32.xlu1 %v15217_v59, %s8839_s30  ;;  %v12089_v27 = vpop.permute.xlu0 %4115 }
 0x52b   : > { %v12094_v28 = vpop.permute.xlu1 %3999  ;;  %4034 = vrot.lane.b32.xlu0 %v11933_v61, %s8839_s30 }
 0x52c   : > { %v4014_v3 = vsel %vm340_vm7, %v12094_v28, %v12081_v11 }
 0x52d   : > { %4146 = vrot.lane.b32.xlu1 %v15217_v59, %s8840_s16  ;;  %v12103_v14 = vpop.permute.xlu0 %3997 }
 0x52e   : > { %5313 = vmatmul.mubr.bf16.gmra.mxu0 %v8598_v16 }
 0x52f   : > { %v12105_v60 = vpop.permute.xlu1 %4113  ;;  %4148 = vrot.lane.b32.xlu0 %v11933_v61, %s8840_s16  ;;  %5322 = vmatprep.mubr.bf16.mxu0 %v8603_v54 }
 0x531   : > { %4231 = vrot.lane.b32.xlu1 %v11840_v26, %s8831_s11  ;;  %v12111_v7 = vpop.permute.xlu0 %4111 }
 0x533   : > { %v12116_v63 = vpop.permute.xlu1 %3995  ;;  %4229 = vrot.lane.b32.xlu0 %v11851_v19, %s8831_s11 }
 0x535   : > { %4227 = vrot.lane.b32.xlu1 %v11824_v44, %s8831_s11  ;;  %v12125_v32 = vpop.permute.xlu0 %3993 }
 0x536   : > { %5323 = vmatmul.mubr.bf16.gmra.mxu0 %v8601_v30 }
 0x537   : > { %v12127_v5 = vpop.permute.xlu1 %4109  ;;  %4225 = vrot.lane.b32.xlu0 %v11868_v58, %s8831_s11  ;;  %5332 = vmatprep.mubr.bf16.mxu0 %v8606_v45 }
 0x539   : > { %4223 = vrot.lane.b32.xlu1 %v11820_v25, %s8831_s11  ;;  %v12133_v43 = vpop.permute.xlu0 %4107 }
 0x53b   : > { %v12138_v57 = vpop.permute.xlu1 %3991  ;;  %4221 = vrot.lane.b32.xlu0 %v11884_v24, %s8831_s11 }
 0x53d   : > { %4219 = vrot.lane.b32.xlu1 %v11812_v13, %s8831_s11  ;;  %v12147_v23 = vpop.permute.xlu0 %3989 }
 0x53e   : > { %5333 = vmatmul.mubr.bf16.gmra.mxu0 %v8604_v1 }
 0x53f   : > { %v12149_v42 = vpop.permute.xlu1 %4105  ;;  %4217 = vrot.lane.b32.xlu0 %v11898_v20, %s8831_s11  ;;  %5342 = vmatprep.mubr.bf16.mxu0 %v8609_v37 }
 0x540   : > { %v4126_v45 = vsel %vm4121_vm12, %v12149_v42, %v12133_v43 }
 0x541   : > { %4215 = vrot.lane.b32.xlu1 %v11798_v36, %s8831_s11  ;;  %v12155_v47 = vpop.permute.xlu0 %4103 }
 0x543   : > { %v12160_v10 = vpop.permute.xlu1 %3987  ;;  %4213 = vrot.lane.b32.xlu0 %v11911_v33, %s8831_s11 }
 0x545   : > { %4211 = vrot.lane.b32.xlu1 %v11784_v35, %s8831_s11  ;;  %v12169_v56 = vpop.permute.xlu0 %3985 }
 0x546   : > { %5343 = vmatmul.mubr.bf16.gmra.mxu0 %v8607_v55 }
 0x547   : > { %v12171_v21 = vpop.permute.xlu1 %4101  ;;  %4209 = vrot.lane.b32.xlu0 %v11924_v15, %s8831_s11  ;;  %5352 = vmatprep.mubr.bf16.mxu0 %v8612_v62 }
 0x548   : > { %v4125_v1 = vsel %vm4121_vm12, %v12171_v21, %v12155_v47 }
 0x549   : > { %4207 = vrot.lane.b32.xlu1 %v15215_v49, %s8831_s11  ;;  %v12177_v17 = vpop.permute.xlu0 %4099 }
 0x54b   : > { %v12182_v0 = vpop.permute.xlu1 %3983  ;;  %4205 = vrot.lane.b32.xlu0 %v11933_v61, %s8831_s11 }
 0x54d   : > { %4203 = vrot.lane.b32.xlu1 %v15217_v59, %s8831_s11  ;;  %v12191_v40 = vpop.permute.xlu0 %3981 }
 0x54e   : > { %5353 = vmatmul.mubr.bf16.gmra.mxu0 %v8610_v6 }
 0x54f   : > { %v12193_v48 = vpop.permute.xlu1 %4097  ;;  %4233 = vrot.lane.b32.xlu0 %v11844_v46, %s8831_s11  ;;  %5362 = vmatprep.mubr.bf16.mxu0 %v8615_v34  ;;  %s8842_s11 = smov 94  }
 0x551   : > { %4288 = vrot.lane.b32.xlu1 %v11840_v26, %s8841_s13  ;;  %v12199_v29 = vpop.permute.xlu0 %4095 }
 0x553   : > { %v12204_v41 = vpop.permute.xlu1 %3979  ;;  %4286 = vrot.lane.b32.xlu0 %v11851_v19, %s8841_s13 }
 0x554   : > { %v4009_v37 = vsel %vm340_vm7, %v12204_v41, %v12191_v40  ;;  %v8634_v41 = vld [vmem:[%s14425_s4 + $0x3a8] ss:$36 sps:$4 sm:$0xff]  }
 0x555   : > { %4345 = vrot.lane.b32.xlu1 %v11840_v26, %s8842_s11  ;;  %v12213_v51 = vpop.permute.xlu0 %3977  ;;  %v8621_v26 = vld [vmem:[%s14425_s4 + $0x244] ss:$36 sps:$4 sm:$0xff]  }
 0x556   : > { %5363 = vmatmul.mubr.bf16.gmra.mxu0 %v8613_v2 }
 0x557   : > { %v12215_v50 = vpop.permute.xlu1 %4093  ;;  %4343 = vrot.lane.b32.xlu0 %v11851_v19, %s8842_s11  ;;  %5372 = vmatprep.mubr.bf16.mxu0 %v8618_v38 }
 0x558   : > { %v4123_v62 = vsel %vm4121_vm12, %v12215_v50, %v12199_v29 }
 0x559   : > { %4284 = vrot.lane.b32.xlu1 %v11824_v44, %s8841_s13  ;;  %v12221_v39 = vpop.permute.xlu0 %4091 }
 0x55b   : > { %v12226_v53 = vpop.permute.xlu1 %3975  ;;  %4282 = vrot.lane.b32.xlu0 %v11868_v58, %s8841_s13 }
 0x55d   : > { %4341 = vrot.lane.b32.xlu1 %v11824_v44, %s8842_s11  ;;  %v12235_v19 = vpop.permute.xlu0 %4058  ;;  %v8619_v44 = vld [vmem:[%s14425_s4 + $0x240] ss:$36 sps:$4 sm:$0xff]  }
 0x55e   : > { %5373 = vmatmul.mubr.bf16.gmra.mxu0 %v8616_v22  ;;  %v8639_v22 = vld [vmem:[%s14425_s4 + $0x3f4] ss:$36 sps:$4 sm:$0xff]  }
 0x55f   : > { %v12237_v31 = vpop.permute.xlu1 %4089  ;;  %4339 = vrot.lane.b32.xlu0 %v11868_v58, %s8842_s11  ;;  %5382 = vmatprep.mubr.bf16.mxu0 %v8621_v26 }
 0x561   : > { %4280 = vrot.lane.b32.xlu1 %v11820_v25, %s8841_s13  ;;  %v4006_v8 = vpop.permute.xlu0 %4005 }
 0x562   : > { %5463 = vmatprep.subr.bf16.mxu1 %v4006_v8  ;;  %v4015_v12 = vsel %vm340_vm7, %v12072_v4, %v4006_v8  ;;  %v6942_v8 = vld [vmem:[%s14426_s5 + $0x10] sm:$0xff] }
 0x563   : > { %v12248_v18 = vpop.permute.xlu1 %4060  ;;  %4278 = vrot.lane.b32.xlu0 %v11884_v24, %s8841_s13  ;;  %5464 = vmatpush1.bf16.msra.mxu1 %v4015_v12 }
 0x564   : > { %5465 = vmatprep.subr.bf16.mxu1 %v12081_v11  ;;  %v4013_v11 = vsel %vm340_vm7, %v12116_v63, %v12103_v14  ;;  %v8625_v63 = vld [vmem:[%s14425_s4 + $0x2d0] ss:$36 sps:$4 sm:$0xff]  }
 0x565   : > { %4337 = vrot.lane.b32.xlu1 %v11820_v25, %s8842_s11  ;;  %v4120_v58 = vpop.permute.xlu0 %4119 }
 0x566   : > { %5383 = vmatmul.mubr.bf16.gmra.mxu0 %v8619_v44  ;;  %5656 = vmatprep.subr.bf16.mxu0 %v4120_v58  ;;  %v4129_v4 = vsel %vm4121_vm12, %v12083_v52, %v4120_v58  ;;  %v8622_v52 = vld [vmem:[%s14425_s4 + $0x288] ss:$36 sps:$4 sm:$0xff]  }
 0x567   : > { %v12263_v16 = vpop.permute.xlu1 %4174  ;;  %4335 = vrot.lane.b32.xlu0 %v11884_v24, %s8842_s11  ;;  %5466 = vmatpush1.bf16.msra.mxu1 %v4014_v3  ;;  %v4128_v24 = vsel %vm4121_vm12, %v12105_v60, %v12089_v27  ;;  %v4127_v60 = vsel %vm4121_vm12, %v12127_v5, %v12111_v7 }
 0x568   : > { %5657 = vmatpush1.bf16.msra.mxu0 %v4129_v4  ;;  %5467 = vmatprep.subr.bf16.mxu1 %v12103_v14  ;;  %v8627_v14 = vld [vmem:[%s14425_s4 + $0x2d4] ss:$36 sps:$4 sm:$0xff]   ;;  %v6944_v4 = vld [vmem:[%s14426_s5 + $0x20] sm:$0xff] }
 0x569   : > { %5658 = vmatprep.subr.bf16.mxu0 %v12089_v27  ;;  %4276 = vrot.lane.b32.xlu1 %v11812_v13, %s8841_s13  ;;  %v12271_v25 = vpop.permute.xlu0 %4172  ;;  %v4012_v27 = vsel %vm340_vm7, %v12138_v57, %v12125_v32 }
 0x56a   : > { %5392 = vmatprep.mubr.bf16.mxu0 %v8624_v9  ;;  %v8642_v9 = vld [vmem:[%s14425_s4 + $0x43c] ss:$36 sps:$4 sm:$0xff]  }
 0x56b   : > { %v12282_v28 = vpop.permute.xlu1 %4056  ;;  %4274 = vrot.lane.b32.xlu0 %v11898_v20, %s8841_s13  ;;  %5468 = vmatpush1.bf16.msra.mxu1 %v4013_v11  ;;  %v6945_v11 = vld [vmem:[%s14426_s5 + $0x28] sm:$0xff] }
 0x56c   : > { %5659 = vmatpush1.bf16.msra.mxu0 %v4128_v24  ;;  %5469 = vmatprep.subr.bf16.mxu1 %v12125_v32  ;;  %v4071_v34 = vsel %vm4064_vm13, %v12282_v28, %v12235_v19  ;;  %v6946_v28 = vld [vmem:[%s14426_s5 + $0x30] sm:$0xff] }
 0x56d   : > { %5660 = vmatprep.subr.bf16.mxu0 %v12111_v7  ;;  %4333 = vrot.lane.b32.xlu1 %v11812_v13, %s8842_s11  ;;  %v12290_v54 = vpop.permute.xlu0 %4054  ;;  %v4011_v7 = vsel %vm340_vm7, %v12160_v10, %v12147_v23  ;;  %v4008_v10 = vsel %vm340_vm7, %v12226_v53, %v12213_v51 }
 0x56e   : > { %5393 = vmatmul.mubr.bf16.gmra.mxu0 %v8622_v52 }
 0x56f   : > { %v12301_v30 = vpop.permute.xlu1 %4170  ;;  %4290 = vrot.lane.b32.xlu0 %v11844_v46, %s8841_s13  ;;  %5470 = vmatpush1.bf16.msra.mxu1 %v4012_v27 }
 0x570   : > { %5661 = vmatpush1.bf16.msra.mxu0 %v4127_v60  ;;  %5471 = vmatprep.subr.bf16.mxu1 %v12147_v23  ;;  %v8628_v23 = vld [vmem:[%s14425_s4 + $0x318] ss:$36 sps:$4 sm:$0xff]  }
 0x571   : > { %5662 = vmatprep.subr.bf16.mxu0 %v12133_v43  ;;  %4272 = vrot.lane.b32.xlu1 %v11798_v36, %s8841_s13  ;;  %v12309_v13 = vpop.permute.xlu0 %4168  ;;  %v4010_v43 = vsel %vm340_vm7, %v12182_v0, %v12169_v56  ;;  %v6947_v60 = vld [vmem:[%s14426_s5 + $0x38] sm:$0xff] }
 0x572   : > { %5402 = vmatprep.mubr.bf16.mxu0 %v8627_v14 }
 0x573   : > { %v12320_v32 = vpop.permute.xlu1 %4052  ;;  %4347 = vrot.lane.b32.xlu0 %v11844_v46, %s8842_s11  ;;  %5472 = vmatpush1.bf16.msra.mxu1 %v4011_v7  ;;  %v8630_v46 = vld [vmem:[%s14425_s4 + $0x31c] ss:$36 sps:$4 sm:$0xff]  }
 0x574   : > { %5663 = vmatpush1.bf16.msra.mxu0 %v4126_v45  ;;  %5473 = vmatprep.subr.bf16.mxu1 %v12169_v56  ;;  %v4070_v2 = vsel %vm4064_vm13, %v12320_v32, %v12290_v54  ;;  %v6948_v45 = vld [vmem:[%s14426_s5 + $0x40] sm:$0xff] }
 0x575   : > { %5664 = vmatprep.subr.bf16.mxu0 %v12155_v47  ;;  %4329 = vrot.lane.b32.xlu1 %v11798_v36, %s8842_s11  ;;  %v12328_v5 = vpop.permute.xlu0 %4050  ;;  %v8633_v47 = vld [vmem:[%s14425_s4 + $0x364] ss:$36 sps:$4 sm:$0xff]  }
 0x576   : > { %5403 = vmatmul.mubr.bf16.gmra.mxu0 %v8625_v63  ;;  %v8643_v63 = vld [vmem:[%s14425_s4 + $0x8] ss:$36 sps:$4 sm:$0xff]  }
 0x577   : > { %v12339_v57 = vpop.permute.xlu1 %4166  ;;  %4331 = vrot.lane.b32.xlu0 %v11898_v20, %s8842_s11  ;;  %5474 = vmatpush1.bf16.msra.mxu1 %v4010_v43  ;;  %v4124_v20 = vsel %vm4121_vm12, %v12193_v48, %v12177_v17  ;;  %v8636_v48 = vld [vmem:[%s14425_s4 + $0x3ac] ss:$36 sps:$4 sm:$0xff]   ;;  %v8651_v43 = vld [vmem:[%s14425_s4 + $0x54] ss:$36 sps:$4 sm:$0xff]  }
 0x578   : > { %5665 = vmatpush1.bf16.msra.mxu0 %v4125_v1  ;;  %5475 = vmatprep.subr.bf16.mxu1 %v12191_v40  ;;  %v4184_v53 = vsel %vm4178_vm14, %v12339_v57, %v12309_v13 }
 0x579   : > { %5666 = vmatprep.subr.bf16.mxu0 %v12177_v17  ;;  %4268 = vrot.lane.b32.xlu1 %v11784_v35, %s8841_s13  ;;  %v12347_v36 = vpop.permute.xlu0 %4164  ;;  %v8631_v17 = vld [vmem:[%s14425_s4 + $0x360] ss:$36 sps:$4 sm:$0xff]  }
 0x57a   : > { %5412 = vmatprep.mubr.bf16.mxu0 %v8630_v46  ;;  %v6949_v46 = vld [vmem:[%s14426_s5 + $0x48] sm:$0xff] }
 0x57b   : > { %v4049_v42 = vpop.permute.xlu1 %4048  ;;  %4270 = vrot.lane.b32.xlu0 %v11911_v33, %s8841_s13  ;;  %5476 = vmatpush1.bf16.msra.mxu1 %v4009_v37 }
 0x57c   : > { %5667 = vmatpush1.bf16.msra.mxu0 %v4124_v20  ;;  %5477 = vmatprep.subr.bf16.mxu1 %v12213_v51  ;;  %v4069_v50 = vsel %vm4064_vm13, %v4049_v42, %v12328_v5  ;;  %v6951_v20 = vld [vmem:[%s14426_s5 + $0x58] sm:$0xff] }
 0x57d   : > { %5668 = vmatprep.subr.bf16.mxu0 %v12199_v29  ;;  %4325 = vrot.lane.b32.xlu1 %v11784_v35, %s8842_s11  ;;  %v12367_v55 = vpop.permute.xlu0 %4046  ;;  %v8654_v42 = vld [vmem:[%s14425_s4 + $0x5c] ss:$36 sps:$4 sm:$0xff]  }
 0x57e   : > { %5413 = vmatmul.mubr.bf16.gmra.mxu0 %v8628_v23  ;;  %v8646_v23 = vld [vmem:[%s14425_s4 + $0x10] ss:$36 sps:$4 sm:$0xff]  }
 0x57f   : > { %v12375_v56 = vpop.permute.xlu1 %4162  ;;  %4327 = vrot.lane.b32.xlu0 %v11911_v33, %s8842_s11  ;;  %5478 = vmatpush1.bf16.msra.mxu1 %v4008_v10  ;;  %v4122_v33 = vsel %vm4121_vm12, %v12237_v31, %v12221_v39  ;;  %v8649_v10 = vld [vmem:[%s14425_s4 + $0x50] ss:$36 sps:$4 sm:$0xff]  }
 0x580   : > { %5669 = vmatpush1.bf16.msra.mxu0 %v4123_v62  ;;  %5422 = vmatprep.mubr.bf16.mxu0 %v8633_v47  ;;  %v4183_v12 = vsel %vm4178_vm14, %v12375_v56, %v12347_v36  ;;  %v8657_v56 = vld [vmem:[%s14425_s4 + $0x9c] ss:$36 sps:$4 sm:$0xff]  }
 0x581   : > { %5670 = vmatprep.subr.bf16.mxu0 %v12221_v39  ;;  %4264 = vrot.lane.b32.xlu1 %v15215_v49, %s8841_s13  ;;  %v4063_v35 = vpop.permute.xlu0 %4062  ;;  %v6940_v39 = vld [vmem:[%s14426_s5] sm:$0xff] }
 0x582   : > { %5479 = vmatprep.subr.bf16.mxu1 %v4063_v35  ;;  %v4072_v21 = vsel %vm4064_vm13, %v12248_v18, %v4063_v35  ;;  %v6943_v18 = vld [vmem:[%s14426_s5 + $0x18] sm:$0xff]  ;;  %v6953_v35 = vld [vmem:[%s14426_s5 + $0x68] sm:$0xff] }
 0x583   : > { %v4045_v6 = vpop.permute.xlu1 %4044  ;;  %4266 = vrot.lane.b32.xlu0 %v11924_v15, %s8841_s13  ;;  %5480 = vmatpush2.bf16.msra.mxu1 %v4072_v21 }
 0x584   : > { %5671 = vmatpush1.bf16.msra.mxu0 %v4122_v33  ;;  %5481 = vmatprep.subr.bf16.mxu1 %v12235_v19  ;;  %v4068_v31 = vsel %vm4064_vm13, %v4045_v6, %v12367_v55  ;;  %v8652_v6 = vld [vmem:[%s14425_s4 + $0x58] ss:$36 sps:$4 sm:$0xff]  }
 0x585   : > { %4321 = vrot.lane.b32.xlu1 %v15215_v49, %s8842_s11  ;;  %v4177_v0 = vpop.permute.xlu0 %4176 }
 0x586   : > { %5423 = vmatmul.mubr.bf16.gmra.mxu0 %v8631_v17  ;;  %5672 = vmatprep.subr.bf16.mxu0 %v4177_v0  ;;  %v4186_v40 = vsel %vm4178_vm14, %v12263_v16, %v4177_v0  ;;  %v6954_v17 = vld [vmem:[%s14426_s5 + $0x70] sm:$0xff]  ;;  %v6955_v0 = vld [vmem:[%s14426_s5 + $0x78] sm:$0xff] }
 0x587   : > { %v4159_v29 = vpop.permute.xlu1 %4158  ;;  %4323 = vrot.lane.b32.xlu0 %v11924_v15, %s8842_s11  ;;  %5482 = vmatpush2.bf16.msra.mxu1 %v4071_v34  ;;  %v4185_v15 = vsel %vm4178_vm14, %v12301_v30, %v12271_v25  ;;  %v8648_v30 = vld [vmem:[%s14425_s4 + $0x14] ss:$36 sps:$4 sm:$0xff]   ;;  %v8660_v34 = vld [vmem:[%s14425_s4 + $0xa4] ss:$36 sps:$4 sm:$0xff]  }
 0x588   : > { %5673 = vmatpush2.bf16.msra.mxu0 %v4186_v40  ;;  %5483 = vmatprep.subr.bf16.mxu1 %v12290_v54  ;;  %v8640_v54 = vld [vmem:[%s14425_s4 + $0x438] ss:$36 sps:$4 sm:$0xff]  }
 0x589   : > { %5674 = vmatprep.subr.bf16.mxu0 %v12271_v25  ;;  %4260 = vrot.lane.b32.xlu1 %v15217_v59, %s8841_s13  ;;  %v4161_v49 = vpop.permute.xlu0 %4160 }
 0x58a   : > { %5432 = vmatprep.mubr.bf16.mxu0 %v8636_v48  ;;  %v4182_v25 = vsel %vm4178_vm14, %v4159_v29, %v4161_v49  ;;  %v6956_v48 = vld [vmem:[%s14426_s5 + $0x80] sm:$0xff]  ;;  %v8655_v29 = vld [vmem:[%s14425_s4 + $0x98] ss:$36 sps:$4 sm:$0xff]  }
 0x58b   : > { %v4041_v38 = vpop.permute.xlu1 %4040  ;;  %4262 = vrot.lane.b32.xlu0 %v11933_v61, %s8841_s13  ;;  %5484 = vmatpush2.bf16.msra.mxu1 %v4070_v2  ;;  %v8663_v2 = vld [vmem:[%s14425_s4 + $0xe4] ss:$36 sps:$4 sm:$0xff]  }
 0x58c   : > { %5675 = vmatpush2.bf16.msra.mxu0 %v4185_v15  ;;  %5485 = vmatprep.subr.bf16.mxu1 %v12328_v5 }
 0x58d   : > { %5676 = vmatprep.subr.bf16.mxu0 %v12309_v13  ;;  %4317 = vrot.lane.b32.xlu1 %v15217_v59, %s8842_s11  ;;  %v4043_v51 = vpop.permute.xlu0 %4042  ;;  %v6941_v59 = vld [vmem:[%s14426_s5 + $0x8] sm:$0xff] }
 0x58e   : > { %5433 = vmatmul.mubr.bf16.gmra.mxu0 %v8634_v41  ;;  %v4067_v3 = vsel %vm4064_vm13, %v4041_v38, %v4043_v51  ;;  %v6957_v41 = vld [vmem:[%s14426_s5 + $0x88] sm:$0xff]  ;;  %v6958_v38 = vld [vmem:[%s14426_s5 + $0x90] sm:$0xff] }
 0x58f   : > { %v4155_v26 = vpop.permute.xlu1 %4154  ;;  %4319 = vrot.lane.b32.xlu0 %v11933_v61, %s8842_s11  ;;  %5486 = vmatpush2.bf16.msra.mxu1 %v4069_v50  ;;  %v8637_v61 = vld [vmem:[%s14425_s4 + $0x3f0] ss:$36 sps:$4 sm:$0xff]   ;;  %v8658_v50 = vld [vmem:[%s14425_s4 + $0xa0] ss:$36 sps:$4 sm:$0xff]  }
 0x590   : > { %5677 = vmatpush2.bf16.msra.mxu0 %v4184_v53  ;;  %5487 = vmatprep.subr.bf16.mxu1 %v12367_v55  ;;  %v6952_v55 = vld [vmem:[%s14426_s5 + $0x60] sm:$0xff] }
 0x591   : > { %5678 = vmatprep.subr.bf16.mxu0 %v12347_v36  ;;  %6974 = vperm.xlu1 %8434, %v6940_v39   ;;  %v4157_v19 = vpop.permute.xlu0 %4156  ;;  %v6950_v36 = vld [vmem:[%s14426_s5 + $0x50] sm:$0xff]  ;;  %v6959_v39 = vld [vmem:[%s14426_s5 + $0x98] sm:$0xff] }
 0x592   : > { %5442 = vmatprep.mubr.bf16.mxu0 %v8639_v22  ;;  %v4181_v14 = vsel %vm4178_vm14, %v4155_v26, %v4157_v19  ;;  %v8666_v22 = vld [vmem:[%s14425_s4 + $0xec] ss:$36 sps:$4 sm:$0xff]   ;;  %v6960_v26 = vld [vmem:[%s14426_s5 + $0xa0] sm:$0xff] }
 0x593   : > { %v4037_v44 = vpop.permute.xlu1 %4036  ;;  %6979 = vperm.xlu0 %8433, %v6941_v59   ;;  %5488 = vmatpush2.bf16.msra.mxu1 %v4068_v31  ;;  %v8661_v59 = vld [vmem:[%s14425_s4 + $0xe0] ss:$36 sps:$4 sm:$0xff]   ;;  %v8669_v31 = vld [vmem:[%s14425_s4 + $0x12c] ss:$36 sps:$4 sm:$0xff]  }
 0x594   : > { %5679 = vmatpush2.bf16.msra.mxu0 %v4183_v12  ;;  %5489 = vmatprep.subr.bf16.mxu1 %v4043_v51  ;;  %v6962_v12 = vld [vmem:[%s14426_s5 + $0xb0] sm:$0xff] }
 0x595   : > { %5680 = vmatprep.subr.bf16.mxu0 %v4161_v49  ;;  %6984 = vperm.xlu1 %8434, %v6942_v8   ;;  %v4039_v58 = vpop.permute.xlu0 %4038  ;;  %v6961_v8 = vld [vmem:[%s14426_s5 + $0xa8] sm:$0xff] }
 0x596   : > { %5443 = vmatmul.mubr.bf16.gmra.mxu0 %v8637_v61  ;;  %v4066_v24 = vsel %vm4064_vm13, %v4037_v44, %v4039_v58 }
 0x597   : > { %v4151_v16 = vpop.permute.xlu1 %4150  ;;  %6989 = vperm.xlu0 %8433, %v6943_v18   ;;  %5490 = vmatpush2.bf16.msra.mxu1 %v4067_v3  ;;  %v8664_v18 = vld [vmem:[%s14425_s4 + $0xe8] ss:$36 sps:$4 sm:$0xff]   ;;  %v8672_v3 = vld [vmem:[%s14425_s4 + $0x134] ss:$36 sps:$4 sm:$0xff]  }
 0x598   : > { %5681 = vmatpush2.bf16.msra.mxu0 %v4182_v25  ;;  %5491 = vmatprep.subr.bf16.mxu1 %v4039_v58  ;;  %v6963_v58 = vld [vmem:[%s14426_s5 + $0xb8] sm:$0xff] }
 0x599   : > { %5682 = vmatprep.subr.bf16.mxu0 %v4157_v19  ;;  %6994 = vperm.xlu1 %8434, %v6944_v4   ;;  %v4153_v52 = vpop.permute.xlu0 %4152 }
 0x59a   : > { %5452 = vmatprep.mubr.bf16.mxu0 %v8642_v9  ;;  %v4180_v5 = vsel %vm4178_vm14, %v4151_v16, %v4153_v52  ;;  %v6964_v9 = vld [vmem:[%s14426_s5 + $0xc0] sm:$0xff]  ;;  %v8667_v16 = vld [vmem:[%s14425_s4 + $0x128] ss:$36 sps:$4 sm:$0xff]  }
 0x59b   : > { %v4033_v27 = vpop.permute.xlu1 %4032  ;;  %6999 = vperm.xlu0 %8433, %v6945_v11   ;;  %5492 = vmatpush2.bf16.msra.mxu1 %v4066_v24  ;;  %v6965_v11 = vld [vmem:[%s14426_s5 + $0xc8] sm:$0xff] }
 0x59c   : > { %5683 = vmatpush2.bf16.msra.mxu0 %v4181_v14  ;;  %v8670_v14 = vld [vmem:[%s14425_s4 + $0x130] ss:$36 sps:$4 sm:$0xff]  }
 0x59d   : > { %5684 = vmatprep.subr.bf16.mxu0 %v4153_v52  ;;  %7004 = vperm.xlu1 %8434, %v6946_v28   ;;  %v4035_v13 = vpop.permute.xlu0 %4034  ;;  %v8675_v52 = vld [vmem:[%s14425_s4 + $0x174] ss:$36 sps:$4 sm:$0xff]  }
 0x59e   : > { %5453 = vmatmul.mubr.bf16.gmra.mxu0 %v8640_v54  ;;  %5493 = vmatprep.subr.bf16.mxu1 %v4035_v13  ;;  %v4065_v7 = vsel %vm4064_vm13, %v4033_v27, %v4035_v13  ;;  %v6966_v54 = vld [vmem:[%s14426_s5 + $0xd0] sm:$0xff] }
 0x59f   : > { %v4147_v32 = vpop.permute.xlu1 %4146  ;;  %7009 = vperm.xlu0 %8433, %v6947_v60   ;;  %5494 = vmatpush2.bf16.msra.mxu1 %v4065_v7  ;;  %v6967_v60 = vld [vmem:[%s14426_s5 + $0xd8] sm:$0xff]  ;;  %v6968_v7 = vld [vmem:[%s14426_s5 + $0xe0] sm:$0xff] }
 0x5a0   : > { %5685 = vmatpush2.bf16.msra.mxu0 %v4180_v5  ;;  %5688 = vmatprep.mubr.bf16.mxu0 %v8648_v30  ;;  %v8678_v30 = vld [vmem:[%s14425_s4 + $0x17c] ss:$36 sps:$4 sm:$0xff]  }
 0x5a1   : > { %7014 = vperm.xlu1 %8434, %v6948_v45   ;;  %v4149_v1 = vpop.permute.xlu0 %4148  ;;  %v8681_v5 = vld [vmem:[%s14425_s4 + $0x1bc] ss:$36 sps:$4 sm:$0xff]  }
 0x5a2   : > { %5496 = vmatmul.mubr.bf16.vlgmr.msra.gmra.mxu1 %v8643_v63  ;;  %5686 = vmatprep.subr.bf16.mxu0 %v4149_v1  ;;  %v4179_v57 = vsel %vm4178_vm14, %v4147_v32, %v4149_v1  ;;  %v8673_v63 = vld [vmem:[%s14425_s4 + $0x170] ss:$36 sps:$4 sm:$0xff]  }
 0x5a3   : > { %v12499_v37 = vpop.permute.xlu1 %4231  ;;  %7019 = vperm.xlu0 %8433, %v6949_v46   ;;  %5505 = vmatprep.mubr.bf16.mxu1 %v8651_v43  ;;  %v6969_v43 = vld [vmem:[%s14426_s5 + $0xe8] sm:$0xff]  ;;  %v6970_v1 = vld [vmem:[%s14426_s5 + $0xf0] sm:$0xff] }
 0x5a4   : > { %5687 = vmatpush2.bf16.msra.mxu0 %v4179_v57 }
 0x5a5   : > { %7024 = vperm.xlu1 %8434, %v6950_v36   ;;  %v12510_v47 = vpop.permute.xlu0 %4229 }
 0x5a7   : > { %5689 = vmatmul.mubr.bf16.vlgmr.msra.gmra.mxu0 %v8646_v23  ;;  %v12518_v62 = vpop.permute.xlu1 %4227  ;;  %7029 = vperm.xlu0 %8433, %v6951_v20   ;;  %v6971_v23 = vld [vmem:[%s14426_s5 + $0xf8] sm:$0xff]  ;;  %v8684_v20 = vld [vmem:[%s14425_s4 + $0x1c4] ss:$36 sps:$4 sm:$0xff]  }
 0x5a8   : > { %5698 = vmatprep.mubr.bf16.mxu0 %v8654_v42  ;;  %v4242_v45 = vsel %vm424_vm5, %v12518_v62, %v12510_v47  ;;  %v8687_v62 = vld [vmem:[%s14425_s4 + $0x204] ss:$36 sps:$4 sm:$0xff]  }
 0x5a9   : > { %7034 = vperm.xlu1 %8434, %v6952_v55   ;;  %v12526_v21 = vpop.permute.xlu0 %4225 }
 0x5aa   : > { %5506 = vmatmul.mubr.bf16.gmra.mxu1 %v8649_v10 }
 0x5ab   : > { %v12531_v33 = vpop.permute.xlu1 %4223  ;;  %7039 = vperm.xlu0 %8433, %v6953_v35   ;;  %5515 = vmatprep.mubr.bf16.mxu1 %v8657_v56 }
 0x5ac   : > { %v4241_v57 = vsel %vm424_vm5, %v12531_v33, %v12526_v21  ;;  %v8690_v33 = vld [vmem:[%s14425_s4 + $0x20c] ss:$36 sps:$4 sm:$0xff]  }
 0x5ad   : > { %7044 = vperm.xlu1 %8434, %v6954_v17   ;;  %v12542_v40 = vpop.permute.xlu0 %4221  ;;  %v8682_v17 = vld [vmem:[%s14425_s4 + $0x1c0] ss:$36 sps:$4 sm:$0xff]  }
 0x5af   : > { %5699 = vmatmul.mubr.bf16.gmra.mxu0 %v8652_v6  ;;  %v12550_v49 = vpop.permute.xlu1 %4219  ;;  %7049 = vperm.xlu0 %8433, %v6955_v0   ;;  %v8685_v0 = vld [vmem:[%s14425_s4 + $0x200] ss:$36 sps:$4 sm:$0xff]  }
 0x5b0   : > { %5708 = vmatprep.mubr.bf16.mxu0 %v8660_v34  ;;  %v4240_v55 = vsel %vm424_vm5, %v12550_v49, %v12542_v40 }
 0x5b1   : > { %7054 = vperm.xlu1 %8434, %v6956_v48   ;;  %v12558_v15 = vpop.permute.xlu0 %4217  ;;  %v8693_v48 = vld [vmem:[%s14425_s4 + $0x24c] ss:$36 sps:$4 sm:$0xff]  }
 0x5b2   : > { %5516 = vmatmul.mubr.bf16.gmra.mxu1 %v8655_v29 }
 0x5b3   : > { %v12563_v51 = vpop.permute.xlu1 %4215  ;;  %7059 = vperm.xlu0 %8433, %v6957_v41   ;;  %5525 = vmatprep.mubr.bf16.mxu1 %v8663_v2  ;;  %v8688_v41 = vld [vmem:[%s14425_s4 + $0x208] ss:$36 sps:$4 sm:$0xff]  }
 0x5b4   : > { %v4239_v35 = vsel %vm424_vm5, %v12563_v51, %v12558_v15  ;;  %v8691_v51 = vld [vmem:[%s14425_s4 + $0x248] ss:$36 sps:$4 sm:$0xff]  }
 0x5b5   : > { %7064 = vperm.xlu1 %8434, %v6958_v38   ;;  %v12574_v53 = vpop.permute.xlu0 %4213 }
 0x5b7   : > { %5709 = vmatmul.mubr.bf16.gmra.mxu0 %v8658_v50  ;;  %v12582_v19 = vpop.permute.xlu1 %4211  ;;  %7069 = vperm.xlu0 %8433, %v6959_v39  }
 0x5b8   : > { %5718 = vmatprep.mubr.bf16.mxu0 %v8666_v22  ;;  %v4238_v34 = vsel %vm424_vm5, %v12582_v19, %v12574_v53  ;;  %v8699_v22 = vld [vmem:[%s14425_s4 + $0x294] ss:$36 sps:$4 sm:$0xff]  }
 0x5b9   : > { %7074 = vperm.xlu1 %8434, %v6960_v26   ;;  %v12590_v61 = vpop.permute.xlu0 %4209  ;;  %v8694_v19 = vld [vmem:[%s14425_s4 + $0x250] ss:$36 sps:$4 sm:$0xff]  }
 0x5ba   : > { %5526 = vmatmul.mubr.bf16.gmra.mxu1 %v8661_v59 }
 0x5bb   : > { %v12595_v44 = vpop.permute.xlu1 %4207  ;;  %7079 = vperm.xlu0 %8433, %v6961_v8   ;;  %5535 = vmatprep.mubr.bf16.mxu1 %v8669_v31 }
 0x5bc   : > { %v4237_v49 = vsel %vm424_vm5, %v12595_v44, %v12590_v61  ;;  %v8702_v44 = vld [vmem:[%s14425_s4 + $0x29c] ss:$36 sps:$4 sm:$0xff]  }
 0x5bd   : > { %7084 = vperm.xlu1 %8434, %v6962_v12   ;;  %v12606_v4 = vpop.permute.xlu0 %4205  ;;  %v8697_v12 = vld [vmem:[%s14425_s4 + $0x290] ss:$36 sps:$4 sm:$0xff]  }
 0x5bf   : > { %5719 = vmatmul.mubr.bf16.gmra.mxu0 %v8664_v18  ;;  %v12614_v25 = vpop.permute.xlu1 %4203  ;;  %7089 = vperm.xlu0 %8433, %v6963_v58  }
 0x5c0   : > { %5728 = vmatprep.mubr.bf16.mxu0 %v8672_v3  ;;  %v4236_v50 = vsel %vm424_vm5, %v12614_v25, %v12606_v4  ;;  %v8705_v3 = vld [vmem:[%s14425_s4 + $0x2dc] ss:$36 sps:$4 sm:$0xff]  }
 0x5c1   : > { %7094 = vperm.xlu1 %8434, %v6964_v9   ;;  %v4234_v24 = vpop.permute.xlu0 %4233 }
 0x5c2   : > { %5536 = vmatmul.mubr.bf16.gmra.mxu1 %v8667_v16  ;;  %5849 = vmatprep.subr.bf16.mxu1 %v4234_v24  ;;  %v4243_v28 = vsel %vm424_vm5, %v12499_v37, %v4234_v24  ;;  %v8676_v37 = vld [vmem:[%s14425_s4 + $0x178] ss:$36 sps:$4 sm:$0xff]  }
 0x5c3   : > { %v12627_v27 = vpop.permute.xlu1 %4288  ;;  %7099 = vperm.xlu0 %8433, %v6965_v11   ;;  %5850 = vmatpush1.bf16.msra.mxu1 %v4243_v28  ;;  %v8700_v24 = vld [vmem:[%s14425_s4 + $0x298] ss:$36 sps:$4 sm:$0xff]  }
 0x5c4   : > { %5851 = vmatprep.subr.bf16.mxu1 %v12510_v47  ;;  %5545 = vmatprep.mubr.bf16.mxu1 %v8675_v52  ;;  %v8679_v47 = vld [vmem:[%s14425_s4 + $0x1b8] ss:$36 sps:$4 sm:$0xff]  }
 0x5c5   : > { %7104 = vperm.xlu1 %8434, %v6966_v54   ;;  %v12639_v13 = vpop.permute.xlu0 %4286 }
 0x5c7   : > { %5729 = vmatmul.mubr.bf16.gmra.mxu0 %v8670_v14  ;;  %v12650_v32 = vpop.permute.xlu1 %4345  ;;  %7109 = vperm.xlu0 %8433, %v6967_v60   ;;  %v8703_v14 = vld [vmem:[%s14425_s4 + $0x2d8] ss:$36 sps:$4 sm:$0xff]   ;;  %v8708_v60 = vld [vmem:[%s14425_s4 + $0x2e4] ss:$36 sps:$4 sm:$0xff]  }
 0x5c8   : > { %5852 = vmatpush1.bf16.msra.mxu1 %v4242_v45  ;;  %5738 = vmatprep.mubr.bf16.mxu0 %v8678_v30 }
 0x5c9   : > { %5853 = vmatprep.subr.bf16.mxu1 %v12526_v21  ;;  %7114 = vperm.xlu1 %8434, %v6968_v7   ;;  %v12659_v46 = vpop.permute.xlu0 %4343 }
 0x5ca   : > { %5546 = vmatmul.mubr.bf16.gmra.mxu1 %v8673_v63  ;;  %v8711_v63 = vld [vmem:[%s14425_s4 + $0x324] ss:$36 sps:$4 sm:$0xff]  }
 0x5cb   : > { %v12667_v36 = vpop.permute.xlu1 %4284  ;;  %7119 = vperm.xlu0 %8433, %v6969_v43   ;;  %5555 = vmatprep.mubr.bf16.mxu1 %v8681_v5 }
 0x5cc   : > { %5854 = vmatpush1.bf16.msra.mxu1 %v4241_v57  ;;  %v4299_v18 = vsel %vm4292_vm15, %v12667_v36, %v12639_v13  ;;  %v8706_v57 = vld [vmem:[%s14425_s4 + $0x2e0] ss:$36 sps:$4 sm:$0xff]  }
 0x5cd   : > { %5855 = vmatprep.subr.bf16.mxu1 %v12542_v40  ;;  %7124 = vperm.xlu1 %8434, %v6970_v1   ;;  %v12679_v42 = vpop.permute.xlu0 %4282 }
 0x5cf   : > { %5739 = vmatmul.mubr.bf16.gmra.mxu0 %v8676_v37  ;;  %v12687_v10 = vpop.permute.xlu1 %4341  ;;  %7129 = vperm.xlu0 %8433, %v6971_v23  }
 0x5d0   : > { %5856 = vmatpush1.bf16.msra.mxu1 %v4240_v55  ;;  %5748 = vmatprep.mubr.bf16.mxu0 %v8684_v20  ;;  %v4356_v25 = vsel %vm4349_vm0, %v12687_v10, %v12659_v46  ;;  %v8709_v20 = vld [vmem:[%s14425_s4 + $0x320] ss:$36 sps:$4 sm:$0xff]  }
 0x5d1   : > { %5857 = vmatprep.subr.bf16.mxu1 %v12558_v15  ;;  %v12693_v56 = vpop.permute.xlu0 %4339  ;;  %v8696_v15 = vld [vmem:[%s14425_s4 + $0x254] ss:$36 sps:$4 sm:$0xff]  }
 0x5d2   : > { %5556 = vmatmul.mubr.bf16.gmra.mxu1 %v8679_v47 }
 0x5d3   : > { %v12698_v21 = vpop.permute.xlu1 %4280  ;;  %5565 = vmatprep.mubr.bf16.mxu1 %v8687_v62  ;;  %v8717_v62 = vld [vmem:[%s14425_s4 + $0x36c] ss:$36 sps:$4 sm:$0xff]  }
 0x5d4   : > { %5858 = vmatpush1.bf16.msra.mxu1 %v4239_v35  ;;  %v4298_v11 = vsel %vm4292_vm15, %v12698_v21, %v12679_v42 }
 0x5d5   : > { %5859 = vmatprep.subr.bf16.mxu1 %v12574_v53  ;;  %v12707_v6 = vpop.permute.xlu0 %4278 }
 0x5d7   : > { %5749 = vmatmul.mubr.bf16.gmra.mxu0 %v8682_v17  ;;  %v12715_v40 = vpop.permute.xlu1 %4337 }
 0x5d8   : > { %5860 = vmatpush1.bf16.msra.mxu1 %v4238_v34  ;;  %5758 = vmatprep.mubr.bf16.mxu0 %v8690_v33  ;;  %v4355_v30 = vsel %vm4349_vm0, %v12715_v40, %v12693_v56 }
 0x5d9   : > { %5861 = vmatprep.subr.bf16.mxu1 %v12590_v61  ;;  %v12721_v29 = vpop.permute.xlu0 %4335 }
 0x5da   : > { %5566 = vmatmul.mubr.bf16.gmra.mxu1 %v8685_v0  ;;  %v8712_v0 = vld [vmem:[%s14425_s4 + $0x328] ss:$36 sps:$4 sm:$0xff]  }
 0x5db   : > { %v4277_v2 = vpop.permute.xlu1 %4276  ;;  %5575 = vmatprep.mubr.bf16.mxu1 %v8693_v48  ;;  %v8720_v48 = vld [vmem:[%s14425_s4 + $0x374] ss:$36 sps:$4 sm:$0xff]  }
 0x5dc   : > { %5862 = vmatpush1.bf16.msra.mxu1 %v4237_v49 }
 0x5dd   : > { %5863 = vmatprep.subr.bf16.mxu1 %v12606_v4  ;;  %v12733_v38 = vpop.permute.xlu0 %4274 }
 0x5df   : > { %5759 = vmatmul.mubr.bf16.gmra.mxu0 %v8688_v41  ;;  %v12741_v39 = vpop.permute.xlu1 %4333 }
 0x5e0   : > { %5864 = vmatpush1.bf16.msra.mxu1 %v4236_v50  ;;  %5768 = vmatprep.mubr.bf16.mxu0 %v8696_v15  ;;  %v4354_v43 = vsel %vm4349_vm0, %v12741_v39, %v12721_v29  ;;  %v8723_v15 = vld [vmem:[%s14425_s4 + $0x3b4] ss:$36 sps:$4 sm:$0xff]   ;;  %v15218_v39 = vmov 0  }
 0x5e1   : > { %v4291_v53 = vpop.permute.xlu0 %4290 }
 0x5e2   : > { %5576 = vmatmul.mubr.bf16.gmra.mxu1 %v8691_v51  ;;  %5865 = vmatprep.subr.bf16.mxu1 %v4291_v53  ;;  %v4300_v26 = vsel %vm4292_vm15, %v12627_v27, %v4291_v53 }
 0x5e3   : > { %v4273_v59 = vpop.permute.xlu1 %4272  ;;  %5585 = vmatprep.mubr.bf16.mxu1 %v8699_v22 }
 0x5e4   : > { %5866 = vmatpush2.bf16.msra.mxu1 %v4300_v26  ;;  %v8718_v26 = vld [vmem:[%s14425_s4 + $0x370] ss:$36 sps:$4 sm:$0xff]  }
 0x5e5   : > { %5867 = vmatprep.subr.bf16.mxu1 %v12639_v13  ;;  %v4348_v31 = vpop.permute.xlu0 %4347  ;;  %v4297_v13 = vsel %vm4292_vm15, %v4277_v2, %v12707_v6  ;;  %v8715_v2 = vld [vmem:[%s14425_s4 + $0x368] ss:$36 sps:$4 sm:$0xff]  }
 0x5e6   : > { %v12752_v8 = vpop.f32.mrf.mxu0  ;;  %6042 = vmatprep.subr.bf16.mxu0 %v4348_v31  ;;  %v4357_v61 = vsel %vm4349_vm0, %v12650_v32, %v4348_v31 }
 0x5e7   : > { %5769 = vmatmul.mubr.bf16.gmra.mxu0 %v8694_v19  ;;  %v4330_v58 = vpop.permute.xlu1 %4329  ;;  %v8726_v19 = vld [vmem:[%s14425_s4 + $0x3bc] ss:$36 sps:$4 sm:$0xff]  }
 0x5e8   : > { %5868 = vmatpush2.bf16.msra.mxu1 %v4299_v18  ;;  %6043 = vmatpush1.bf16.msra.mxu0 %v4357_v61  ;;  %v12768_v4 = vpop.f32.mrf.mxu0  ;;  %v8721_v61 = vld [vmem:[%s14425_s4 + $0x3b0] ss:$36 sps:$4 sm:$0xff]  }
 0x5e9   : > { %5869 = vmatprep.subr.bf16.mxu1 %v12679_v42  ;;  %6044 = vmatprep.subr.bf16.mxu0 %v12659_v46  ;;  %v4332_v9 = vpop.permute.xlu0 %4331  ;;  %v4296_v46 = vsel %vm4292_vm15, %v4273_v59, %v12733_v38  ;;  %v8714_v42 = vld [vmem:[%s14425_s4 + $0x32c] ss:$36 sps:$4 sm:$0xff]  }
 0x5ea   : > { %v12772_v16 = vpop.f32.mrf.mxu0  ;;  %5586 = vmatmul.mubr.bf16.gmra.mxu1 %v8697_v12  ;;  %5778 = vmatprep.mubr.bf16.mxu0 %v8702_v44  ;;  %v4353_v10 = vsel %vm4349_vm0, %v4330_v58, %v4332_v9  ;;  %v8729_v12 = vld [vmem:[%s14425_s4 + $0x3fc] ss:$36 sps:$4 sm:$0xff]  }
 0x5eb   : > { %v4269_v52 = vpop.permute.xlu1 %4268  ;;  %5595 = vmatprep.mubr.bf16.mxu1 %v8705_v3  ;;  %v8724_v58 = vld [vmem:[%s14425_s4 + $0x3b8] ss:$36 sps:$4 sm:$0xff]  }
 0x5ec   : > { %5870 = vmatpush2.bf16.msra.mxu1 %v4298_v11  ;;  %6045 = vmatpush1.bf16.msra.mxu0 %v4356_v25  ;;  %v12783_v28 = vpop.f32.mrf.mxu0  ;;  %v8727_v11 = vld [vmem:[%s14425_s4 + $0x3f8] ss:$36 sps:$4 sm:$0xff]  }
 0x5ed   : > { %5871 = vmatprep.subr.bf16.mxu1 %v12707_v6  ;;  %6046 = vmatprep.subr.bf16.mxu0 %v12693_v56  ;;  %v4271_v54 = vpop.permute.xlu0 %4270 }
 0x5ee   : > { %v12787_v27 = vpop.f32.mrf.mxu0  ;;  %v4295_v55 = vsel %vm4292_vm15, %v4269_v52, %v4271_v54  ;;  %v8735_v52 = vld [vmem:[%s14425_s4 + $0x444] ss:$36 sps:$4 sm:$0xff]  }
 0x5ef   : > { %5779 = vmatmul.mubr.bf16.gmra.mxu0 %v8700_v24  ;;  %v4326_v7 = vpop.permute.xlu1 %4325 }
 0x5f0   : > { %5872 = vmatpush2.bf16.msra.mxu1 %v4297_v13  ;;  %6047 = vmatpush1.bf16.msra.mxu0 %v4355_v30  ;;  %v12803_v45 = vpop.f32.mrf.mxu0  ;;  %v8738_v30 = vld [vmem:[%s14425_s4 + $0x44c] ss:$36 sps:$4 sm:$0xff]  }
 0x5f1   : > { %5873 = vmatprep.subr.bf16.mxu1 %v12733_v38  ;;  %6048 = vmatprep.subr.bf16.mxu0 %v12721_v29  ;;  %v4328_v32 = vpop.permute.xlu0 %4327 }
 0x5f2   : > { %v12807_v5 = vpop.f32.mrf.mxu0  ;;  %5596 = vmatmul.mubr.bf16.gmra.mxu1 %v8703_v14  ;;  %5788 = vmatprep.mubr.bf16.mxu0 %v8708_v60  ;;  %v4352_v6 = vsel %vm4349_vm0, %v4326_v7, %v4328_v32  ;;  %v8730_v14 = vld [vmem:[%s14425_s4 + $0x400] ss:$36 sps:$4 sm:$0xff]  }
 0x5f3   : > { %v4265_v1 = vpop.permute.xlu1 %4264  ;;  %5605 = vmatprep.mubr.bf16.mxu1 %v8711_v63  ;;  %v8733_v7 = vld [vmem:[%s14425_s4 + $0x440] ss:$36 sps:$4 sm:$0xff]  }
 0x5f4   : > { %5874 = vmatpush2.bf16.msra.mxu1 %v4296_v46  ;;  %6049 = vmatpush1.bf16.msra.mxu0 %v4354_v43  ;;  %v12817_v36 = vpop.f32.mrf.mxu0  ;;  %v8741_v63 = vld [vmem:[%s14425_s4 + $0x1c] ss:$36 sps:$4 sm:$0xff]   ;;  %v8736_v46 = vld [vmem:[%s14425_s4 + $0x448] ss:$36 sps:$4 sm:$0xff]  }
 0x5f5   : > { %5875 = vmatprep.subr.bf16.mxu1 %v4271_v54  ;;  %6050 = vmatprep.subr.bf16.mxu0 %v4332_v9  ;;  %v4267_v37 = vpop.permute.xlu0 %4266  ;;  %v8732_v9 = vld [vmem:[%s14425_s4 + $0x404] ss:$36 sps:$4 sm:$0xff]  }
 0x5f6   : > { %v12819_v23 = vpop.f32.mrf.mxu0  ;;  %v4294_v33 = vsel %vm4292_vm15, %v4265_v1, %v4267_v37 }
 0x5f7   : > { %5789 = vmatmul.mubr.bf16.gmra.mxu0 %v8706_v57  ;;  %v4322_v47 = vpop.permute.xlu1 %4321 }
 0x5f8   : > { %5876 = vmatpush2.bf16.msra.mxu1 %v4295_v55  ;;  %6051 = vmatpush1.bf16.msra.mxu0 %v4353_v10  ;;  %v12832_v56 = vpop.f32.mrf.mxu0  ;;  %v8742_v55 = vld [vmem:[%s14425_s4 + $0x20] ss:$36 sps:$4 sm:$0xff]  }
 0x5f9   : > { %5877 = vmatprep.subr.bf16.mxu1 %v4267_v37  ;;  %6052 = vmatprep.subr.bf16.mxu0 %v4328_v32  ;;  %v4324_v35 = vpop.permute.xlu0 %4323  ;;  %v8739_v37 = vld [vmem:[%s14425_s4 + $0x18] ss:$36 sps:$4 sm:$0xff]  }
 0x5fa   : > { %v12834_v21 = vpop.f32.mrf.mxu0  ;;  %5606 = vmatmul.mubr.bf16.gmra.mxu1 %v8709_v20  ;;  %5798 = vmatprep.mubr.bf16.mxu0 %v8714_v42  ;;  %v4351_v41 = vsel %vm4349_vm0, %v4322_v47, %v4324_v35  ;;  %v8745_v20 = vld [vmem:[%s14425_s4 + $0x64] ss:$36 sps:$4 sm:$0xff]  }
 0x5fb   : > { %v4261_v17 = vpop.permute.xlu1 %4260  ;;  %5615 = vmatprep.mubr.bf16.mxu1 %v8717_v62 }
 0x5fc   : > { %5878 = vmatpush2.bf16.msra.mxu1 %v4294_v33  ;;  %6053 = vmatpush1.bf16.msra.mxu0 %v4352_v6  ;;  %v12841_v34 = vpop.f32.mrf.mxu0 }
 0x5fd   : > { %6054 = vmatprep.subr.bf16.mxu0 %v4324_v35  ;;  %v4263_v40 = vpop.permute.xlu0 %4262  ;;  %v8743_v35 = vld [vmem:[%s14425_s4 + $0x60] ss:$36 sps:$4 sm:$0xff]  }
 0x5fe   : > { %v12846_v29 = vpop.f32.mrf.mxu0  ;;  %5879 = vmatprep.subr.bf16.mxu1 %v4263_v40  ;;  %v4293_v49 = vsel %vm4292_vm15, %v4261_v17, %v4263_v40  ;;  %v8749_v17 = vld [vmem:[%s14425_s4 + $0xac] ss:$36 sps:$4 sm:$0xff]  }
 0x5ff   : > { %5799 = vmatmul.mubr.bf16.gmra.mxu0 %v8712_v0  ;;  %v4318_v51 = vpop.permute.xlu1 %4317  ;;  %v8746_v0 = vld [vmem:[%s14425_s4 + $0x68] ss:$36 sps:$4 sm:$0xff]  }
 0x600   : > { %5880 = vmatpush2.bf16.msra.mxu1 %v4293_v49  ;;  %6055 = vmatpush1.bf16.msra.mxu0 %v4351_v41  ;;  %v12856_v38 = vpop.f32.mrf.mxu0  ;;  %v8747_v49 = vld [vmem:[%s14425_s4 + $0xa8] ss:$36 sps:$4 sm:$0xff]  }
 0x601   : > { %v4320_v50 = vpop.permute.xlu0 %4319  ;;  %5808 = vmatprep.mubr.bf16.mxu0 %v8720_v48  ;;  %7451 = vmatprep.subr.bf16.mxu1 %v15218_v39 }
 0x602   : > { %v12859_v22 = vpop.f32.mrf.mxu0  ;;  %5616 = vmatmul.mubr.bf16.gmra.mxu1 %v8715_v2  ;;  %6056 = vmatprep.subr.bf16.mxu0 %v4320_v50  ;;  %v4350_v53 = vsel %vm4349_vm0, %v4318_v51, %v4320_v50  ;;  %v8753_v2 = vld [vmem:[%s14425_s4 + $0xf4] ss:$36 sps:$4 sm:$0xff]  }
 0x603   : > { %5625 = vmatprep.mubr.bf16.mxu1 %v8723_v15  ;;  %v8750_v51 = vld [vmem:[%s14425_s4 + $0xb0] ss:$36 sps:$4 sm:$0xff]  }
 0x604   : > { %6057 = vmatpush1.bf16.msra.mxu0 %v4350_v53  ;;  %v12865_v59 = vpop.f32.mrf.mxu0 }
 0x606   : > { %v12870_v31 = vpop.f32.mrf.mxu0 }
 0x607   : > { %5809 = vmatmul.mubr.bf16.gmra.mxu0 %v8718_v26  ;;  %v8751_v26 = vld [vmem:[%s14425_s4 + $0xf0] ss:$36 sps:$4 sm:$0xff]  }
 0x608   : > { %v12878_v44 = vpop.f32.mrf.mxu0  ;;  %5818 = vmatprep.mubr.bf16.mxu0 %v8726_v19  ;;  %v8757_v19 = vld [vmem:[%s14425_s4 + $0x13c] ss:$36 sps:$4 sm:$0xff]  }
 0x60a   : > { %v12880_v18 = vpop.f32.mrf.mxu0  ;;  %5626 = vmatmul.mubr.bf16.gmra.mxu1 %v8721_v61 }
 0x60b   : > { %5635 = vmatprep.mubr.bf16.mxu1 %v8729_v12 }
 0x60c   : > { %v12885_v3 = vpop.f32.mrf.mxu0 }
 0x60d   : > { %15219 = vst [vmem:[#allocation38_spill] sm:$0xff] %v12885_v3 }
 0x60e   : > { %v12890_v25 = vpop.f32.mrf.mxu0 }
 0x60f   : > { %5819 = vmatmul.mubr.bf16.gmra.mxu0 %v8724_v58  ;;  %v8754_v58 = vld [vmem:[%s14425_s4 + $0xf8] ss:$36 sps:$4 sm:$0xff]  }
 0x610   : > { %v12898_v24 = vpop.f32.mrf.mxu0  ;;  %5828 = vmatprep.mubr.bf16.mxu0 %v8732_v9 }
 0x612   : > { %5636 = vmatmul.mubr.bf16.gmra.mxu1 %v8727_v11  ;;  %v12900_v54 = vpop.f32.mrf.mxu0 }
 0x613   : > { %5645 = vmatprep.mubr.bf16.mxu1 %v8735_v52  ;;  %v8755_v52 = vld [vmem:[%s14425_s4 + $0x138] ss:$36 sps:$4 sm:$0xff]  }
 0x614   : > { %v12905_v60 = vpop.f32.mrf.mxu0 }
 0x615   : > { %15220 = vst [vmem:[#allocation8_spill] sm:$0xff] %v12905_v60 }
 0x616   : > { %v12910_v13 = vpop.f32.mrf.mxu0 }
 0x617   : > { %5829 = vmatmul.mubr.bf16.gmra.mxu0 %v8730_v14  ;;  %v8761_v14 = vld [vmem:[%s14425_s4 + $0x184] ss:$36 sps:$4 sm:$0xff]  }
 0x618   : > { %v12918_v32 = vpop.f32.mrf.mxu0  ;;  %5838 = vmatprep.mubr.bf16.mxu0 %v8738_v30 }
 0x61a   : > { %5646 = vmatmul.mubr.bf16.gmra.mxu1 %v8733_v7  ;;  %v12920_v43 = vpop.f32.mrf.mxu0 }
 0x61b   : > { %5881 = vmatprep.mubr.bf16.mxu1 %v8741_v63  ;;  %v8758_v63 = vld [vmem:[%s14425_s4 + $0x140] ss:$36 sps:$4 sm:$0xff]  }
 0x61c   : > { %v12925_v1 = vpop.f32.mrf.mxu0 }
 0x61d   : > { %15221 = vst [vmem:[#allocation77_spill] sm:$0xff] %v12925_v1  ;;  %v8775_v1 = vld [vmem:[%s14425_s4 + $0x2a0] ss:$36 sps:$4 sm:$0xff]  }
 0x61e   : > { %v12927_v57 = vpop.f32.mrf.mxu0 }
 0x61f   : > { %5839 = vmatmul.mubr.bf16.gmra.mxu0 %v8736_v46 }
 0x620   : > { %v12935_v42 = vpop.f32.mrf.mxu0  ;;  %6074 = vmatprep.mubr.bf16.mxu0 %v15218_v39 }
 0x622   : > { %5882 = vmatmul.mubr.bf16.vlgmr.msra.gmra.mxu1 %v8739_v37  ;;  %v12938_v47 = vpop.f32.mrf.mxu0 }
 0x623   : > { %5891 = vmatprep.mubr.bf16.mxu1 %v8745_v20  ;;  %v8759_v20 = vld [vmem:[%s14425_s4 + $0x180] ss:$36 sps:$4 sm:$0xff]  }
 0x624   : > { %v12943_v10 = vpop.f32.mrf.mxu0 }
 0x625   : > { %15222 = vst [vmem:[#allocation82_spill] sm:$0xff] %v12943_v10 }
 0x626   : > { %v12945_v62 = vpop.f32.mrf.mxu0 }
 0x627   : > { %6075 = vmatmul.mubr.bf16.vlgmr.msra.gmra.mxu0 %v8742_v55  ;;  %v8765_v55 = vld [vmem:[%s14425_s4 + $0x1cc] ss:$36 sps:$4 sm:$0xff]  }
 0x628   : > { %v12953_v33 = vpop.f32.mrf.mxu0  ;;  %6084 = vmatprep.mubr.bf16.mxu0 %v15218_v39 }
 0x62a   : > { %5892 = vmatmul.mubr.bf16.gmra.mxu1 %v8743_v35  ;;  %v12956_v6 = vpop.f32.mrf.mxu0 }
 0x62b   : > { %5901 = vmatprep.mubr.bf16.mxu1 %v8749_v17 }
 0x62c   : > { %v12961_v40 = vpop.f32.mrf.mxu0 }
 0x62d   : > { %15223 = vst [vmem:[#allocation20_spill] sm:$0xff] %v12961_v40 }
 0x62e   : > { %v12963_v48 = vpop.f32.mrf.mxu0 }
 0x62f   : > { %6085 = vmatmul.mubr.bf16.gmra.mxu0 %v8746_v0  ;;  %v8762_v0 = vld [vmem:[%s14425_s4 + $0x188] ss:$36 sps:$4 sm:$0xff]  }
 0x630   : > { %v12971_v41 = vpop.f32.mrf.mxu0  ;;  %6094 = vmatprep.mubr.bf16.mxu0 %v15218_v39 }
 0x632   : > { %5902 = vmatmul.mubr.bf16.gmra.mxu1 %v8747_v49  ;;  %v12974_v15 = vpop.f32.mrf.mxu0 }
 0x633   : > { %5911 = vmatprep.mubr.bf16.mxu1 %v8753_v2 }
 0x634   : > { %v12979_v50 = vpop.f32.mrf.mxu0 }
 0x635   : > { %15224 = vst [vmem:[#allocation10_spill] sm:$0xff] %v12979_v50 }
 0x636   : > { %v12981_v53 = vpop.f32.mrf.mxu0 }
 0x637   : > { %6095 = vmatmul.mubr.bf16.gmra.mxu0 %v8750_v51  ;;  %v8763_v51 = vld [vmem:[%s14425_s4 + $0x1c8] ss:$36 sps:$4 sm:$0xff]  }
 0x638   : > { %v12989_v61 = vpop.f32.mrf.mxu0  ;;  %6104 = vmatprep.mubr.bf16.mxu0 %v15218_v39 }
 0x63a   : > { %5912 = vmatmul.mubr.bf16.gmra.mxu1 %v8751_v26  ;;  %v12992_v12 = vpop.f32.mrf.mxu0  ;;  %v8769_v26 = vld [vmem:[%s14425_s4 + $0x214] ss:$36 sps:$4 sm:$0xff]  }
 0x63b   : > { %5921 = vmatprep.mubr.bf16.mxu1 %v8757_v19 }
 0x63c   : > { %v12997_v9 = vpop.f32.mrf.mxu0 }
 0x63d   : > { %15225 = vst [vmem:[#allocation81_spill] sm:$0xff] %v12997_v9 }
 0x63e   : > { %v12999_v11 = vpop.f32.mrf.mxu0 }
 0x63f   : > { %6105 = vmatmul.mubr.bf16.gmra.mxu0 %v8754_v58 }
 0x640   : > { %v13007_v30 = vpop.f32.mrf.mxu0  ;;  %6114 = vmatprep.mubr.bf16.mxu0 %v15218_v39 }
 0x642   : > { %5922 = vmatmul.mubr.bf16.gmra.mxu1 %v8755_v52  ;;  %v13010_v7 = vpop.f32.mrf.mxu0  ;;  %v8766_v52 = vld [vmem:[%s14425_s4 + $0x1d0] ss:$36 sps:$4 sm:$0xff]  }
 0x643   : > { %5931 = vmatprep.mubr.bf16.mxu1 %v8761_v14 }
 0x644   : > { %v13015_v46 = vpop.f32.mrf.mxu0 }
 0x645   : > { %15226 = vst [vmem:[#allocation116_spill] sm:$0xff] %v13015_v46  ;;  %v8777_v46 = vld [vmem:[%s14425_s4 + $0x2a4] ss:$36 sps:$4 sm:$0xff]  }
 0x646   : > { %v13017_v37 = vpop.f32.mrf.mxu0 }
 0x647   : > { %6115 = vmatmul.mubr.bf16.gmra.mxu0 %v8758_v63 }
 0x648   : > { %v13025_v35 = vpop.f32.mrf.mxu0  ;;  %6124 = vmatprep.mubr.bf16.mxu0 %v15218_v39 }
 0x64a   : > { %5932 = vmatmul.mubr.bf16.gmra.mxu1 %v8759_v20  ;;  %v13028_v17 = vpop.f32.mrf.mxu0  ;;  %v8767_v20 = vld [vmem:[%s14425_s4 + $0x210] ss:$36 sps:$4 sm:$0xff]  }
 0x64b   : > { %5941 = vmatprep.mubr.bf16.mxu1 %v8765_v55  ;;  %v8773_v55 = vld [vmem:[%s14425_s4 + $0x25c] ss:$36 sps:$4 sm:$0xff]  }
 0x64c   : > { %v13033_v49 = vpop.f32.mrf.mxu0 }
 0x64d   : > { %15227 = vst [vmem:[#allocation85_spill] sm:$0xff] %v13033_v49 }
 0x64e   : > { %v13035_v2 = vpop.f32.mrf.mxu0 }
 0x64f   : > { %6125 = vmatmul.mubr.bf16.gmra.mxu0 %v8762_v0 }
 0x650   : > { %v13043_v19 = vpop.f32.mrf.mxu0  ;;  %6134 = vmatprep.mubr.bf16.mxu0 %v15218_v39 }
 0x652   : > { %v13046_v58 = vpop.f32.mrf.mxu0  ;;  %5942 = vmatmul.mubr.bf16.gmra.mxu1 %v8763_v51 }
 0x653   : > { %5951 = vmatprep.mubr.bf16.mxu1 %v8769_v26  ;;  %v8770_v26 = vld [vmem:[%s14425_s4 + $0x218] ss:$36 sps:$4 sm:$0xff]  }
 0x654   : > { %v13051_v14 = vpop.f32.mrf.mxu0 }
 0x655   : > { %15228 = vst [vmem:[#allocation51_spill] sm:$0xff] %v13051_v14 }
 0x656   : > { %v13053_v63 = vpop.f32.mrf.mxu0 }
 0x657   : > { %6135 = vmatmul.mubr.bf16.gmra.mxu0 %v8766_v52  ;;  %v8771_v52 = vld [vmem:[%s14425_s4 + $0x258] ss:$36 sps:$4 sm:$0xff]  }
 0x658   : > { %v13061_v0 = vpop.f32.mrf.mxu0  ;;  %6144 = vmatprep.mubr.bf16.mxu0 %v15218_v39 }
 0x65a   : > { %v13064_v51 = vpop.f32.mrf.mxu0  ;;  %5952 = vmatmul.mubr.bf16.gmra.mxu1 %v8767_v20 }
 0x65b   : > { %15229 = vst [vmem:[#allocation113_spill] sm:$0xff] %v13064_v51  ;;  %5961 = vmatprep.mubr.bf16.mxu1 %v8773_v55 }
 0x65c   : > { %v13069_v14 = vpop.f32.mrf.mxu0 }
 0x65d   : > { %15230 = vst [vmem:[#allocation89_spill] sm:$0xff] %v13069_v14  ;;  %v8774_v14 = vld [vmem:[%s14425_s4 + $0x260] ss:$36 sps:$4 sm:$0xff]  }
 0x65e   : > { %v13071_v49 = vpop.f32.mrf.mxu0 }
 0x65f   : > { %15231 = vst [vmem:[#allocation39_spill] sm:$0xff] %v13071_v49  ;;  %6145 = vmatmul.mubr.bf16.gmra.mxu0 %v8770_v26 }
 0x660   : > { %v13079_v9 = vpop.f32.mrf.mxu0  ;;  %6154 = vmatprep.mubr.bf16.mxu0 %v15218_v39 }
 0x661   : > { %15232 = vst [vmem:[#allocation111_spill] sm:$0xff] %v13079_v9 }
 0x662   : > { %v13082_v20 = vpop.f32.mrf.mxu0  ;;  %v5497_v55 = vpop.f32.mrf.mxu1  ;;  %5962 = vmatmul.mubr.bf16.gmra.mxu1 %v8771_v52  ;;  %v8781_v52 = vld [vmem:[%s14425_s4 + $0x2ec] ss:$36 sps:$4 sm:$0xff]  }
 0x663   : > { %15233 = vst [vmem:[#allocation90_spill] sm:$0xff] %v13082_v20  ;;  %5971 = vmatprep.mubr.bf16.mxu1 %v8777_v46  ;;  %v5498_v40 = vadd.f32 %v5497_v55, %v12752_v8 }
 0x664   : > { %v13087_v50 = vpop.f32.mrf.mxu0  ;;  %v5499_v26 = vpop.f32.mrf.mxu1 }
 0x665   : > { %15234 = vst [vmem:[#allocation42_spill] sm:$0xff] %v13087_v50  ;;  %v5500_v3 = vadd.f32 %v5499_v26, %v12768_v4 }
 0x666   : > { %v5501_v10 = vpop.f32.mrf.mxu1 }
 0x667   : > { %v5690_v60 = vpop.f32.mrf.mxu0  ;;  %6155 = vmatmul.mubr.bf16.gmra.mxu0 %v8774_v14  ;;  %v5502_v8 = vadd.f32 %v5501_v10, %v12772_v16  ;;  %v8778_v14 = vld [vmem:[%s14425_s4 + $0x2a8] ss:$36 sps:$4 sm:$0xff]   ;;  %v8785_v10 = vld [vmem:[%s14425_s4 + $0x334] ss:$36 sps:$4 sm:$0xff]  }
 0x668   : > { %v13097_v20 = vadd.f32 %v5690_v60, %v5498_v40  ;;  %v5503_v46 = vpop.f32.mrf.mxu1  ;;  %6164 = vmatprep.mubr.bf16.mxu0 %v15218_v39 }
 0x669   : > { %v5692_v50 = vpop.f32.mrf.mxu0  ;;  %v5504_v4 = vadd.f32 %v5503_v46, %v12783_v28 }
 0x66a   : > { %15235 = vst [vmem:[#allocation117_spill] sm:$0xff] %v13097_v20  ;;  %v13101_v55 = vadd.f32 %v5692_v50, %v5500_v3  ;;  %v5507_v9 = vpop.f32.mrf.mxu1  ;;  %5972 = vmatmul.mubr.bf16.gmra.mxu1 %v8775_v1  ;;  %v8779_v3 = vld [vmem:[%s14425_s4 + $0x2e8] ss:$36 sps:$4 sm:$0xff]  }
 0x66b   : > { %v5694_v49 = vpop.f32.mrf.mxu0  ;;  %5981 = vmatprep.mubr.bf16.mxu1 %v8781_v52  ;;  %v5508_v20 = vadd.f32 %v5507_v9, %v12787_v27 }
 0x66c   : > { %v13107_v60 = vadd.f32 %v5694_v49, %v5502_v8  ;;  %v5509_v40 = vpop.f32.mrf.mxu1 }
 0x66d   : > { %v5696_v26 = vpop.f32.mrf.mxu0  ;;  %v5510_v28 = vadd.f32 %v5509_v40, %v12803_v45 }
 0x66e   : > { %v13110_v51 = vadd.f32 %v5696_v26, %v5504_v4  ;;  %v5511_v16 = vpop.f32.mrf.mxu1 }
 0x66f   : > { %v5700_v1 = vpop.f32.mrf.mxu0  ;;  %6165 = vmatmul.mubr.bf16.gmra.mxu0 %v8778_v14  ;;  %v5512_v9 = vadd.f32 %v5511_v16, %v12807_v5  ;;  %v8782_v14 = vld [vmem:[%s14425_s4 + $0x2f0] ss:$36 sps:$4 sm:$0xff]  }
 0x670   : > { %v13119_v50 = vadd.f32 %v5700_v1, %v5508_v20  ;;  %v5513_v49 = vpop.f32.mrf.mxu1  ;;  %6174 = vmatprep.mubr.bf16.mxu0 %v15218_v39  ;;  %v8783_v16 = vld [vmem:[%s14425_s4 + $0x330] ss:$36 sps:$4 sm:$0xff]  }
 0x671   : > { %v5702_v27 = vpop.f32.mrf.mxu0  ;;  %v5514_v45 = vadd.f32 %v5513_v49, %v12817_v36 }
 0x672   : > { %v13123_v52 = vadd.f32 %v5702_v27, %v5510_v28  ;;  %v5517_v46 = vpop.f32.mrf.mxu1  ;;  %5982 = vmatmul.mubr.bf16.gmra.mxu1 %v8779_v3 }
 0x673   : > { %v5704_v8 = vpop.f32.mrf.mxu0  ;;  %5991 = vmatprep.mubr.bf16.mxu1 %v8785_v10  ;;  %v5518_v26 = vadd.f32 %v5517_v46, %v12819_v23  ;;  %v8789_v10 = vld [vmem:[%s14425_s4 + $0x37c] ss:$36 sps:$4 sm:$0xff]  }
 0x674   : > { %v13129_v20 = vadd.f32 %v5704_v8, %v5512_v9  ;;  %v5519_v4 = vpop.f32.mrf.mxu1 }
 0x675   : > { %v5706_v40 = vpop.f32.mrf.mxu0  ;;  %v5520_v36 = vadd.f32 %v5519_v4, %v12832_v56 }
 0x676   : > { %v13132_v1 = vadd.f32 %v5706_v40, %v5514_v45  ;;  %v5521_v5 = vpop.f32.mrf.mxu1 }
 0x677   : > { %v5710_v3 = vpop.f32.mrf.mxu0  ;;  %6175 = vmatmul.mubr.bf16.gmra.mxu0 %v8782_v14  ;;  %v5522_v27 = vadd.f32 %v5521_v5, %v12834_v21  ;;  %v8786_v14 = vld [vmem:[%s14425_s4 + $0x338] ss:$36 sps:$4 sm:$0xff]  }
 0x678   : > { %v13141_v28 = vadd.f32 %v5710_v3, %v5518_v26  ;;  %v5523_v49 = vpop.f32.mrf.mxu1  ;;  %6184 = vmatprep.mubr.bf16.mxu0 %v15218_v39  ;;  %v8787_v5 = vld [vmem:[%s14425_s4 + $0x378] ss:$36 sps:$4 sm:$0xff]  }
 0x679   : > { %v5712_v23 = vpop.f32.mrf.mxu0  ;;  %v5524_v56 = vadd.f32 %v5523_v49, %v12841_v34 }
 0x67a   : > { %v13145_v9 = vadd.f32 %v5712_v23, %v5520_v36  ;;  %v5527_v46 = vpop.f32.mrf.mxu1  ;;  %5992 = vmatmul.mubr.bf16.gmra.mxu1 %v8783_v16 }
 0x67b   : > { %v5714_v8 = vpop.f32.mrf.mxu0  ;;  %6001 = vmatprep.mubr.bf16.mxu1 %v8789_v10  ;;  %v5528_v26 = vadd.f32 %v5527_v46, %v12846_v29  ;;  %v8793_v10 = vld [vmem:[%s14425_s4 + $0x3c4] ss:$36 sps:$4 sm:$0xff]  }
 0x67c   : > { %v13151_v45 = vadd.f32 %v5714_v8, %v5522_v27  ;;  %v5529_v4 = vpop.f32.mrf.mxu1 }
 0x67d   : > { %v5716_v40 = vpop.f32.mrf.mxu0  ;;  %v5530_v34 = vadd.f32 %v5529_v4, %v12856_v38 }
 0x67e   : > { %v13154_v3 = vadd.f32 %v5716_v40, %v5524_v56  ;;  %v5531_v21 = vpop.f32.mrf.mxu1 }
 0x67f   : > { %v5720_v16 = vpop.f32.mrf.mxu0  ;;  %6185 = vmatmul.mubr.bf16.gmra.mxu0 %v8786_v14  ;;  %v5532_v23 = vadd.f32 %v5531_v21, %v12859_v22  ;;  %v8790_v14 = vld [vmem:[%s14425_s4 + $0x380] ss:$36 sps:$4 sm:$0xff]  }
 0x680   : > { %v13163_v36 = vadd.f32 %v5720_v16, %v5528_v26  ;;  %v5533_v49 = vpop.f32.mrf.mxu1  ;;  %6194 = vmatprep.mubr.bf16.mxu0 %v15218_v39  ;;  %v8791_v21 = vld [vmem:[%s14425_s4 + $0x3c0] ss:$36 sps:$4 sm:$0xff]  }
 0x681   : > { %v5722_v29 = vpop.f32.mrf.mxu0  ;;  %v5534_v38 = vadd.f32 %v5533_v49, %v12865_v59 }
 0x682   : > { %v13167_v27 = vadd.f32 %v5722_v29, %v5530_v34  ;;  %v5537_v46 = vpop.f32.mrf.mxu1  ;;  %6002 = vmatmul.mubr.bf16.gmra.mxu1 %v8787_v5 }
 0x683   : > { %v5724_v8 = vpop.f32.mrf.mxu0  ;;  %6011 = vmatprep.mubr.bf16.mxu1 %v8793_v10  ;;  %v5538_v26 = vadd.f32 %v5537_v46, %v12870_v31  ;;  %v8797_v10 = vld [vmem:[%s14425_s4 + $0x40c] ss:$36 sps:$4 sm:$0xff]  }
 0x684   : > { %v13173_v56 = vadd.f32 %v5724_v8, %v5532_v23  ;;  %v5539_v4 = vpop.f32.mrf.mxu1 }
 0x685   : > { %v5726_v40 = vpop.f32.mrf.mxu0  ;;  %v5540_v59 = vadd.f32 %v5539_v4, %v12878_v44 }
 0x686   : > { %v13176_v16 = vadd.f32 %v5726_v40, %v5534_v38  ;;  %v5541_v22 = vpop.f32.mrf.mxu1 }
 0x687   : > { %v5730_v5 = vpop.f32.mrf.mxu0  ;;  %6195 = vmatmul.mubr.bf16.gmra.mxu0 %v8790_v14  ;;  %v5542_v29 = vadd.f32 %v5541_v22, %v12880_v18  ;;  %v8794_v14 = vld [vmem:[%s14425_s4 + $0x3c8] ss:$36 sps:$4 sm:$0xff]  }
 0x688   : > { %v13185_v34 = vadd.f32 %v5730_v5, %v5538_v26  ;;  %v13187_v49 = vpop.f32.mrf.mxu1  ;;  %6204 = vmatprep.mubr.bf16.mxu0 %v15218_v39  ;;  %v8795_v18 = vld [vmem:[%s14425_s4 + $0x408] ss:$36 sps:$4 sm:$0xff]  }
 0x689   : > { %v5732_v31 = vpop.f32.mrf.mxu0 }
 0x68a   : > { %v13191_v23 = vadd.f32 %v5732_v31, %v5540_v59  ;;  %v5547_v46 = vpop.f32.mrf.mxu1  ;;  %6012 = vmatmul.mubr.bf16.gmra.mxu1 %v8791_v21  ;;  %v8801_v21 = vld [vmem:[%s14425_s4 + $0x454] ss:$36 sps:$4 sm:$0xff]  }
 0x68b   : > { %v5734_v8 = vpop.f32.mrf.mxu0  ;;  %6021 = vmatprep.mubr.bf16.mxu1 %v8797_v10  ;;  %v5548_v40 = vadd.f32 %v5547_v46, %v12890_v25 }
 0x68c   : > { %v13196_v44 = vadd.f32 %v5734_v8, %v5542_v29  ;;  %v5549_v38 = vpop.f32.mrf.mxu1 }
 0x68d   : > { %v13198_v4 = vpop.f32.mrf.mxu0  ;;  %v5550_v5 = vadd.f32 %v5549_v38, %v12898_v24 }
 0x68e   : > { %v5551_v26 = vpop.f32.mrf.mxu1 }
 0x68f   : > { %v5740_v22 = vpop.f32.mrf.mxu0  ;;  %6205 = vmatmul.mubr.bf16.gmra.mxu0 %v8794_v14  ;;  %v5552_v31 = vadd.f32 %v5551_v26, %v12900_v54  ;;  %v8798_v14 = vld [vmem:[%s14425_s4 + $0x410] ss:$36 sps:$4 sm:$0xff]  }
 0x690   : > { %v13208_v10 = vadd.f32 %v5740_v22, %v5548_v40  ;;  %v13210_v59 = vpop.f32.mrf.mxu1  ;;  %6214 = vmatprep.mubr.bf16.mxu0 %v15218_v39  ;;  %v8799_v54 = vld [vmem:[%s14425_s4 + $0x450] ss:$36 sps:$4 sm:$0xff]  }
 0x691   : > { %15236 = vst [vmem:[#allocation93_spill] sm:$0xff] %v13210_v59  ;;  %v5742_v25 = vpop.f32.mrf.mxu0 }
 0x692   : > { %v13214_v29 = vadd.f32 %v5742_v25, %v5550_v5  ;;  %v5557_v46 = vpop.f32.mrf.mxu1  ;;  %6022 = vmatmul.mubr.bf16.gmra.mxu1 %v8795_v18 }
 0x693   : > { %v5744_v8 = vpop.f32.mrf.mxu0  ;;  %6031 = vmatprep.mubr.bf16.mxu1 %v8801_v21  ;;  %v5558_v22 = vadd.f32 %v5557_v46, %v12910_v13 }
 0x694   : > { %v13219_v24 = vadd.f32 %v5744_v8, %v5552_v31  ;;  %v5559_v38 = vpop.f32.mrf.mxu1 }
 0x695   : > { %v13221_v40 = vpop.f32.mrf.mxu0  ;;  %v5560_v18 = vadd.f32 %v5559_v38, %v12918_v32 }
 0x696   : > { %15237 = vst [vmem:[#allocation94_spill] sm:$0xff] %v13219_v24  ;;  %v5561_v59 = vpop.f32.mrf.mxu1 }
 0x697   : > { %v5750_v26 = vpop.f32.mrf.mxu0  ;;  %6215 = vmatmul.mubr.bf16.gmra.mxu0 %v8798_v14  ;;  %v5562_v31 = vadd.f32 %v5561_v59, %v12920_v43  ;;  %v8802_v14 = vld [vmem:[%s14425_s4 + $0x458] ss:$36 sps:$4 sm:$0xff]  }
 0x698   : > { %v13228_v5 = vadd.f32 %v5750_v26, %v5558_v22  ;;  %v13230_v25 = vpop.f32.mrf.mxu1  ;;  %6224 = vmatprep.mubr.bf16.mxu0 %v15218_v39 }
 0x699   : > { %v5752_v21 = vpop.f32.mrf.mxu0 }
 0x69a   : > { %v13234_v8 = vadd.f32 %v5752_v21, %v5560_v18  ;;  %v5567_v13 = vpop.f32.mrf.mxu1  ;;  %6032 = vmatmul.mubr.bf16.gmra.mxu1 %v8799_v54 }
 0x69b   : > { %v5754_v46 = vpop.f32.mrf.mxu0  ;;  %v5568_v22 = vadd.f32 %v5567_v13, %v12927_v57 }
 0x69c   : > { %15238 = vst [vmem:[#allocation15_spill] sm:$0xff] %v13234_v8  ;;  %v13239_v24 = vadd.f32 %v5754_v46, %v5562_v31  ;;  %v5569_v32 = vpop.f32.mrf.mxu1 }
 0x69d   : > { %v13241_v38 = vpop.f32.mrf.mxu0  ;;  %v5570_v43 = vadd.f32 %v5569_v32, %v12935_v42 }
 0x69e   : > { %15239 = vst [vmem:[#allocation86_spill] sm:$0xff] %v13239_v24  ;;  %15240 = vst [vmem:[#allocation100_spill] sm:$0xff] %v13241_v38  ;;  %v5571_v26 = vpop.f32.mrf.mxu1 }
 0x69f   : > { %v5760_v39 = vpop.f32.mrf.mxu0  ;;  %6225 = vmatmul.mubr.bf16.gmra.mxu0 %v8802_v14  ;;  %v5572_v21 = vadd.f32 %v5571_v26, %v12938_v47 }
 0x6a0   : > { %v13245_v59 = vadd.f32 %v5760_v39, %v5568_v22  ;;  %v13247_v54 = vpop.f32.mrf.mxu1 }
 0x6a1   : > { %v5762_v18 = vpop.f32.mrf.mxu0 }
 0x6a2   : > { %v13250_v8 = vadd.f32 %v5762_v18, %v5570_v43  ;;  %v5577_v31 = vpop.f32.mrf.mxu1 }
 0x6a3   : > { %v5764_v46 = vpop.f32.mrf.mxu0  ;;  %v5578_v13 = vadd.f32 %v5577_v31, %v12945_v62 }
 0x6a4   : > { %v13252_v24 = vadd.f32 %v5764_v46, %v5572_v21  ;;  %v5579_v38 = vpop.f32.mrf.mxu1 }
 0x6a5   : > { %v13254_v57 = vpop.f32.mrf.mxu0  ;;  %v5580_v39 = vadd.f32 %v5579_v38, %v12953_v33 }
 0x6a6   : > { %15241 = vst [vmem:[#allocation56_spill] sm:$0xff] %v13252_v24  ;;  %15242 = vst [vmem:[#allocation16_spill] sm:$0xff] %v13254_v57  ;;  %v5581_v14 = vpop.f32.mrf.mxu1 }
 0x6a7   : > { %v5770_v42 = vpop.f32.mrf.mxu0  ;;  %v5582_v26 = vadd.f32 %v5581_v14, %v12956_v6 }
 0x6a8   : > { %v13258_v32 = vadd.f32 %v5770_v42, %v5578_v13  ;;  %v13260_v22 = vpop.f32.mrf.mxu1 }
 0x6a9   : > { %v5772_v47 = vpop.f32.mrf.mxu0 }
 0x6aa   : > { %v13263_v43 = vadd.f32 %v5772_v47, %v5580_v39  ;;  %v5587_v18 = vpop.f32.mrf.mxu1 }
 0x6ab   : > { %v5774_v21 = vpop.f32.mrf.mxu0  ;;  %v5588_v62 = vadd.f32 %v5587_v18, %v12963_v48 }
 0x6ac   : > { %v13265_v46 = vadd.f32 %v5774_v21, %v5582_v26  ;;  %v5589_v24 = vpop.f32.mrf.mxu1 }
 0x6ad   : > { %v13267_v57 = vpop.f32.mrf.mxu0  ;;  %v5590_v38 = vadd.f32 %v5589_v24, %v12971_v41 }
 0x6ae   : > { %15243 = vst [vmem:[#allocation91_spill] sm:$0xff] %v13265_v46  ;;  %15244 = vst [vmem:[#allocation47_spill] sm:$0xff] %v13267_v57  ;;  %v5591_v31 = vpop.f32.mrf.mxu1 }
 0x6af   : > { %v5780_v33 = vpop.f32.mrf.mxu0  ;;  %v5592_v14 = vadd.f32 %v5591_v31, %v12974_v15 }
 0x6b0   : > { %v13271_v13 = vadd.f32 %v5780_v33, %v5588_v62  ;;  %v13273_v42 = vpop.f32.mrf.mxu1 }
 0x6b1   : > { %v5782_v6 = vpop.f32.mrf.mxu0 }
 0x6b2   : > { %v13276_v39 = vadd.f32 %v5782_v6, %v5590_v38  ;;  %v5597_v47 = vpop.f32.mrf.mxu1 }
 0x6b3   : > { %v5784_v26 = vpop.f32.mrf.mxu0  ;;  %v5598_v48 = vadd.f32 %v5597_v47, %v12981_v53 }
 0x6b4   : > { %v13278_v21 = vadd.f32 %v5784_v26, %v5592_v14  ;;  %v5599_v46 = vpop.f32.mrf.mxu1 }
 0x6b5   : > { %v13280_v57 = vpop.f32.mrf.mxu0  ;;  %v5600_v24 = vadd.f32 %v5599_v46, %v12989_v61 }
 0x6b6   : > { %15245 = vst [vmem:[#allocation37_spill] sm:$0xff] %v13278_v21  ;;  %15246 = vst [vmem:[#allocation107_spill] sm:$0xff] %v13280_v57  ;;  %v5601_v18 = vpop.f32.mrf.mxu1 }
 0x6b7   : > { %v5790_v41 = vpop.f32.mrf.mxu0  ;;  %v5602_v31 = vadd.f32 %v5601_v18, %v12992_v12 }
 0x6b8   : > { %v13284_v62 = vadd.f32 %v5790_v41, %v5598_v48  ;;  %v13286_v33 = vpop.f32.mrf.mxu1 }
 0x6b9   : > { %v5792_v15 = vpop.f32.mrf.mxu0 }
 0x6ba   : > { %v13289_v38 = vadd.f32 %v5792_v15, %v5600_v24  ;;  %v5607_v6 = vpop.f32.mrf.mxu1 }
 0x6bb   : > { %v5794_v14 = vpop.f32.mrf.mxu0  ;;  %v5608_v53 = vadd.f32 %v5607_v6, %v12999_v11 }
 0x6bc   : > { %v13291_v26 = vadd.f32 %v5794_v14, %v5602_v31  ;;  %v5609_v21 = vpop.f32.mrf.mxu1 }
 0x6bd   : > { %v13293_v57 = vpop.f32.mrf.mxu0  ;;  %v5610_v46 = vadd.f32 %v5609_v21, %v13007_v30 }
 0x6be   : > { %15247 = vst [vmem:[#allocation48_spill] sm:$0xff] %v13291_v26  ;;  %15248 = vst [vmem:[#allocation122_spill] sm:$0xff] %v13293_v57  ;;  %v5611_v47 = vpop.f32.mrf.mxu1 }
 0x6bf   : > { %v5800_v61 = vpop.f32.mrf.mxu0  ;;  %v5612_v18 = vadd.f32 %v5611_v47, %v13010_v7 }
 0x6c0   : > { %v13297_v48 = vadd.f32 %v5800_v61, %v5608_v53  ;;  %v13299_v41 = vpop.f32.mrf.mxu1 }
 0x6c1   : > { %v5802_v12 = vpop.f32.mrf.mxu0 }
 0x6c2   : > { %v13302_v24 = vadd.f32 %v5802_v12, %v5610_v46  ;;  %v5617_v15 = vpop.f32.mrf.mxu1 }
 0x6c3   : > { %v5804_v31 = vpop.f32.mrf.mxu0  ;;  %v5618_v11 = vadd.f32 %v5617_v15, %v13017_v37 }
 0x6c4   : > { %v13304_v14 = vadd.f32 %v5804_v31, %v5612_v18  ;;  %v5619_v26 = vpop.f32.mrf.mxu1 }
 0x6c5   : > { %v13306_v57 = vpop.f32.mrf.mxu0  ;;  %v5620_v21 = vadd.f32 %v5619_v26, %v13025_v35 }
 0x6c6   : > { %15249 = vst [vmem:[#allocation99_spill] sm:$0xff] %v13304_v14  ;;  %15250 = vst [vmem:[#allocation112_spill] sm:$0xff] %v13306_v57  ;;  %v5621_v6 = vpop.f32.mrf.mxu1 }
 0x6c7   : > { %v5810_v30 = vpop.f32.mrf.mxu0  ;;  %v5622_v47 = vadd.f32 %v5621_v6, %v13028_v17 }
 0x6c8   : > { %v13310_v53 = vadd.f32 %v5810_v30, %v5618_v11  ;;  %v13312_v61 = vpop.f32.mrf.mxu1 }
 0x6c9   : > { %v5812_v7 = vpop.f32.mrf.mxu0 }
 0x6ca   : > { %v13315_v46 = vadd.f32 %v5812_v7, %v5620_v21  ;;  %v5627_v12 = vpop.f32.mrf.mxu1 }
 0x6cb   : > { %v5814_v18 = vpop.f32.mrf.mxu0  ;;  %v5628_v37 = vadd.f32 %v5627_v12, %v13035_v2 }
 0x6cc   : > { %v13317_v31 = vadd.f32 %v5814_v18, %v5622_v47  ;;  %v5629_v14 = vpop.f32.mrf.mxu1 }
 0x6cd   : > { %v13319_v57 = vpop.f32.mrf.mxu0  ;;  %v5630_v26 = vadd.f32 %v5629_v14, %v13043_v19 }
 0x6ce   : > { %15251 = vst [vmem:[#allocation40_spill] sm:$0xff] %v13317_v31  ;;  %15252 = vst [vmem:[#allocation31_spill] sm:$0xff] %v13319_v57  ;;  %v5631_v15 = vpop.f32.mrf.mxu1 }
 0x6cf   : > { %v5820_v35 = vpop.f32.mrf.mxu0  ;;  %v5632_v6 = vadd.f32 %v5631_v15, %v13046_v58  ;;  %v15259_v15 = vld [vmem:[#allocation113_spill] sm:$0xff] }
 0x6d0   : > { %v13323_v11 = vadd.f32 %v5820_v35, %v5628_v37  ;;  %v13325_v30 = vpop.f32.mrf.mxu1 }
 0x6d1   : > { %15253 = vst [vmem:[#allocation106_spill] sm:$0xff] %v13325_v30  ;;  %v5822_v17 = vpop.f32.mrf.mxu0 }
 0x6d2   : > { %v13328_v21 = vadd.f32 %v5822_v17, %v5630_v26  ;;  %v5637_v7 = vpop.f32.mrf.mxu1 }
 0x6d3   : > { %v5824_v47 = vpop.f32.mrf.mxu0  ;;  %v5638_v2 = vadd.f32 %v5637_v7, %v13053_v63  ;;  %v15263_v63 = vld [vmem:[#allocation39_spill] sm:$0xff] }
 0x6d4   : > { %15254 = vst [vmem:[#allocation59_spill] sm:$0xff] %v13328_v21  ;;  %v13330_v18 = vadd.f32 %v5824_v47, %v5632_v6  ;;  %v5639_v31 = vpop.f32.mrf.mxu1 }
 0x6d5   : > { %v13332_v57 = vpop.f32.mrf.mxu0  ;;  %v5640_v14 = vadd.f32 %v5639_v31, %v13061_v0  ;;  %v15264_v31 = vld [vmem:[#allocation111_spill] sm:$0xff] }
 0x6d6   : > { %15255 = vst [vmem:[#allocation115_spill] sm:$0xff] %v13330_v18  ;;  %15256 = vst [vmem:[#allocation61_spill] sm:$0xff] %v13332_v57  ;;  %v5641_v12 = vpop.f32.mrf.mxu1 }
 0x6d7   : > { %v5830_v19 = vpop.f32.mrf.mxu0  ;;  %v5642_v26 = vadd.f32 %v5641_v12, %v15259_v15 }
 0x6d8   : > { %v13336_v37 = vadd.f32 %v5830_v19, %v5638_v2  ;;  %v13338_v35 = vpop.f32.mrf.mxu1 }
 0x6d9   : > { %15258 = vst [vmem:[#allocation96_spill] sm:$0xff] %v13338_v35  ;;  %v5832_v58 = vpop.f32.mrf.mxu0 }
 0x6da   : > { %15257 = vst [vmem:[#allocation28_spill] sm:$0xff] %v13336_v37  ;;  %v13341_v17 = vadd.f32 %v5832_v58, %v5640_v14  ;;  %v5647_v6 = vpop.f32.mrf.mxu1  ;;  %v15266_v14 = vld [vmem:[#allocation90_spill] sm:$0xff] }
 0x6db   : > { %v5834_v47 = vpop.f32.mrf.mxu0  ;;  %v5648_v7 = vadd.f32 %v5647_v6, %v15263_v63  ;;  %v15267_v6 = vld [vmem:[#allocation117_spill] sm:$0xff] }
 0x6dc   : > { %15260 = vst [vmem:[#allocation34_spill] sm:$0xff] %v13341_v17  ;;  %v13343_v18 = vadd.f32 %v5834_v47, %v5642_v26  ;;  %v5649_v57 = vpop.f32.mrf.mxu1 }
 0x6dd   : > { %v13345_v21 = vpop.f32.mrf.mxu0  ;;  %v5650_v2 = vadd.f32 %v5649_v57, %v15264_v31 }
 0x6de   : > { %15261 = vst [vmem:[#allocation64_spill] sm:$0xff] %v13343_v18  ;;  %15262 = vst [vmem:[#allocation21_spill] sm:$0xff] %v13345_v21  ;;  %v5651_v30 = vpop.f32.mrf.mxu1 }
 0x6df   : > { %v5840_v0 = vpop.f32.mrf.mxu0  ;;  %v5652_v58 = vadd.f32 %v5651_v30, %v15266_v14 }
 0x6e0   : > { %v13349_v19 = vadd.f32 %v5840_v0, %v5648_v7  ;;  %v13351_v35 = vpop.f32.mrf.mxu1 }
 0x6e1   : > { %15265 = vst [vmem:[#allocation102_spill] sm:$0xff] %v13351_v35  ;;  %v5842_v12 = vpop.f32.mrf.mxu0 }
 0x6e2   : > { %v13354_v15 = vadd.f32 %v5842_v12, %v5650_v2  ;;  %v5883_v26 = vpop.f32.mrf.mxu1 }
 0x6e3   : > { %v5844_v47 = vpop.f32.mrf.mxu0  ;;  %v5884_v63 = vadd.f32 %v5883_v26, %v15267_v6 }
 0x6e4   : > { %v13356_v18 = vadd.f32 %v5844_v47, %v5652_v58  ;;  %v5885_v21 = vpop.f32.mrf.mxu1 }
 0x6e5   : > { %v13358_v17 = vpop.f32.mrf.mxu0  ;;  %v5886_v7 = vadd.f32 %v5885_v21, %v13101_v55 }
 0x6e6   : > { %v5887_v37 = vpop.f32.mrf.mxu1 }
 0x6e7   : > { %v6076_v57 = vpop.f32.mrf.mxu0  ;;  %v5888_v30 = vadd.f32 %v5887_v37, %v13107_v60 }
 0x6e8   : > { %v13362_v0 = vadd.f32 %v6076_v57, %v5884_v63  ;;  %v5889_v31 = vpop.f32.mrf.mxu1 }
 0x6e9   : > { %v6078_v35 = vpop.f32.mrf.mxu0  ;;  %v5890_v58 = vadd.f32 %v5889_v31, %v13110_v51 }
 0x6ea   : > { %v13365_v2 = vadd.f32 %v6078_v35, %v5886_v7  ;;  %6299 = vrot.lane.b32.xlu1 %v13362_v0, %s8836_s15  ;;  %v5893_v12 = vpop.f32.mrf.mxu1 }
 0x6eb   : > { %v6080_v14 = vpop.f32.mrf.mxu0  ;;  %v5894_v47 = vadd.f32 %v5893_v12, %v13119_v50 }
 0x6ec   : > { %v13370_v26 = vadd.f32 %v6080_v14, %v5888_v30  ;;  %6301 = vrot.lane.b32.xlu0 %v13365_v2, %s8836_s15  ;;  %v5895_v55 = vpop.f32.mrf.mxu1 }
 0x6ed   : > { %v6082_v21 = vpop.f32.mrf.mxu0  ;;  %v5896_v35 = vadd.f32 %v5895_v55, %v13123_v52 }
 0x6ee   : > { %v13375_v6 = vadd.f32 %v6082_v21, %v5890_v58  ;;  %6303 = vrot.lane.b32.xlu1 %v13370_v26, %s8836_s15  ;;  %v5897_v60 = vpop.f32.mrf.mxu1 }
 0x6ef   : > { %v6086_v37 = vpop.f32.mrf.mxu0  ;;  %v5898_v7 = vadd.f32 %v5897_v60, %v13129_v20 }
 0x6f0   : > { %v13380_v63 = vadd.f32 %v6086_v37, %v5894_v47  ;;  %6305 = vrot.lane.b32.xlu0 %v13375_v6, %s8836_s15  ;;  %v5899_v51 = vpop.f32.mrf.mxu1 }
 0x6f1   : > { %v6088_v57 = vpop.f32.mrf.mxu0  ;;  %v5900_v12 = vadd.f32 %v5899_v51, %v13132_v1 }
 0x6f2   : > { %v13385_v31 = vadd.f32 %v6088_v57, %v5896_v35  ;;  %6307 = vrot.lane.b32.xlu1 %v13380_v63, %s8836_s15  ;;  %v5903_v50 = vpop.f32.mrf.mxu1 }
 0x6f3   : > { %v6090_v30 = vpop.f32.mrf.mxu0  ;;  %v5904_v55 = vadd.f32 %v5903_v50, %v13141_v28 }
 0x6f4   : > { %v13390_v14 = vadd.f32 %v6090_v30, %v5898_v7  ;;  %6309 = vrot.lane.b32.xlu0 %v13385_v31, %s8836_s15  ;;  %v5905_v52 = vpop.f32.mrf.mxu1 }
 0x6f5   : > { %v6092_v58 = vpop.f32.mrf.mxu0  ;;  %v5906_v60 = vadd.f32 %v5905_v52, %v13145_v9  ;;  %v13414_v52 = vpop.permute.xlu1 %6974 }
 0x6f6   : > { %v13395_v21 = vadd.f32 %v6092_v58, %v5900_v12  ;;  %6311 = vrot.lane.b32.xlu1 %v13390_v14, %s8836_s15  ;;  %v5907_v20 = vpop.f32.mrf.mxu1  ;;  %15268 = vst [vmem:[#allocation120_spill] sm:$0xff] %v13414_v52 }
 0x6f7   : > { %v6096_v47 = vpop.f32.mrf.mxu0  ;;  %v5908_v51 = vadd.f32 %v5907_v20, %v13151_v45 }
 0x6f8   : > { %v13400_v37 = vadd.f32 %v6096_v47, %v5904_v55  ;;  %6313 = vrot.lane.b32.xlu0 %v13395_v21, %s8836_s15  ;;  %v5909_v1 = vpop.f32.mrf.mxu1  ;;  %v13421_v47 = vpop.permute.xlu0 %6979 }
 0x6f9   : > { %v6098_v35 = vpop.f32.mrf.mxu0  ;;  %v5910_v50 = vadd.f32 %v5909_v1, %v13154_v3  ;;  %15269 = vst [vmem:[#allocation53_spill] sm:$0xff] %v13421_v47 }
 0x6fa   : > { %v13405_v57 = vadd.f32 %v6098_v35, %v5906_v60  ;;  %6315 = vrot.lane.b32.xlu1 %v13400_v37, %s8836_s15  ;;  %v5913_v28 = vpop.f32.mrf.mxu1 }
 0x6fb   : > { %v6100_v7 = vpop.f32.mrf.mxu0  ;;  %v5914_v45 = vadd.f32 %v5913_v28, %v13163_v36 }
 0x6fc   : > { %v13410_v30 = vadd.f32 %v6100_v7, %v5908_v51  ;;  %6317 = vrot.lane.b32.xlu0 %v13405_v57, %s8836_s15  ;;  %v5915_v9 = vpop.f32.mrf.mxu1 }
 0x6fd   : > { %v6102_v12 = vpop.f32.mrf.mxu0  ;;  %v5916_v3 = vadd.f32 %v5915_v9, %v13167_v27 }
 0x6fe   : > { %v13417_v58 = vadd.f32 %v6102_v12, %v5910_v50  ;;  %6319 = vrot.lane.b32.xlu1 %v13410_v30, %s8836_s15  ;;  %v5917_v55 = vpop.f32.mrf.mxu1  ;;  %v13433_v50 = vpop.permute.xlu1 %6984 }
 0x6ff   : > { %v6106_v20 = vpop.f32.mrf.mxu0  ;;  %v5918_v36 = vadd.f32 %v5917_v55, %v13173_v56  ;;  %15270 = vst [vmem:[#allocation124_spill] sm:$0xff] %v13433_v50  ;;  %v15272_v50 = vld [vmem:[#allocation38_spill] sm:$0xff] }
 0x700   : > { %v13424_v60 = vadd.f32 %v6106_v20, %v5914_v45  ;;  %6321 = vrot.lane.b32.xlu0 %v13417_v58, %s8836_s15  ;;  %v5919_v1 = vpop.f32.mrf.mxu1  ;;  %v13440_v20 = vpop.permute.xlu0 %6989 }
 0x701   : > { %v6108_v35 = vpop.f32.mrf.mxu0  ;;  %v5920_v27 = vadd.f32 %v5919_v1, %v13176_v16  ;;  %15271 = vst [vmem:[#allocation52_spill] sm:$0xff] %v13440_v20  ;;  %v5544_v16 = vadd.f32 %v13187_v49, %v15272_v50 }
 0x702   : > { %v13429_v51 = vadd.f32 %v6108_v35, %v5916_v3  ;;  %6323 = vrot.lane.b32.xlu1 %v13424_v60, %s8836_s15  ;;  %v5923_v28 = vpop.f32.mrf.mxu1 }
 0x703   : > { %v6110_v7 = vpop.f32.mrf.mxu0  ;;  %v5924_v56 = vadd.f32 %v5923_v28, %v13185_v34  ;;  %v13454_v34 = vpop.permute.xlu1 %6994  ;;  %v5737_v28 = vadd.f32 %v13198_v4, %v5544_v16 }
 0x704   : > { %v13436_v9 = vadd.f32 %v6110_v7, %v5918_v36  ;;  %6325 = vrot.lane.b32.xlu0 %v13429_v51, %s8836_s15  ;;  %v5925_v12 = vpop.f32.mrf.mxu1  ;;  %15273 = vst [vmem:[#allocation125_spill] sm:$0xff] %v13454_v34  ;;  %v13462_v50 = vpop.permute.xlu0 %6999 }
 0x705   : > { %v6112_v45 = vpop.f32.mrf.mxu0  ;;  %v5926_v1 = vadd.f32 %v5925_v12, %v13191_v23  ;;  %15274 = vst [vmem:[#allocation127_spill] sm:$0xff] %v13462_v50  ;;  %v15279_v50 = vld [vmem:[#allocation94_spill] sm:$0xff] }
 0x706   : > { %v13443_v55 = vadd.f32 %v6112_v45, %v5920_v27  ;;  %6327 = vrot.lane.b32.xlu1 %v13436_v9, %s8836_s15  ;;  %v5927_v3 = vpop.f32.mrf.mxu1 }
 0x707   : > { %v6116_v35 = vpop.f32.mrf.mxu0  ;;  %v5928_v27 = vadd.f32 %v5927_v3, %v13196_v44  ;;  %v13473_v16 = vpop.permute.xlu1 %7004 }
 0x708   : > { %v13450_v36 = vadd.f32 %v6116_v35, %v5924_v56  ;;  %6329 = vrot.lane.b32.xlu0 %v13443_v55, %s8836_s15  ;;  %v5929_v7 = vpop.f32.mrf.mxu1  ;;  %15275 = vst [vmem:[#allocation58_spill] sm:$0xff] %v13473_v16 }
 0x709   : > { %v6118_v20 = vpop.f32.mrf.mxu0  ;;  %v5930_v12 = vadd.f32 %v5929_v7, %v5737_v28  ;;  %v15277_v7 = vld [vmem:[#allocation93_spill] sm:$0xff] }
 0x70a   : > { %v13458_v45 = vadd.f32 %v6118_v20, %v5926_v1  ;;  %6331 = vrot.lane.b32.xlu1 %v13450_v36, %s8836_s15  ;;  %v5933_v49 = vpop.f32.mrf.mxu1  ;;  %v15276_v1 = vld [vmem:[#allocation8_spill] sm:$0xff] }
 0x70b   : > { %v6120_v23 = vpop.f32.mrf.mxu0  ;;  %v5934_v4 = vadd.f32 %v5933_v49, %v13208_v10  ;;  %v5554_v28 = vadd.f32 %v15277_v7, %v15276_v1  ;;  %v13482_v49 = vpop.permute.xlu0 %7009 }
 0x70c   : > { %v13464_v56 = vadd.f32 %v6120_v23, %v5928_v27  ;;  %6333 = vrot.lane.b32.xlu0 %v13458_v45, %s8836_s15  ;;  %v5935_v35 = vpop.f32.mrf.mxu1  ;;  %15278 = vst [vmem:[#allocation129_spill] sm:$0xff] %v13482_v49  ;;  %v13494_v49 = vpop.permute.xlu1 %7014 }
 0x70d   : > { %v6122_v34 = vpop.f32.mrf.mxu0  ;;  %v5936_v27 = vadd.f32 %v5935_v35, %v13214_v29  ;;  %15281 = vst [vmem:[#allocation65_spill] sm:$0xff] %v13494_v49  ;;  %v15286_v49 = vld [vmem:[#allocation86_spill] sm:$0xff] }
 0x70e   : > { %v13469_v44 = vadd.f32 %v6122_v34, %v5930_v12  ;;  %6335 = vrot.lane.b32.xlu1 %v13464_v56, %s8836_s15  ;;  %v5937_v20 = vpop.f32.mrf.mxu1  ;;  %v5747_v12 = vadd.f32 %v13221_v40, %v5554_v28 }
 0x70f   : > { %v6126_v3 = vpop.f32.mrf.mxu0  ;;  %v5938_v47 = vadd.f32 %v5937_v20, %v15279_v50 }
 0x710   : > { %v13478_v23 = vadd.f32 %v6126_v3, %v5934_v4  ;;  %6337 = vrot.lane.b32.xlu0 %v13469_v44, %s8836_s15  ;;  %v5939_v10 = vpop.f32.mrf.mxu1 }
 0x711   : > { %v6128_v34 = vpop.f32.mrf.mxu0  ;;  %v5940_v35 = vadd.f32 %v5939_v10, %v5747_v12 }
 0x712   : > { %v13486_v52 = vadd.f32 %v6128_v34, %v5936_v27  ;;  %6339 = vrot.lane.b32.xlu1 %v13478_v23, %s8836_s15  ;;  %v5943_v1 = vpop.f32.mrf.mxu1  ;;  %v13501_v27 = vpop.permute.xlu0 %7019  ;;  %v15284_v34 = vld [vmem:[#allocation15_spill] sm:$0xff] }
 0x713   : > { %v6130_v29 = vpop.f32.mrf.mxu0  ;;  %v5944_v40 = vadd.f32 %v5943_v1, %v13228_v5  ;;  %15282 = vst [vmem:[#allocation130_spill] sm:$0xff] %v13501_v27 }
 0x714   : > { %v13490_v4 = vadd.f32 %v6130_v29, %v5938_v47  ;;  %6341 = vrot.lane.b32.xlu0 %v13486_v52, %s8836_s15  ;;  %v5945_v3 = vpop.f32.mrf.mxu1  ;;  %v15283_v47 = vld [vmem:[#allocation77_spill] sm:$0xff] }
 0x715   : > { %v6132_v7 = vpop.f32.mrf.mxu0  ;;  %v5564_v10 = vadd.f32 %v13230_v25, %v15283_v47  ;;  %v5946_v12 = vadd.f32 %v5945_v3, %v15284_v34  ;;  %v13516_v47 = vpop.permute.xlu1 %7024 }
 0x716   : > { %15280 = vst [vmem:[#allocation128_spill] sm:$0xff] %v13490_v4  ;;  %v13497_v50 = vadd.f32 %v6132_v7, %v5940_v35  ;;  %6343 = vrot.lane.b32.xlu1 %v13490_v4, %s8836_s15  ;;  %v5947_v20 = vpop.f32.mrf.mxu1  ;;  %v15285_v35 = vld [vmem:[#allocation100_spill] sm:$0xff]  ;;  %15287 = vst [vmem:[#allocation2_spill] sm:$0xff] %v13516_v47 }
 0x717   : > { %v6136_v28 = vpop.f32.mrf.mxu0  ;;  %v5757_v7 = vadd.f32 %v15285_v35, %v5564_v10  ;;  %v5948_v16 = vadd.f32 %v5947_v20, %v15286_v49  ;;  %v13522_v10 = vpop.permute.xlu0 %7029  ;;  %v15290_v35 = vld [vmem:[#allocation82_spill] sm:$0xff] }
 0x718   : > { %v13506_v29 = vadd.f32 %v6136_v28, %v5944_v40  ;;  %6345 = vrot.lane.b32.xlu0 %v13497_v50, %s8836_s15  ;;  %v5949_v5 = vpop.f32.mrf.mxu1  ;;  %15289 = vst [vmem:[#allocation3_spill] sm:$0xff] %v13522_v10 }
 0x719   : > { %v6138_v1 = vpop.f32.mrf.mxu0  ;;  %v5950_v3 = vadd.f32 %v5949_v5, %v5757_v7 }
 0x71a   : > { %v13512_v4 = vadd.f32 %v6138_v1, %v5946_v12  ;;  %6347 = vrot.lane.b32.xlu1 %v13506_v29, %s8836_s15  ;;  %v5953_v27 = vpop.f32.mrf.mxu1 }
 0x71b   : > { %v6140_v25 = vpop.f32.mrf.mxu0  ;;  %v5954_v49 = vadd.f32 %v5953_v27, %v13245_v59  ;;  %v13536_v59 = vpop.permute.xlu1 %7034  ;;  %v15292_v27 = vld [vmem:[#allocation16_spill] sm:$0xff] }
 0x71c   : > { %v13518_v40 = vadd.f32 %v6140_v25, %v5948_v16  ;;  %6349 = vrot.lane.b32.xlu0 %v13512_v4, %s8836_s15  ;;  %v5955_v28 = vpop.f32.mrf.mxu1  ;;  %v5574_v16 = vadd.f32 %v13247_v54, %v15290_v35  ;;  %15291 = vst [vmem:[#allocation133_spill] sm:$0xff] %v13536_v59 }
 0x71d   : > { %v6142_v34 = vpop.f32.mrf.mxu0  ;;  %v5956_v5 = vadd.f32 %v5955_v28, %v13250_v8  ;;  %v13544_v28 = vpop.permute.xlu0 %7039 }
 0x71e   : > { %15288 = vst [vmem:[#allocation131_spill] sm:$0xff] %v13518_v40  ;;  %v13525_v20 = vadd.f32 %v6142_v34, %v5950_v3  ;;  %6351 = vrot.lane.b32.xlu1 %v13518_v40, %s8836_s15  ;;  %v5957_v12 = vpop.f32.mrf.mxu1  ;;  %v5767_v3 = vadd.f32 %v15292_v27, %v5574_v16  ;;  %v15293_v34 = vld [vmem:[#allocation56_spill] sm:$0xff]  ;;  %15295 = vst [vmem:[#allocation137_spill] sm:$0xff] %v13544_v28  ;;  %v15301_v28 = vld [vmem:[#allocation91_spill] sm:$0xff] }
 0x71f   : > { %v6146_v1 = vpop.f32.mrf.mxu0  ;;  %v5958_v47 = vadd.f32 %v5957_v12, %v15293_v34  ;;  %v13555_v27 = vpop.permute.xlu1 %7044  ;;  %v15298_v34 = vld [vmem:[#allocation20_spill] sm:$0xff] }
 0x720   : > { %v13532_v7 = vadd.f32 %v6146_v1, %v5954_v49  ;;  %6353 = vrot.lane.b32.xlu0 %v13525_v20, %s8836_s15  ;;  %v5959_v25 = vpop.f32.mrf.mxu1  ;;  %15297 = vst [vmem:[#allocation14_spill] sm:$0xff] %v13555_v27 }
 0x721   : > { %v6148_v10 = vpop.f32.mrf.mxu0  ;;  %v5960_v49 = vadd.f32 %v5959_v25, %v5767_v3 }
 0x722   : > { %v13540_v40 = vadd.f32 %v6148_v10, %v5956_v5  ;;  %6355 = vrot.lane.b32.xlu1 %v13532_v7, %s8836_s15  ;;  %v5963_v54 = vpop.f32.mrf.mxu1 }
 0x723   : > { %v6150_v8 = vpop.f32.mrf.mxu0  ;;  %v5964_v16 = vadd.f32 %v5963_v54, %v13258_v32  ;;  %v13564_v54 = vpop.permute.xlu0 %7049 }
 0x724   : > { %15294 = vst [vmem:[#allocation4_spill] sm:$0xff] %v13540_v40  ;;  %v13546_v1 = vadd.f32 %v6150_v8, %v5958_v47  ;;  %6357 = vrot.lane.b32.xlu0 %v13540_v40, %s8836_s15  ;;  %v5965_v35 = vpop.f32.mrf.mxu1  ;;  %v5584_v47 = vadd.f32 %v13260_v22, %v15298_v34  ;;  %15299 = vst [vmem:[#allocation104_spill] sm:$0xff] %v13564_v54  ;;  %v15300_v8 = vld [vmem:[#allocation47_spill] sm:$0xff]  ;;  %v8803_v34 = vld [vmem:[%s14427_s6 + $0x38] sm:$0xff]  }
 0x725   : > { %v6152_v59 = vpop.f32.mrf.mxu0  ;;  %v5966_v25 = vadd.f32 %v5965_v35, %v13263_v43  ;;  %7452 = vmatpush1.bf16.msra.mxu1 %v8803_v34  ;;  %v15308_v34 = vld [vmem:[#allocation37_spill] sm:$0xff] }
 0x726   : > { %15296 = vst [vmem:[#allocation5_spill] sm:$0xff] %v13546_v1  ;;  %v13551_v12 = vadd.f32 %v6152_v59, %v5960_v49  ;;  %6359 = vrot.lane.b32.xlu1 %v13546_v1, %s8836_s15  ;;  %v5967_v10 = vpop.f32.mrf.mxu1  ;;  %v5777_v49 = vadd.f32 %v15300_v8, %v5584_v47 }
 0x727   : > { %v6156_v5 = vpop.f32.mrf.mxu0  ;;  %v5968_v1 = vadd.f32 %v5967_v10, %v15301_v28  ;;  %v13579_v28 = vpop.permute.xlu1 %7054 }
 0x728   : > { %v13560_v3 = vadd.f32 %v6156_v5, %v5964_v16  ;;  %6361 = vrot.lane.b32.xlu0 %v13551_v12, %s8836_s15  ;;  %v5969_v32 = vpop.f32.mrf.mxu1  ;;  %15303 = vst [vmem:[#allocation98_spill] sm:$0xff] %v13579_v28  ;;  %v13587_v8 = vpop.permute.xlu0 %7059 }
 0x729   : > { %v6158_v59 = vpop.f32.mrf.mxu0  ;;  %v5970_v35 = vadd.f32 %v5969_v32, %v5777_v49  ;;  %15305 = vst [vmem:[#allocation33_spill] sm:$0xff] %v13587_v8  ;;  %v15306_v49 = vld [vmem:[#allocation10_spill] sm:$0xff] }
 0x72a   : > { %v13568_v40 = vadd.f32 %v6158_v59, %v5966_v25  ;;  %6363 = vrot.lane.b32.xlu1 %v13560_v3, %s8836_s15  ;;  %v5973_v22 = vpop.f32.mrf.mxu1  ;;  %v15304_v59 = vmov 0  }
 0x72b   : > { %v6160_v43 = vpop.f32.mrf.mxu0  ;;  %v5974_v10 = vadd.f32 %v5973_v22, %v13271_v13  ;;  %7453 = vmatprep.subr.bf16.mxu1 %v15304_v59 }
 0x72c   : > { %v13572_v16 = vadd.f32 %v6160_v43, %v5968_v1  ;;  %6365 = vrot.lane.b32.xlu0 %v13568_v40, %s8836_s15  ;;  %v5975_v5 = vpop.f32.mrf.mxu1  ;;  %v5594_v43 = vadd.f32 %v13273_v42, %v15306_v49  ;;  %v13602_v49 = vpop.permute.xlu1 %7064 }
 0x72d   : > { %v6162_v47 = vpop.f32.mrf.mxu0  ;;  %v5976_v54 = vadd.f32 %v5975_v5, %v13276_v39  ;;  %15309 = vst [vmem:[#allocation24_spill] sm:$0xff] %v13602_v49  ;;  %v15315_v49 = vld [vmem:[#allocation48_spill] sm:$0xff] }
 0x72e   : > { %15302 = vst [vmem:[#allocation101_spill] sm:$0xff] %v13572_v16  ;;  %v13582_v25 = vadd.f32 %v6162_v47, %v5970_v35  ;;  %6367 = vrot.lane.b32.xlu1 %v13572_v16, %s8836_s15  ;;  %v5977_v1 = vpop.f32.mrf.mxu1  ;;  %v15307_v35 = vld [vmem:[#allocation107_spill] sm:$0xff] }
 0x72f   : > { %v6166_v32 = vpop.f32.mrf.mxu0  ;;  %v5787_v47 = vadd.f32 %v15307_v35, %v5594_v43  ;;  %v5978_v27 = vadd.f32 %v5977_v1, %v15308_v34  ;;  %v13608_v43 = vpop.permute.xlu0 %7069  ;;  %v15312_v34 = vld [vmem:[#allocation81_spill] sm:$0xff] }
 0x730   : > { %v13592_v28 = vadd.f32 %v6166_v32, %v5974_v10  ;;  %6369 = vrot.lane.b32.xlu0 %v13582_v25, %s8836_s15  ;;  %v5979_v13 = vpop.f32.mrf.mxu1  ;;  %15311 = vst [vmem:[#allocation17_spill] sm:$0xff] %v13608_v43 }
 0x731   : > { %v6168_v22 = vpop.f32.mrf.mxu0  ;;  %v5980_v39 = vadd.f32 %v5979_v13, %v5787_v47 }
 0x732   : > { %v13598_v16 = vadd.f32 %v6168_v22, %v5976_v54  ;;  %6371 = vrot.lane.b32.xlu1 %v13592_v28, %s8836_s15  ;;  %v5983_v8 = vpop.f32.mrf.mxu1 }
 0x733   : > { %v6170_v42 = vpop.f32.mrf.mxu0  ;;  %v5984_v54 = vadd.f32 %v5983_v8, %v13284_v62  ;;  %v8804_v62 = vld [vmem:[%s14427_s6 + $0x30] sm:$0xff]  }
 0x734   : > { %v13604_v5 = vadd.f32 %v6170_v42, %v5978_v27  ;;  %6373 = vrot.lane.b32.xlu0 %v13598_v16, %s8836_s15  ;;  %v5985_v10 = vpop.f32.mrf.mxu1  ;;  %v5604_v27 = vadd.f32 %v13286_v33, %v15312_v34  ;;  %7454 = vmatpush1.bf16.msra.mxu1 %v8804_v62 }
 0x735   : > { %v6172_v32 = vpop.f32.mrf.mxu0  ;;  %v5986_v13 = vadd.f32 %v5985_v10, %v13289_v38  ;;  %7455 = vmatprep.subr.bf16.mxu1 %v15304_v59 }
 0x736   : > { %15310 = vst [vmem:[#allocation123_spill] sm:$0xff] %v13604_v5  ;;  %v13611_v1 = vadd.f32 %v6172_v32, %v5980_v39  ;;  %6375 = vrot.lane.b32.xlu1 %v13604_v5, %s8836_s15  ;;  %v5987_v22 = vpop.f32.mrf.mxu1  ;;  %v13625_v39 = vpop.permute.xlu1 %7074  ;;  %v15314_v32 = vld [vmem:[#allocation122_spill] sm:$0xff] }
 0x737   : > { %v6176_v35 = vpop.f32.mrf.mxu0  ;;  %15313 = vst [vmem:[#allocation54_spill] sm:$0xff] %v13625_v39  ;;  %v5797_v43 = vadd.f32 %v15314_v32, %v5604_v27  ;;  %v5988_v5 = vadd.f32 %v5987_v22, %v15315_v49  ;;  %v8805_v49 = vld [vmem:[%s14427_s6 + $0x28] sm:$0xff]  }
 0x738   : > { %v13618_v47 = vadd.f32 %v6176_v35, %v5984_v54  ;;  %6377 = vrot.lane.b32.xlu0 %v13611_v1, %s8836_s15  ;;  %v5989_v42 = vpop.f32.mrf.mxu1  ;;  %v13634_v54 = vpop.permute.xlu0 %7079  ;;  %7456 = vmatpush1.bf16.msra.mxu1 %v8805_v49  ;;  %v15322_v39 = vld [vmem:[#allocation99_spill] sm:$0xff] }
 0x739   : > { %v6178_v8 = vpop.f32.mrf.mxu0  ;;  %15316 = vst [vmem:[#allocation25_spill] sm:$0xff] %v13634_v54  ;;  %v5990_v35 = vadd.f32 %v5989_v42, %v5797_v43  ;;  %7457 = vmatprep.subr.bf16.mxu1 %v15304_v59  ;;  %v15319_v42 = vld [vmem:[#allocation116_spill] sm:$0xff] }
 0x73a   : > { %v13629_v33 = vadd.f32 %v6178_v8, %v5986_v13  ;;  %6379 = vrot.lane.b32.xlu1 %v13618_v47, %s8836_s15  ;;  %v5993_v38 = vpop.f32.mrf.mxu1  ;;  %v13649_v43 = vpop.permute.xlu1 %7084  ;;  %v5614_v32 = vadd.f32 %v13299_v41, %v15319_v42 }
 0x73b   : > { %v6180_v10 = vpop.f32.mrf.mxu0  ;;  %v5994_v13 = vadd.f32 %v5993_v38, %v13297_v48  ;;  %15318 = vst [vmem:[#allocation23_spill] sm:$0xff] %v13649_v43  ;;  %v8806_v38 = vld [vmem:[%s14427_s6 + $0x20] sm:$0xff]  }
 0x73c   : > { %v13636_v34 = vadd.f32 %v6180_v10, %v5988_v5  ;;  %6381 = vrot.lane.b32.xlu0 %v13629_v33, %s8836_s15  ;;  %v5995_v27 = vpop.f32.mrf.mxu1  ;;  %v13661_v49 = vpop.permute.xlu0 %7089  ;;  %7458 = vmatpush1.bf16.msra.mxu1 %v8806_v38 }
 0x73d   : > { %v6182_v22 = vpop.f32.mrf.mxu0  ;;  %v5996_v10 = vadd.f32 %v5995_v27, %v13302_v24  ;;  %15320 = vst [vmem:[#allocation97_spill] sm:$0xff] %v13661_v49  ;;  %7459 = vmatprep.subr.bf16.mxu1 %v15304_v59  ;;  %v15330_v49 = vld [vmem:[#allocation40_spill] sm:$0xff] }
 0x73e   : > { %15317 = vst [vmem:[#allocation119_spill] sm:$0xff] %v13636_v34  ;;  %v13644_v62 = vadd.f32 %v6182_v22, %v5990_v35  ;;  %6383 = vrot.lane.b32.xlu1 %v13636_v34, %s8836_s15  ;;  %v5997_v8 = vpop.f32.mrf.mxu1  ;;  %v15321_v22 = vld [vmem:[#allocation112_spill] sm:$0xff] }
 0x73f   : > { %v6186_v5 = vpop.f32.mrf.mxu0  ;;  %v5807_v43 = vadd.f32 %v15321_v22, %v5614_v32  ;;  %v5998_v34 = vadd.f32 %v5997_v8, %v15322_v39  ;;  %v8807_v39 = vld [vmem:[%s14427_s6 + $0x18] sm:$0xff]   ;;  %v13677_v32 = vpop.permute.xlu1 %7094 }
 0x740   : > { %v13654_v54 = vadd.f32 %v6186_v5, %v5994_v13  ;;  %6385 = vrot.lane.b32.xlu0 %v13644_v62, %s8836_s15  ;;  %v5999_v48 = vpop.f32.mrf.mxu1  ;;  %15324 = vst [vmem:[#allocation43_spill] sm:$0xff] %v13677_v32  ;;  %7460 = vmatpush1.bf16.msra.mxu1 %v8807_v39  ;;  %v15329_v39 = vld [vmem:[#allocation31_spill] sm:$0xff] }
 0x741   : > { %v6188_v35 = vpop.f32.mrf.mxu0  ;;  %v6000_v13 = vadd.f32 %v5999_v48, %v5807_v43  ;;  %7461 = vmatprep.subr.bf16.mxu1 %v15304_v59  ;;  %v13685_v48 = vpop.permute.xlu0 %7099 }
 0x742   : > { %v13665_v41 = vadd.f32 %v6188_v35, %v5996_v10  ;;  %6387 = vrot.lane.b32.xlu1 %v13654_v54, %s8836_s15  ;;  %v6003_v24 = vpop.f32.mrf.mxu1  ;;  %15326 = vst [vmem:[#allocation49_spill] sm:$0xff] %v13685_v48  ;;  %v15327_v35 = vld [vmem:[#allocation85_spill] sm:$0xff] }
 0x743   : > { %v6190_v27 = vpop.f32.mrf.mxu0  ;;  %v6004_v10 = vadd.f32 %v6003_v24, %v13310_v53  ;;  %v5624_v22 = vadd.f32 %v13312_v61, %v15327_v35  ;;  %v8808_v24 = vld [vmem:[%s14427_s6 + $0x10] sm:$0xff]  }
 0x744   : > { %v13670_v5 = vadd.f32 %v6190_v27, %v5998_v34  ;;  %6389 = vrot.lane.b32.xlu0 %v13665_v41, %s8836_s15  ;;  %v6005_v42 = vpop.f32.mrf.mxu1  ;;  %7462 = vmatpush1.bf16.msra.mxu1 %v8808_v24 }
 0x745   : > { %v6192_v8 = vpop.f32.mrf.mxu0  ;;  %v6006_v27 = vadd.f32 %v6005_v42, %v13315_v46  ;;  %7463 = vmatprep.subr.bf16.mxu1 %v15304_v59  ;;  %v13704_v42 = vpop.permute.xlu1 %7104 }
 0x746   : > { %15323 = vst [vmem:[#allocation103_spill] sm:$0xff] %v13670_v5  ;;  %v13680_v38 = vadd.f32 %v6192_v8, %v6000_v13  ;;  %6391 = vrot.lane.b32.xlu1 %v13670_v5, %s8836_s15  ;;  %v6007_v34 = vpop.f32.mrf.mxu1  ;;  %v5817_v8 = vadd.f32 %v15329_v39, %v5624_v22  ;;  %15332 = vst [vmem:[#allocation114_spill] sm:$0xff] %v13704_v42  ;;  %v13713_v22 = vpop.permute.xlu0 %7109 }
 0x747   : > { %v6196_v43 = vpop.f32.mrf.mxu0  ;;  %v6008_v48 = vadd.f32 %v6007_v34, %v15330_v49  ;;  %v8809_v49 = vld [vmem:[%s14427_s6 + $0x8] sm:$0xff]   ;;  %15334 = vst [vmem:[#allocation29_spill] sm:$0xff] %v13713_v22 }
 0x748   : > { %15325 = vst [vmem:[#allocation30_spill] sm:$0xff] %v13680_v38  ;;  %v13690_v32 = vadd.f32 %v6196_v43, %v6004_v10  ;;  %6393 = vrot.lane.b32.xlu0 %v13680_v38, %s8836_s15  ;;  %v6009_v53 = vpop.f32.mrf.mxu1  ;;  %7464 = vmatpush1.bf16.msra.mxu1 %v8809_v49 }
 0x749   : > { %v6198_v13 = vpop.f32.mrf.mxu0  ;;  %v6010_v10 = vadd.f32 %v6009_v53, %v5817_v8  ;;  %7465 = vmatprep.subr.bf16.mxu1 %v15304_v59  ;;  %v15336_v8 = vld [vmem:[#allocation51_spill] sm:$0xff]  ;;  %v13732_v49 = vpop.permute.xlu1 %7114 }
 0x74a   : > { %15328 = vst [vmem:[#allocation36_spill] sm:$0xff] %v13690_v32  ;;  %v13699_v5 = vadd.f32 %v6198_v13, %v6006_v27  ;;  %6395 = vrot.lane.b32.xlu1 %v13690_v32, %s8836_s15  ;;  %v6013_v61 = vpop.f32.mrf.mxu1  ;;  %v15335_v13 = vmov 65535   ;;  %15340 = vst [vmem:[#allocation22_spill] sm:$0xff] %v13732_v49 }
 0x74b   : > { %v6200_v46 = vpop.f32.mrf.mxu0  ;;  %v6014_v27 = vadd.f32 %v6013_v61, %v13323_v11  ;;  %v7446_v39 = vsel %vm7444_vm1, 4294967295, %v15335_v13  ;;  %v8810_v61 = vld [vmem:[%s14427_s6] sm:$0xff]  }
 0x74c   : > { %15331 = vst [vmem:[#allocation109_spill] sm:$0xff] %v13699_v5  ;;  %v13706_v43 = vadd.f32 %v6200_v46, %v6008_v48  ;;  %6397 = vrot.lane.b32.xlu0 %v13699_v5, %s8836_s15  ;;  %v6015_v35 = vpop.f32.mrf.mxu1  ;;  %v15337_v46 = vld [vmem:[#allocation106_spill] sm:$0xff]  ;;  %v15338_v5 = vld [vmem:[#allocation59_spill] sm:$0xff]  ;;  %7466 = vmatpush1.bf16.msra.mxu1 %v8810_v61 }
 0x74d   : > { %v6202_v34 = vpop.f32.mrf.mxu0  ;;  %v5634_v42 = vadd.f32 %v15337_v46, %v15336_v8  ;;  %v6016_v32 = vadd.f32 %v6015_v35, %v15338_v5  ;;  %v8811_v35 = vld [vmem:[%s14427_s6 + $0x60] sm:$0x7f]   ;;  %7473 = vmatprep.subr.bf16.mxu1 %v15304_v59  ;;  %v13744_v46 = vpop.permute.xlu0 %7119 }
 0x74e   : > { %15333 = vst [vmem:[#allocation45_spill] sm:$0xff] %v13706_v43  ;;  %v13716_v24 = vadd.f32 %v6202_v34, %v6010_v10  ;;  %6399 = vrot.lane.b32.xlu1 %v13706_v43, %s8836_s15  ;;  %v6017_v48 = vpop.f32.mrf.mxu1  ;;  %v15341_v34 = vld [vmem:[#allocation61_spill] sm:$0xff]  ;;  %v15342_v43 = vld [vmem:[#allocation115_spill] sm:$0xff]  ;;  %15344 = vst [vmem:[#allocation118_spill] sm:$0xff] %v13744_v46 }
 0x74f   : > { %v6206_v53 = vpop.f32.mrf.mxu0  ;;  %v5827_v13 = vadd.f32 %v15341_v34, %v5634_v42  ;;  %v6018_v38 = vadd.f32 %v6017_v48, %v15342_v43  ;;  %v15350_v46 = vld [vmem:[#allocation34_spill] sm:$0xff] }
 0x750   : > { %v13725_v22 = vadd.f32 %v6206_v53, %v6014_v27  ;;  %6401 = vrot.lane.b32.xlu0 %v13716_v24, %s8836_s15  ;;  %v6019_v11 = vpop.f32.mrf.mxu1  ;;  %v7447_v53 = vsel %vm7445_vm2, %v7446_v39, 0 }
 0x751   : > { %v6208_v10 = vpop.f32.mrf.mxu0  ;;  %v6020_v42 = vadd.f32 %v6019_v11, %v5827_v13  ;;  %v7449_v48 = vand.u32 %v8811_v35, %v7447_v53  ;;  %v15348_v11 = vld [vmem:[#allocation89_spill] sm:$0xff]  ;;  %v15349_v13 = vld [vmem:[#allocation96_spill] sm:$0xff] }
 0x752   : > { %15339 = vst [vmem:[#allocation55_spill] sm:$0xff] %v13725_v22  ;;  %v13736_v8 = vadd.f32 %v6208_v10, %v6016_v32  ;;  %6403 = vrot.lane.b32.xlu1 %v13725_v22, %s8836_s15  ;;  %v6023_v5 = vpop.f32.mrf.mxu1  ;;  %v15346_v10 = vld [vmem:[#allocation28_spill] sm:$0xff] }
 0x753   : > { %v6210_v27 = vpop.f32.mrf.mxu0  ;;  %v6024_v34 = vadd.f32 %v6023_v5, %v15346_v10  ;;  %7474 = vmatpush2.bf16.msra.mxu1 %v7449_v48  ;;  %v8812_v5 = vld [vmem:[%s14427_s6 + $0x58] sm:$0xff]  }
 0x754   : > { %15343 = vst [vmem:[#allocation44_spill] sm:$0xff] %v13736_v8  ;;  %v13746_v43 = vadd.f32 %v6210_v27, %v6018_v38  ;;  %6405 = vrot.lane.b32.xlu0 %v13736_v8, %s8836_s15  ;;  %v6025_v32 = vpop.f32.mrf.mxu1  ;;  %7475 = vmatprep.subr.bf16.mxu1 %v15304_v59  ;;  %v13756_v38 = vpop.permute.xlu1 %7124  ;;  %v5644_v27 = vadd.f32 %v15349_v13, %v15348_v11  ;;  %v15352_v10 = vld [vmem:[#allocation21_spill] sm:$0xff] }
 0x755   : > { %v6212_v61 = vpop.f32.mrf.mxu0  ;;  %15347 = vst [vmem:[#allocation50_spill] sm:$0xff] %v13756_v38  ;;  %v6026_v35 = vadd.f32 %v6025_v32, %v15350_v46 }
 0x756   : > { %15345 = vst [vmem:[#allocation63_spill] sm:$0xff] %v13746_v43  ;;  %v13751_v49 = vadd.f32 %v6212_v61, %v6020_v42  ;;  %6407 = vrot.lane.b32.xlu1 %v13746_v43, %s8836_s15  ;;  %v6027_v22 = vpop.f32.mrf.mxu1  ;;  %v13768_v61 = vpop.permute.xlu0 %7129  ;;  %v5837_v38 = vadd.f32 %v15352_v10, %v5644_v27  ;;  %v15353_v43 = vld [vmem:[#allocation64_spill] sm:$0xff] }
 0x757   : > { %v6216_v39 = vpop.f32.mrf.mxu0  ;;  %15351 = vst [vmem:[#allocation68_spill] sm:$0xff] %v13768_v61  ;;  %v6028_v8 = vadd.f32 %v6027_v22, %v15353_v43  ;;  %7476 = vmatpush2.bf16.msra.mxu1 %v8812_v5  ;;  %v8813_v22 = vld [vmem:[%s14427_s6 + $0x50] sm:$0xff]  }
 0x758   : > { %v13761_v53 = vadd.f32 %v6216_v39, %v6024_v34  ;;  %6409 = vrot.lane.b32.xlu0 %v13751_v49, %s8836_s15  ;;  %v6029_v42 = vpop.f32.mrf.mxu1  ;;  %7477 = vmatprep.subr.bf16.mxu1 %v15304_v59 }
 0x759   : > { %v6218_v48 = vpop.f32.mrf.mxu0  ;;  %v6030_v32 = vadd.f32 %v6029_v42, %v5837_v38 }
 0x75a   : > { %v13772_v11 = vadd.f32 %v6218_v48, %v6026_v35  ;;  %6411 = vrot.lane.b32.xlu1 %v13761_v53, %s8836_s15  ;;  %v6033_v43 = vpop.f32.mrf.mxu1  ;;  %v8814_v48 = vld [vmem:[%s14427_s6 + $0x48] sm:$0xff]  }
 0x75b   : > { %v6220_v46 = vpop.f32.mrf.mxu0  ;;  %7478 = vmatpush2.bf16.msra.mxu1 %v8813_v22 }
 0x75c   : > { %v13777_v34 = vadd.f32 %v6220_v46, %v6028_v8  ;;  %6413 = vrot.lane.b32.xlu0 %v13772_v11, %s8836_s15  ;;  %v6300_v39 = vpop.permute.xlu1 %6299  ;;  %7479 = vmatprep.subr.bf16.mxu1 %v15304_v59  ;;  %v6035_v10 = vpop.f32.mrf.mxu1  ;;  %v6034_v46 = vadd.f32 %v6033_v43, %v13349_v19  ;;  %v8815_v19 = vld [vmem:[%s14427_s6 + $0x40] sm:$0xff]  }
 0x75d   : > { %v6222_v13 = vpop.f32.mrf.mxu0  ;;  %v6036_v22 = vadd.f32 %v6035_v10, %v13354_v15 }
 0x75e   : > { %v13784_v27 = vadd.f32 %v6222_v13, %v6030_v32  ;;  %v6302_v35 = vpop.permute.xlu0 %6301  ;;  %6415 = vrot.lane.b32.xlu1 %v13777_v34, %s8836_s15 }
 0x75f   : > { %v6427_v8 = vsel %vm312_vm8, %v6300_v39, %v6302_v35  ;;  %v6226_v38 = vpop.f32.mrf.mxu0  ;;  %v13800_v32 = vmax.f32 %v13365_v2, %v6302_v35  ;;  %7480 = vmatpush2.bf16.msra.mxu1 %v8814_v48  ;;  %v6037_v2 = vpop.f32.mrf.mxu1 }
 0x760   : > { %15354 = vst [vmem:[#allocation57_spill] sm:$0xff] %v13784_v27  ;;  %v13791_v5 = vmax.f32 %v13362_v0, %v6427_v8  ;;  %6417 = vrot.lane.b32.xlu0 %v13784_v27, %s8836_s15  ;;  %v6304_v42 = vpop.permute.xlu1 %6303  ;;  %7481 = vmatprep.subr.bf16.mxu1 %v15304_v59  ;;  %v13806_v13 = vadd.f32 %v6226_v38, %v6034_v46  ;;  %v15356_v59 = vld [vmem:[#allocation42_spill] sm:$0xff] }
 0x761   : > { %v6228_v0 = vpop.f32.mrf.mxu0  ;;  %v15357_v38 = vld [vmem:[#allocation102_spill] sm:$0xff]  ;;  %v6039_v27 = vpop.f32.mrf.mxu1 }
 0x762   : > { %v6306_v39 = vpop.permute.xlu0 %6305  ;;  %6651 = vrot.lane.b32.xlu1 %v13791_v5, %s8839_s30  ;;  %v13814_v35 = vadd.f32 %v6228_v0, %v6036_v22  ;;  %v5654_v10 = vadd.f32 %v15357_v38, %v15356_v59  ;;  %v6038_v0 = vadd.f32 %v6037_v2, %v13356_v18 }
 0x763   : > { %v6428_v43 = vsel %vm312_vm8, %v6304_v42, %v6306_v39  ;;  %7482 = vmatpush2.bf16.msra.mxu1 %v8815_v19  ;;  %v6230_v15 = vpop.f32.mrf.mxu0  ;;  %v13828_v22 = vmax.f32 %v13375_v6, %v6306_v39 }
 0x764   : > { %6653 = vrot.lane.b32.xlu0 %v13800_v32, %s8839_s30  ;;  %v6308_v8 = vpop.permute.xlu1 %6307  ;;  %15355 = vst [vmem:[#allocation121_spill] sm:$0xff] %v13814_v35  ;;  %v13821_v46 = vmax.f32 %v13370_v26, %v6428_v43  ;;  %v5847_v42 = vadd.f32 %v13358_v17, %v5654_v10  ;;  %v13832_v26 = vadd.f32 %v6230_v15, %v6038_v0 }
 0x765   : > { %v6232_v59 = vpop.f32.mrf.mxu0 }
 0x766   : > { %v6310_v48 = vpop.permute.xlu0 %6309  ;;  %6419 = vrot.lane.b32.xlu1 %v13806_v13, %s8836_s15  ;;  %v6040_v38 = vadd.f32 %v6039_v27, %v5847_v42 }
 0x767   : > { %v13848_v2 = vmax.f32 %v13385_v31, %v6310_v48 }
 0x768   : > { %6421 = vrot.lane.b32.xlu0 %v13814_v35, %s8836_s15  ;;  %v6312_v61 = vpop.permute.xlu1 %6311  ;;  %v6429_v35 = vsel %vm312_vm8, %v6308_v8, %v6310_v48  ;;  %v13837_v17 = vadd.f32 %v6232_v59, %v6040_v38 }
 0x769   : > { %v13842_v6 = vmax.f32 %v13380_v63, %v6429_v35 }
 0x76a   : > { %v6314_v19 = vpop.permute.xlu0 %6313  ;;  %6655 = vrot.lane.b32.xlu1 %v13821_v46, %s8839_s30 }
 0x76b   : > { %v6430_v27 = vsel %vm312_vm8, %v6312_v61, %v6314_v19  ;;  %v13859_v35 = vmax.f32 %v13395_v21, %v6314_v19 }
 0x76c   : > { %6657 = vrot.lane.b32.xlu0 %v13828_v22, %s8839_s30  ;;  %v6316_v43 = vpop.permute.xlu1 %6315  ;;  %v13853_v8 = vmax.f32 %v13390_v14, %v6430_v27 }
 0x76e   : > { %v6318_v18 = vpop.permute.xlu0 %6317  ;;  %6423 = vrot.lane.b32.xlu1 %v13832_v26, %s8836_s15 }
 0x76f   : > { %v6431_v63 = vsel %vm312_vm8, %v6316_v43, %v6318_v18  ;;  %v13870_v42 = vmax.f32 %v13405_v57, %v6318_v18 }
 0x770   : > { %v6320_v39 = vpop.permute.xlu1 %6319  ;;  %6425 = vrot.lane.b32.xlu0 %v13837_v17, %s8836_s15  ;;  %v13864_v31 = vmax.f32 %v13400_v37, %v6431_v63  ;;  %s7838_s15 = sshll.u32 %s8889_s25, 3 }
 0x771   : > { %p276_p4 = scmp.lt.s32.totalorder %s7838_s15, 15 }
 0x772   : > { %v6322_v15 = vpop.permute.xlu0 %6321  ;;  %6659 = vrot.lane.b32.xlu1 %v13842_v6, %s8839_s30 }
 0x773   : > { %v6432_v14 = vsel %vm312_vm8, %v6320_v39, %v6322_v15  ;;  %v13881_v59 = vmax.f32 %v13417_v58, %v6322_v15  ;;  %s15438_s15 = smov (!%p276_p4, %s7838_s15), 15 }
 0x774   : > { %v6324_v10 = vpop.permute.xlu1 %6323  ;;  %6661 = vrot.lane.b32.xlu0 %v13848_v2, %s8839_s30  ;;  %v13875_v21 = vmax.f32 %v13410_v30, %v6432_v14 }
 0x776   : > { %v6326_v61 = vpop.permute.xlu0 %6325  ;;  %6663 = vrot.lane.b32.xlu1 %v13853_v8, %s8839_s30 }
 0x777   : > { %v6433_v37 = vsel %vm312_vm8, %v6324_v10, %v6326_v61  ;;  %v13892_v18 = vmax.f32 %v13429_v51, %v6326_v61 }
 0x778   : > { %v6328_v48 = vpop.permute.xlu1 %6327  ;;  %6665 = vrot.lane.b32.xlu0 %v13859_v35, %s8839_s30  ;;  %v13886_v57 = vmax.f32 %v13424_v60, %v6433_v37 }
 0x77a   : > { %v6330_v0 = vpop.permute.xlu0 %6329  ;;  %6667 = vrot.lane.b32.xlu1 %v13864_v31, %s8839_s30 }
 0x77b   : > { %v6434_v30 = vsel %vm312_vm8, %v6328_v48, %v6330_v0  ;;  %v13903_v15 = vmax.f32 %v13443_v55, %v6330_v0 }
 0x77c   : > { %v6332_v19 = vpop.permute.xlu1 %6331  ;;  %6669 = vrot.lane.b32.xlu0 %v13870_v42, %s8839_s30  ;;  %v13897_v58 = vmax.f32 %v13436_v9, %v6434_v30 }
 0x77e   : > { %v6334_v38 = vpop.permute.xlu0 %6333  ;;  %6671 = vrot.lane.b32.xlu1 %v13875_v21, %s8839_s30 }
 0x77f   : > { %v6435_v60 = vsel %vm312_vm8, %v6332_v19, %v6334_v38  ;;  %v13914_v61 = vmax.f32 %v13458_v45, %v6334_v38 }
 0x780   : > { %v6336_v43 = vpop.permute.xlu1 %6335  ;;  %6673 = vrot.lane.b32.xlu0 %v13881_v59, %s8839_s30  ;;  %v13908_v51 = vmax.f32 %v13450_v36, %v6435_v60 }
 0x782   : > { %v6338_v39 = vpop.permute.xlu0 %6337  ;;  %6675 = vrot.lane.b32.xlu1 %v13886_v57, %s8839_s30 }
 0x783   : > { %v6436_v9 = vsel %vm312_vm8, %v6336_v43, %v6338_v39  ;;  %v13925_v0 = vmax.f32 %v13469_v44, %v6338_v39  ;;  %v15358_v44 = vld [vmem:[#allocation128_spill] sm:$0xff] }
 0x784   : > { %v6340_v27 = vpop.permute.xlu1 %6339  ;;  %6677 = vrot.lane.b32.xlu0 %v13892_v18, %s8839_s30  ;;  %v13919_v55 = vmax.f32 %v13464_v56, %v6436_v9 }
 0x786   : > { %v6342_v10 = vpop.permute.xlu0 %6341  ;;  %6679 = vrot.lane.b32.xlu1 %v13897_v58, %s8839_s30 }
 0x787   : > { %v6437_v36 = vsel %vm312_vm8, %v6340_v27, %v6342_v10  ;;  %v13936_v38 = vmax.f32 %v13486_v52, %v6342_v10 }
 0x788   : > { %v6344_v63 = vpop.permute.xlu1 %6343  ;;  %6681 = vrot.lane.b32.xlu0 %v13903_v15, %s8839_s30  ;;  %v13930_v45 = vmax.f32 %v13478_v23, %v6437_v36 }
 0x78a   : > { %v6346_v48 = vpop.permute.xlu0 %6345  ;;  %6683 = vrot.lane.b32.xlu1 %v13908_v51, %s8839_s30 }
 0x78b   : > { %v6438_v56 = vsel %vm312_vm8, %v6344_v63, %v6346_v48  ;;  %v13947_v27 = vmax.f32 %v13497_v50, %v6346_v48  ;;  %v15359_v50 = vld [vmem:[#allocation131_spill] sm:$0xff] }
 0x78c   : > { %v6348_v14 = vpop.permute.xlu1 %6347  ;;  %6685 = vrot.lane.b32.xlu0 %v13914_v61, %s8839_s30  ;;  %v13941_v30 = vmax.f32 %v15358_v44, %v6438_v56 }
 0x78e   : > { %v6350_v19 = vpop.permute.xlu0 %6349  ;;  %6687 = vrot.lane.b32.xlu1 %v13919_v55, %s8839_s30 }
 0x78f   : > { %v6439_v23 = vsel %vm312_vm8, %v6348_v14, %v6350_v19  ;;  %v13958_v9 = vmax.f32 %v13512_v4, %v6350_v19 }
 0x790   : > { %v6352_v37 = vpop.permute.xlu1 %6351  ;;  %6689 = vrot.lane.b32.xlu0 %v13925_v0, %s8839_s30  ;;  %v13952_v52 = vmax.f32 %v13506_v29, %v6439_v23  ;;  %v15360_v23 = vld [vmem:[#allocation4_spill] sm:$0xff] }
 0x792   : > { %v6354_v43 = vpop.permute.xlu0 %6353  ;;  %6691 = vrot.lane.b32.xlu1 %v13930_v45, %s8839_s30 }
 0x793   : > { %v6440_v63 = vsel %vm312_vm8, %v6352_v37, %v6354_v43  ;;  %v13969_v56 = vmax.f32 %v13525_v20, %v6354_v43  ;;  %v15361_v20 = vld [vmem:[#allocation5_spill] sm:$0xff] }
 0x794   : > { %v6356_v39 = vpop.permute.xlu1 %6355  ;;  %6693 = vrot.lane.b32.xlu0 %v13936_v38, %s8839_s30  ;;  %v13963_v48 = vmax.f32 %v15359_v50, %v6440_v63 }
 0x796   : > { %v6358_v60 = vpop.permute.xlu0 %6357  ;;  %6695 = vrot.lane.b32.xlu1 %v13941_v30, %s8839_s30 }
 0x797   : > { %v6441_v29 = vsel %vm312_vm8, %v6356_v39, %v6358_v60  ;;  %v13980_v63 = vmax.f32 %v15360_v23, %v6358_v60 }
 0x798   : > { %v6360_v10 = vpop.permute.xlu1 %6359  ;;  %6697 = vrot.lane.b32.xlu0 %v13947_v27, %s8839_s30  ;;  %v13974_v4 = vmax.f32 %v13532_v7, %v6441_v29 }
 0x79a   : > { %v6362_v14 = vpop.permute.xlu0 %6361  ;;  %6699 = vrot.lane.b32.xlu1 %v13952_v52, %s8839_s30 }
 0x79b   : > { %v6442_v44 = vsel %vm312_vm8, %v6360_v10, %v6362_v14  ;;  %v13991_v29 = vmax.f32 %v13551_v12, %v6362_v14  ;;  %v15363_v12 = vld [vmem:[#allocation101_spill] sm:$0xff] }
 0x79c   : > { %v6364_v36 = vpop.permute.xlu1 %6363  ;;  %6701 = vrot.lane.b32.xlu0 %v13958_v9, %s8839_s30  ;;  %v13985_v43 = vmax.f32 %v15361_v20, %v6442_v44 }
 0x79e   : > { %v6366_v37 = vpop.permute.xlu0 %6365  ;;  %6703 = vrot.lane.b32.xlu1 %v13963_v48, %s8839_s30  ;;  %15362 = vst [vmem:[#allocation126_spill] sm:$0xff] %v13985_v43 }
 0x79f   : > { %v6443_v7 = vsel %vm312_vm8, %v6364_v36, %v6366_v37  ;;  %v14002_v20 = vmax.f32 %v13568_v40, %v6366_v37 }
 0x7a0   : > { %v6368_v19 = vpop.permute.xlu1 %6367  ;;  %6705 = vrot.lane.b32.xlu0 %v13969_v56, %s8839_s30  ;;  %v13996_v60 = vmax.f32 %v13560_v3, %v6443_v7 }
 0x7a2   : > { %v6370_v39 = vpop.permute.xlu0 %6369  ;;  %6707 = vrot.lane.b32.xlu1 %v13974_v4, %s8839_s30 }
 0x7a3   : > { %v6444_v44 = vsel %vm312_vm8, %v6368_v19, %v6370_v39  ;;  %v14013_v7 = vmax.f32 %v13582_v25, %v6370_v39  ;;  %v15365_v25 = vld [vmem:[#allocation123_spill] sm:$0xff] }
 0x7a4   : > { %v6372_v50 = vpop.permute.xlu1 %6371  ;;  %6709 = vrot.lane.b32.xlu0 %v13980_v63, %s8839_s30  ;;  %v14007_v14 = vmax.f32 %v15363_v12, %v6444_v44 }
 0x7a6   : > { %v6374_v10 = vpop.permute.xlu0 %6373  ;;  %6711 = vrot.lane.b32.xlu1 %v13985_v43, %s8839_s30  ;;  %15364 = vst [vmem:[#allocation72_spill] sm:$0xff] %v14007_v14 }
 0x7a7   : > { %v6445_v3 = vsel %vm312_vm8, %v6372_v50, %v6374_v10  ;;  %v14024_v12 = vmax.f32 %v13598_v16, %v6374_v10 }
 0x7a8   : > { %v6376_v23 = vpop.permute.xlu1 %6375  ;;  %6713 = vrot.lane.b32.xlu0 %v13991_v29, %s8839_s30  ;;  %v14018_v40 = vmax.f32 %v13592_v28, %v6445_v3 }
 0x7aa   : > { %v6378_v36 = vpop.permute.xlu0 %6377  ;;  %6715 = vrot.lane.b32.xlu1 %v13996_v60, %s8839_s30 }
 0x7ab   : > { %v6446_v44 = vsel %vm312_vm8, %v6376_v23, %v6378_v36  ;;  %v14035_v3 = vmax.f32 %v13611_v1, %v6378_v36  ;;  %v15367_v1 = vld [vmem:[#allocation119_spill] sm:$0xff] }
 0x7ac   : > { %v6380_v43 = vpop.permute.xlu1 %6379  ;;  %6717 = vrot.lane.b32.xlu0 %v14002_v20, %s8839_s30  ;;  %v14029_v39 = vmax.f32 %v15365_v25, %v6446_v44 }
 0x7ae   : > { %v6382_v19 = vpop.permute.xlu0 %6381  ;;  %6719 = vrot.lane.b32.xlu1 %v14007_v14, %s8839_s30  ;;  %15366 = vst [vmem:[#allocation35_spill] sm:$0xff] %v14029_v39 }
 0x7af   : > { %v6447_v28 = vsel %vm312_vm8, %v6380_v43, %v6382_v19  ;;  %v14046_v25 = vmax.f32 %v13629_v33, %v6382_v19 }
 0x7b0   : > { %v6384_v37 = vpop.permute.xlu1 %6383  ;;  %6721 = vrot.lane.b32.xlu0 %v14013_v7, %s8839_s30  ;;  %v14040_v16 = vmax.f32 %v13618_v47, %v6447_v28 }
 0x7b2   : > { %v6386_v50 = vpop.permute.xlu0 %6385  ;;  %6723 = vrot.lane.b32.xlu1 %v14018_v40, %s8839_s30 }
 0x7b3   : > { %v6448_v44 = vsel %vm312_vm8, %v6384_v37, %v6386_v50  ;;  %v14057_v28 = vmax.f32 %v13644_v62, %v6386_v50  ;;  %v15372_v62 = vld [vmem:[#allocation103_spill] sm:$0xff] }
 0x7b4   : > { %v6388_v14 = vpop.permute.xlu1 %6387  ;;  %6725 = vrot.lane.b32.xlu0 %v14024_v12, %s8839_s30  ;;  %v14051_v36 = vmax.f32 %v15367_v1, %v6448_v44 }
 0x7b5   : > { %15369 = vst [vmem:[#allocation27_spill] sm:$0xff] %v14057_v28 }
 0x7b6   : > { %v6390_v23 = vpop.permute.xlu0 %6389  ;;  %6727 = vrot.lane.b32.xlu1 %v14029_v39, %s8839_s30  ;;  %15368 = vst [vmem:[#allocation76_spill] sm:$0xff] %v14051_v36 }
 0x7b7   : > { %v6449_v47 = vsel %vm312_vm8, %v6388_v14, %v6390_v23  ;;  %v14068_v1 = vmax.f32 %v13665_v41, %v6390_v23  ;;  %v15375_v41 = vld [vmem:[#allocation36_spill] sm:$0xff] }
 0x7b8   : > { %v6392_v10 = vpop.permute.xlu1 %6391  ;;  %6729 = vrot.lane.b32.xlu0 %v14035_v3, %s8839_s30  ;;  %v14062_v33 = vmax.f32 %v13654_v54, %v6449_v47  ;;  %v15374_v47 = vld [vmem:[#allocation30_spill] sm:$0xff] }
 0x7b9   : > { %15371 = vst [vmem:[#allocation136_spill] sm:$0xff] %v14068_v1 }
 0x7ba   : > { %v6394_v43 = vpop.permute.xlu0 %6393  ;;  %6731 = vrot.lane.b32.xlu1 %v14040_v16, %s8839_s30  ;;  %15370 = vst [vmem:[#allocation62_spill] sm:$0xff] %v14062_v33 }
 0x7bb   : > { %v6450_v44 = vsel %vm312_vm8, %v6392_v10, %v6394_v43 }
 0x7bc   : > { %v6396_v39 = vpop.permute.xlu1 %6395  ;;  %6733 = vrot.lane.b32.xlu0 %v14046_v25, %s8839_s30  ;;  %v14073_v50 = vmax.f32 %v15372_v62, %v6450_v44  ;;  %v15377_v62 = vld [vmem:[#allocation109_spill] sm:$0xff] }
 0x7be   : > { %v6398_v37 = vpop.permute.xlu0 %6397  ;;  %6735 = vrot.lane.b32.xlu1 %v14051_v36, %s8839_s30  ;;  %15373 = vst [vmem:[#allocation80_spill] sm:$0xff] %v14073_v50 }
 0x7bf   : > { %v6451_v54 = vsel %vm312_vm8, %v6396_v39, %v6398_v37 }
 0x7c0   : > { %v6400_v19 = vpop.permute.xlu1 %6399  ;;  %6737 = vrot.lane.b32.xlu0 %v14057_v28, %s8839_s30  ;;  %v14079_v28 = vmax.f32 %v15374_v47, %v6394_v43  ;;  %v14084_v23 = vmax.f32 %v15375_v41, %v6451_v54  ;;  %v15379_v43 = vld [vmem:[#allocation45_spill] sm:$0xff] }
 0x7c2   : > { %v6402_v14 = vpop.permute.xlu0 %6401  ;;  %6739 = vrot.lane.b32.xlu1 %v14062_v33, %s8839_s30  ;;  %15376 = vst [vmem:[#allocation71_spill] sm:$0xff] %v14084_v23 }
 0x7c3   : > { %v6452_v44 = vsel %vm312_vm8, %v6400_v19, %v6402_v14  ;;  %v14101_v41 = vmax.f32 %v13716_v24, %v6402_v14  ;;  %v15383_v24 = vld [vmem:[#allocation63_spill] sm:$0xff] }
 0x7c4   : > { %v6404_v36 = vpop.permute.xlu1 %6403  ;;  %6741 = vrot.lane.b32.xlu0 %v14068_v1, %s8839_s30  ;;  %v14090_v1 = vmax.f32 %v15377_v62, %v6398_v37  ;;  %v14095_v47 = vmax.f32 %v15379_v43, %v6452_v44  ;;  %v15381_v37 = vld [vmem:[#allocation55_spill] sm:$0xff]  ;;  %v15382_v43 = vld [vmem:[#allocation44_spill] sm:$0xff] }
 0x7c6   : > { %v6406_v10 = vpop.permute.xlu0 %6405  ;;  %6743 = vrot.lane.b32.xlu1 %v14073_v50, %s8839_s30  ;;  %15378 = vst [vmem:[#allocation6_spill] sm:$0xff] %v14090_v1  ;;  %15380 = vst [vmem:[#allocation95_spill] sm:$0xff] %v14095_v47 }
 0x7c7   : > { %v6453_v54 = vsel %vm312_vm8, %v6404_v36, %v6406_v10 }
 0x7c8   : > { %v6408_v33 = vpop.permute.xlu1 %6407  ;;  %6745 = vrot.lane.b32.xlu0 %v14079_v28, %s8839_s30  ;;  %v14106_v62 = vmax.f32 %v15381_v37, %v6453_v54 }
 0x7ca   : > { %v6410_v39 = vpop.permute.xlu0 %6409  ;;  %6747 = vrot.lane.b32.xlu1 %v14084_v23, %s8839_s30 }
 0x7cb   : > { %v6454_v44 = vsel %vm312_vm8, %v6408_v33, %v6410_v39  ;;  %v14123_v37 = vmax.f32 %v13751_v49, %v6410_v39 }
 0x7cc   : > { %v6412_v50 = vpop.permute.xlu1 %6411  ;;  %6749 = vrot.lane.b32.xlu0 %v14090_v1, %s8839_s30  ;;  %v14112_v1 = vmax.f32 %v15382_v43, %v6406_v10  ;;  %v14117_v14 = vmax.f32 %v15383_v24, %v6454_v44 }
 0x7ce   : > { %v6414_v19 = vpop.permute.xlu0 %6413  ;;  %6751 = vrot.lane.b32.xlu1 %v14095_v47, %s8839_s30  ;;  %15384 = vst [vmem:[#allocation135_spill] sm:$0xff] %v14117_v14 }
 0x7cf   : > { %v6455_v54 = vsel %vm312_vm8, %v6412_v50, %v6414_v19  ;;  %v14135_v50 = vmax.f32 %v13772_v11, %v6414_v19 }
 0x7d0   : > { %v6416_v23 = vpop.permute.xlu1 %6415  ;;  %6753 = vrot.lane.b32.xlu0 %v14101_v41, %s8839_s30  ;;  %v14128_v10 = vmax.f32 %v13761_v53, %v6455_v54 }
 0x7d1   : > { %15386 = vst [vmem:[#allocation75_spill] sm:$0xff] %v14135_v50 }
 0x7d2   : > { %v6418_v36 = vpop.permute.xlu0 %6417  ;;  %6755 = vrot.lane.b32.xlu1 %v14106_v62, %s8839_s30  ;;  %15385 = vst [vmem:[#allocation83_spill] sm:$0xff] %v14128_v10 }
 0x7d3   : > { %v6456_v44 = vsel %vm312_vm8, %v6416_v23, %v6418_v36 }
 0x7d4   : > { %v6652_v47 = vpop.permute.xlu1 %6651  ;;  %6757 = vrot.lane.b32.xlu0 %v14112_v1, %s8839_s30  ;;  %v14141_v53 = vmax.f32 %v13777_v34, %v6456_v44 }
 0x7d6   : > { %v6654_v33 = vpop.permute.xlu0 %6653  ;;  %6759 = vrot.lane.b32.xlu1 %v14117_v14, %s8839_s30  ;;  %15387 = vst [vmem:[#allocation67_spill] sm:$0xff] %v14141_v53 }
 0x7d7   : > { %v6780_v24 = vsel %vm4064_vm13, %v6652_v47, %v6654_v33  ;;  %v6877_v39 = vmax.f32 %v13800_v32, %v6654_v33  ;;  %v15388_v47 = vld [vmem:[#allocation57_spill] sm:$0xff] }
 0x7d8   : > { %v6420_v43 = vpop.permute.xlu1 %6419  ;;  %6761 = vrot.lane.b32.xlu0 %v14123_v37, %s8839_s30  ;;  %v6876_v54 = vmax.f32 %v13791_v5, %v6780_v24  ;;  %v14148_v11 = vmax.f32 %v15388_v47, %v6418_v36  ;;  %v15390_v36 = vld [vmem:[#allocation53_spill] sm:$0xff] }
 0x7da   : > { %v6422_v49 = vpop.permute.xlu0 %6421  ;;  %6763 = vrot.lane.b32.xlu1 %v14128_v10, %s8839_s30  ;;  %v15389_v10 = vld [vmem:[#allocation120_spill] sm:$0xff] }
 0x7db   : > { %v6457_v23 = vsel %vm312_vm8, %v6420_v43, %v6422_v49  ;;  %v7133_v32 = vadd.f32 %v15389_v10, %v6877_v39  ;;  %v7132_v5 = vadd.f32 %v15389_v10, %v6876_v54 }
 0x7dc   : > { %v6656_v14 = vpop.permute.xlu1 %6655  ;;  %6765 = vrot.lane.b32.xlu0 %v14135_v50, %s8839_s30  ;;  %v14157_v44 = vmax.f32 %v13806_v13, %v6457_v23 }
 0x7dd   : > { %v7197_v10 = vmax.f32 %v7133_v32, 0.0 }
 0x7de   : > { %v6658_v19 = vpop.permute.xlu0 %6657  ;;  %6767 = vrot.lane.b32.xlu1 %v14141_v53, %s8839_s30  ;;  %v15391_v53 = vld [vmem:[#allocation121_spill] sm:$0xff] }
 0x7df   : > { %v6781_v34 = vsel %vm4064_vm13, %v6656_v14, %v6658_v19  ;;  %v6879_v33 = vmax.f32 %v13828_v22, %v6658_v19  ;;  %v14164_v50 = vmax.f32 %v15391_v53, %v6422_v49 }
 0x7e0   : > { %v6878_v43 = vmax.f32 %v13821_v46, %v6781_v34  ;;  %v6424_v24 = vpop.permute.xlu1 %6423  ;;  %6769 = vrot.lane.b32.xlu0 %v14148_v11, %s8839_s30  ;;  %v7196_v46 = vmax.f32 %v7132_v5, 0.0 }
 0x7e1   : > { %v7135_v47 = vadd.f32 %v15390_v36, %v6879_v33 }
 0x7e2   : > { %v7134_v14 = vadd.f32 %v15390_v36, %v6878_v43  ;;  %6771 = vrot.lane.b32.xlu1 %v14157_v44, %s8839_s30  ;;  %v6426_v22 = vpop.permute.xlu0 %6425 }
 0x7e3   : > { %v7199_v13 = vmax.f32 %v7135_v47, 0.0  ;;  %v6458_v39 = vsel %vm312_vm8, %v6424_v24, %v6426_v22  ;;  %v14176_v34 = vmax.f32 %v13837_v17, %v6426_v22  ;;  %v15392_v17 = vld [vmem:[#allocation124_spill] sm:$0xff] }
 0x7e4   : > { %v7198_v54 = vmax.f32 %v7134_v14, 0.0  ;;  %v14171_v23 = vmax.f32 %v13832_v26, %v6458_v39  ;;  %v6660_v19 = vpop.permute.xlu1 %6659  ;;  %6773 = vrot.lane.b32.xlu0 %v14164_v50, %s8839_s30 }
 0x7e5   : > { %v7261_v49 = vpack.c.bf16 %v7199_v13, %v7197_v10  ;;  %v15393_v13 = vld [vmem:[#allocation52_spill] sm:$0xff] }
 0x7e6   : > { %v7260_v53 = vpack.c.bf16 %v7198_v54, %v7196_v46  ;;  %6775 = vrot.lane.b32.xlu1 %v14171_v23, %s8839_s30  ;;  %v6662_v32 = vpop.permute.xlu0 %6661 }
 0x7e7   : > { %v6782_v33 = vsel %vm4064_vm13, %v6660_v19, %v6662_v32  ;;  %v6881_v5 = vmax.f32 %v13848_v2, %v6662_v32  ;;  %8151 = vmatprep.mubr.msk.bf16.mxu1 %vm7395_vm3, %v7261_v49 }
 0x7e8   : > { %v6880_v26 = vmax.f32 %v13842_v6, %v6782_v33  ;;  %7484 = vmatmul.mubr.bf16.vlgmr.msra.gmra.mxu1 %v7260_v53  ;;  %v6664_v43 = vpop.permute.xlu1 %6663  ;;  %6777 = vrot.lane.b32.xlu0 %v14176_v34, %s8839_s30  ;;  %s8202_s30 = sshll.u32 %s15438_s15, 4 }
 0x7e9   : > { %v7137_v36 = vadd.f32 %v15392_v17, %v6881_v5  ;;  %s14352_s19 = scalar_lea.vmem %s14428_s7, %s8202_s30 }
 0x7ea   : > { %v6666_v24 = vpop.permute.xlu0 %6665  ;;  %v7136_v22 = vadd.f32 %v15392_v17, %v6880_v26 }
 0x7eb   : > { %v6783_v47 = vsel %vm4064_vm13, %v6664_v43, %v6666_v24  ;;  %v6883_v14 = vmax.f32 %v13859_v35, %v6666_v24  ;;  %v7201_v54 = vmax.f32 %v7137_v36, 0.0  ;;  %v15394_v24 = vld [vmem:[#allocation125_spill] sm:$0xff] }
 0x7ec   : > { %v6882_v2 = vmax.f32 %v13853_v8, %v6783_v47  ;;  %v6668_v10 = vpop.permute.xlu1 %6667  ;;  %v7200_v32 = vmax.f32 %v7136_v22, 0.0 }
 0x7ed   : > { %v7139_v39 = vadd.f32 %v15393_v13, %v6883_v14 }
 0x7ee   : > { %v7138_v6 = vadd.f32 %v15393_v13, %v6882_v2  ;;  %v6670_v46 = vpop.permute.xlu0 %6669  ;;  %v15395_v2 = vld [vmem:[#allocation127_spill] sm:$0xff] }
 0x7ef   : > { %v7203_v19 = vmax.f32 %v7139_v39, 0.0  ;;  %v6784_v49 = vsel %vm4064_vm13, %v6668_v10, %v6670_v46  ;;  %v6885_v53 = vmax.f32 %v13870_v42, %v6670_v46 }
 0x7f0   : > { %v7202_v33 = vmax.f32 %v7138_v6, 0.0  ;;  %v6884_v35 = vmax.f32 %v13864_v31, %v6784_v49  ;;  %v6672_v5 = vpop.permute.xlu1 %6671 }
 0x7f1   : > { %v7263_v26 = vpack.c.bf16 %v7203_v19, %v7201_v54  ;;  %v7141_v17 = vadd.f32 %v15394_v24, %v6885_v53 }
 0x7f2   : > { %v7262_v43 = vpack.c.bf16 %v7202_v33, %v7200_v32  ;;  %v6674_v8 = vpop.permute.xlu0 %6673  ;;  %v7140_v36 = vadd.f32 %v15394_v24, %v6884_v35  ;;  %v15396_v35 = vld [vmem:[#allocation58_spill] sm:$0xff] }
 0x7f3   : > { %v6785_v47 = vsel %vm4064_vm13, %v6672_v5, %v6674_v8  ;;  %v6887_v14 = vmax.f32 %v13881_v59, %v6674_v8  ;;  %8152 = vmatprep.mubr.msk.bf16.mxu1 %vm7395_vm3, %v7263_v26  ;;  %v7205_v39 = vmax.f32 %v7141_v17, 0.0  ;;  %v15397_v17 = vld [vmem:[#allocation129_spill] sm:$0xff] }
 0x7f4   : > { %v6886_v42 = vmax.f32 %v13875_v21, %v6785_v47  ;;  %v6676_v22 = vpop.permute.xlu1 %6675  ;;  %7492 = vmatmul.mubr.bf16.gmra.mxu1 %v7262_v43  ;;  %v7204_v59 = vmax.f32 %v7140_v36, 0.0 }
 0x7f5   : > { %v7143_v31 = vadd.f32 %v15395_v2, %v6887_v14 }
 0x7f6   : > { %v7142_v10 = vadd.f32 %v15395_v2, %v6886_v42  ;;  %v6678_v13 = vpop.permute.xlu0 %6677 }
 0x7f7   : > { %v7207_v6 = vmax.f32 %v7143_v31, 0.0  ;;  %v6786_v46 = vsel %vm4064_vm13, %v6676_v22, %v6678_v13  ;;  %v6889_v54 = vmax.f32 %v13892_v18, %v6678_v13 }
 0x7f8   : > { %v7206_v19 = vmax.f32 %v7142_v10, 0.0  ;;  %v6888_v49 = vmax.f32 %v13886_v57, %v6786_v46  ;;  %v6680_v53 = vpop.permute.xlu1 %6679  ;;  %v15398_v46 = vld [vmem:[#allocation65_spill] sm:$0xff] }
 0x7f9   : > { %v7265_v32 = vpack.c.bf16 %v7207_v6, %v7205_v39  ;;  %v7145_v5 = vadd.f32 %v15396_v35, %v6889_v54 }
 0x7fa   : > { %v7264_v21 = vpack.c.bf16 %v7206_v19, %v7204_v59  ;;  %v6682_v33 = vpop.permute.xlu0 %6681  ;;  %v7144_v8 = vadd.f32 %v15396_v35, %v6888_v49 }
 0x7fb   : > { %v6787_v26 = vsel %vm4064_vm13, %v6680_v53, %v6682_v33  ;;  %v6891_v43 = vmax.f32 %v13903_v15, %v6682_v33  ;;  %8153 = vmatprep.mubr.msk.bf16.mxu1 %vm7395_vm3, %v7265_v32  ;;  %v7209_v36 = vmax.f32 %v7145_v5, 0.0  ;;  %v15399_v32 = vld [vmem:[#allocation130_spill] sm:$0xff] }
 0x7fc   : > { %v6890_v18 = vmax.f32 %v13897_v58, %v6787_v26  ;;  %v6684_v24 = vpop.permute.xlu1 %6683  ;;  %7500 = vmatmul.mubr.bf16.gmra.mxu1 %v7264_v21  ;;  %v7208_v15 = vmax.f32 %v7144_v8, 0.0 }
 0x7fd   : > { %v7147_v57 = vadd.f32 %v15397_v17, %v6891_v43 }
 0x7fe   : > { %v7146_v47 = vadd.f32 %v15397_v17, %v6890_v18  ;;  %v6686_v14 = vpop.permute.xlu0 %6685 }
 0x7ff   : > { %v7211_v42 = vmax.f32 %v7147_v57, 0.0  ;;  %v6788_v22 = vsel %vm4064_vm13, %v6684_v24, %v6686_v14  ;;  %v6893_v2 = vmax.f32 %v13914_v61, %v6686_v14 }
 0x800   : > { %v7210_v31 = vmax.f32 %v7146_v47, 0.0  ;;  %v6892_v10 = vmax.f32 %v13908_v51, %v6788_v22  ;;  %v6688_v13 = vpop.permute.xlu1 %6687  ;;  %v15400_v47 = vld [vmem:[#allocation2_spill] sm:$0xff] }
 0x801   : > { %v7267_v39 = vpack.c.bf16 %v7211_v42, %v7209_v36  ;;  %v7149_v54 = vadd.f32 %v15398_v46, %v6893_v2 }
 0x802   : > { %v7266_v58 = vpack.c.bf16 %v7210_v31, %v7208_v15  ;;  %v6690_v6 = vpop.permute.xlu0 %6689  ;;  %v7148_v49 = vadd.f32 %v15398_v46, %v6892_v10  ;;  %v15401_v15 = vld [vmem:[#allocation3_spill] sm:$0xff] }
 0x803   : > { %v6789_v59 = vsel %vm4064_vm13, %v6688_v13, %v6690_v6  ;;  %v6895_v19 = vmax.f32 %v13925_v0, %v6690_v6  ;;  %8154 = vmatprep.mubr.msk.bf16.mxu1 %vm7395_vm3, %v7267_v39  ;;  %v7213_v35 = vmax.f32 %v7149_v54, 0.0 }
 0x804   : > { %v6894_v61 = vmax.f32 %v13919_v55, %v6789_v59  ;;  %v6692_v53 = vpop.permute.xlu1 %6691  ;;  %7508 = vmatmul.mubr.bf16.gmra.mxu1 %v7266_v58  ;;  %v7212_v0 = vmax.f32 %v7148_v49, 0.0 }
 0x805   : > { %v7151_v51 = vadd.f32 %v15399_v32, %v6895_v19 }
 0x806   : > { %v7150_v21 = vadd.f32 %v15399_v32, %v6894_v61  ;;  %v6694_v33 = vpop.permute.xlu0 %6693  ;;  %v15402_v61 = vld [vmem:[#allocation133_spill] sm:$0xff] }
 0x807   : > { %v7215_v5 = vmax.f32 %v7151_v51, 0.0  ;;  %v6790_v26 = vsel %vm4064_vm13, %v6692_v53, %v6694_v33  ;;  %v6897_v43 = vmax.f32 %v13936_v38, %v6694_v33 }
 0x808   : > { %v7214_v8 = vmax.f32 %v7150_v21, 0.0  ;;  %v6896_v18 = vmax.f32 %v13930_v45, %v6790_v26  ;;  %v6696_v24 = vpop.permute.xlu1 %6695 }
 0x809   : > { %v7269_v17 = vpack.c.bf16 %v7215_v5, %v7213_v35  ;;  %v7153_v14 = vadd.f32 %v15400_v47, %v6897_v43  ;;  %v15403_v35 = vld [vmem:[#allocation137_spill] sm:$0xff] }
 0x80a   : > { %v7268_v55 = vpack.c.bf16 %v7214_v8, %v7212_v0  ;;  %v6698_v57 = vpop.permute.xlu0 %6697  ;;  %v7152_v22 = vadd.f32 %v15400_v47, %v6896_v18 }
 0x80b   : > { %v6791_v36 = vsel %vm4064_vm13, %v6696_v24, %v6698_v57  ;;  %v6899_v42 = vmax.f32 %v13947_v27, %v6698_v57  ;;  %8155 = vmatprep.mubr.msk.bf16.mxu1 %vm7395_vm3, %v7269_v17  ;;  %v7217_v13 = vmax.f32 %v7153_v14, 0.0  ;;  %v15404_v14 = vld [vmem:[#allocation14_spill] sm:$0xff] }
 0x80c   : > { %v6898_v38 = vmax.f32 %v13941_v30, %v6791_v36  ;;  %v6700_v2 = vpop.permute.xlu1 %6699  ;;  %7516 = vmatmul.mubr.bf16.gmra.mxu1 %v7268_v55  ;;  %v7216_v27 = vmax.f32 %v7152_v22, 0.0 }
 0x80d   : > { %v7155_v45 = vadd.f32 %v15401_v15, %v6899_v42 }
 0x80e   : > { %v7154_v31 = vadd.f32 %v15401_v15, %v6898_v38  ;;  %v6702_v10 = vpop.permute.xlu0 %6701 }
 0x80f   : > { %v7219_v39 = vmax.f32 %v7155_v45, 0.0  ;;  %v6792_v58 = vsel %vm4064_vm13, %v6700_v2, %v6702_v10  ;;  %v6901_v6 = vmax.f32 %v13958_v9, %v6702_v10  ;;  %v15405_v2 = vld [vmem:[#allocation126_spill] sm:$0xff]  ;;  %v15406_v45 = vld [vmem:[#allocation104_spill] sm:$0xff] }
 0x810   : > { %v7218_v46 = vmax.f32 %v7154_v31, 0.0  ;;  %v6900_v54 = vmax.f32 %v13952_v52, %v6792_v58  ;;  %v6704_v59 = vpop.permute.xlu1 %6703 }
 0x811   : > { %v7271_v19 = vpack.c.bf16 %v7219_v39, %v7217_v13  ;;  %v7157_v53 = vadd.f32 %v15402_v61, %v6901_v6 }
 0x812   : > { %v7270_v30 = vpack.c.bf16 %v7218_v46, %v7216_v27  ;;  %v6706_v49 = vpop.permute.xlu0 %6705  ;;  %v7156_v21 = vadd.f32 %v15402_v61, %v6900_v54 }
 0x813   : > { %v6793_v32 = vsel %vm4064_vm13, %v6704_v59, %v6706_v49  ;;  %v6903_v51 = vmax.f32 %v13969_v56, %v6706_v49  ;;  %8156 = vmatprep.mubr.msk.bf16.mxu1 %vm7395_vm3, %v7271_v19  ;;  %v7221_v43 = vmax.f32 %v7157_v53, 0.0  ;;  %v15407_v49 = vld [vmem:[#allocation98_spill] sm:$0xff] }
 0x814   : > { %v6902_v9 = vmax.f32 %v13963_v48, %v6793_v32  ;;  %v6708_v33 = vpop.permute.xlu1 %6707  ;;  %7524 = vmatmul.mubr.bf16.gmra.mxu1 %v7270_v30  ;;  %v7220_v56 = vmax.f32 %v7156_v21, 0.0  ;;  %v15408_v21 = vld [vmem:[#allocation72_spill] sm:$0xff] }
 0x815   : > { %v7159_v52 = vadd.f32 %v15403_v35, %v6903_v51 }
 0x816   : > { %v7158_v5 = vadd.f32 %v15403_v35, %v6902_v9  ;;  %v6710_v26 = vpop.permute.xlu0 %6709 }
 0x817   : > { %v7223_v0 = vmax.f32 %v7159_v52, 0.0  ;;  %v6794_v8 = vsel %vm4064_vm13, %v6708_v33, %v6710_v26  ;;  %v6905_v18 = vmax.f32 %v13980_v63, %v6710_v26  ;;  %v15409_v33 = vld [vmem:[#allocation33_spill] sm:$0xff] }
 0x818   : > { %v7222_v24 = vmax.f32 %v7158_v5, 0.0  ;;  %v6904_v17 = vmax.f32 %v13974_v4, %v6794_v8  ;;  %v6712_v55 = vpop.permute.xlu1 %6711 }
 0x819   : > { %v7273_v57 = vpack.c.bf16 %v7223_v0, %v7221_v43  ;;  %v7161_v36 = vadd.f32 %v15404_v14, %v6905_v18 }
 0x81a   : > { %v7272_v48 = vpack.c.bf16 %v7222_v24, %v7220_v56  ;;  %v6714_v47 = vpop.permute.xlu0 %6713  ;;  %v7160_v38 = vadd.f32 %v15404_v14, %v6904_v17 }
 0x81b   : > { %v6795_v42 = vsel %vm4064_vm13, %v6712_v55, %v6714_v47  ;;  %v6907_v22 = vmax.f32 %v13991_v29, %v6714_v47  ;;  %8157 = vmatprep.mubr.msk.bf16.mxu1 %vm7395_vm3, %v7273_v57  ;;  %v7225_v13 = vmax.f32 %v7161_v36, 0.0  ;;  %v15410_v57 = vld [vmem:[#allocation24_spill] sm:$0xff] }
 0x81c   : > { %v6906_v63 = vmax.f32 %v15405_v2, %v6795_v42  ;;  %v6716_v15 = vpop.permute.xlu1 %6715  ;;  %7532 = vmatmul.mubr.bf16.gmra.mxu1 %v7272_v48  ;;  %v7224_v29 = vmax.f32 %v7160_v38, 0.0  ;;  %v15411_v42 = vld [vmem:[#allocation35_spill] sm:$0xff]  ;;  %v15412_v38 = vld [vmem:[#allocation17_spill] sm:$0xff] }
 0x81d   : > { %v7163_v4 = vadd.f32 %v15406_v45, %v6907_v22 }
 0x81e   : > { %v7162_v31 = vadd.f32 %v15406_v45, %v6906_v63  ;;  %v6718_v10 = vpop.permute.xlu0 %6717 }
 0x81f   : > { %v7227_v39 = vmax.f32 %v7163_v4, 0.0  ;;  %v6796_v58 = vsel %vm4064_vm13, %v6716_v15, %v6718_v10  ;;  %v6909_v6 = vmax.f32 %v14002_v20, %v6718_v10 }
 0x820   : > { %v7226_v27 = vmax.f32 %v7162_v31, 0.0  ;;  %v6908_v46 = vmax.f32 %v13996_v60, %v6796_v58  ;;  %v6720_v54 = vpop.permute.xlu1 %6719 }
 0x821   : > { %v7275_v59 = vpack.c.bf16 %v7227_v39, %v7225_v13  ;;  %v7165_v61 = vadd.f32 %v15407_v49, %v6909_v6 }
 0x822   : > { %v7274_v19 = vpack.c.bf16 %v7226_v27, %v7224_v29  ;;  %v6722_v30 = vpop.permute.xlu0 %6721  ;;  %v7164_v51 = vadd.f32 %v15407_v49, %v6908_v46  ;;  %v15413_v27 = vld [vmem:[#allocation54_spill] sm:$0xff]  ;;  %v15415_v49 = vld [vmem:[#allocation76_spill] sm:$0xff] }
 0x823   : > { %v6797_v53 = vsel %vm4064_vm13, %v6720_v54, %v6722_v30  ;;  %v6911_v32 = vmax.f32 %v14013_v7, %v6722_v30  ;;  %8158 = vmatprep.mubr.msk.bf16.mxu1 %vm7395_vm3, %v7275_v59  ;;  %v7229_v5 = vmax.f32 %v7165_v61, 0.0  ;;  %v15414_v59 = vld [vmem:[#allocation27_spill] sm:$0xff] }
 0x824   : > { %v6910_v20 = vmax.f32 %v15408_v21, %v6797_v53  ;;  %v6724_v9 = vpop.permute.xlu1 %6723  ;;  %7540 = vmatmul.mubr.bf16.gmra.mxu1 %v7274_v19  ;;  %v7228_v7 = vmax.f32 %v7164_v51, 0.0  ;;  %v15416_v53 = vld [vmem:[#allocation25_spill] sm:$0xff] }
 0x825   : > { %v7167_v60 = vadd.f32 %v15409_v33, %v6911_v32 }
 0x826   : > { %v7166_v35 = vadd.f32 %v15409_v33, %v6910_v20  ;;  %v6726_v52 = vpop.permute.xlu0 %6725  ;;  %v15417_v33 = vld [vmem:[#allocation136_spill] sm:$0xff] }
 0x827   : > { %v7231_v26 = vmax.f32 %v7167_v60, 0.0  ;;  %v6798_v43 = vsel %vm4064_vm13, %v6724_v9, %v6726_v52  ;;  %v6913_v0 = vmax.f32 %v14024_v12, %v6726_v52 }
 0x828   : > { %v7230_v8 = vmax.f32 %v7166_v35, 0.0  ;;  %v6912_v18 = vmax.f32 %v14018_v40, %v6798_v43  ;;  %v6728_v56 = vpop.permute.xlu1 %6727 }
 0x829   : > { %v7277_v24 = vpack.c.bf16 %v7231_v26, %v7229_v5  ;;  %v7169_v48 = vadd.f32 %v15410_v57, %v6913_v0  ;;  %v15418_v5 = vld [vmem:[#allocation62_spill] sm:$0xff] }
 0x82a   : > { %v7276_v17 = vpack.c.bf16 %v7230_v8, %v7228_v7  ;;  %v6730_v55 = vpop.permute.xlu0 %6729  ;;  %v7168_v36 = vadd.f32 %v15410_v57, %v6912_v18  ;;  %v15419_v18 = vld [vmem:[#allocation23_spill] sm:$0xff]  ;;  %v15420_v57 = vld [vmem:[#allocation80_spill] sm:$0xff] }
 0x82b   : > { %v6799_v47 = vsel %vm4064_vm13, %v6728_v56, %v6730_v55  ;;  %v6915_v14 = vmax.f32 %v14035_v3, %v6730_v55  ;;  %8159 = vmatprep.mubr.msk.bf16.mxu1 %vm7395_vm3, %v7277_v24  ;;  %v7233_v15 = vmax.f32 %v7169_v48, 0.0 }
 0x82c   : > { %v6914_v12 = vmax.f32 %v15411_v42, %v6799_v47  ;;  %v6732_v22 = vpop.permute.xlu1 %6731  ;;  %7548 = vmatmul.mubr.bf16.gmra.mxu1 %v7276_v17  ;;  %v7232_v3 = vmax.f32 %v7168_v36, 0.0 }
 0x82d   : > { %v7171_v40 = vadd.f32 %v15412_v38, %v6915_v14  ;;  %v15421_v14 = vld [vmem:[#allocation97_spill] sm:$0xff] }
 0x82e   : > { %v7170_v2 = vadd.f32 %v15412_v38, %v6914_v12  ;;  %v6734_v63 = vpop.permute.xlu0 %6733 }
 0x82f   : > { %v7235_v45 = vmax.f32 %v7171_v40, 0.0  ;;  %v6800_v4 = vsel %vm4064_vm13, %v6732_v22, %v6734_v63  ;;  %v6917_v31 = vmax.f32 %v14046_v25, %v6734_v63 }
 0x830   : > { %v7234_v10 = vmax.f32 %v7170_v2, 0.0  ;;  %v6916_v13 = vmax.f32 %v14040_v16, %v6800_v4  ;;  %v6736_v39 = vpop.permute.xlu1 %6735  ;;  %v15422_v2 = vld [vmem:[#allocation6_spill] sm:$0xff] }
 0x831   : > { %v7279_v58 = vpack.c.bf16 %v7235_v45, %v7233_v15  ;;  %v7173_v46 = vadd.f32 %v15413_v27, %v6917_v31  ;;  %v15423_v45 = vld [vmem:[#allocation71_spill] sm:$0xff] }
 0x832   : > { %v7278_v6 = vpack.c.bf16 %v7234_v10, %v7232_v3  ;;  %v6738_v29 = vpop.permute.xlu0 %6737  ;;  %v7172_v30 = vadd.f32 %v15413_v27, %v6916_v13 }
 0x833   : > { %v6801_v54 = vsel %vm4064_vm13, %v6736_v39, %v6738_v29  ;;  %v6919_v19 = vmax.f32 %v15414_v59, %v6738_v29  ;;  %8160 = vmatprep.mubr.msk.bf16.mxu1 %vm7395_vm3, %v7279_v58  ;;  %v7237_v21 = vmax.f32 %v7173_v46, 0.0  ;;  %v15424_v39 = vld [vmem:[#allocation43_spill] sm:$0xff] }
 0x834   : > { %v6918_v25 = vmax.f32 %v15415_v49, %v6801_v54  ;;  %v6740_v61 = vpop.permute.xlu1 %6739  ;;  %7556 = vmatmul.mubr.bf16.gmra.mxu1 %v7278_v6  ;;  %v7236_v35 = vmax.f32 %v7172_v30, 0.0  ;;  %v15425_v46 = vld [vmem:[#allocation95_spill] sm:$0xff] }
 0x835   : > { %v7175_v16 = vadd.f32 %v15416_v53, %v6919_v19  ;;  %v15426_v19 = vld [vmem:[#allocation49_spill] sm:$0xff] }
 0x836   : > { %v7174_v32 = vadd.f32 %v15416_v53, %v6918_v25  ;;  %v6742_v51 = vpop.permute.xlu0 %6741 }
 0x837   : > { %v7239_v20 = vmax.f32 %v7175_v16, 0.0  ;;  %v6802_v9 = vsel %vm4064_vm13, %v6740_v61, %v6742_v51  ;;  %v6921_v60 = vmax.f32 %v15417_v33, %v6742_v51 }
 0x838   : > { %v7238_v52 = vmax.f32 %v7174_v32, 0.0  ;;  %v6920_v26 = vmax.f32 %v15418_v5, %v6802_v9  ;;  %v6744_v43 = vpop.permute.xlu1 %6743 }
 0x839   : > { %v7281_v0 = vpack.c.bf16 %v7239_v20, %v7237_v21  ;;  %v7177_v56 = vadd.f32 %v15419_v18, %v6921_v60 }
 0x83a   : > { %v7280_v7 = vpack.c.bf16 %v7238_v52, %v7236_v35  ;;  %v6746_v8 = vpop.permute.xlu0 %6745  ;;  %v7176_v55 = vadd.f32 %v15419_v18, %v6920_v26  ;;  %v15427_v35 = vld [vmem:[#allocation114_spill] sm:$0xff] }
 0x83b   : > { %v6803_v24 = vsel %vm4064_vm13, %v6744_v43, %v6746_v8  ;;  %v6923_v17 = vmax.f32 %v14079_v28, %v6746_v8  ;;  %8161 = vmatprep.mubr.msk.bf16.mxu1 %vm7395_vm3, %v7281_v0  ;;  %v7241_v22 = vmax.f32 %v7177_v56, 0.0  ;;  %v15428_v0 = vld [vmem:[#allocation135_spill] sm:$0xff]  ;;  %v15429_v8 = vld [vmem:[#allocation29_spill] sm:$0xff] }
 0x83c   : > { %v6922_v48 = vmax.f32 %v15420_v57, %v6803_v24  ;;  %v6748_v47 = vpop.permute.xlu1 %6747  ;;  %7564 = vmatmul.mubr.bf16.gmra.mxu1 %v7280_v7  ;;  %v7240_v28 = vmax.f32 %v7176_v55, 0.0  ;;  %v15430_v57 = vld [vmem:[#allocation75_spill] sm:$0xff] }
 0x83d   : > { %v7179_v36 = vadd.f32 %v15421_v14, %v6923_v17 }
 0x83e   : > { %v7178_v42 = vadd.f32 %v15421_v14, %v6922_v48  ;;  %v6750_v12 = vpop.permute.xlu0 %6749  ;;  %v15431_v14 = vld [vmem:[#allocation83_spill] sm:$0xff] }
 0x83f   : > { %v7243_v38 = vmax.f32 %v7179_v36, 0.0  ;;  %v6804_v40 = vsel %vm4064_vm13, %v6748_v47, %v6750_v12  ;;  %v6925_v63 = vmax.f32 %v15422_v2, %v6750_v12 }
 0x840   : > { %v7242_v15 = vmax.f32 %v7178_v42, 0.0  ;;  %v6924_v4 = vmax.f32 %v15423_v45, %v6804_v40  ;;  %v6752_v31 = vpop.permute.xlu1 %6751  ;;  %v15432_v40 = vld [vmem:[#allocation22_spill] sm:$0xff]  ;;  %v15433_v45 = vld [vmem:[#allocation67_spill] sm:$0xff] }
 0x841   : > { %v7283_v3 = vpack.c.bf16 %v7243_v38, %v7241_v22  ;;  %v7181_v58 = vadd.f32 %v15424_v39, %v6925_v63 }
 0x842   : > { %v7282_v10 = vpack.c.bf16 %v7242_v15, %v7240_v28  ;;  %v6754_v13 = vpop.permute.xlu0 %6753  ;;  %v7180_v27 = vadd.f32 %v15424_v39, %v6924_v4 }
 0x843   : > { %v6805_v6 = vsel %vm4064_vm13, %v6752_v31, %v6754_v13  ;;  %v6927_v29 = vmax.f32 %v14101_v41, %v6754_v13  ;;  %8162 = vmatprep.mubr.msk.bf16.mxu1 %vm7395_vm3, %v7283_v3  ;;  %v7245_v61 = vmax.f32 %v7181_v58, 0.0  ;;  %v15434_v3 = vld [vmem:[#allocation118_spill] sm:$0xff] }
 0x844   : > { %v6926_v54 = vmax.f32 %v15425_v46, %v6805_v6  ;;  %v6756_v59 = vpop.permute.xlu1 %6755  ;;  %7572 = vmatmul.mubr.bf16.gmra.mxu1 %v7282_v10  ;;  %v7244_v41 = vmax.f32 %v7180_v27, 0.0 }
 0x845   : > { %v7183_v30 = vadd.f32 %v15426_v19, %v6927_v29 }
 0x846   : > { %v7182_v49 = vadd.f32 %v15426_v19, %v6926_v54  ;;  %v6758_v25 = vpop.permute.xlu0 %6757 }
 0x847   : > { %v7247_v53 = vmax.f32 %v7183_v30, 0.0  ;;  %v6806_v16 = vsel %vm4064_vm13, %v6756_v59, %v6758_v25  ;;  %v6929_v32 = vmax.f32 %v14112_v1, %v6758_v25  ;;  %v15435_v25 = vld [vmem:[#allocation50_spill] sm:$0xff] }
 0x848   : > { %v7246_v51 = vmax.f32 %v7182_v49, 0.0  ;;  %v6928_v21 = vmax.f32 %v14106_v62, %v6806_v16  ;;  %v6760_v20 = vpop.permute.xlu1 %6759 }
 0x849   : > { %v7285_v9 = vpack.c.bf16 %v7247_v53, %v7245_v61  ;;  %v7185_v52 = vadd.f32 %v15427_v35, %v6929_v32 }
 0x84a   : > { %v7284_v33 = vpack.c.bf16 %v7246_v51, %v7244_v41  ;;  %v6762_v60 = vpop.permute.xlu0 %6761  ;;  %v7184_v43 = vadd.f32 %v15427_v35, %v6928_v21  ;;  %v15436_v41 = vld [vmem:[#allocation68_spill] sm:$0xff] }
 0x84b   : > { %v6807_v5 = vsel %vm4064_vm13, %v6760_v20, %v6762_v60  ;;  %v6931_v26 = vmax.f32 %v14123_v37, %v6762_v60  ;;  %8163 = vmatprep.mubr.msk.bf16.mxu1 %vm7395_vm3, %v7285_v9  ;;  %v7249_v24 = vmax.f32 %v7185_v52, 0.0 }
 0x84c   : > { %v6930_v1 = vmax.f32 %v15428_v0, %v6807_v5  ;;  %v6764_v7 = vpop.permute.xlu1 %6763  ;;  %7580 = vmatmul.mubr.bf16.gmra.mxu1 %v7284_v33  ;;  %v7248_v37 = vmax.f32 %v7184_v43, 0.0 }
 0x84d   : > { %v7187_v62 = vadd.f32 %v15429_v8, %v6931_v26 }
 0x84e   : > { %v7186_v18 = vadd.f32 %v15429_v8, %v6930_v1  ;;  %v6766_v56 = vpop.permute.xlu0 %6765 }
 0x84f   : > { %v7251_v17 = vmax.f32 %v7187_v62, 0.0  ;;  %v6808_v55 = vsel %vm4064_vm13, %v6764_v7, %v6766_v56  ;;  %v6933_v48 = vmax.f32 %v15430_v57, %v6766_v56 }
 0x850   : > { %v7250_v47 = vmax.f32 %v7186_v18, 0.0  ;;  %v6932_v36 = vmax.f32 %v15431_v14, %v6808_v55  ;;  %v6768_v42 = vpop.permute.xlu1 %6767 }
 0x851   : > { %v7287_v12 = vpack.c.bf16 %v7251_v17, %v7249_v24  ;;  %v7189_v2 = vadd.f32 %v15432_v40, %v6933_v48 }
 0x852   : > { %v7286_v22 = vpack.c.bf16 %v7250_v47, %v7248_v37  ;;  %v6770_v38 = vpop.permute.xlu0 %6769  ;;  %v7188_v15 = vadd.f32 %v15432_v40, %v6932_v36 }
 0x853   : > { %v6809_v63 = vsel %vm4064_vm13, %v6768_v42, %v6770_v38  ;;  %v6935_v28 = vmax.f32 %v14148_v11, %v6770_v38  ;;  %8164 = vmatprep.mubr.msk.bf16.mxu1 %vm7395_vm3, %v7287_v12  ;;  %v7253_v58 = vmax.f32 %v7189_v2, 0.0 }
 0x854   : > { %v6934_v4 = vmax.f32 %v15433_v45, %v6809_v63  ;;  %v6772_v31 = vpop.permute.xlu1 %6771  ;;  %7588 = vmatmul.mubr.bf16.gmra.mxu1 %v7286_v22  ;;  %v7252_v11 = vmax.f32 %v7188_v15, 0.0 }
 0x855   : > { %v7191_v10 = vadd.f32 %v15434_v3, %v6935_v28 }
 0x856   : > { %v7190_v13 = vadd.f32 %v15434_v3, %v6934_v4  ;;  %v6774_v39 = vpop.permute.xlu0 %6773 }
 0x857   : > { %v7255_v6 = vmax.f32 %v7191_v10, 0.0  ;;  %v6810_v29 = vsel %vm4064_vm13, %v6772_v31, %v6774_v39  ;;  %v6937_v27 = vmax.f32 %v14164_v50, %v6774_v39 }
 0x858   : > { %v7254_v46 = vmax.f32 %v7190_v13, 0.0  ;;  %v6936_v54 = vmax.f32 %v14157_v44, %v6810_v29  ;;  %v6776_v30 = vpop.permute.xlu1 %6775 }
 0x859   : > { %v7289_v59 = vpack.c.bf16 %v7255_v6, %v7253_v58  ;;  %v7193_v61 = vadd.f32 %v15435_v25, %v6937_v27 }
 0x85a   : > { %v7288_v19 = vpack.c.bf16 %v7254_v46, %v7252_v11  ;;  %v6778_v49 = vpop.permute.xlu0 %6777  ;;  %v7192_v32 = vadd.f32 %v15435_v25, %v6936_v54 }
 0x85b   : > { %v6811_v53 = vsel %vm4064_vm13, %v6776_v30, %v6778_v49  ;;  %v6939_v16 = vmax.f32 %v14176_v34, %v6778_v49  ;;  %8165 = vmatprep.mubr.msk.bf16.mxu1 %vm7395_vm3, %v7289_v59  ;;  %v7257_v21 = vmax.f32 %v7193_v61, 0.0 }
 0x85c   : > { %v6938_v50 = vmax.f32 %v14171_v23, %v6811_v53  ;;  %7596 = vmatmul.mubr.bf16.gmra.mxu1 %v7288_v19  ;;  %v7256_v9 = vmax.f32 %v7192_v32, 0.0 }
 0x85d   : > { %v7195_v44 = vadd.f32 %v15436_v41, %v6939_v16 }
 0x85e   : > { %v7194_v51 = vadd.f32 %v15436_v41, %v6938_v50 }
 0x85f   : > { %v7259_v20 = vmax.f32 %v7195_v44, 0.0 }
 0x860   : > { %v7258_v33 = vmax.f32 %v7194_v51, 0.0 }
 0x861   : > { %v7291_v60 = vpack.c.bf16 %v7259_v20, %v7257_v21 }
 0x862   : > { %v7290_v35 = vpack.c.bf16 %v7258_v33, %v7256_v9 }
 0x863   : > { %8166 = vmatprep.mubr.msk.bf16.mxu1 %vm7395_vm3, %v7291_v60 }
 0x864   : > { %7604 = vmatmul.mubr.bf16.gmra.mxu1 %v7290_v35 }
 0x8a8   : > { %v7485_v23 = vpop.f32.mrf.mxu1 }
 0x8a9   : > { %v8203_v34 = vpack.c.bf16 %v7485_v23, %v7485_v23 }
 0x8aa   : > { %v7487_v52 = vpop.f32.mrf.mxu1 }
 0x8ab   : > { %7741 = vst.msk [vmem:[%s14352_s19] sm:$0xf] %vm7740_vm4, %v8203_v34 }
 0x8ac   : > { %v7488_v5 = vpop.f32.mrf.mxu1 }
 0x8ad   : > { %v8204_v26 = vpack.c.bf16 %v7488_v5, %v7488_v5 }
 0x8ae   : > { %v7490_v43 = vpop.f32.mrf.mxu1 }
 0x8af   : > { %7742 = vst.msk [vmem:[%s14352_s19 + $0x4] sm:$0xf] %vm7740_vm4, %v8204_v26 }
 0x8b4   : > { %v7493_v0 = vpop.f32.mrf.mxu1 }
 0x8b5   : > { %v8205_v1 = vpack.c.bf16 %v7493_v0, %v7493_v0 }
 0x8b6   : > { %v7495_v7 = vpop.f32.mrf.mxu1 }
 0x8b7   : > { %7743 = vst.msk [vmem:[%s14352_s19 + $0x8] sm:$0xf] %vm7740_vm4, %v8205_v1 }
 0x8b8   : > { %v7496_v8 = vpop.f32.mrf.mxu1 }
 0x8b9   : > { %v8206_v62 = vpack.c.bf16 %v7496_v8, %v7496_v8 }
 0x8ba   : > { %v7498_v18 = vpop.f32.mrf.mxu1 }
 0x8bb   : > { %7744 = vst.msk [vmem:[%s14352_s19 + $0xc] sm:$0xf] %vm7740_vm4, %v8206_v62 }
 0x8bc   : > { %v7501_v56 = vpop.f32.mrf.mxu1 }
 0x8bd   : > { %v8207_v24 = vpack.c.bf16 %v7501_v56, %v7501_v56 }
 0x8be   : > { %v7503_v17 = vpop.f32.mrf.mxu1 }
 0x8bf   : > { %7745 = vst.msk [vmem:[%s14352_s19 + $0x10] sm:$0xf] %vm7740_vm4, %v8207_v24 }
 0x8c0   : > { %v7504_v55 = vpop.f32.mrf.mxu1 }
 0x8c1   : > { %v8208_v57 = vpack.c.bf16 %v7504_v55, %v7504_v55 }
 0x8c2   : > { %v7506_v48 = vpop.f32.mrf.mxu1 }
 0x8c3   : > { %7746 = vst.msk [vmem:[%s14352_s19 + $0x14] sm:$0xf] %vm7740_vm4, %v8208_v57 }
 0x8c4   : > { %v7509_v37 = vpop.f32.mrf.mxu1 }
 0x8c5   : > { %v8209_v47 = vpack.c.bf16 %v7509_v37, %v7509_v37 }
 0x8c6   : > { %v7511_v14 = vpop.f32.mrf.mxu1 }
 0x8c7   : > { %7747 = vst.msk [vmem:[%s14352_s19 + $0x18] sm:$0xf] %vm7740_vm4, %v8209_v47 }
 0x8c8   : > { %v7512_v36 = vpop.f32.mrf.mxu1 }
 0x8c9   : > { %v8210_v42 = vpack.c.bf16 %v7512_v36, %v7512_v36 }
 0x8ca   : > { %v7514_v12 = vpop.f32.mrf.mxu1 }
 0x8cb   : > { %7748 = vst.msk [vmem:[%s14352_s19 + $0x1c] sm:$0xf] %vm7740_vm4, %v8210_v42 }
 0x8cc   : > { %v7517_v22 = vpop.f32.mrf.mxu1 }
 0x8cd   : > { %v8211_v38 = vpack.c.bf16 %v7517_v22, %v7517_v22 }
 0x8ce   : > { %v7519_v40 = vpop.f32.mrf.mxu1 }
 0x8cf   : > { %7749 = vst.msk [vmem:[%s14352_s19 + $0x20] sm:$0xf] %vm7740_vm4, %v8211_v38 }
 0x8d0   : > { %v7520_v2 = vpop.f32.mrf.mxu1 }
 0x8d1   : > { %v8212_v63 = vpack.c.bf16 %v7520_v2, %v7520_v2 }
 0x8d2   : > { %v7522_v28 = vpop.f32.mrf.mxu1 }
 0x8d3   : > { %7750 = vst.msk [vmem:[%s14352_s19 + $0x24] sm:$0xf] %vm7740_vm4, %v8212_v63 }
 0x8d4   : > { %v7525_v15 = vpop.f32.mrf.mxu1 }
 0x8d5   : > { %v8213_v45 = vpack.c.bf16 %v7525_v15, %v7525_v15 }
 0x8d6   : > { %v7527_v4 = vpop.f32.mrf.mxu1 }
 0x8d7   : > { %7751 = vst.msk [vmem:[%s14352_s19 + $0x28] sm:$0xf] %vm7740_vm4, %v8213_v45 }
 0x8d8   : > { %v7528_v31 = vpop.f32.mrf.mxu1 }
 0x8d9   : > { %v8214_v3 = vpack.c.bf16 %v7528_v31, %v7528_v31 }
 0x8da   : > { %v7530_v10 = vpop.f32.mrf.mxu1 }
 0x8db   : > { %7752 = vst.msk [vmem:[%s14352_s19 + $0x2c] sm:$0xf] %vm7740_vm4, %v8214_v3 }
 0x8dc   : > { %v7533_v13 = vpop.f32.mrf.mxu1 }
 0x8dd   : > { %v8215_v39 = vpack.c.bf16 %v7533_v13, %v7533_v13 }
 0x8de   : > { %v7535_v58 = vpop.f32.mrf.mxu1 }
 0x8df   : > { %7753 = vst.msk [vmem:[%s14352_s19 + $0x30] sm:$0xf] %vm7740_vm4, %v8215_v39 }
 0x8e0   : > { %v7536_v6 = vpop.f32.mrf.mxu1 }
 0x8e1   : > { %v8216_v29 = vpack.c.bf16 %v7536_v6, %v7536_v6 }
 0x8e2   : > { %v7538_v27 = vpop.f32.mrf.mxu1 }
 0x8e3   : > { %7754 = vst.msk [vmem:[%s14352_s19 + $0x34] sm:$0xf] %vm7740_vm4, %v8216_v29 }
 0x8e4   : > { %v7541_v11 = vpop.f32.mrf.mxu1 }
 0x8e5   : > { %v8217_v46 = vpack.c.bf16 %v7541_v11, %v7541_v11 }
 0x8e6   : > { %v7543_v54 = vpop.f32.mrf.mxu1 }
 0x8e7   : > { %7755 = vst.msk [vmem:[%s14352_s19 + $0x38] sm:$0xf] %vm7740_vm4, %v8217_v46 }
 0x8e8   : > { %v7544_v59 = vpop.f32.mrf.mxu1 }
 0x8e9   : > { %v8218_v19 = vpack.c.bf16 %v7544_v59, %v7544_v59 }
 0x8ea   : > { %v7546_v30 = vpop.f32.mrf.mxu1 }
 0x8eb   : > { %7756 = vst.msk [vmem:[%s14352_s19 + $0x3c] sm:$0xf] %vm7740_vm4, %v8218_v19 }
 0x8ec   : > { %v7549_v49 = vpop.f32.mrf.mxu1 }
 0x8ed   : > { %v8219_v25 = vpack.c.bf16 %v7549_v49, %v7549_v49 }
 0x8ee   : > { %v7551_v61 = vpop.f32.mrf.mxu1 }
 0x8ef   : > { %7757 = vst.msk [vmem:[%s14352_s19 + $0x40] sm:$0xf] %vm7740_vm4, %v8219_v25 }
 0x8f0   : > { %v7552_v53 = vpop.f32.mrf.mxu1 }
 0x8f1   : > { %v8220_v16 = vpack.c.bf16 %v7552_v53, %v7552_v53 }
 0x8f2   : > { %v7554_v32 = vpop.f32.mrf.mxu1 }
 0x8f3   : > { %7758 = vst.msk [vmem:[%s14352_s19 + $0x44] sm:$0xf] %vm7740_vm4, %v8220_v16 }
 0x8f4   : > { %v7557_v50 = vpop.f32.mrf.mxu1 }
 0x8f5   : > { %v8221_v41 = vpack.c.bf16 %v7557_v50, %v7557_v50 }
 0x8f6   : > { %v7559_v44 = vpop.f32.mrf.mxu1 }
 0x8f7   : > { %7759 = vst.msk [vmem:[%s14352_s19 + $0x48] sm:$0xf] %vm7740_vm4, %v8221_v41 }
 0x8f8   : > { %v7560_v51 = vpop.f32.mrf.mxu1 }
 0x8f9   : > { %v8222_v21 = vpack.c.bf16 %v7560_v51, %v7560_v51 }
 0x8fa   : > { %v7562_v20 = vpop.f32.mrf.mxu1 }
 0x8fb   : > { %7760 = vst.msk [vmem:[%s14352_s19 + $0x4c] sm:$0xf] %vm7740_vm4, %v8222_v21 }
 0x8fc   : > { %v7565_v9 = vpop.f32.mrf.mxu1 }
 0x8fd   : > { %v8223_v33 = vpack.c.bf16 %v7565_v9, %v7565_v9 }
 0x8fe   : > { %v7567_v60 = vpop.f32.mrf.mxu1 }
 0x8ff   : > { %7761 = vst.msk [vmem:[%s14352_s19 + $0x50] sm:$0xf] %vm7740_vm4, %v8223_v33 }
 0x900   : > { %v7568_v35 = vpop.f32.mrf.mxu1 }
 0x901   : > { %v8224_v23 = vpack.c.bf16 %v7568_v35, %v7568_v35 }
 0x902   : > { %v7570_v34 = vpop.f32.mrf.mxu1 }
 0x903   : > { %7762 = vst.msk [vmem:[%s14352_s19 + $0x54] sm:$0xf] %vm7740_vm4, %v8224_v23 }
 0x904   : > { %v7573_v52 = vpop.f32.mrf.mxu1 }
 0x905   : > { %v8225_v5 = vpack.c.bf16 %v7573_v52, %v7573_v52 }
 0x906   : > { %v7575_v26 = vpop.f32.mrf.mxu1 }
 0x907   : > { %7763 = vst.msk [vmem:[%s14352_s19 + $0x58] sm:$0xf] %vm7740_vm4, %v8225_v5 }
 0x908   : > { %v7576_v43 = vpop.f32.mrf.mxu1 }
 0x909   : > { %v8226_v0 = vpack.c.bf16 %v7576_v43, %v7576_v43 }
 0x90a   : > { %v7578_v1 = vpop.f32.mrf.mxu1 }
 0x90b   : > { %7764 = vst.msk [vmem:[%s14352_s19 + $0x5c] sm:$0xf] %vm7740_vm4, %v8226_v0 }
 0x90c   : > { %v7581_v7 = vpop.f32.mrf.mxu1 }
 0x90d   : > { %v8227_v8 = vpack.c.bf16 %v7581_v7, %v7581_v7 }
 0x90e   : > { %v7583_v62 = vpop.f32.mrf.mxu1 }
 0x90f   : > { %7765 = vst.msk [vmem:[%s14352_s19 + $0x60] sm:$0xf] %vm7740_vm4, %v8227_v8 }
 0x910   : > { %v7584_v18 = vpop.f32.mrf.mxu1 }
 0x911   : > { %v8228_v56 = vpack.c.bf16 %v7584_v18, %v7584_v18 }
 0x912   : > { %v7586_v24 = vpop.f32.mrf.mxu1 }
 0x913   : > { %7766 = vst.msk [vmem:[%s14352_s19 + $0x64] sm:$0xf] %vm7740_vm4, %v8228_v56 }
 0x914   : > { %v7589_v17 = vpop.f32.mrf.mxu1 }
 0x915   : > { %v8229_v55 = vpack.c.bf16 %v7589_v17, %v7589_v17 }
 0x916   : > { %v7591_v57 = vpop.f32.mrf.mxu1 }
 0x917   : > { %7767 = vst.msk [vmem:[%s14352_s19 + $0x68] sm:$0xf] %vm7740_vm4, %v8229_v55 }
 0x918   : > { %v7592_v48 = vpop.f32.mrf.mxu1 }
 0x919   : > { %v8230_v37 = vpack.c.bf16 %v7592_v48, %v7592_v48 }
 0x91a   : > { %v7594_v47 = vpop.f32.mrf.mxu1 }
 0x91b   : > { %7768 = vst.msk [vmem:[%s14352_s19 + $0x6c] sm:$0xf] %vm7740_vm4, %v8230_v37 }
 0x91c   : > { %v7597_v14 = vpop.f32.mrf.mxu1 }
 0x91d   : > { %v8231_v36 = vpack.c.bf16 %v7597_v14, %v7597_v14 }
 0x91e   : > { %v7599_v42 = vpop.f32.mrf.mxu1 }
 0x91f   : > { %7769 = vst.msk [vmem:[%s14352_s19 + $0x70] sm:$0xf] %vm7740_vm4, %v8231_v36 }
 0x920   : > { %v7600_v12 = vpop.f32.mrf.mxu1 }
 0x921   : > { %v8232_v22 = vpack.c.bf16 %v7600_v12, %v7600_v12 }
 0x922   : > { %v7602_v38 = vpop.f32.mrf.mxu1 }
 0x923   : > { %7770 = vst.msk [vmem:[%s14352_s19 + $0x74] sm:$0xf] %vm7740_vm4, %v8232_v22 }
 0x924   : > { %v7605_v40 = vpop.f32.mrf.mxu1 }
 0x925   : > { %v8233_v2 = vpack.c.bf16 %v7605_v40, %v7605_v40 }
 0x926   : > { %v7607_v63 = vpop.f32.mrf.mxu1 }
 0x927   : > { %7771 = vst.msk [vmem:[%s14352_s19 + $0x78] sm:$0xf] %vm7740_vm4, %v8233_v2 }
 0x928   : > { %v7608_v28 = vpop.f32.mrf.mxu1 }
 0x929   : > { %v8234_v15 = vpack.c.bf16 %v7608_v28, %v7608_v28 }
 0x92a   : > { %v7610_v45 = vpop.f32.mrf.mxu1 }
 0x92b   : > { %7772 = vst.msk [vmem:[%s14352_s19 + $0x7c] sm:$0xf] %vm7740_vm4, %v8234_v15 }
 0x92c PF: > { %s17_s24 = sadd.s32 1, %s8826_s24  }
 0x92d   : > { %p14_p5 = scmp.ge.s32.totalorder %s17_s24, 4  }
 0x92f   :  { %16 = sbr.rel (!%p14_p5) target bundleno = 1 (0x1), region = 78 }

</bundles_post_ra>
